<compile_context>
chip_gen: v7x
topology: tpu7x:2x2x1
jax: 0.10.0
libtpu: 0.0.40
codegen_flags: <defaults>
</compile_context>

<pallas_src>
import functools

import jax
import jax.numpy as jnp
from jax.experimental import pallas as pl
from jax.experimental.pallas import tpu as pltpu


# ---------------------------------------------------------------------------
# Fused kernel.
#
# Activation layout ("interleaved padded grid"): row index = q * n + s, where
# q = gh*8 + gw is the position on the 8x8 conv1-output grid and s is the
# sample.  A conv tap (ki, kj) is then a contiguous row shift of
# (ki*8 + kj) * n, so each im2col column block is one contiguous slice copy.
# Valid conv2 outputs live at q in [0,4)x[0,4) (all < 28), valid conv3 outputs
# at q in {0, 1, 8, 9} (all < 10), so conv2/conv3 only compute 28n / 10n rows
# and no padding rows are ever needed.
# ---------------------------------------------------------------------------
def _osac_kernel(p1_ref, w1_ref, b1_ref, w2_ref, b2_ref, w3_ref, b3_ref,
                 fw1_ref, fb1_ref, fw2_ref, fb2_ref, fw3_ref, fb3_ref,
                 out_ref, a1_ref, im2_ref, a2_ref, im3_ref, f3_ref, *, n):
    f32, bf16 = jnp.float32, jnp.bfloat16
    m2 = 28 * n          # conv2 rows computed (covers every valid 4x4 output)
    m3 = 10 * n          # conv3 rows computed (covers every valid 2x2 output)

    # conv1 (7x7, 1 -> 64, lane-padded to 128): one K=49 matmul.
    c1 = jnp.dot(p1_ref[...], w1_ref[...], preferred_element_type=f32)
    a1_ref[...] = jnp.maximum(c1 + b1_ref[...], 0.0)

    # conv2 (5x5, 128pad -> 128): VMEM im2col (25 contiguous shifted copies,
    # lane-aligned 128-wide blocks) + ONE deep-K (K=3200) matmul.
    for ki in range(5):
        for kj in range(5):
            t = ki * 5 + kj
            shift = (ki * 8 + kj) * n
            im2_ref[:, t * 128:(t + 1) * 128] = \
                a1_ref[shift:shift + m2, :].astype(bf16)
    c2 = jnp.dot(im2_ref[...], w2_ref[...], preferred_element_type=f32)
    a2_ref[...] = jnp.maximum(c2 + b2_ref[...], 0.0)

    # conv3 (3x3, 128 -> 256): same pattern, ONE K=1152 matmul, 10n rows only.
    for ki in range(3):
        for kj in range(3):
            t = ki * 3 + kj
            shift = (ki * 8 + kj) * n
            im3_ref[:, t * 128:(t + 1) * 128] = \
                a2_ref[shift:shift + m3, :].astype(bf16)
    c3 = jnp.dot(im3_ref[...], w3_ref[...], preferred_element_type=f32)
    a3 = jnp.maximum(c3 + b3_ref[...], 0.0)          # (10n, 256) f32 value

    # Flatten: valid conv3 rows sit at grid positions q in {0,1,8,9} as
    # contiguous n-row blocks -> 4 block copies, no per-sample loop.  The
    # PyTorch (c, h, w) flatten order is folded into fw1's row permutation.
    for pos, q in enumerate((0, 1, 8, 9)):
        f3_ref[:, pos * 256:(pos + 1) * 256] = \
            a3[q * n:(q + 1) * n, :].astype(bf16)

    # FC stack (bf16 MXU operands, f32 accumulation; fc3 lane-padded to 128).
    h = jnp.dot(f3_ref[...], fw1_ref[...], preferred_element_type=f32)
    h = jnp.maximum(h + fb1_ref[...], 0.0).astype(bf16)
    h = jnp.dot(h, fw2_ref[...], preferred_element_type=f32)
    h = jnp.maximum(h + fb2_ref[...], 0.0).astype(bf16)
    out_ref[...] = (jnp.dot(h, fw3_ref[...], preferred_element_type=f32)
                    + fb3_ref[...])


# ---------------------------------------------------------------------------
# Wrapper: one cheap patch-extraction op for conv1, then one pallas_call.
# ---------------------------------------------------------------------------
@jax.jit
def osac_forward(x, kp):
    n = x.shape[0]
    m1 = 64 * n

    # conv1 patches (C_in == 1): NHWC patches (n, 8, 8, 49), reordered to the
    # kernel's (h, w, sample)-major row layout; feature order (kh, kw) matches
    # PyTorch's weight.reshape(64, -1).
    # TODO(synk): for non-toy batches, build these patches inside the kernel
    # from the raw input (49 shifted reads) to avoid the 8x-inflated HBM copy.
    patches = jax.lax.conv_general_dilated_patches(
        x, filter_shape=(7, 7), window_strides=(1, 1), padding='VALID',
        dimension_numbers=('NCHW', 'OIHW', 'NHWC'))
    patches = patches.transpose(1, 2, 0, 3).reshape(m1, 49).astype(jnp.bfloat16)

    def full(shape):
        return pl.BlockSpec(shape, lambda i: (0, 0))

    # NOTE: batch=2 toy size -> grid=(1,) with everything VMEM-resident
    # (weights ~4.5 MiB bf16, scratch <0.5 MiB).  For real batches, tile the
    # row dimension with an actual grid, mark that axis "parallel" (2 TCs on
    # v7x), keep weight BlockSpecs grid-invariant (optionally Buffered(1)),
    # and size tiles against the 32 MiB scoped / 64 MiB total v7x VMEM budget.
    out_padded = pl.pallas_call(
        functools.partial(_osac_kernel, n=n),
        out_shape=jax.ShapeDtypeStruct((n, 128), jnp.float32),
        grid=(1,),
        in_specs=[
            full((m1, 49)),                               # conv1 patches
            full((49, 128)), full((1, 128)),              # conv1 w, b (OC pad)
            full((3200, 128)), full((1, 128)),            # conv2 w (IC pad), b
            full((1152, 256)), full((1, 256)),            # conv3 w, b
            full((1024, 1024)), full((1, 1024)),          # fc1 w, b
            full((1024, 512)), full((1, 512)),            # fc2 w, b
            full((512, 128)), full((1, 128)),             # fc3 w, b (padded)
        ],
        out_specs=full((n, 128)),
        scratch_shapes=[
            pltpu.VMEM((64 * n, 128), jnp.float32),       # a1: conv1 out grid
            pltpu.VMEM((28 * n, 3200), jnp.bfloat16),     # conv2 im2col
            pltpu.VMEM((28 * n, 128), jnp.float32),       # a2: conv2 out
            pltpu.VMEM((10 * n, 1152), jnp.bfloat16),     # conv3 im2col
            pltpu.VMEM((n, 1024), jnp.bfloat16),          # flattened fc1 input
        ],
        compiler_params=pltpu.CompilerParams(
            dimension_semantics=("arbitrary",),
            vmem_limit_bytes=32 * 1024 * 1024),
    )(patches, kp['w1p'], kp['b1p'], kp['w2p'], kp['b2'], kp['w3m'], kp['b3'],
      kp['fw1t'], kp['fb1'], kp['fw2t'], kp['fb2'], kp['fw3t'], kp['fb3'])

    return out_padded[:, :10]


# ---------------------------------------------------------------------------
# Parameter init (PyTorch layout) + one-time conversion to the kernel layout.
# ---------------------------------------------------------------------------
def init_params(key):
    def uni(k, shape, fan_in):
        bound = 1.0 / (fan_in ** 0.5)
        return jax.random.uniform(k, shape, jnp.float32, -bound, bound)

    ks = jax.random.split(key, 12)
    return {
        "w1": uni(ks[0], (64, 1, 7, 7), 1 * 7 * 7),
        "b1": uni(ks[1], (64,), 1 * 7 * 7),
        "w2": uni(ks[2], (128, 64, 5, 5), 64 * 5 * 5),
        "b2": uni(ks[3], (128,), 64 * 5 * 5),
        "w3": uni(ks[4], (256, 128, 3, 3), 128 * 3 * 3),
        "b3": uni(ks[5], (256,), 128 * 3 * 3),
        "fw1": uni(ks[6], (1024, 256 * 2 * 2), 256 * 2 * 2),
        "fb1": uni(ks[7], (1024,), 256 * 2 * 2),
        "fw2": uni(ks[8], (512, 1024), 1024),
        "fb2": uni(ks[9], (512,), 1024),
        "fw3": uni(ks[10], (10, 512), 512),
        "fb3": uni(ks[11], (10,), 512),
    }


def prepare_params(p):
    """Hoisted, one-time weight reshuffle into the kernel's matmul layout."""
    bf16, f32 = jnp.bfloat16, jnp.float32
    # conv1: [64,1,7,7] -> [49, 64] -> lane-pad OC 64 -> 128 with zeros.
    w1m = p['w1'].reshape(64, 49).T
    w1p = jnp.zeros((49, 128), f32).at[:, :64].set(w1m).astype(bf16)
    b1p = jnp.zeros((1, 128), f32).at[0, :64].set(p['b1'])
    # conv2: [128,64,5,5] -> rows (kh, kw, ic padded to 128) x 128 cols.
    w2t = p['w2'].transpose(2, 3, 1, 0)                               # (5,5,64,128)
    w2p = jnp.zeros((5, 5, 128, 128), f32).at[:, :, :64, :].set(w2t)
    w2p = w2p.reshape(3200, 128).astype(bf16)
    # conv3: [256,128,3,3] -> rows (kh, kw, ic) x 256 cols.
    w3m = p['w3'].transpose(2, 3, 1, 0).reshape(1152, 256).astype(bf16)
    # fc1: fold PyTorch's (C, H, W) flatten order into the weight so the
    # kernel consumes activations in (H, W, C) order: row (h*2+w)*256 + c.
    fw1t = (p['fw1'].reshape(1024, 256, 2, 2)
            .transpose(2, 3, 1, 0).reshape(1024, 1024).astype(bf16))
    fw2t = p['fw2'].T.astype(bf16)                                    # [1024, 512]
    # fc3: lane-pad N=10 -> 128 (zero weights / zero bias in the pad lanes).
    fw3t = jnp.zeros((512, 128), f32).at[:, :10].set(p['fw3'].T).astype(bf16)
    fb3p = jnp.zeros((1, 128), f32).at[0, :10].set(p['fb3'])
    return dict(
        w1p=w1p, b1p=b1p,
        w2p=w2p, b2=p['b2'].reshape(1, 128).astype(f32),
        w3m=w3m, b3=p['b3'].reshape(1, 256).astype(f32),
        fw1t=fw1t, fb1=p['fb1'].reshape(1, 1024).astype(f32),
        fw2t=fw2t, fb2=p['fb2'].reshape(1, 512).astype(f32),
        fw3t=fw3t, fb3=fb3p)


# ---------------------------------------------------------------------------
# Pure-JAX f32 reference with PyTorch semantics (for a sanity check).
# ---------------------------------------------------------------------------
def osac_reference(x, p):
    dn = ('NCHW', 'OIHW', 'NCHW')
    prec = jax.lax.Precision.HIGHEST
    a = x
    for w, b in ((p['w1'], p['b1']), (p['w2'], p['b2']), (p['w3'], p['b3'])):
        a = jax.lax.conv_general_dilated(a, w, (1, 1), 'VALID',
                                         dimension_numbers=dn, precision=prec)
        a = jax.nn.relu(a + b[None, :, None, None])
    a = a.reshape(a.shape[0], -1)                      # (C, H, W) flatten
    a = jax.nn.relu(jnp.dot(a, p['fw1'].T, precision=prec) + p['fb1'])
    a = jax.nn.relu(jnp.dot(a, p['fw2'].T, precision=prec) + p['fb2'])
    return jnp.dot(a, p['fw3'].T, precision=prec) + p['fb3']


if __name__ == "__main__":
    key = jax.random.PRNGKey(0)
    k_params, k_x = jax.random.split(key)
    params = init_params(k_params)
    kernel_params = prepare_params(params)

    # Input: NCHW, spatial 14x14 so the 256*2*2 flatten is consistent.
    x = jax.random.normal(k_x, (2, 1, 14, 14), dtype=jnp.float32)

    out = osac_forward(x, kernel_params)
    out = jax.block_until_ready(out)
    assert out.shape == (2, 10) and out.dtype == jnp.float32

    ref = osac_reference(x, params)
    err = float(jnp.max(jnp.abs(out - ref)))
    assert err < 5e-3, f"kernel vs f32 reference: max |diff| = {err}"
    print("KERNEL_OK")
</pallas_src>

<mosaic_0001>
module attributes {stable_mosaic.version = 11 : i64} {
  func.func @_osac_kernel(%arg0: i32, %arg1: memref<128x49xbf16, #tpu.memory_space<vmem>>, %arg2: memref<49x128xbf16, #tpu.memory_space<vmem>>, %arg3: memref<1x128xf32, #tpu.memory_space<vmem>>, %arg4: memref<3200x128xbf16, #tpu.memory_space<vmem>>, %arg5: memref<1x128xf32, #tpu.memory_space<vmem>>, %arg6: memref<1152x256xbf16, #tpu.memory_space<vmem>>, %arg7: memref<1x256xf32, #tpu.memory_space<vmem>>, %arg8: memref<1024x1024xbf16, #tpu.memory_space<vmem>>, %arg9: memref<1x1024xf32, #tpu.memory_space<vmem>>, %arg10: memref<1024x512xbf16, #tpu.memory_space<vmem>>, %arg11: memref<1x512xf32, #tpu.memory_space<vmem>>, %arg12: memref<512x128xbf16, #tpu.memory_space<vmem>>, %arg13: memref<1x128xf32, #tpu.memory_space<vmem>>, %arg14: memref<2x128xf32, #tpu.memory_space<vmem>>, %arg15: memref<128x128xf32, #tpu.memory_space<vmem>>, %arg16: memref<56x3200xbf16, #tpu.memory_space<vmem>>, %arg17: memref<56x128xf32, #tpu.memory_space<vmem>>, %arg18: memref<20x1152xbf16, #tpu.memory_space<vmem>>, %arg19: memref<2x1024xbf16, #tpu.memory_space<vmem>>) attributes {dimension_semantics = [#tpu.dimension_semantics<arbitrary>], iteration_bounds = array<i64: 1>, scalar_prefetch = 0 : i64, scratch_operands = 5 : i64, tpu.core_type = #tpu.core_type<tc>, window_params = [{pipeline_mode = #tpu.pipeline_mode<synchronous>, transform_indices = @transform_0, window_bounds = array<i64: 128, 49>}, {pipeline_mode = #tpu.pipeline_mode<synchronous>, transform_indices = @transform_1, window_bounds = array<i64: 49, 128>}, {pipeline_mode = #tpu.pipeline_mode<synchronous>, transform_indices = @transform_2, window_bounds = array<i64: 1, 128>}, {pipeline_mode = #tpu.pipeline_mode<synchronous>, transform_indices = @transform_3, window_bounds = array<i64: 3200, 128>}, {pipeline_mode = #tpu.pipeline_mode<synchronous>, transform_indices = @transform_4, window_bounds = array<i64: 1, 128>}, {pipeline_mode = #tpu.pipeline_mode<synchronous>, transform_indices = @transform_5, window_bounds = array<i64: 1152, 256>}, {pipeline_mode = #tpu.pipeline_mode<synchronous>, transform_indices = @transform_6, window_bounds = array<i64: 1, 256>}, {pipeline_mode = #tpu.pipeline_mode<synchronous>, transform_indices = @transform_7, window_bounds = array<i64: 1024, 1024>}, {pipeline_mode = #tpu.pipeline_mode<synchronous>, transform_indices = @transform_8, window_bounds = array<i64: 1, 1024>}, {pipeline_mode = #tpu.pipeline_mode<synchronous>, transform_indices = @transform_9, window_bounds = array<i64: 1024, 512>}, {pipeline_mode = #tpu.pipeline_mode<synchronous>, transform_indices = @transform_10, window_bounds = array<i64: 1, 512>}, {pipeline_mode = #tpu.pipeline_mode<synchronous>, transform_indices = @transform_11, window_bounds = array<i64: 512, 128>}, {pipeline_mode = #tpu.pipeline_mode<synchronous>, transform_indices = @transform_12, window_bounds = array<i64: 1, 128>}, {pipeline_mode = #tpu.pipeline_mode<synchronous>, transform_indices = @transform_13, window_bounds = array<i64: 2, 128>}]} {
    %c0 = arith.constant 0 : index
    %c0_0 = arith.constant 0 : index
    %0 = vector.load %arg1[%c0, %c0_0] : memref<128x49xbf16, #tpu.memory_space<vmem>>, vector<128x49xbf16>
    %c0_1 = arith.constant 0 : index
    %c0_2 = arith.constant 0 : index
    %1 = vector.load %arg2[%c0_1, %c0_2] : memref<49x128xbf16, #tpu.memory_space<vmem>>, vector<49x128xbf16>
    %cst = arith.constant dense<0.000000e+00> : vector<128x128xf32>
    %2 = tpu.matmul %0, %1, %cst {dimension_numbers = #tpu.dot_dimension_numbers<[1], [0], [0], [1], [0, 0, 1, 1], [], []>} : vector<128x49xbf16>, vector<49x128xbf16>, vector<128x128xf32> -> vector<128x128xf32>
    %c0_3 = arith.constant 0 : index
    %c0_4 = arith.constant 0 : index
    %3 = vector.load %arg3[%c0_3, %c0_4] : memref<1x128xf32, #tpu.memory_space<vmem>>, vector<1x128xf32>
    %4 = vector.broadcast %3 : vector<1x128xf32> to vector<128x128xf32>
    %5 = arith.addf %2, %4 : vector<128x128xf32>
    %cst_5 = arith.constant 0.000000e+00 : f32
    %6 = vector.broadcast %cst_5 : f32 to vector<128x128xf32>
    %7 = arith.maximumf %5, %6 : vector<128x128xf32>
    %c0_6 = arith.constant 0 : index
    %c0_7 = arith.constant 0 : index
    %8 = vector.load %arg15[%c0_6, %c0_7] : memref<128x128xf32, #tpu.memory_space<vmem>>, vector<128x128xf32>
    tpu.vector_store %arg15[%c0_6, %c0_7], %7 {strides = array<i32>} : memref<128x128xf32, #tpu.memory_space<vmem>>, vector<128x128xf32>,
    %c0_8 = arith.constant 0 : index
    %c0_9 = arith.constant 0 : index
    %9 = vector.load %arg15[%c0_8, %c0_9] : memref<128x128xf32, #tpu.memory_space<vmem>>, vector<56x128xf32>
    %10 = arith.truncf %9 : vector<56x128xf32> to vector<56x128xbf16>
    %c0_10 = arith.constant 0 : index
    %c0_11 = arith.constant 0 : index
    %11 = vector.load %arg16[%c0_10, %c0_11] : memref<56x3200xbf16, #tpu.memory_space<vmem>>, vector<56x128xbf16>
    tpu.vector_store %arg16[%c0_10, %c0_11], %10 {strides = array<i32>} : memref<56x3200xbf16, #tpu.memory_space<vmem>>, vector<56x128xbf16>,
    %c2 = arith.constant 2 : index
    %c0_12 = arith.constant 0 : index
    %12 = vector.load %arg15[%c2, %c0_12] : memref<128x128xf32, #tpu.memory_space<vmem>>, vector<56x128xf32>
    %13 = arith.truncf %12 : vector<56x128xf32> to vector<56x128xbf16>
    %c0_13 = arith.constant 0 : index
    %c128 = arith.constant 128 : index
    %14 = vector.load %arg16[%c0_13, %c128] : memref<56x3200xbf16, #tpu.memory_space<vmem>>, vector<56x128xbf16>
    tpu.vector_store %arg16[%c0_13, %c128], %13 {strides = array<i32>} : memref<56x3200xbf16, #tpu.memory_space<vmem>>, vector<56x128xbf16>,
    %c4 = arith.constant 4 : index
    %c0_14 = arith.constant 0 : index
    %15 = vector.load %arg15[%c4, %c0_14] : memref<128x128xf32, #tpu.memory_space<vmem>>, vector<56x128xf32>
    %16 = arith.truncf %15 : vector<56x128xf32> to vector<56x128xbf16>
    %c0_15 = arith.constant 0 : index
    %c256 = arith.constant 256 : index
    %17 = vector.load %arg16[%c0_15, %c256] : memref<56x3200xbf16, #tpu.memory_space<vmem>>, vector<56x128xbf16>
    tpu.vector_store %arg16[%c0_15, %c256], %16 {strides = array<i32>} : memref<56x3200xbf16, #tpu.memory_space<vmem>>, vector<56x128xbf16>,
    %c6 = arith.constant 6 : index
    %c0_16 = arith.constant 0 : index
    %18 = vector.load %arg15[%c6, %c0_16] : memref<128x128xf32, #tpu.memory_space<vmem>>, vector<56x128xf32>
    %19 = arith.truncf %18 : vector<56x128xf32> to vector<56x128xbf16>
    %c0_17 = arith.constant 0 : index
    %c384 = arith.constant 384 : index
    %20 = vector.load %arg16[%c0_17, %c384] : memref<56x3200xbf16, #tpu.memory_space<vmem>>, vector<56x128xbf16>
    tpu.vector_store %arg16[%c0_17, %c384], %19 {strides = array<i32>} : memref<56x3200xbf16, #tpu.memory_space<vmem>>, vector<56x128xbf16>,
    %c8 = arith.constant 8 : index
    %c0_18 = arith.constant 0 : index
    %21 = vector.load %arg15[%c8, %c0_18] : memref<128x128xf32, #tpu.memory_space<vmem>>, vector<56x128xf32>
    %22 = arith.truncf %21 : vector<56x128xf32> to vector<56x128xbf16>
    %c0_19 = arith.constant 0 : index
    %c512 = arith.constant 512 : index
    %23 = vector.load %arg16[%c0_19, %c512] : memref<56x3200xbf16, #tpu.memory_space<vmem>>, vector<56x128xbf16>
    tpu.vector_store %arg16[%c0_19, %c512], %22 {strides = array<i32>} : memref<56x3200xbf16, #tpu.memory_space<vmem>>, vector<56x128xbf16>,
    %c16 = arith.constant 16 : index
    %c0_20 = arith.constant 0 : index
    %24 = vector.load %arg15[%c16, %c0_20] : memref<128x128xf32, #tpu.memory_space<vmem>>, vector<56x128xf32>
    %25 = arith.truncf %24 : vector<56x128xf32> to vector<56x128xbf16>
    %c0_21 = arith.constant 0 : index
    %c640 = arith.constant 640 : index
    %26 = vector.load %arg16[%c0_21, %c640] : memref<56x3200xbf16, #tpu.memory_space<vmem>>, vector<56x128xbf16>
    tpu.vector_store %arg16[%c0_21, %c640], %25 {strides = array<i32>} : memref<56x3200xbf16, #tpu.memory_space<vmem>>, vector<56x128xbf16>,
    %c18 = arith.constant 18 : index
    %c0_22 = arith.constant 0 : index
    %27 = vector.load %arg15[%c18, %c0_22] : memref<128x128xf32, #tpu.memory_space<vmem>>, vector<56x128xf32>
    %28 = arith.truncf %27 : vector<56x128xf32> to vector<56x128xbf16>
    %c0_23 = arith.constant 0 : index
    %c768 = arith.constant 768 : index
    %29 = vector.load %arg16[%c0_23, %c768] : memref<56x3200xbf16, #tpu.memory_space<vmem>>, vector<56x128xbf16>
    tpu.vector_store %arg16[%c0_23, %c768], %28 {strides = array<i32>} : memref<56x3200xbf16, #tpu.memory_space<vmem>>, vector<56x128xbf16>,
    %c20 = arith.constant 20 : index
    %c0_24 = arith.constant 0 : index
    %30 = vector.load %arg15[%c20, %c0_24] : memref<128x128xf32, #tpu.memory_space<vmem>>, vector<56x128xf32>
    %31 = arith.truncf %30 : vector<56x128xf32> to vector<56x128xbf16>
    %c0_25 = arith.constant 0 : index
    %c896 = arith.constant 896 : index
    %32 = vector.load %arg16[%c0_25, %c896] : memref<56x3200xbf16, #tpu.memory_space<vmem>>, vector<56x128xbf16>
    tpu.vector_store %arg16[%c0_25, %c896], %31 {strides = array<i32>} : memref<56x3200xbf16, #tpu.memory_space<vmem>>, vector<56x128xbf16>,
    %c22 = arith.constant 22 : index
    %c0_26 = arith.constant 0 : index
    %33 = vector.load %arg15[%c22, %c0_26] : memref<128x128xf32, #tpu.memory_space<vmem>>, vector<56x128xf32>
    %34 = arith.truncf %33 : vector<56x128xf32> to vector<56x128xbf16>
    %c0_27 = arith.constant 0 : index
    %c1024 = arith.constant 1024 : index
    %35 = vector.load %arg16[%c0_27, %c1024] : memref<56x3200xbf16, #tpu.memory_space<vmem>>, vector<56x128xbf16>
    tpu.vector_store %arg16[%c0_27, %c1024], %34 {strides = array<i32>} : memref<56x3200xbf16, #tpu.memory_space<vmem>>, vector<56x128xbf16>,
    %c24 = arith.constant 24 : index
    %c0_28 = arith.constant 0 : index
    %36 = vector.load %arg15[%c24, %c0_28] : memref<128x128xf32, #tpu.memory_space<vmem>>, vector<56x128xf32>
    %37 = arith.truncf %36 : vector<56x128xf32> to vector<56x128xbf16>
    %c0_29 = arith.constant 0 : index
    %c1152 = arith.constant 1152 : index
    %38 = vector.load %arg16[%c0_29, %c1152] : memref<56x3200xbf16, #tpu.memory_space<vmem>>, vector<56x128xbf16>
    tpu.vector_store %arg16[%c0_29, %c1152], %37 {strides = array<i32>} : memref<56x3200xbf16, #tpu.memory_space<vmem>>, vector<56x128xbf16>,
    %c32 = arith.constant 32 : index
    %c0_30 = arith.constant 0 : index
    %39 = vector.load %arg15[%c32, %c0_30] : memref<128x128xf32, #tpu.memory_space<vmem>>, vector<56x128xf32>
    %40 = arith.truncf %39 : vector<56x128xf32> to vector<56x128xbf16>
    %c0_31 = arith.constant 0 : index
    %c1280 = arith.constant 1280 : index
    %41 = vector.load %arg16[%c0_31, %c1280] : memref<56x3200xbf16, #tpu.memory_space<vmem>>, vector<56x128xbf16>
    tpu.vector_store %arg16[%c0_31, %c1280], %40 {strides = array<i32>} : memref<56x3200xbf16, #tpu.memory_space<vmem>>, vector<56x128xbf16>,
    %c34 = arith.constant 34 : index
    %c0_32 = arith.constant 0 : index
    %42 = vector.load %arg15[%c34, %c0_32] : memref<128x128xf32, #tpu.memory_space<vmem>>, vector<56x128xf32>
    %43 = arith.truncf %42 : vector<56x128xf32> to vector<56x128xbf16>
    %c0_33 = arith.constant 0 : index
    %c1408 = arith.constant 1408 : index
    %44 = vector.load %arg16[%c0_33, %c1408] : memref<56x3200xbf16, #tpu.memory_space<vmem>>, vector<56x128xbf16>
    tpu.vector_store %arg16[%c0_33, %c1408], %43 {strides = array<i32>} : memref<56x3200xbf16, #tpu.memory_space<vmem>>, vector<56x128xbf16>,
    %c36 = arith.constant 36 : index
    %c0_34 = arith.constant 0 : index
    %45 = vector.load %arg15[%c36, %c0_34] : memref<128x128xf32, #tpu.memory_space<vmem>>, vector<56x128xf32>
    %46 = arith.truncf %45 : vector<56x128xf32> to vector<56x128xbf16>
    %c0_35 = arith.constant 0 : index
    %c1536 = arith.constant 1536 : index
    %47 = vector.load %arg16[%c0_35, %c1536] : memref<56x3200xbf16, #tpu.memory_space<vmem>>, vector<56x128xbf16>
    tpu.vector_store %arg16[%c0_35, %c1536], %46 {strides = array<i32>} : memref<56x3200xbf16, #tpu.memory_space<vmem>>, vector<56x128xbf16>,
    %c38 = arith.constant 38 : index
    %c0_36 = arith.constant 0 : index
    %48 = vector.load %arg15[%c38, %c0_36] : memref<128x128xf32, #tpu.memory_space<vmem>>, vector<56x128xf32>
    %49 = arith.truncf %48 : vector<56x128xf32> to vector<56x128xbf16>
    %c0_37 = arith.constant 0 : index
    %c1664 = arith.constant 1664 : index
    %50 = vector.load %arg16[%c0_37, %c1664] : memref<56x3200xbf16, #tpu.memory_space<vmem>>, vector<56x128xbf16>
    tpu.vector_store %arg16[%c0_37, %c1664], %49 {strides = array<i32>} : memref<56x3200xbf16, #tpu.memory_space<vmem>>, vector<56x128xbf16>,
    %c40 = arith.constant 40 : index
    %c0_38 = arith.constant 0 : index
    %51 = vector.load %arg15[%c40, %c0_38] : memref<128x128xf32, #tpu.memory_space<vmem>>, vector<56x128xf32>
    %52 = arith.truncf %51 : vector<56x128xf32> to vector<56x128xbf16>
    %c0_39 = arith.constant 0 : index
    %c1792 = arith.constant 1792 : index
    %53 = vector.load %arg16[%c0_39, %c1792] : memref<56x3200xbf16, #tpu.memory_space<vmem>>, vector<56x128xbf16>
    tpu.vector_store %arg16[%c0_39, %c1792], %52 {strides = array<i32>} : memref<56x3200xbf16, #tpu.memory_space<vmem>>, vector<56x128xbf16>,
    %c48 = arith.constant 48 : index
    %c0_40 = arith.constant 0 : index
    %54 = vector.load %arg15[%c48, %c0_40] : memref<128x128xf32, #tpu.memory_space<vmem>>, vector<56x128xf32>
    %55 = arith.truncf %54 : vector<56x128xf32> to vector<56x128xbf16>
    %c0_41 = arith.constant 0 : index
    %c1920 = arith.constant 1920 : index
    %56 = vector.load %arg16[%c0_41, %c1920] : memref<56x3200xbf16, #tpu.memory_space<vmem>>, vector<56x128xbf16>
    tpu.vector_store %arg16[%c0_41, %c1920], %55 {strides = array<i32>} : memref<56x3200xbf16, #tpu.memory_space<vmem>>, vector<56x128xbf16>,
    %c50 = arith.constant 50 : index
    %c0_42 = arith.constant 0 : index
    %57 = vector.load %arg15[%c50, %c0_42] : memref<128x128xf32, #tpu.memory_space<vmem>>, vector<56x128xf32>
    %58 = arith.truncf %57 : vector<56x128xf32> to vector<56x128xbf16>
    %c0_43 = arith.constant 0 : index
    %c2048 = arith.constant 2048 : index
    %59 = vector.load %arg16[%c0_43, %c2048] : memref<56x3200xbf16, #tpu.memory_space<vmem>>, vector<56x128xbf16>
    tpu.vector_store %arg16[%c0_43, %c2048], %58 {strides = array<i32>} : memref<56x3200xbf16, #tpu.memory_space<vmem>>, vector<56x128xbf16>,
    %c52 = arith.constant 52 : index
    %c0_44 = arith.constant 0 : index
    %60 = vector.load %arg15[%c52, %c0_44] : memref<128x128xf32, #tpu.memory_space<vmem>>, vector<56x128xf32>
    %61 = arith.truncf %60 : vector<56x128xf32> to vector<56x128xbf16>
    %c0_45 = arith.constant 0 : index
    %c2176 = arith.constant 2176 : index
    %62 = vector.load %arg16[%c0_45, %c2176] : memref<56x3200xbf16, #tpu.memory_space<vmem>>, vector<56x128xbf16>
    tpu.vector_store %arg16[%c0_45, %c2176], %61 {strides = array<i32>} : memref<56x3200xbf16, #tpu.memory_space<vmem>>, vector<56x128xbf16>,
    %c54 = arith.constant 54 : index
    %c0_46 = arith.constant 0 : index
    %63 = vector.load %arg15[%c54, %c0_46] : memref<128x128xf32, #tpu.memory_space<vmem>>, vector<56x128xf32>
    %64 = arith.truncf %63 : vector<56x128xf32> to vector<56x128xbf16>
    %c0_47 = arith.constant 0 : index
    %c2304 = arith.constant 2304 : index
    %65 = vector.load %arg16[%c0_47, %c2304] : memref<56x3200xbf16, #tpu.memory_space<vmem>>, vector<56x128xbf16>
    tpu.vector_store %arg16[%c0_47, %c2304], %64 {strides = array<i32>} : memref<56x3200xbf16, #tpu.memory_space<vmem>>, vector<56x128xbf16>,
    %c56 = arith.constant 56 : index
    %c0_48 = arith.constant 0 : index
    %66 = vector.load %arg15[%c56, %c0_48] : memref<128x128xf32, #tpu.memory_space<vmem>>, vector<56x128xf32>
    %67 = arith.truncf %66 : vector<56x128xf32> to vector<56x128xbf16>
    %c0_49 = arith.constant 0 : index
    %c2432 = arith.constant 2432 : index
    %68 = vector.load %arg16[%c0_49, %c2432] : memref<56x3200xbf16, #tpu.memory_space<vmem>>, vector<56x128xbf16>
    tpu.vector_store %arg16[%c0_49, %c2432], %67 {strides = array<i32>} : memref<56x3200xbf16, #tpu.memory_space<vmem>>, vector<56x128xbf16>,
    %c64 = arith.constant 64 : index
    %c0_50 = arith.constant 0 : index
    %69 = vector.load %arg15[%c64, %c0_50] : memref<128x128xf32, #tpu.memory_space<vmem>>, vector<56x128xf32>
    %70 = arith.truncf %69 : vector<56x128xf32> to vector<56x128xbf16>
    %c0_51 = arith.constant 0 : index
    %c2560 = arith.constant 2560 : index
    %71 = vector.load %arg16[%c0_51, %c2560] : memref<56x3200xbf16, #tpu.memory_space<vmem>>, vector<56x128xbf16>
    tpu.vector_store %arg16[%c0_51, %c2560], %70 {strides = array<i32>} : memref<56x3200xbf16, #tpu.memory_space<vmem>>, vector<56x128xbf16>,
    %c66 = arith.constant 66 : index
    %c0_52 = arith.constant 0 : index
    %72 = vector.load %arg15[%c66, %c0_52] : memref<128x128xf32, #tpu.memory_space<vmem>>, vector<56x128xf32>
    %73 = arith.truncf %72 : vector<56x128xf32> to vector<56x128xbf16>
    %c0_53 = arith.constant 0 : index
    %c2688 = arith.constant 2688 : index
    %74 = vector.load %arg16[%c0_53, %c2688] : memref<56x3200xbf16, #tpu.memory_space<vmem>>, vector<56x128xbf16>
    tpu.vector_store %arg16[%c0_53, %c2688], %73 {strides = array<i32>} : memref<56x3200xbf16, #tpu.memory_space<vmem>>, vector<56x128xbf16>,
    %c68 = arith.constant 68 : index
    %c0_54 = arith.constant 0 : index
    %75 = vector.load %arg15[%c68, %c0_54] : memref<128x128xf32, #tpu.memory_space<vmem>>, vector<56x128xf32>
    %76 = arith.truncf %75 : vector<56x128xf32> to vector<56x128xbf16>
    %c0_55 = arith.constant 0 : index
    %c2816 = arith.constant 2816 : index
    %77 = vector.load %arg16[%c0_55, %c2816] : memref<56x3200xbf16, #tpu.memory_space<vmem>>, vector<56x128xbf16>
    tpu.vector_store %arg16[%c0_55, %c2816], %76 {strides = array<i32>} : memref<56x3200xbf16, #tpu.memory_space<vmem>>, vector<56x128xbf16>,
    %c70 = arith.constant 70 : index
    %c0_56 = arith.constant 0 : index
    %78 = vector.load %arg15[%c70, %c0_56] : memref<128x128xf32, #tpu.memory_space<vmem>>, vector<56x128xf32>
    %79 = arith.truncf %78 : vector<56x128xf32> to vector<56x128xbf16>
    %c0_57 = arith.constant 0 : index
    %c2944 = arith.constant 2944 : index
    %80 = vector.load %arg16[%c0_57, %c2944] : memref<56x3200xbf16, #tpu.memory_space<vmem>>, vector<56x128xbf16>
    tpu.vector_store %arg16[%c0_57, %c2944], %79 {strides = array<i32>} : memref<56x3200xbf16, #tpu.memory_space<vmem>>, vector<56x128xbf16>,
    %c72 = arith.constant 72 : index
    %c0_58 = arith.constant 0 : index
    %81 = vector.load %arg15[%c72, %c0_58] : memref<128x128xf32, #tpu.memory_space<vmem>>, vector<56x128xf32>
    %82 = arith.truncf %81 : vector<56x128xf32> to vector<56x128xbf16>
    %c0_59 = arith.constant 0 : index
    %c3072 = arith.constant 3072 : index
    %83 = vector.load %arg16[%c0_59, %c3072] : memref<56x3200xbf16, #tpu.memory_space<vmem>>, vector<56x128xbf16>
    tpu.vector_store %arg16[%c0_59, %c3072], %82 {strides = array<i32>} : memref<56x3200xbf16, #tpu.memory_space<vmem>>, vector<56x128xbf16>,
    %c0_60 = arith.constant 0 : index
    %c0_61 = arith.constant 0 : index
    %84 = vector.load %arg16[%c0_60, %c0_61] : memref<56x3200xbf16, #tpu.memory_space<vmem>>, vector<56x3200xbf16>
    %c0_62 = arith.constant 0 : index
    %c0_63 = arith.constant 0 : index
    %85 = vector.load %arg4[%c0_62, %c0_63] : memref<3200x128xbf16, #tpu.memory_space<vmem>>, vector<3200x128xbf16>
    %cst_64 = arith.constant dense<0.000000e+00> : vector<56x128xf32>
    %86 = tpu.matmul %84, %85, %cst_64 {dimension_numbers = #tpu.dot_dimension_numbers<[1], [0], [0], [1], [0, 0, 1, 1], [], []>} : vector<56x3200xbf16>, vector<3200x128xbf16>, vector<56x128xf32> -> vector<56x128xf32>
    %c0_65 = arith.constant 0 : index
    %c0_66 = arith.constant 0 : index
    %87 = vector.load %arg5[%c0_65, %c0_66] : memref<1x128xf32, #tpu.memory_space<vmem>>, vector<1x128xf32>
    %88 = vector.broadcast %87 : vector<1x128xf32> to vector<56x128xf32>
    %89 = arith.addf %86, %88 : vector<56x128xf32>
    %cst_67 = arith.constant 0.000000e+00 : f32
    %90 = vector.broadcast %cst_67 : f32 to vector<56x128xf32>
    %91 = arith.maximumf %89, %90 : vector<56x128xf32>
    %c0_68 = arith.constant 0 : index
    %c0_69 = arith.constant 0 : index
    %92 = vector.load %arg17[%c0_68, %c0_69] : memref<56x128xf32, #tpu.memory_space<vmem>>, vector<56x128xf32>
    tpu.vector_store %arg17[%c0_68, %c0_69], %91 {strides = array<i32>} : memref<56x128xf32, #tpu.memory_space<vmem>>, vector<56x128xf32>,
    %c0_70 = arith.constant 0 : index
    %c0_71 = arith.constant 0 : index
    %93 = vector.load %arg17[%c0_70, %c0_71] : memref<56x128xf32, #tpu.memory_space<vmem>>, vector<20x128xf32>
    %94 = arith.truncf %93 : vector<20x128xf32> to vector<20x128xbf16>
    %c0_72 = arith.constant 0 : index
    %c0_73 = arith.constant 0 : index
    %95 = vector.load %arg18[%c0_72, %c0_73] : memref<20x1152xbf16, #tpu.memory_space<vmem>>, vector<20x128xbf16>
    tpu.vector_store %arg18[%c0_72, %c0_73], %94 {strides = array<i32>} : memref<20x1152xbf16, #tpu.memory_space<vmem>>, vector<20x128xbf16>,
    %c2_74 = arith.constant 2 : index
    %c0_75 = arith.constant 0 : index
    %96 = vector.load %arg17[%c2_74, %c0_75] : memref<56x128xf32, #tpu.memory_space<vmem>>, vector<20x128xf32>
    %97 = arith.truncf %96 : vector<20x128xf32> to vector<20x128xbf16>
    %c0_76 = arith.constant 0 : index
    %c128_77 = arith.constant 128 : index
    %98 = vector.load %arg18[%c0_76, %c128_77] : memref<20x1152xbf16, #tpu.memory_space<vmem>>, vector<20x128xbf16>
    tpu.vector_store %arg18[%c0_76, %c128_77], %97 {strides = array<i32>} : memref<20x1152xbf16, #tpu.memory_space<vmem>>, vector<20x128xbf16>,
    %c4_78 = arith.constant 4 : index
    %c0_79 = arith.constant 0 : index
    %99 = vector.load %arg17[%c4_78, %c0_79] : memref<56x128xf32, #tpu.memory_space<vmem>>, vector<20x128xf32>
    %100 = arith.truncf %99 : vector<20x128xf32> to vector<20x128xbf16>
    %c0_80 = arith.constant 0 : index
    %c256_81 = arith.constant 256 : index
    %101 = vector.load %arg18[%c0_80, %c256_81] : memref<20x1152xbf16, #tpu.memory_space<vmem>>, vector<20x128xbf16>
    tpu.vector_store %arg18[%c0_80, %c256_81], %100 {strides = array<i32>} : memref<20x1152xbf16, #tpu.memory_space<vmem>>, vector<20x128xbf16>,
    %c16_82 = arith.constant 16 : index
    %c0_83 = arith.constant 0 : index
    %102 = vector.load %arg17[%c16_82, %c0_83] : memref<56x128xf32, #tpu.memory_space<vmem>>, vector<20x128xf32>
    %103 = arith.truncf %102 : vector<20x128xf32> to vector<20x128xbf16>
    %c0_84 = arith.constant 0 : index
    %c384_85 = arith.constant 384 : index
    %104 = vector.load %arg18[%c0_84, %c384_85] : memref<20x1152xbf16, #tpu.memory_space<vmem>>, vector<20x128xbf16>
    tpu.vector_store %arg18[%c0_84, %c384_85], %103 {strides = array<i32>} : memref<20x1152xbf16, #tpu.memory_space<vmem>>, vector<20x128xbf16>,
    %c18_86 = arith.constant 18 : index
    %c0_87 = arith.constant 0 : index
    %105 = vector.load %arg17[%c18_86, %c0_87] : memref<56x128xf32, #tpu.memory_space<vmem>>, vector<20x128xf32>
    %106 = arith.truncf %105 : vector<20x128xf32> to vector<20x128xbf16>
    %c0_88 = arith.constant 0 : index
    %c512_89 = arith.constant 512 : index
    %107 = vector.load %arg18[%c0_88, %c512_89] : memref<20x1152xbf16, #tpu.memory_space<vmem>>, vector<20x128xbf16>
    tpu.vector_store %arg18[%c0_88, %c512_89], %106 {strides = array<i32>} : memref<20x1152xbf16, #tpu.memory_space<vmem>>, vector<20x128xbf16>,
    %c20_90 = arith.constant 20 : index
    %c0_91 = arith.constant 0 : index
    %108 = vector.load %arg17[%c20_90, %c0_91] : memref<56x128xf32, #tpu.memory_space<vmem>>, vector<20x128xf32>
    %109 = arith.truncf %108 : vector<20x128xf32> to vector<20x128xbf16>
    %c0_92 = arith.constant 0 : index
    %c640_93 = arith.constant 640 : index
    %110 = vector.load %arg18[%c0_92, %c640_93] : memref<20x1152xbf16, #tpu.memory_space<vmem>>, vector<20x128xbf16>
    tpu.vector_store %arg18[%c0_92, %c640_93], %109 {strides = array<i32>} : memref<20x1152xbf16, #tpu.memory_space<vmem>>, vector<20x128xbf16>,
    %c32_94 = arith.constant 32 : index
    %c0_95 = arith.constant 0 : index
    %111 = vector.load %arg17[%c32_94, %c0_95] : memref<56x128xf32, #tpu.memory_space<vmem>>, vector<20x128xf32>
    %112 = arith.truncf %111 : vector<20x128xf32> to vector<20x128xbf16>
    %c0_96 = arith.constant 0 : index
    %c768_97 = arith.constant 768 : index
    %113 = vector.load %arg18[%c0_96, %c768_97] : memref<20x1152xbf16, #tpu.memory_space<vmem>>, vector<20x128xbf16>
    tpu.vector_store %arg18[%c0_96, %c768_97], %112 {strides = array<i32>} : memref<20x1152xbf16, #tpu.memory_space<vmem>>, vector<20x128xbf16>,
    %c34_98 = arith.constant 34 : index
    %c0_99 = arith.constant 0 : index
    %114 = vector.load %arg17[%c34_98, %c0_99] : memref<56x128xf32, #tpu.memory_space<vmem>>, vector<20x128xf32>
    %115 = arith.truncf %114 : vector<20x128xf32> to vector<20x128xbf16>
    %c0_100 = arith.constant 0 : index
    %c896_101 = arith.constant 896 : index
    %116 = vector.load %arg18[%c0_100, %c896_101] : memref<20x1152xbf16, #tpu.memory_space<vmem>>, vector<20x128xbf16>
    tpu.vector_store %arg18[%c0_100, %c896_101], %115 {strides = array<i32>} : memref<20x1152xbf16, #tpu.memory_space<vmem>>, vector<20x128xbf16>,
    %c36_102 = arith.constant 36 : index
    %c0_103 = arith.constant 0 : index
    %117 = vector.load %arg17[%c36_102, %c0_103] : memref<56x128xf32, #tpu.memory_space<vmem>>, vector<20x128xf32>
    %118 = arith.truncf %117 : vector<20x128xf32> to vector<20x128xbf16>
    %c0_104 = arith.constant 0 : index
    %c1024_105 = arith.constant 1024 : index
    %119 = vector.load %arg18[%c0_104, %c1024_105] : memref<20x1152xbf16, #tpu.memory_space<vmem>>, vector<20x128xbf16>
    tpu.vector_store %arg18[%c0_104, %c1024_105], %118 {strides = array<i32>} : memref<20x1152xbf16, #tpu.memory_space<vmem>>, vector<20x128xbf16>,
    %c0_106 = arith.constant 0 : index
    %c0_107 = arith.constant 0 : index
    %120 = vector.load %arg18[%c0_106, %c0_107] : memref<20x1152xbf16, #tpu.memory_space<vmem>>, vector<20x1152xbf16>
    %c0_108 = arith.constant 0 : index
    %c0_109 = arith.constant 0 : index
    %121 = vector.load %arg6[%c0_108, %c0_109] : memref<1152x256xbf16, #tpu.memory_space<vmem>>, vector<1152x256xbf16>
    %cst_110 = arith.constant dense<0.000000e+00> : vector<20x256xf32>
    %122 = tpu.matmul %120, %121, %cst_110 {dimension_numbers = #tpu.dot_dimension_numbers<[1], [0], [0], [1], [0, 0, 1, 1], [], []>} : vector<20x1152xbf16>, vector<1152x256xbf16>, vector<20x256xf32> -> vector<20x256xf32>
    %c0_111 = arith.constant 0 : index
    %c0_112 = arith.constant 0 : index
    %123 = vector.load %arg7[%c0_111, %c0_112] : memref<1x256xf32, #tpu.memory_space<vmem>>, vector<1x256xf32>
    %124 = vector.broadcast %123 : vector<1x256xf32> to vector<20x256xf32>
    %125 = arith.addf %122, %124 : vector<20x256xf32>
    %cst_113 = arith.constant 0.000000e+00 : f32
    %126 = vector.broadcast %cst_113 : f32 to vector<20x256xf32>
    %127 = arith.maximumf %125, %126 : vector<20x256xf32>
    %128 = vector.extract_strided_slice %127 {offsets = [0, 0], sizes = [2, 256], strides = [1, 1]} : vector<20x256xf32> to vector<2x256xf32>
    %129 = arith.truncf %128 : vector<2x256xf32> to vector<2x256xbf16>
    %c0_114 = arith.constant 0 : index
    %c0_115 = arith.constant 0 : index
    %130 = vector.load %arg19[%c0_114, %c0_115] : memref<2x1024xbf16, #tpu.memory_space<vmem>>, vector<2x256xbf16>
    tpu.vector_store %arg19[%c0_114, %c0_115], %129 {strides = array<i32>} : memref<2x1024xbf16, #tpu.memory_space<vmem>>, vector<2x256xbf16>,
    %131 = vector.extract_strided_slice %127 {offsets = [2, 0], sizes = [2, 256], strides = [1, 1]} : vector<20x256xf32> to vector<2x256xf32>
    %132 = arith.truncf %131 : vector<2x256xf32> to vector<2x256xbf16>
    %c0_116 = arith.constant 0 : index
    %c256_117 = arith.constant 256 : index
    %133 = vector.load %arg19[%c0_116, %c256_117] : memref<2x1024xbf16, #tpu.memory_space<vmem>>, vector<2x256xbf16>
    tpu.vector_store %arg19[%c0_116, %c256_117], %132 {strides = array<i32>} : memref<2x1024xbf16, #tpu.memory_space<vmem>>, vector<2x256xbf16>,
    %134 = vector.extract_strided_slice %127 {offsets = [16, 0], sizes = [2, 256], strides = [1, 1]} : vector<20x256xf32> to vector<2x256xf32>
    %135 = arith.truncf %134 : vector<2x256xf32> to vector<2x256xbf16>
    %c0_118 = arith.constant 0 : index
    %c512_119 = arith.constant 512 : index
    %136 = vector.load %arg19[%c0_118, %c512_119] : memref<2x1024xbf16, #tpu.memory_space<vmem>>, vector<2x256xbf16>
    tpu.vector_store %arg19[%c0_118, %c512_119], %135 {strides = array<i32>} : memref<2x1024xbf16, #tpu.memory_space<vmem>>, vector<2x256xbf16>,
    %137 = vector.extract_strided_slice %127 {offsets = [18, 0], sizes = [2, 256], strides = [1, 1]} : vector<20x256xf32> to vector<2x256xf32>
    %138 = arith.truncf %137 : vector<2x256xf32> to vector<2x256xbf16>
    %c0_120 = arith.constant 0 : index
    %c768_121 = arith.constant 768 : index
    %139 = vector.load %arg19[%c0_120, %c768_121] : memref<2x1024xbf16, #tpu.memory_space<vmem>>, vector<2x256xbf16>
    tpu.vector_store %arg19[%c0_120, %c768_121], %138 {strides = array<i32>} : memref<2x1024xbf16, #tpu.memory_space<vmem>>, vector<2x256xbf16>,
    %c0_122 = arith.constant 0 : index
    %c0_123 = arith.constant 0 : index
    %140 = vector.load %arg19[%c0_122, %c0_123] : memref<2x1024xbf16, #tpu.memory_space<vmem>>, vector<2x1024xbf16>
    %c0_124 = arith.constant 0 : index
    %c0_125 = arith.constant 0 : index
    %141 = vector.load %arg8[%c0_124, %c0_125] : memref<1024x1024xbf16, #tpu.memory_space<vmem>>, vector<1024x1024xbf16>
    %cst_126 = arith.constant dense<0.000000e+00> : vector<2x1024xf32>
    %142 = tpu.matmul %140, %141, %cst_126 {dimension_numbers = #tpu.dot_dimension_numbers<[1], [0], [0], [1], [0, 0, 1, 1], [], []>} : vector<2x1024xbf16>, vector<1024x1024xbf16>, vector<2x1024xf32> -> vector<2x1024xf32>
    %c0_127 = arith.constant 0 : index
    %c0_128 = arith.constant 0 : index
    %143 = vector.load %arg9[%c0_127, %c0_128] : memref<1x1024xf32, #tpu.memory_space<vmem>>, vector<1x1024xf32>
    %144 = vector.broadcast %143 : vector<1x1024xf32> to vector<2x1024xf32>
    %145 = arith.addf %142, %144 : vector<2x1024xf32>
    %cst_129 = arith.constant 0.000000e+00 : f32
    %146 = vector.broadcast %cst_129 : f32 to vector<2x1024xf32>
    %147 = arith.maximumf %145, %146 : vector<2x1024xf32>
    %148 = arith.truncf %147 : vector<2x1024xf32> to vector<2x1024xbf16>
    %c0_130 = arith.constant 0 : index
    %c0_131 = arith.constant 0 : index
    %149 = vector.load %arg10[%c0_130, %c0_131] : memref<1024x512xbf16, #tpu.memory_space<vmem>>, vector<1024x512xbf16>
    %cst_132 = arith.constant dense<0.000000e+00> : vector<2x512xf32>
    %150 = tpu.matmul %148, %149, %cst_132 {dimension_numbers = #tpu.dot_dimension_numbers<[1], [0], [0], [1], [0, 0, 1, 1], [], []>} : vector<2x1024xbf16>, vector<1024x512xbf16>, vector<2x512xf32> -> vector<2x512xf32>
    %c0_133 = arith.constant 0 : index
    %c0_134 = arith.constant 0 : index
    %151 = vector.load %arg11[%c0_133, %c0_134] : memref<1x512xf32, #tpu.memory_space<vmem>>, vector<1x512xf32>
    %152 = vector.broadcast %151 : vector<1x512xf32> to vector<2x512xf32>
    %153 = arith.addf %150, %152 : vector<2x512xf32>
    %cst_135 = arith.constant 0.000000e+00 : f32
    %154 = vector.broadcast %cst_135 : f32 to vector<2x512xf32>
    %155 = arith.maximumf %153, %154 : vector<2x512xf32>
    %156 = arith.truncf %155 : vector<2x512xf32> to vector<2x512xbf16>
    %c0_136 = arith.constant 0 : index
    %c0_137 = arith.constant 0 : index
    %157 = vector.load %arg12[%c0_136, %c0_137] : memref<512x128xbf16, #tpu.memory_space<vmem>>, vector<512x128xbf16>
    %cst_138 = arith.constant dense<0.000000e+00> : vector<2x128xf32>
    %158 = tpu.matmul %156, %157, %cst_138 {dimension_numbers = #tpu.dot_dimension_numbers<[1], [0], [0], [1], [0, 0, 1, 1], [], []>} : vector<2x512xbf16>, vector<512x128xbf16>, vector<2x128xf32> -> vector<2x128xf32>
    %c0_139 = arith.constant 0 : index
    %c0_140 = arith.constant 0 : index
    %159 = vector.load %arg13[%c0_139, %c0_140] : memref<1x128xf32, #tpu.memory_space<vmem>>, vector<1x128xf32>
    %160 = vector.broadcast %159 : vector<1x128xf32> to vector<2x128xf32>
    %161 = arith.addf %158, %160 : vector<2x128xf32>
    %c0_141 = arith.constant 0 : index
    %c0_142 = arith.constant 0 : index
    %162 = vector.load %arg14[%c0_141, %c0_142] : memref<2x128xf32, #tpu.memory_space<vmem>>, vector<2x128xf32>
    tpu.vector_store %arg14[%c0_141, %c0_142], %161 {strides = array<i32>} : memref<2x128xf32, #tpu.memory_space<vmem>>, vector<2x128xf32>,
    return
  }
  func.func @transform_0(%arg0: i32) -> (i32, i32) {
    %c0_i32 = arith.constant 0 : i32
    %c0_i32_0 = arith.constant 0 : i32
    %c0_i32_1 = arith.constant 0 : i32
    return %c0_i32, %c0_i32_0 : i32, i32
  }
  func.func @transform_1(%arg0: i32) -> (i32, i32) {
    %c0_i32 = arith.constant 0 : i32
    %c0_i32_0 = arith.constant 0 : i32
    %c0_i32_1 = arith.constant 0 : i32
    return %c0_i32, %c0_i32_0 : i32, i32
  }
  func.func @transform_2(%arg0: i32) -> (i32, i32) {
    %c0_i32 = arith.constant 0 : i32
    %c0_i32_0 = arith.constant 0 : i32
    %c0_i32_1 = arith.constant 0 : i32
    return %c0_i32, %c0_i32_0 : i32, i32
  }
  func.func @transform_3(%arg0: i32) -> (i32, i32) {
    %c0_i32 = arith.constant 0 : i32
    %c0_i32_0 = arith.constant 0 : i32
    %c0_i32_1 = arith.constant 0 : i32
    return %c0_i32, %c0_i32_0 : i32, i32
  }
  func.func @transform_4(%arg0: i32) -> (i32, i32) {
    %c0_i32 = arith.constant 0 : i32
    %c0_i32_0 = arith.constant 0 : i32
    %c0_i32_1 = arith.constant 0 : i32
    return %c0_i32, %c0_i32_0 : i32, i32
  }
  func.func @transform_5(%arg0: i32) -> (i32, i32) {
    %c0_i32 = arith.constant 0 : i32
    %c0_i32_0 = arith.constant 0 : i32
    %c0_i32_1 = arith.constant 0 : i32
    return %c0_i32, %c0_i32_0 : i32, i32
  }
  func.func @transform_6(%arg0: i32) -> (i32, i32) {
    %c0_i32 = arith.constant 0 : i32
    %c0_i32_0 = arith.constant 0 : i32
    %c0_i32_1 = arith.constant 0 : i32
    return %c0_i32, %c0_i32_0 : i32, i32
  }
  func.func @transform_7(%arg0: i32) -> (i32, i32) {
    %c0_i32 = arith.constant 0 : i32
    %c0_i32_0 = arith.constant 0 : i32
    %c0_i32_1 = arith.constant 0 : i32
    return %c0_i32, %c0_i32_0 : i32, i32
  }
  func.func @transform_8(%arg0: i32) -> (i32, i32) {
    %c0_i32 = arith.constant 0 : i32
    %c0_i32_0 = arith.constant 0 : i32
    %c0_i32_1 = arith.constant 0 : i32
    return %c0_i32, %c0_i32_0 : i32, i32
  }
  func.func @transform_9(%arg0: i32) -> (i32, i32) {
    %c0_i32 = arith.constant 0 : i32
    %c0_i32_0 = arith.constant 0 : i32
    %c0_i32_1 = arith.constant 0 : i32
    return %c0_i32, %c0_i32_0 : i32, i32
  }
  func.func @transform_10(%arg0: i32) -> (i32, i32) {
    %c0_i32 = arith.constant 0 : i32
    %c0_i32_0 = arith.constant 0 : i32
    %c0_i32_1 = arith.constant 0 : i32
    return %c0_i32, %c0_i32_0 : i32, i32
  }
  func.func @transform_11(%arg0: i32) -> (i32, i32) {
    %c0_i32 = arith.constant 0 : i32
    %c0_i32_0 = arith.constant 0 : i32
    %c0_i32_1 = arith.constant 0 : i32
    return %c0_i32, %c0_i32_0 : i32, i32
  }
  func.func @transform_12(%arg0: i32) -> (i32, i32) {
    %c0_i32 = arith.constant 0 : i32
    %c0_i32_0 = arith.constant 0 : i32
    %c0_i32_1 = arith.constant 0 : i32
    return %c0_i32, %c0_i32_0 : i32, i32
  }
  func.func @transform_13(%arg0: i32) -> (i32, i32) {
    %c0_i32 = arith.constant 0 : i32
    %c0_i32_0 = arith.constant 0 : i32
    %c0_i32_1 = arith.constant 0 : i32
    return %c0_i32, %c0_i32_0 : i32, i32
  }
}

</mosaic_0001>

<bundles_post_ra>
// kernel: osac_forward.1
= control target key start
LH: loop header
LB: loop body
LE: loop exit
PB: predicated region body
PF: predicated region fallthrough
CT: control target
= control target key end

     0   :  { %18 = vsyncpa [#allocation8], 0  ;;  %s17247_s0 = inlined_call_operand.vmem [shape: bf16[128,49], index: 0, kind: input, shape index: {}]   ;;  %s17248_s1 = inlined_call_operand.hbm [shape: bf16[49,128], index: 1, kind: input, shape index: {}]   ;;  %s17249_s2 = inlined_call_operand.hbm [shape: f32[1,128], index: 2, kind: input, shape index: {}]   ;;  %s17250_s3 = inlined_call_operand.hbm [shape: bf16[3200,128], index: 3, kind: input, shape index: {}]   ;;  %s17251_s4 = inlined_call_operand.hbm [shape: f32[1,128], index: 4, kind: input, shape index: {}]   ;;  %s17252_s5 = inlined_call_operand.hbm [shape: bf16[1152,256], index: 5, kind: input, shape index: {}]   ;;  %s17253_s6 = inlined_call_operand.hbm [shape: f32[1,256], index: 6, kind: input, shape index: {}]   ;;  %s17254_s7 = inlined_call_operand.hbm [shape: bf16[1024,1024], index: 7, kind: input, shape index: {}]   ;;  %s17255_s8 = inlined_call_operand.hbm [shape: f32[1,1024], index: 8, kind: input, shape index: {}]   ;;  %s17256_s9 = inlined_call_operand.vmem [shape: bf16[1024,512], index: 9, kind: input, shape index: {}]   ;;  %s17257_s10 = inlined_call_operand.hbm [shape: f32[1,512], index: 10, kind: input, shape index: {}]   ;;  %s17258_s11 = inlined_call_operand.hbm [shape: bf16[512,128], index: 11, kind: input, shape index: {}]   ;;  %s17259_s12 = inlined_call_operand.hbm [shape: f32[1,128], index: 12, kind: input, shape index: {}]   ;;  %s17260_s13 = inlined_call_operand.hbm [shape: f32[2,128], index: 13, kind: output, shape index: {}]  }
   0x1   :  { %19 = vsyncpa [#allocation11], 0 }
   0x2   :  { %20 = vsyncpa [#allocation14], 0 }
   0x3   :  { %21 = vsyncpa [#allocation17], 0 }
   0x4   :  { %22 = vsyncpa [#allocation20], 0 }
   0x5   :  { %23 = vsyncpa [#allocation23], 0 }
   0x6   :  { %24 = vsyncpa [#allocation9], 0  ;;  %s15784_s25 = smov [#allocation10]   ;;  %s15785_s27 = smov [#allocation13]  }
   0x7   :  { %s45_s26 = sshll.u32 %s15784_s25, 4  ;;  %s67_s28 = sshll.u32 %s15785_s27, 4  ;;  %s46_s26 = int_to_ptr.vmem [resolvable:$true] %s45_s26  ;;  %s68_s28 = int_to_ptr.vmem [resolvable:$true] %s67_s28 }
   0x8   :  { %s15506_s14 = scalar_lea.hbm %s17249_s2, 16 }
   0x9   :  { %p15507_p0 = scmp.ne.s32.totalorder %s17249_s2, %s15506_s14  ;;  %p15510_p1 = scmp.lt.u32.totalorder %s15506_s14, %s17249_s2 }
   0xb   :  { %p15512_p2 = pnand %p15510_p1, %p15507_p0 }
   0xd   :  { %15515 = shalt.err (!%p15512_p2)
}
   0xe   :  { %s15516_s19 = scalar_lea.vmem %s46_s26, 16  ;;  %s15520_s20 = scalar_lea.vmem %s46_s26, 32 }
   0xf   :  { %p15517_p3 = scmp.ne.s32.totalorder %s46_s26, %s15516_s19  ;;  %p15521_p4 = scmp.lt.s32.totalorder %s46_s26, %s46_s26 }
  0x10   :  { %p15522_p5 = scmp.lt.s32.totalorder %s15520_s20, %s15516_s19 }
  0x12   :  { %p15523_p6 = por %p15522_p5, %p15521_p4 }
  0x14   :  { %p15524_p7 = pnand %p15523_p6, %p15517_p3 }
  0x16   :  { %15527 = shalt.err (!%p15524_p7)
}
  0x17   :  { %48 = dma.hbm_to_vmem [thread:$0]  %s17249_s2, 16, %s46_s26, [#allocation11]  }
  0x18   :  { %s15528_s25 = scalar_lea.hbm %s17251_s4, 16 }
  0x19   :  { %p15529_p8 = scmp.ne.s32.totalorder %s17251_s4, %s15528_s25  ;;  %p15532_p9 = scmp.lt.u32.totalorder %s15528_s25, %s17251_s4 }
  0x1b   :  { %p15534_p10 = pnand %p15532_p9, %p15529_p8 }
  0x1d   :  { %15537 = shalt.err (!%p15534_p10)
}
  0x1e   :  { %s15538_s15 = scalar_lea.vmem %s68_s28, 16  ;;  %s15542_s16 = scalar_lea.vmem %s68_s28, 32 }
  0x1f   :  { %p15539_p11 = scmp.ne.s32.totalorder %s68_s28, %s15538_s15  ;;  %p15543_p12 = scmp.lt.s32.totalorder %s68_s28, %s68_s28 }
  0x20   :  { %p15544_p13 = scmp.lt.s32.totalorder %s15542_s16, %s15538_s15 }
  0x22   :  { %p15545_p0 = por %p15544_p13, %p15543_p12 }
  0x24   :  { %p15546_p1 = pnand %p15545_p0, %p15539_p11 }
  0x26   :  { %15549 = shalt.err (!%p15546_p1)
}
  0x27   :  { %70 = dma.hbm_to_vmem [thread:$0]  %s17251_s4, 16, %s68_s28, [#allocation14]  }
  0x28   :  { %s15786_s17 = smov [#allocation16]   ;;  %s15787_s19 = smov [#allocation19]  }
  0x29   :  { %s89_s18 = sshll.u32 %s15786_s17, 4  ;;  %s111_s20 = sshll.u32 %s15787_s19, 4  ;;  %s90_s18 = int_to_ptr.vmem [resolvable:$true] %s89_s18  ;;  %s112_s20 = int_to_ptr.vmem [resolvable:$true] %s111_s20 }
  0x2a   :  { %s15550_s23 = scalar_lea.hbm %s17253_s6, 32 }
  0x2b   :  { %p15551_p2 = scmp.ne.s32.totalorder %s17253_s6, %s15550_s23  ;;  %p15554_p3 = scmp.lt.u32.totalorder %s15550_s23, %s17253_s6 }
  0x2d   :  { %p15556_p4 = pnand %p15554_p3, %p15551_p2 }
  0x2f   :  { %15559 = shalt.err (!%p15556_p4)
}
  0x30   :  { %s15560_s4 = scalar_lea.vmem %s90_s18, 32  ;;  %p15565_p6 = scmp.lt.s32.totalorder %s90_s18, %s90_s18 }
  0x31   :  { %p15561_p5 = scmp.ne.s32.totalorder %s90_s18, %s15560_s4  ;;  %p15566_p7 = scmp.lt.s32.totalorder %s15560_s4, %s15560_s4 }
  0x33   :  { %p15567_p8 = por %p15566_p7, %p15565_p6 }
  0x35   :  { %p15568_p9 = pnand %p15567_p8, %p15561_p5 }
  0x37   :  { %15571 = shalt.err (!%p15568_p9)
}
  0x38   :  { %92 = dma.hbm_to_vmem [thread:$0]  %s17253_s6, 32, %s90_s18, [#allocation17]  }
  0x39   :  { %s15572_s16 = scalar_lea.hbm %s17255_s8, 128 }
  0x3a   :  { %p15573_p10 = scmp.ne.s32.totalorder %s17255_s8, %s15572_s16  ;;  %p15576_p11 = scmp.lt.u32.totalorder %s15572_s16, %s17255_s8 }
  0x3c   :  { %p15578_p12 = pnand %p15576_p11, %p15573_p10 }
  0x3e   :  { %15581 = shalt.err (!%p15578_p12)
}
  0x3f   :  { %s15582_s21 = scalar_lea.vmem %s112_s20, 128  ;;  %p15587_p0 = scmp.lt.s32.totalorder %s112_s20, %s112_s20 }
  0x40   :  { %p15583_p13 = scmp.ne.s32.totalorder %s112_s20, %s15582_s21  ;;  %p15588_p1 = scmp.lt.s32.totalorder %s15582_s21, %s15582_s21 }
  0x42   :  { %p15589_p2 = por %p15588_p1, %p15587_p0 }
  0x44   :  { %p15590_p3 = pnand %p15589_p2, %p15583_p13 }
  0x46   :  { %15593 = shalt.err (!%p15590_p3)
}
  0x47   :  { %114 = dma.hbm_to_vmem [thread:$0]  %s17255_s8, 128, %s112_s20, [#allocation20]  }
  0x48   :  { %s15788_s22 = smov [#allocation22]   ;;  %s15789_s24 = smov [#allocation7]  }
  0x49   :  { %s132_s23 = sshll.u32 %s15788_s22, 4  ;;  %s32_s25 = sshll.u32 %s15789_s24, 4  ;;  %s133_s23 = int_to_ptr.vmem [resolvable:$true] %s132_s23  ;;  %s15922_s25 = int_to_ptr.vmem [resolvable:$true] %s32_s25 }
  0x4a   :  { %s15594_s4 = scalar_lea.hbm %s17258_s11, 4096 }
  0x4b   :  { %p15595_p4 = scmp.ne.s32.totalorder %s17258_s11, %s15594_s4  ;;  %p15598_p5 = scmp.lt.u32.totalorder %s15594_s4, %s17258_s11 }
  0x4d   :  { %p15600_p6 = pnand %p15598_p5, %p15595_p4 }
  0x4f   :  { %15603 = shalt.err (!%p15600_p6)
}
  0x50   :  { %s15604_s8 = scalar_lea.vmem %s133_s23, 4096  ;;  %p15609_p8 = scmp.lt.s32.totalorder %s133_s23, %s133_s23 }
  0x51   :  { %p15605_p7 = scmp.ne.s32.totalorder %s133_s23, %s15604_s8  ;;  %p15610_p9 = scmp.lt.s32.totalorder %s15604_s8, %s15604_s8 }
  0x53   :  { %p15611_p10 = por %p15610_p9, %p15609_p8 }
  0x55   :  { %p15612_p11 = pnand %p15611_p10, %p15605_p7 }
  0x57   :  { %15615 = shalt.err (!%p15612_p11)
}
  0x58   :  { %s15790_s20 = smov 64   ;;  %s15791_s16 = smov 4  }
  0x59   :  { %138 = dma.hbm_to_vmem [thread:$0]  %s17258_s11, 4096, %s133_s23, [#allocation23], %s15790_s20, %s15790_s20, %s15791_s16  }
  0x5a   :  { %s15616_s21 = scalar_lea.hbm %s17248_s1, 448 }
  0x5b   :  { %p15617_p12 = scmp.ne.s32.totalorder %s17248_s1, %s15616_s21  ;;  %p15620_p13 = scmp.lt.u32.totalorder %s15616_s21, %s17248_s1 }
  0x5d   :  { %p15622_p0 = pnand %p15620_p13, %p15617_p12 }
  0x5f   :  { %15625 = shalt.err (!%p15622_p0)
}
  0x60   :  { %s15626_s27 = scalar_lea.vmem %s15922_s25, 448  ;;  %p15631_p2 = scmp.lt.s32.totalorder %s15922_s25, %s15922_s25 }
  0x61   :  { %p15627_p1 = scmp.ne.s32.totalorder %s15922_s25, %s15626_s27  ;;  %p15632_p3 = scmp.lt.s32.totalorder %s15626_s27, %s15626_s27 }
  0x63   :  { %p15633_p4 = por %p15632_p3, %p15631_p2 }
  0x65   :  { %p15634_p5 = pnand %p15633_p4, %p15627_p1 }
  0x67   :  { %15637 = shalt.err (!%p15634_p5)
}
  0x68   :  { %38 = dma.hbm_to_vmem [thread:$0]  %s17248_s1, 448, %s15922_s25, [#allocation8], %s15790_s20, %s15790_s20, %s15791_s16  }
  0x69   :  { %s15792_s29 = smov [#allocation12]   ;;  %s15793_s28 = smov [#allocation15]  }
  0x6a   :  { %s54_s4 = sshll.u32 %s15792_s29, 4  ;;  %s76_s30 = sshll.u32 %s15793_s28, 4  ;;  %s55_s4 = int_to_ptr.vmem [resolvable:$true] %s54_s4  ;;  %s15959_s30 = int_to_ptr.vmem [resolvable:$true] %s76_s30 }
  0x6b   :  { %s15638_s8 = scalar_lea.hbm %s17250_s3, 25600 }
  0x6c   :  { %p15639_p6 = scmp.ne.s32.totalorder %s17250_s3, %s15638_s8  ;;  %p15642_p7 = scmp.lt.u32.totalorder %s15638_s8, %s17250_s3 }
  0x6e   :  { %p15644_p8 = pnand %p15642_p7, %p15639_p6 }
  0x70   :  { %15647 = shalt.err (!%p15644_p8)
}
  0x71   :  { %s15648_s1 = scalar_lea.vmem %s55_s4, 25600  ;;  %p15653_p10 = scmp.lt.s32.totalorder %s55_s4, %s55_s4 }
  0x72   :  { %p15649_p9 = scmp.ne.s32.totalorder %s55_s4, %s15648_s1  ;;  %p15654_p11 = scmp.lt.s32.totalorder %s15648_s1, %s15648_s1 }
  0x74   :  { %p15655_p12 = por %p15654_p11, %p15653_p10 }
  0x76   :  { %p15656_p13 = pnand %p15655_p12, %p15649_p9 }
  0x78   :  { %15659 = shalt.err (!%p15656_p13)
}
  0x79   :  { %60 = dma.hbm_to_vmem [thread:$0]  %s17250_s3, 25600, %s55_s4, [#allocation11], %s15790_s20, %s15790_s20, %s15791_s16  }
  0x7a   :  { %s15660_s22 = scalar_lea.hbm %s17252_s5, 18432 }
  0x7b   :  { %p15661_p0 = scmp.ne.s32.totalorder %s17252_s5, %s15660_s22  ;;  %p15664_p1 = scmp.lt.u32.totalorder %s15660_s22, %s17252_s5 }
  0x7d   :  { %p15666_p2 = pnand %p15664_p1, %p15661_p0 }
  0x7f   :  { %15669 = shalt.err (!%p15666_p2)
}
  0x80   :  { %s15670_s29 = scalar_lea.vmem %s15959_s30, 18432  ;;  %p15675_p4 = scmp.lt.s32.totalorder %s15959_s30, %s15959_s30 }
  0x81   :  { %p15671_p3 = scmp.ne.s32.totalorder %s15959_s30, %s15670_s29  ;;  %p15676_p5 = scmp.lt.s32.totalorder %s15670_s29, %s15670_s29 }
  0x83   :  { %p15677_p6 = por %p15676_p5, %p15675_p4 }
  0x85   :  { %p15678_p7 = pnand %p15677_p6, %p15671_p3 }
  0x87   :  { %15681 = shalt.err (!%p15678_p7)
}
  0x88   :  { %s15794_s3 = smov 128   ;;  %s15795_s20 = smov 8  }
  0x89   :  { %82 = dma.hbm_to_vmem [thread:$0]  %s17252_s5, 18432, %s15959_s30, [#allocation14], %s15794_s3, %s15794_s3, %s15795_s20  }
  0x8a   :  { %s15796_s28 = smov [#allocation18]   ;;  %s15682_s2 = scalar_lea.hbm %s17254_s7, 65536 }
  0x8b   :  { %s98_s14 = sshll.u32 %s15796_s28, 4  ;;  %p15683_p8 = scmp.ne.s32.totalorder %s17254_s7, %s15682_s2  ;;  %s99_s14 = int_to_ptr.vmem [resolvable:$true] %s98_s14 }
  0x8c   :  { %p15686_p9 = scmp.lt.u32.totalorder %s15682_s2, %s17254_s7 }
  0x8e   :  { %p15688_p10 = pnand %p15686_p9, %p15683_p8 }
  0x90   :  { %15691 = shalt.err (!%p15688_p10)
}
  0x91   :  { %s15692_s25 = scalar_lea.vmem %s99_s14, 65536  ;;  %p15697_p12 = scmp.lt.s32.totalorder %s99_s14, %s99_s14 }
  0x92   :  { %p15693_p11 = scmp.ne.s32.totalorder %s99_s14, %s15692_s25  ;;  %p15698_p13 = scmp.lt.s32.totalorder %s15692_s25, %s15692_s25 }
  0x94   :  { %p15699_p0 = por %p15698_p13, %p15697_p12 }
  0x96   :  { %p15700_p1 = pnand %p15699_p0, %p15693_p11 }
  0x98   :  { %15703 = shalt.err (!%p15700_p1)
}
  0x99   :  { %s15797_s5 = smov 512   ;;  %s15798_s30 = smov 32  }
  0x9a   :  { %104 = dma.hbm_to_vmem [thread:$0]  %s17254_s7, 65536, %s99_s14, [#allocation17], %s15797_s5, %s15797_s5, %s15798_s30  }
  0x9b   :  { %s15799_s18 = smov [#allocation21]   ;;  %s15800_s24 = smov [#allocation24]  }
  0x9c   :  { %s123_s22 = sshll.u32 %s15799_s18, 4  ;;  %s145_s27 = sshll.u32 %s15800_s24, 4  ;;  %s124_s22 = int_to_ptr.vmem [resolvable:$true] %s123_s22  ;;  %s146_s27 = int_to_ptr.vmem [resolvable:$true] %s145_s27 }
  0x9d   :  { %s15704_s29 = scalar_lea.hbm %s17257_s10, 64 }
  0x9e   :  { %p15705_p2 = scmp.ne.s32.totalorder %s17257_s10, %s15704_s29  ;;  %p15708_p3 = scmp.lt.u32.totalorder %s15704_s29, %s17257_s10 }
  0xa0   :  { %p15710_p4 = pnand %p15708_p3, %p15705_p2 }
  0xa2   :  { %15713 = shalt.err (!%p15710_p4)
}
  0xa3   :  { %s15714_s7 = scalar_lea.vmem %s124_s22, 64  ;;  %p15719_p6 = scmp.lt.s32.totalorder %s124_s22, %s124_s22 }
  0xa4   :  { %p15715_p5 = scmp.ne.s32.totalorder %s124_s22, %s15714_s7  ;;  %p15720_p7 = scmp.lt.s32.totalorder %s15714_s7, %s15714_s7 }
  0xa6   :  { %p15721_p8 = por %p15720_p7, %p15719_p6 }
  0xa8   :  { %p15722_p9 = pnand %p15721_p8, %p15715_p5 }
  0xaa   :  { %15725 = shalt.err (!%p15722_p9)
}
  0xab   :  { %126 = dma.hbm_to_vmem [thread:$0]  %s17257_s10, 64, %s124_s22, [#allocation20]  }
  0xac   :  { %s15726_s2 = scalar_lea.hbm %s17259_s12, 16 }
  0xad   :  { %p15727_p10 = scmp.ne.s32.totalorder %s17259_s12, %s15726_s2  ;;  %p15730_p11 = scmp.lt.u32.totalorder %s15726_s2, %s17259_s12 }
  0xaf   :  { %p15732_p12 = pnand %p15730_p11, %p15727_p10 }
  0xb1   :  { %15735 = shalt.err (!%p15732_p12)
}
  0xb2   :  { %s15736_s25 = scalar_lea.vmem %s146_s27, 16  ;;  %s15740_s5 = scalar_lea.vmem %s146_s27, 32 }
  0xb3   :  { %p15737_p13 = scmp.ne.s32.totalorder %s146_s27, %s15736_s25  ;;  %p15741_p0 = scmp.lt.s32.totalorder %s146_s27, %s146_s27 }
  0xb4   :  { %p15742_p1 = scmp.lt.s32.totalorder %s15740_s5, %s15736_s25 }
  0xb6   :  { %p15743_p2 = por %p15742_p1, %p15741_p0 }
  0xb8   :  { %p15744_p3 = pnand %p15743_p2, %p15737_p13 }
  0xba   :  { %15747 = shalt.err (!%p15744_p3)
}
  0xbb   :  { %148 = dma.hbm_to_vmem [thread:$0]  %s17259_s12, 16, %s146_s27, [#allocation23]  }
  0xbc   :  { %15770 = dma.done.wait [#allocation8], 448  }
  0xbd   :  { %15771 = vsyncadd [#allocation8], 4294966848 }
  0xbe   :  { %15772 = dma.done.wait [#allocation11], 25616  }
  0xbf   :  { %15773 = vsyncadd [#allocation11], 4294941680 }
  0xc0   :  { %15774 = dma.done.wait [#allocation14], 18448  }
  0xc1   :  { %15775 = vsyncadd [#allocation14], 4294948848 }
  0xc2   :  { %15776 = dma.done.wait [#allocation17], 65568  }
  0xc3   :  { %15777 = vsyncadd [#allocation17], 4294901728 }
  0xc4   :  { %15778 = dma.done.wait [#allocation20], 192  }
  0xc5   :  { %15779 = vsyncadd [#allocation20], 4294967104 }
  0xc6   :  { %15780 = dma.done.wait [#allocation23], 4112  }
  0xc7   :  { %15781 = vsyncadd [#allocation23], 4294963184  ;;  %v14502_v0 = vld [vmem:[#allocation7] sm:$0xff]   ;;  %vm299_vm0 = vcmask 1040384   ;;  %v14503_v1 = vld [vmem:[#allocation7 + $0x8] sm:$0xff]   ;;  %vm274_vm1 = vcmask 400384  }
  0xc8   :  { %14316 = vmatprep.subr.bf16.mxu0 %v14502_v0  ;;  %v14504_v2 = vld [vmem:[#allocation7 + $0x10] sm:$0xff]   ;;  %v14505_v3 = vld [vmem:[#allocation7 + $0x18] ss:$0 sps:$4 sm:$0x11]   ;;  %v15801_v5 = vmov 0   ;;  %v14507_v8 = vld [vmem:[%s17247_s0 + $0x8] sm:$0xff]  }
  0xc9   :  { %14317 = vmatpush3.bf16.msra.mxu0 %v14502_v0  ;;  %v14506_v4 = vld [vmem:[%s17247_s0] sm:$0xff]   ;;  %v301_v6 = vsel %vm299_vm0, 65535, %v15801_v5  ;;  %v14508_v10 = vld [vmem:[%s17247_s0 + $0x10] sm:$0xff]   ;;  %v14509_v14 = vld [vmem:[%s17247_s0 + $0x18] sm:$0xff]  }
  0xca   :  { %14318 = vmatprep.subr.bf16.mxu0 %v14503_v1  ;;  %14324 = vmatprep.mubr.msk.bf16.mxu0 %vm274_vm1, %v14506_v4  ;;  %v303_v7 = vand.u32 %v14505_v3, %v301_v6  ;;  %v14514_v9 = vld [vmem:[#allocation12 + $0x40] sm:$0xff]   ;;  %v14512_v17 = vld [vmem:[%s17247_s0 + $0x30] sm:$0xff]   ;;  %v14513_v18 = vld [vmem:[%s17247_s0 + $0x38] sm:$0xff]  }
  0xcb   :  { %v14515_v11 = vld [vmem:[#allocation12] sm:$0xff]   ;;  %v14520_v19 = vld [vmem:[#allocation12 + $0x148] sm:$0xff]   ;;  %v14524_v21 = vld [vmem:[#allocation12 + $0x150] sm:$0xff]  }
  0xcc   :  { %v14516_v12 = vld [vmem:[#allocation12 + $0x140] sm:$0xff]   ;;  %v14521_v20 = vld [vmem:[#allocation12 + $0x108] sm:$0xff]   ;;  %v14525_v22 = vld [vmem:[#allocation12 + $0x110] sm:$0xff]  }
  0xcd   :  { %14319 = vmatpush3.bf16.msra.mxu0 %v14503_v1  ;;  %v14517_v13 = vld [vmem:[#allocation12 + $0x100] sm:$0xff]   ;;  %13860 = vmatprep.subr.bf16.mxu1 %v14516_v12  ;;  %v14518_v23 = vld [vmem:[#allocation12 + $0x48] sm:$0xff]   ;;  %v14528_v25 = vld [vmem:[#allocation12 + $0x158] sm:$0xff]  }
  0xce   :  { %14320 = vmatprep.subr.bf16.mxu0 %v14504_v2  ;;  %13861 = vmatpush3.bf16.msra.mxu1 %v14517_v13  ;;  %v14510_v15 = vld [vmem:[%s17247_s0 + $0x20] sm:$0xff]   ;;  %v14511_v16 = vld [vmem:[%s17247_s0 + $0x28] sm:$0xff]   ;;  %v14522_v27 = vld [vmem:[#allocation12 + $0x50] sm:$0xff]  }
  0xcf   :  { %13862 = vmatprep.subr.bf16.mxu1 %v14520_v19  ;;  %v14519_v24 = vld [vmem:[#allocation12 + $0x8] sm:$0xff]   ;;  %v14529_v26 = vld [vmem:[#allocation12 + $0x118] sm:$0xff]   ;;  %v14532_v28 = vld [vmem:[#allocation12 + $0x160] sm:$0xff]  }
  0xd0   :  { %v14523_v29 = vld [vmem:[#allocation12 + $0x10] sm:$0xff]   ;;  %v14533_v30 = vld [vmem:[#allocation12 + $0x120] sm:$0xff]   ;;  %v14526_v31 = vld [vmem:[#allocation12 + $0x58] sm:$0xff]  }
  0xd1   :  { %14321 = vmatpush3.bf16.msra.mxu0 %v14504_v2  ;;  %v14536_v32 = vld [vmem:[#allocation12 + $0x168] sm:$0xff]   ;;  %v14527_v33 = vld [vmem:[#allocation12 + $0x18] sm:$0xff]   ;;  %v14530_v35 = vld [vmem:[#allocation12 + $0x60] sm:$0xff]  }
  0xd2   :  { %14322 = vmatprep.subr.bf16.mxu0 %v303_v7  ;;  %13863 = vmatpush3.bf16.msra.mxu1 %v14521_v20  ;;  %v14537_v34 = vld [vmem:[#allocation12 + $0x128] sm:$0xff]   ;;  %v14531_v36 = vld [vmem:[#allocation12 + $0x20] sm:$0xff]   ;;  %v14540_v37 = vld [vmem:[#allocation12 + $0x170] sm:$0xff]  }
  0xd3   :  { %13864 = vmatprep.subr.bf16.mxu1 %v14524_v21  ;;  %v14541_v38 = vld [vmem:[#allocation12 + $0x130] sm:$0xff]   ;;  %v14534_v39 = vld [vmem:[#allocation12 + $0x68] sm:$0xff]   ;;  %v14544_v41 = vld [vmem:[#allocation12 + $0x178] sm:$0xff]  }
  0xd4   :  { %v14535_v40 = vld [vmem:[#allocation12 + $0x28] sm:$0xff]   ;;  %v14545_v42 = vld [vmem:[#allocation12 + $0x138] sm:$0xff]   ;;  %v14538_v43 = vld [vmem:[#allocation12 + $0x70] sm:$0xff]  }
  0xd5   :  { %14323 = vmatpush3.bf16.msra.mxu0 %v303_v7  ;;  %v14554_v44 = vld [vmem:[#allocation12 + $0x240] sm:$0xff]   ;;  %v14539_v45 = vld [vmem:[#allocation12 + $0x30] sm:$0xff]   ;;  %v14542_v46 = vld [vmem:[#allocation12 + $0x78] sm:$0xff]  }
  0xd6   :  { %13780 = vmatprep.subr.bf16.mxu0 %v14514_v9  ;;  %13865 = vmatpush3.bf16.msra.mxu1 %v14525_v22  ;;  %v14543_v47 = vld [vmem:[#allocation12 + $0x38] sm:$0xff]   ;;  %v14549_v48 = vld [vmem:[#allocation12 + $0xc0] sm:$0xff]  }
  0xd7   :  { %13866 = vmatprep.subr.bf16.mxu1 %v14528_v25  ;;  %v16062_v49 = vld [vmem:[#allocation10] ss:$0 sm:$0xff] }
  0xd8   :  { %14325 = vmatmul.mubr.msk.bf16.vlgmr.msra.gmra.mrb[0].mxu0 %vm274_vm1, %v14507_v8 }
  0xd9   :  { %14328 = vmatprep.mubr.msk.bf16.mxu0 %vm274_vm1, %v14508_v10  ;;  %13781 = vmatpush3.bf16.msra.mxu0 %v14515_v11 }
  0xda   :  { %13782 = vmatprep.subr.bf16.mxu0 %v14518_v23  ;;  %13867 = vmatpush3.bf16.msra.mxu1 %v14529_v26 }
  0xdb   :  { %13868 = vmatprep.subr.bf16.mxu1 %v14532_v28 }
  0xdd   :  { %13783 = vmatpush3.bf16.msra.mxu0 %v14519_v24 }
  0xde   :  { %13784 = vmatprep.subr.bf16.mxu0 %v14522_v27  ;;  %13869 = vmatpush3.bf16.msra.mxu1 %v14533_v30 }
  0xdf   :  { %13870 = vmatprep.subr.bf16.mxu1 %v14536_v32 }
  0xe0   :  { %14329 = vmatmul.mubr.msk.bf16.gmra.mrb[4].mxu0 %vm274_vm1, %v14509_v14 }
  0xe1   :  { %14332 = vmatprep.mubr.msk.bf16.mxu0 %vm274_vm1, %v14510_v15  ;;  %13785 = vmatpush3.bf16.msra.mxu0 %v14523_v29 }
  0xe2   :  { %13786 = vmatprep.subr.bf16.mxu0 %v14526_v31  ;;  %13871 = vmatpush3.bf16.msra.mxu1 %v14537_v34 }
  0xe3   :  { %13872 = vmatprep.subr.bf16.mxu1 %v14540_v37 }
  0xe5   :  { %13787 = vmatpush3.bf16.msra.mxu0 %v14527_v33 }
  0xe6   :  { %13788 = vmatprep.subr.bf16.mxu0 %v14530_v35  ;;  %13873 = vmatpush3.bf16.msra.mxu1 %v14541_v38 }
  0xe7   :  { %13874 = vmatprep.subr.bf16.mxu1 %v14544_v41 }
  0xe8   :  { %14333 = vmatmul.mubr.msk.bf16.gmra.mrb[8].mxu0 %vm274_vm1, %v14511_v16 }
  0xe9   :  { %14336 = vmatprep.mubr.msk.bf16.mxu0 %vm274_vm1, %v14512_v17  ;;  %13789 = vmatpush3.bf16.msra.mxu0 %v14531_v36 }
  0xea   :  { %13790 = vmatprep.subr.bf16.mxu0 %v14534_v39  ;;  %13875 = vmatpush3.bf16.msra.mxu1 %v14545_v42 }
  0xeb   :  { %13940 = vmatprep.subr.bf16.mxu1 %v14554_v44  ;;  %v14555_v44 = vld [vmem:[#allocation12 + $0x200] sm:$0xff]  }
  0xed   :  { %13791 = vmatpush3.bf16.msra.mxu0 %v14535_v40 }
  0xee   :  { %13792 = vmatprep.subr.bf16.mxu0 %v14538_v43 }
  0xf0   :  { %14337 = vmatmul.mubr.msk.bf16.gmra.mrb[12].mxu0 %vm274_vm1, %v14513_v18 }
  0xf1   :  { %13793 = vmatpush3.bf16.msra.mxu0 %v14539_v45 }
  0xf2   :  { %13794 = vmatprep.subr.bf16.mxu0 %v14542_v46 }
  0xf5   :  { %13795 = vmatpush3.bf16.msra.mxu0 %v14543_v47 }
  0xf6   :  { %13820 = vmatprep.subr.bf16.mxu0 %v14549_v48  ;;  %v14558_v48 = vld [vmem:[#allocation12 + $0x248] sm:$0xff]  }
 0x1ab   :  { %v14326_v50 = vpop.f32.mrb[0].mxu0 }
 0x1ac   :  { %v348_v51 = vadd.f32 %v14326_v50, %v16062_v49  ;;  %v339_v52 = vpop.f32.mrb[1].mxu0 }
 0x1ad   :  { %v340_v53 = vadd.f32 %v16062_v49, %v339_v52  ;;  %v14327_v54 = vpop.f32.mrb[2].mxu0  ;;  %v16076_v52 = vld [vmem:[#allocation12 + $0x208] sm:$0xff]  }
 0x1ae   :  { %v404_v55 = vmax.f32 %v348_v51, 0.0  ;;  %v351_v56 = vadd.f32 %v14327_v54, %v16062_v49  ;;  %v342_v57 = vpop.f32.mrb[3].mxu0 }
 0x1af   :  { %v402_v58 = vmax.f32 %v340_v53, 0.0  ;;  %v343_v59 = vadd.f32 %v16062_v49, %v342_v57 }
 0x1b0   :  { %420 = vst [vmem:[#allocation2 + $0x10] sm:$0xff] %v404_v55  ;;  %v13568_v60 = vpack.c.bf16 %v404_v55, %v404_v55  ;;  %v405_v61 = vmax.f32 %v351_v56, 0.0 }
 0x1b1   :  { %418 = vst [vmem:[#allocation2] sm:$0xff] %v402_v58  ;;  %v13566_v62 = vpack.c.bf16 %v402_v58, %v402_v58  ;;  %v403_v63 = vmax.f32 %v343_v59, 0.0  ;;  %v16078_v58 = vld [vmem:[#allocation12 + $0x250] sm:$0xff]  }
 0x1b2   :  { %472 = vst [vmem:[#allocation3 + $0xc8] sm:$0xf] %v13568_v60  ;;  %421 = vst [vmem:[#allocation2 + $0x18] sm:$0xff] %v405_v61  ;;  %v13569_v0 = vpack.c.bf16 %v405_v61, %v405_v61 }
 0x1b3   :  { %643 = vst [vmem:[#allocation3 + $0x74] sm:$0xf] %v13568_v60  ;;  %685 = vst [vmem:[#allocation3 + $0x14] sm:$0xf] %v13568_v60  ;;  %v13567_v1 = vpack.c.bf16 %v403_v63, %v403_v63  ;;  %v14330_v2 = vpop.f32.mrb[4].mxu0 }
 0x1b4   :  { %470 = vst [vmem:[#allocation3] sm:$0xf] %v13566_v62  ;;  %419 = vst [vmem:[#allocation2 + $0x8] sm:$0xff] %v403_v63  ;;  %v364_v3 = vadd.f32 %v14330_v2, %v16062_v49  ;;  %v355_v4 = vpop.f32.mrb[5].mxu0 }
 0x1b5   :  { %473 = vst [vmem:[#allocation3 + $0x12c] sm:$0xf] %v13569_v0  ;;  %644 = vst [vmem:[#allocation3 + $0xd8] sm:$0xf] %v13569_v0  ;;  %v356_v6 = vadd.f32 %v16062_v49, %v355_v4  ;;  %v14331_v7 = vpop.f32.mrb[6].mxu0 }
 0x1b6   :  { %857 = vst [vmem:[#allocation3 + $0x24] sm:$0xf] %v13569_v0  ;;  %686 = vst [vmem:[#allocation3 + $0x78] sm:$0xf] %v13569_v0  ;;  %v408_v8 = vmax.f32 %v364_v3, 0.0  ;;  %v367_v9 = vadd.f32 %v14331_v7, %v16062_v49  ;;  %v358_v10 = vpop.f32.mrb[7].mxu0 }
 0x1b7   :  { %471 = vst [vmem:[#allocation3 + $0x64] sm:$0xf] %v13567_v1  ;;  %642 = vst [vmem:[#allocation3 + $0x10] sm:$0xf] %v13567_v1  ;;  %v406_v11 = vmax.f32 %v356_v6, 0.0  ;;  %v359_v12 = vadd.f32 %v16062_v49, %v358_v10 }
 0x1b8   :  { %424 = vst [vmem:[#allocation2 + $0x30] sm:$0xff] %v408_v8  ;;  %v13572_v13 = vpack.c.bf16 %v408_v8, %v408_v8  ;;  %v409_v14 = vmax.f32 %v367_v9, 0.0 }
 0x1b9   :  { %v479_v15 = vld [vmem:[#allocation2 + $0x12] sm:$0xff]  ;;  %422 = vst [vmem:[#allocation2 + $0x20] sm:$0xff] %v406_v11  ;;  %v13570_v18 = vpack.c.bf16 %v406_v11, %v406_v11  ;;  %v407_v19 = vmax.f32 %v359_v12, 0.0 }
 0x1ba   :  { %v522_v16 = vld [vmem:[#allocation2 + $0x14] sm:$0xff]  ;;  %v13575_v20 = vpack.c.bf16 %v479_v15, %v479_v15  ;;  %476 = vst [vmem:[#allocation3 + $0x258] sm:$0xf] %v13572_v13  ;;  %647 = vst [vmem:[#allocation3 + $0x204] sm:$0xf] %v13572_v13  ;;  %v13600_v26 = vpack.c.bf16 %v409_v14, %v409_v14 }
 0x1bb   :  { %v565_v17 = vld [vmem:[#allocation2 + $0x16] sm:$0xff]  ;;  %v13582_v21 = vpack.c.bf16 %v522_v16, %v522_v16  ;;  %v477_v23 = vld [vmem:[#allocation2 + $0x2] sm:$0xff]  ;;  %v478_v24 = vld [vmem:[#allocation2 + $0xa] sm:$0xff]  ;;  %689 = vst [vmem:[#allocation3 + $0x1a4] sm:$0xf] %v13572_v13  ;;  %v13571_v33 = vpack.c.bf16 %v407_v19, %v407_v19  ;;  %v14334_v34 = vpop.f32.mrb[8].mxu0 }
 0x1bc   :  { %v13589_v22 = vpack.c.bf16 %v565_v17, %v565_v17  ;;  %v520_v25 = vld [vmem:[#allocation2 + $0x4] sm:$0xff]  ;;  %860 = vst [vmem:[#allocation3 + $0x150] sm:$0xf] %v13572_v13  ;;  %902 = vst [vmem:[#allocation3 + $0xf0] sm:$0xf] %v13572_v13  ;;  %v13573_v27 = vpack.c.bf16 %v477_v23, %v477_v23  ;;  %v13574_v28 = vpack.c.bf16 %v478_v24, %v478_v24  ;;  %v521_v29 = vld [vmem:[#allocation2 + $0xc] sm:$0xff] }
 0x1bd   :  { %1073 = vst [vmem:[#allocation3 + $0x9c] sm:$0xf] %v13572_v13  ;;  %1115 = vst [vmem:[#allocation3 + $0x3c] sm:$0xf] %v13572_v13  ;;  %v13580_v30 = vpack.c.bf16 %v520_v25, %v520_v25  ;;  %v563_v31 = vld [vmem:[#allocation2 + $0x6] sm:$0xff]  ;;  %v564_v32 = vld [vmem:[#allocation2 + $0xe] sm:$0xff]  ;;  %v13581_v35 = vpack.c.bf16 %v521_v29, %v521_v29  ;;  %v380_v38 = vadd.f32 %v14334_v34, %v16062_v49 }
 0x1be   :  { %425 = vst [vmem:[#allocation2 + $0x38] sm:$0xff] %v409_v14  ;;  %474 = vst [vmem:[#allocation3 + $0x190] sm:$0xf] %v13570_v18  ;;  %v13587_v36 = vpack.c.bf16 %v563_v31, %v563_v31  ;;  %v13588_v37 = vpack.c.bf16 %v564_v32, %v564_v32  ;;  %v371_v39 = vpop.f32.mrb[9].mxu0  ;;  %v14550_v40 = vld [vmem:[#allocation3 + $0x10] ss:$100 sps:$4 sm:$0xff]  }
 0x1bf   :  { %645 = vst [vmem:[#allocation3 + $0x13c] sm:$0xf] %v13570_v18  ;;  %687 = vst [vmem:[#allocation3 + $0xdc] sm:$0xf] %v13570_v18  ;;  %v372_v41 = vadd.f32 %v16062_v49, %v371_v39  ;;  %v14335_v42 = vpop.f32.mrb[10].mxu0  ;;  %v412_v45 = vmax.f32 %v380_v38, 0.0 }
 0x1c0   :  { %858 = vst [vmem:[#allocation3 + $0x88] sm:$0xf] %v13570_v18  ;;  %900 = vst [vmem:[#allocation3 + $0x28] sm:$0xf] %v13570_v18  ;;  %v14552_v43 = vld [vmem:[#allocation3 + $0x14] ss:$100 sps:$4 sm:$0xff]   ;;  %v383_v46 = vadd.f32 %v14335_v42, %v16062_v49 }
 0x1c1   :  { %423 = vst [vmem:[#allocation2 + $0x28] sm:$0xff] %v407_v19  ;;  %515 = vst [vmem:[#allocation3 + $0xcc] sm:$0xf] %v13575_v20  ;;  %v374_v47 = vpop.f32.mrb[11].mxu0  ;;  %v410_v50 = vmax.f32 %v372_v41, 0.0  ;;  %3833 = vmatprep.mubr.bf16.mxu1 %v14552_v43  ;;  %v480_v53 = vld [vmem:[#allocation2 + $0x1a] sm:$0xff]  ;;  %v13642_v56 = vpack.c.bf16 %v412_v45, %v412_v45 }
 0x1c2   :  { %558 = vst [vmem:[#allocation3 + $0xd0] sm:$0xf] %v13582_v21  ;;  %601 = vst [vmem:[#allocation3 + $0xd4] sm:$0xf] %v13589_v22  ;;  %v375_v51 = vadd.f32 %v16062_v49, %v374_v47  ;;  %v523_v54 = vld [vmem:[#allocation2 + $0x1c] sm:$0xff]  ;;  %v413_v57 = vmax.f32 %v383_v46, 0.0  ;;  %3834 = vmatmul.mubr.bf16.vlgmr.msra.gmra.mrb[0].mxu1 %v14550_v40  ;;  %v13576_v59 = vpack.c.bf16 %v480_v53, %v480_v53 }
 0x1c3   :  { %728 = vst [vmem:[#allocation3 + $0x18] sm:$0xf] %v13575_v20  ;;  %771 = vst [vmem:[#allocation3 + $0x1c] sm:$0xf] %v13582_v21  ;;  %v566_v55 = vld [vmem:[#allocation2 + $0x1e] sm:$0xff]  ;;  %v13583_v60 = vpack.c.bf16 %v523_v54, %v523_v54  ;;  %v13607_v1 = vpack.c.bf16 %v410_v50, %v410_v50  ;;  %13941 = vmatpush3.bf16.msra.mxu1 %v14555_v44  ;;  %v16080_v17 = vld [vmem:[#allocation12 + $0x80] sm:$0xff]  }
 0x1c4   :  { %814 = vst [vmem:[#allocation3 + $0x20] sm:$0xf] %v13589_v22  ;;  %648 = vst [vmem:[#allocation3 + $0x268] sm:$0xf] %v13600_v26  ;;  %v13590_v61 = vpack.c.bf16 %v566_v55, %v566_v55  ;;  %v13670_v9 = vpack.c.bf16 %v413_v57, %v413_v57  ;;  %13942 = vmatprep.subr.bf16.mxu1 %v14558_v48  ;;  %v411_v16 = vmax.f32 %v375_v51, 0.0  ;;  %v14338_v18 = vpop.f32.mrb[12].mxu0 }
 0x1c5   :  { %690 = vst [vmem:[#allocation3 + $0x208] sm:$0xf] %v13600_v26  ;;  %861 = vst [vmem:[#allocation3 + $0x1b4] sm:$0xf] %v13600_v26  ;;  %v483_v62 = vld [vmem:[#allocation2 + $0x32] sm:$0xff]  ;;  %v396_v24 = vadd.f32 %v14338_v18, %v16062_v49  ;;  %v387_v25 = vpop.f32.mrb[13].mxu0 }
 0x1c6   :  { %903 = vst [vmem:[#allocation3 + $0x154] sm:$0xf] %v13600_v26  ;;  %1074 = vst [vmem:[#allocation3 + $0x100] sm:$0xf] %v13600_v26  ;;  %v526_v63 = vld [vmem:[#allocation2 + $0x34] sm:$0xff]  ;;  %v13579_v2 = vpack.c.bf16 %v483_v62, %v483_v62  ;;  %v388_v29 = vadd.f32 %v16062_v49, %v387_v25  ;;  %v14575_v18 = vld [vmem:[#allocation12 + $0x98] sm:$0xff]  }
 0x1c7   :  { %1116 = vst [vmem:[#allocation3 + $0xa0] sm:$0xf] %v13600_v26  ;;  %1287 = vst [vmem:[#allocation3 + $0x4c] sm:$0xf] %v13600_v26  ;;  %v569_v0 = vld [vmem:[#allocation2 + $0x36] sm:$0xff]  ;;  %v13586_v3 = vpack.c.bf16 %v526_v63, %v526_v63  ;;  %v16082_v23 = vld [vmem:[#allocation12 + $0xc8] sm:$0xff]   ;;  %v13635_v26 = vpack.c.bf16 %v411_v16, %v411_v16  ;;  %13943 = vmatpush3.bf16.msra.mxu1 %v16076_v52 }
 0x1c8   :  { %513 = vst [vmem:[#allocation3 + $0x4] sm:$0xf] %v13573_v27  ;;  %514 = vst [vmem:[#allocation3 + $0x68] sm:$0xf] %v13574_v28  ;;  %v13593_v4 = vpack.c.bf16 %v569_v0, %v569_v0  ;;  %v481_v6 = vld [vmem:[#allocation2 + $0x22] sm:$0xff]  ;;  %v482_v7 = vld [vmem:[#allocation2 + $0x2a] sm:$0xff]  ;;  %13944 = vmatprep.subr.bf16.mxu1 %v16078_v58 }
 0x1c9   :  { %556 = vst [vmem:[#allocation3 + $0x8] sm:$0xf] %v13580_v30  ;;  %475 = vst [vmem:[#allocation3 + $0x1f4] sm:$0xf] %v13571_v33  ;;  %v524_v8 = vld [vmem:[#allocation2 + $0x24] sm:$0xff]  ;;  %v13577_v10 = vpack.c.bf16 %v481_v6, %v481_v6  ;;  %v13578_v11 = vpack.c.bf16 %v482_v7, %v482_v7  ;;  %v525_v12 = vld [vmem:[#allocation2 + $0x2c] sm:$0xff] }
 0x1ca   :  { %646 = vst [vmem:[#allocation3 + $0x1a0] sm:$0xf] %v13571_v33  ;;  %688 = vst [vmem:[#allocation3 + $0x140] sm:$0xf] %v13571_v33  ;;  %v13584_v13 = vpack.c.bf16 %v524_v8, %v524_v8  ;;  %v567_v14 = vld [vmem:[#allocation2 + $0x26] sm:$0xff]  ;;  %v568_v15 = vld [vmem:[#allocation2 + $0x2e] sm:$0xff]  ;;  %v13585_v19 = vpack.c.bf16 %v525_v12, %v525_v12 }
 0x1cb   :  { %859 = vst [vmem:[#allocation3 + $0xec] sm:$0xf] %v13571_v33  ;;  %901 = vst [vmem:[#allocation3 + $0x8c] sm:$0xf] %v13571_v33  ;;  %v13591_v20 = vpack.c.bf16 %v567_v14, %v567_v14  ;;  %v13592_v21 = vpack.c.bf16 %v568_v15, %v568_v15  ;;  %v14546_v22 = vld [vmem:[#allocation3] ss:$100 sps:$4 sm:$0xff]  }
 0x1cc   :  { %1072 = vst [vmem:[#allocation3 + $0x38] sm:$0xf] %v13571_v33  ;;  %557 = vst [vmem:[#allocation3 + $0x6c] sm:$0xf] %v13581_v35  ;;  %v16086_v28 = vld [vmem:[#allocation12 + $0x210] sm:$0xff]   ;;  %v14339_v30 = vpop.f32.mrb[14].mxu0 }
 0x1cd   :  { %599 = vst [vmem:[#allocation3 + $0xc] sm:$0xf] %v13587_v36  ;;  %600 = vst [vmem:[#allocation3 + $0x70] sm:$0xf] %v13588_v37  ;;  %v14567_v32 = vld [vmem:[#allocation3 + $0xd8] ss:$100 sps:$4 sm:$0xff]   ;;  %v399_v35 = vadd.f32 %v14339_v30, %v16062_v49  ;;  %13945 = vmatpush3.bf16.msra.mxu1 %v16086_v28 }
 0x1ce   :  { %428 = vst [vmem:[#allocation2 + $0x50] sm:$0xff] %v412_v45  ;;  %426 = vst [vmem:[#allocation2 + $0x40] sm:$0xff] %v410_v50  ;;  %v16090_v33 = vld [vmem:[#allocation12 + $0x258] sm:$0xff]   ;;  %v416_v34 = vmax.f32 %v396_v24, 0.0  ;;  %v16093_v36 = vld [vmem:[#allocation12 + $0x88] sm:$0xff]   ;;  %v414_v38 = vmax.f32 %v388_v29, 0.0 }
 0x1cf   :  { %906 = vst [vmem:[#allocation3 + $0x280] sm:$0xf] %v13642_v56  ;;  %1077 = vst [vmem:[#allocation3 + $0x22c] sm:$0xf] %v13642_v56  ;;  %v14548_v27 = vld [vmem:[#allocation3 + $0x4] ss:$100 sps:$4 sm:$0xff]   ;;  %13946 = vmatprep.subr.bf16.mxu1 %v16090_v33 }
 0x1d0   :  { %1119 = vst [vmem:[#allocation3 + $0x1cc] sm:$0xf] %v13642_v56  ;;  %1290 = vst [vmem:[#allocation3 + $0x178] sm:$0xf] %v13642_v56  ;;  %3705 = vmatprep.mubr.bf16.mxu0 %v14548_v27  ;;  %v14571_v37 = vld [vmem:[#allocation3 + $0x1a4] ss:$100 sps:$4 sm:$0xff]   ;;  %v13712_v43 = vpack.c.bf16 %v416_v34, %v416_v34 }
 0x1d1   :  { %1332 = vst [vmem:[#allocation3 + $0x118] sm:$0xf] %v13642_v56  ;;  %1503 = vst [vmem:[#allocation3 + $0xc4] sm:$0xf] %v13642_v56  ;;  %v14563_v31 = vld [vmem:[#allocation3 + $0xdc] ss:$100 sps:$4 sm:$0xff]   ;;  %3706 = vmatmul.mubr.bf16.vlgmr.msra.gmra.mrb[16].mxu0 %v14546_v22 }
 0x1d2   :  { %429 = vst [vmem:[#allocation2 + $0x58] sm:$0xff] %v413_v57  ;;  %516 = vst [vmem:[#allocation3 + $0x130] sm:$0xf] %v13576_v59  ;;  %v390_v39 = vpop.f32.mrb[15].mxu0  ;;  %3841 = vmatprep.mubr.bf16.mxu1 %v14563_v31  ;;  %v16095_v44 = vmax.f32 %v399_v35, 0.0  ;;  %13821 = vmatpush3.bf16.msra.mxu0 %v16080_v17  ;;  %v14562_v57 = vld [vmem:[#allocation12 + $0xd0] sm:$0xff]  }
 0x1d3   :  { %559 = vst [vmem:[#allocation3 + $0x134] sm:$0xf] %v13583_v60  ;;  %602 = vst [vmem:[#allocation3 + $0x138] sm:$0xf] %v13590_v61  ;;  %v391_v45 = vadd.f32 %v16062_v49, %v390_v39  ;;  %3842 = vmatmul.mubr.bf16.gmra.mrb[4].mxu1 %v14567_v32  ;;  %13822 = vmatprep.subr.bf16.mxu0 %v16082_v23  ;;  %v16101_v58 = vld [vmem:[#allocation12 + $0x90] sm:$0xff]   ;;  %v14589_v23 = vld [vmem:[#allocation12 + $0x228] sm:$0xff]  }
 0x1d4   :  { %729 = vst [vmem:[#allocation3 + $0x7c] sm:$0xf] %v13576_v59  ;;  %772 = vst [vmem:[#allocation3 + $0x80] sm:$0xf] %v13583_v60  ;;  %3849 = vmatprep.mubr.bf16.mxu1 %v14571_v37  ;;  %v14577_v59 = vld [vmem:[#allocation12 + $0x218] sm:$0xff]   ;;  %v16104_v60 = vld [vmem:[#allocation12 + $0x260] sm:$0xff]   ;;  %v13740_v62 = vpack.c.bf16 %v16095_v44, %v16095_v44 }
 0x1d5   :  { %815 = vst [vmem:[#allocation3 + $0x84] sm:$0xf] %v13590_v61  ;;  %691 = vst [vmem:[#allocation3 + $0x26c] sm:$0xf] %v13607_v1  ;;  %v697_v40 = vld [vmem:[#allocation2 + $0x3a] sm:$0xff]  ;;  %v415_v49 = vmax.f32 %v391_v45, 0.0  ;;  %v13677_v61 = vpack.c.bf16 %v414_v38, %v414_v38  ;;  %13947 = vmatpush3.bf16.msra.mxu1 %v14577_v59 }
 0x1d6   :  { %862 = vst [vmem:[#allocation3 + $0x218] sm:$0xf] %v13607_v1  ;;  %904 = vst [vmem:[#allocation3 + $0x1b8] sm:$0xf] %v13607_v1  ;;  %v740_v41 = vld [vmem:[#allocation2 + $0x3c] sm:$0xff]  ;;  %v13613_v46 = vpack.c.bf16 %v697_v40, %v697_v40  ;;  %13823 = vmatpush3.bf16.msra.mxu0 %v16093_v36  ;;  %13948 = vmatprep.subr.bf16.mxu1 %v16104_v60  ;;  %v14580_v29 = vld [vmem:[#allocation12 + $0xa0] sm:$0xff]  }
 0x1d7   :  { %1075 = vst [vmem:[#allocation3 + $0x164] sm:$0xf] %v13607_v1  ;;  %1117 = vst [vmem:[#allocation3 + $0x104] sm:$0xf] %v13607_v1  ;;  %v783_v42 = vld [vmem:[#allocation2 + $0x3e] sm:$0xff]  ;;  %v13620_v47 = vpack.c.bf16 %v740_v41, %v740_v41  ;;  %13824 = vmatprep.subr.bf16.mxu0 %v14562_v57  ;;  %v14594_v24 = vld [vmem:[#allocation12 + $0x270] sm:$0xff]  }
 0x1d8   :  { %1288 = vst [vmem:[#allocation3 + $0xb0] sm:$0xf] %v13607_v1  ;;  %1330 = vst [vmem:[#allocation3 + $0x50] sm:$0xf] %v13607_v1  ;;  %v13627_v48 = vpack.c.bf16 %v783_v42, %v783_v42  ;;  %v14586_v30 = vld [vmem:[#allocation12 + $0xe8] sm:$0xff]   ;;  %v14598_v36 = vld [vmem:[#allocation12 + $0x230] sm:$0xff]  }
 0x1d9   :  { %519 = vst [vmem:[#allocation3 + $0x25c] sm:$0xf] %v13579_v2  ;;  %562 = vst [vmem:[#allocation3 + $0x260] sm:$0xf] %v13586_v3  ;;  %v913_v50 = vld [vmem:[#allocation2 + $0x52] sm:$0xff]  ;;  %v14604_v39 = vld [vmem:[#allocation12 + $0x278] sm:$0xff]  }
 0x1da   :  { %605 = vst [vmem:[#allocation3 + $0x264] sm:$0xf] %v13593_v4  ;;  %732 = vst [vmem:[#allocation3 + $0x1a8] sm:$0xf] %v13579_v2  ;;  %v956_v51 = vld [vmem:[#allocation2 + $0x54] sm:$0xff]  ;;  %v13649_v53 = vpack.c.bf16 %v913_v50, %v913_v50  ;;  %13825 = vmatpush3.bf16.msra.mxu0 %v16101_v58  ;;  %v14605_v42 = vld [vmem:[#allocation12 + $0x238] sm:$0xff]  }
 0x1db   :  { %775 = vst [vmem:[#allocation3 + $0x1ac] sm:$0xf] %v13586_v3  ;;  %818 = vst [vmem:[#allocation3 + $0x1b0] sm:$0xf] %v13593_v4  ;;  %v999_v52 = vld [vmem:[#allocation2 + $0x56] sm:$0xff]  ;;  %v13656_v54 = vpack.c.bf16 %v956_v51, %v956_v51  ;;  %v14587_v37 = vld [vmem:[#allocation12 + $0xa8] sm:$0xff]  }
 0x1dc   :  { %945 = vst [vmem:[#allocation3 + $0xf4] sm:$0xf] %v13579_v2  ;;  %988 = vst [vmem:[#allocation3 + $0xf8] sm:$0xf] %v13586_v3  ;;  %v13663_v55 = vpack.c.bf16 %v999_v52, %v999_v52  ;;  %v14559_v56 = vld [vmem:[#allocation3 + $0xcc] ss:$100 sps:$4 sm:$0xff]  }
 0x1dd   :  { %1031 = vst [vmem:[#allocation3 + $0xfc] sm:$0xf] %v13593_v4  ;;  %1158 = vst [vmem:[#allocation3 + $0x40] sm:$0xf] %v13579_v2  ;;  %3713 = vmatprep.mubr.bf16.mxu0 %v14559_v56  ;;  %v14565_v2 = vld [vmem:[#allocation3 + $0xc8] ss:$100 sps:$4 sm:$0xff]  }
 0x1de   :  { %1201 = vst [vmem:[#allocation3 + $0x44] sm:$0xf] %v13586_v3  ;;  %1244 = vst [vmem:[#allocation3 + $0x48] sm:$0xf] %v13593_v4  ;;  %v14574_v3 = vld [vmem:[#allocation12 + $0xd8] sm:$0xff]   ;;  %v16110_v15 = vld [vmem:[#allocation3 + $0x268] sm:$0xff]  ;;  %3714 = vmatmul.mubr.bf16.gmra.mrb[20].mxu0 %v14565_v2 }
 0x1df   :  { %1504 = vst [vmem:[#allocation3 + $0x128] sm:$0xf] %v13670_v9  ;;  %1078 = vst [vmem:[#allocation3 + $0x290] sm:$0xf] %v13670_v9  ;;  %v12350_v22 = vcombine.high %v16110_v15, %v16110_v15  ;;  %13826 = vmatprep.subr.bf16.mxu0 %v14574_v3  ;;  %v14601_v40 = vld [vmem:[#allocation3 + $0x24] ss:$100 sps:$4 sm:$0xff]  }
 0x1e0   :  { %1120 = vst [vmem:[#allocation3 + $0x230] sm:$0xf] %v13670_v9  ;;  %1291 = vst [vmem:[#allocation3 + $0x1dc] sm:$0xf] %v13670_v9  ;;  %v1587_v25 = vld [vmem:[#allocation3 + $0x258] sm:$0xff]  ;;  %13827 = vmatpush3.bf16.msra.mxu0 %v14575_v18  ;;  %v14616_v51 = vld [vmem:[#allocation12 + $0x348] sm:$0xff]  }
 0x1e1   :  { %1333 = vst [vmem:[#allocation3 + $0x17c] sm:$0xf] %v13670_v9  ;;  %517 = vst [vmem:[#allocation3 + $0x194] sm:$0xf] %v13577_v10  ;;  %v12346_v35 = vcombine.high %v1587_v25, %v1587_v25  ;;  %v14590_v41 = vld [vmem:[#allocation12 + $0xf0] sm:$0xff]   ;;  %v14602_v45 = vld [vmem:[#allocation12 + $0xf8] sm:$0xff]  }
 0x1e2   :  { %518 = vst [vmem:[#allocation3 + $0x1f8] sm:$0xf] %v13578_v11  ;;  %560 = vst [vmem:[#allocation3 + $0x198] sm:$0xf] %v13584_v13  ;;  %v14599_v50 = vld [vmem:[#allocation3 + $0x20] ss:$100 sps:$4 sm:$0xff]  }
 0x1e3   :  { %730 = vst [vmem:[#allocation3 + $0xe0] sm:$0xf] %v13577_v10  ;;  %731 = vst [vmem:[#allocation3 + $0x144] sm:$0xf] %v13578_v11  ;;  %v14603_v52 = vld [vmem:[#allocation12 + $0xb8] sm:$0xff]   ;;  %v14607_v56 = vld [vmem:[#allocation12 + $0x180] sm:$0xff]  }
 0x1e4   :  { %773 = vst [vmem:[#allocation3 + $0xe4] sm:$0xf] %v13584_v13  ;;  %943 = vst [vmem:[#allocation3 + $0x2c] sm:$0xf] %v13577_v10  ;;  %v14622_v57 = vld [vmem:[#allocation12 + $0x350] sm:$0xff]   ;;  %v14614_v58 = vld [vmem:[#allocation12 + $0x1c8] sm:$0xff]  }
 0x1e5   :  { %944 = vst [vmem:[#allocation3 + $0x90] sm:$0xf] %v13578_v11  ;;  %986 = vst [vmem:[#allocation3 + $0x30] sm:$0xf] %v13584_v13  ;;  %v14585_v11 = vld [vmem:[#allocation12 + $0x220] sm:$0xff]   ;;  %v14615_v18 = vld [vmem:[#allocation12 + $0x188] sm:$0xff]  }
 0x1e6   :  { %427 = vst [vmem:[#allocation2 + $0x48] sm:$0xff] %v411_v16  ;;  %561 = vst [vmem:[#allocation3 + $0x1fc] sm:$0xf] %v13585_v19  ;;  %v13705_v16 = vpack.c.bf16 %v415_v49, %v415_v49  ;;  %13949 = vmatpush3.bf16.msra.mxu1 %v14585_v11 }
 0x1e7   :  { %603 = vst [vmem:[#allocation3 + $0x19c] sm:$0xf] %v13591_v20  ;;  %604 = vst [vmem:[#allocation3 + $0x200] sm:$0xf] %v13592_v21 }
 0x1e8   :  { %774 = vst [vmem:[#allocation3 + $0x148] sm:$0xf] %v13585_v19  ;;  %816 = vst [vmem:[#allocation3 + $0xe8] sm:$0xf] %v13591_v20 }
 0x1e9   :  { %817 = vst [vmem:[#allocation3 + $0x14c] sm:$0xf] %v13592_v21  ;;  %987 = vst [vmem:[#allocation3 + $0x94] sm:$0xf] %v13585_v19  ;;  %v14569_v17 = vld [vmem:[#allocation3 + $0x194] ss:$100 sps:$4 sm:$0xff]  }
 0x1ea   :  { %1029 = vst [vmem:[#allocation3 + $0x34] sm:$0xf] %v13591_v20  ;;  %1030 = vst [vmem:[#allocation3 + $0x98] sm:$0xf] %v13592_v21  ;;  %v14581_v19 = vld [vmem:[#allocation3 + $0x1a0] ss:$100 sps:$4 sm:$0xff]   ;;  %3721 = vmatprep.mubr.bf16.mxu0 %v14569_v17 }
 0x1eb   :  { %863 = vst [vmem:[#allocation3 + $0x27c] sm:$0xf] %v13635_v26  ;;  %905 = vst [vmem:[#allocation3 + $0x21c] sm:$0xf] %v13635_v26  ;;  %v14588_v20 = vld [vmem:[#allocation12 + $0x268] sm:$0xff]   ;;  %v14578_v21 = vld [vmem:[#allocation12 + $0xe0] sm:$0xff]   ;;  %3850 = vmatmul.mubr.bf16.gmra.mrb[8].mxu1 %v14581_v19 }
 0x1ec   :  { %1076 = vst [vmem:[#allocation3 + $0x1c8] sm:$0xf] %v13635_v26  ;;  %1118 = vst [vmem:[#allocation3 + $0x168] sm:$0xf] %v13635_v26  ;;  %3857 = vmatprep.mubr.bf16.mxu1 %v12350_v22  ;;  %13950 = vmatprep.subr.bf16.mxu1 %v14588_v20  ;;  %v14625_v19 = vld [vmem:[#allocation3 + $0x1b4] ss:$100 sps:$4 sm:$0xff]  }
 0x1ed   :  { %1289 = vst [vmem:[#allocation3 + $0x114] sm:$0xf] %v13635_v26  ;;  %1331 = vst [vmem:[#allocation3 + $0xb4] sm:$0xf] %v13635_v26  ;;  %v698_v63 = vld [vmem:[#allocation2 + $0x42] sm:$0xff]  ;;  %v912_v8 = vld [vmem:[#allocation2 + $0x4a] sm:$0xff]  ;;  %13828 = vmatprep.subr.bf16.mxu0 %v14578_v21  ;;  %13951 = vmatpush3.bf16.msra.mxu1 %v14589_v23 }
 0x1ee   :  { %1502 = vst [vmem:[#allocation3 + $0x60] sm:$0xf] %v13635_v26  ;;  %432 = vst [vmem:[#allocation2 + $0x70] sm:$0xff] %v416_v34  ;;  %v741_v0 = vld [vmem:[#allocation2 + $0x44] sm:$0xff]  ;;  %v13614_v4 = vpack.c.bf16 %v698_v63, %v698_v63  ;;  %v955_v9 = vld [vmem:[#allocation2 + $0x4c] sm:$0xff]  ;;  %v13648_v12 = vpack.c.bf16 %v912_v8, %v912_v8  ;;  %13952 = vmatprep.subr.bf16.mxu1 %v14594_v24  ;;  %13829 = vmatpush3.bf16.msra.mxu0 %v14580_v29 }
 0x1ef   :  { %430 = vst [vmem:[#allocation2 + $0x60] sm:$0xff] %v414_v38  ;;  %1336 = vst [vmem:[#allocation3 + $0x2a8] sm:$0xf] %v13712_v43  ;;  %v784_v1 = vld [vmem:[#allocation2 + $0x46] sm:$0xff]  ;;  %v13621_v6 = vpack.c.bf16 %v741_v0, %v741_v0  ;;  %v998_v10 = vld [vmem:[#allocation2 + $0x4e] sm:$0xff]  ;;  %v13655_v13 = vpack.c.bf16 %v955_v9, %v955_v9  ;;  %v12349_v38 = vcombine.low %v16110_v15, %v16110_v15  ;;  %13830 = vmatprep.subr.bf16.mxu0 %v14586_v30 }
 0x1f0   :  { %1507 = vst [vmem:[#allocation3 + $0x254] sm:$0xf] %v13712_v43  ;;  %433 = vst [vmem:[#allocation2 + $0x78] sm:$0xff] %v16095_v44  ;;  %v13628_v7 = vpack.c.bf16 %v784_v1, %v784_v1  ;;  %v13662_v14 = vpack.c.bf16 %v998_v10, %v998_v10  ;;  %v14579_v34 = vld [vmem:[#allocation3 + $0x190] ss:$100 sps:$4 sm:$0xff]   ;;  %v14608_v43 = vld [vmem:[#allocation12 + $0x340] sm:$0xff]  }
 0x1f1   :  { %733 = vst [vmem:[#allocation3 + $0x20c] sm:$0xf] %v13613_v46  ;;  %776 = vst [vmem:[#allocation3 + $0x210] sm:$0xf] %v13620_v47  ;;  %3722 = vmatmul.mubr.bf16.gmra.mrb[24].mxu0 %v14579_v34  ;;  %13953 = vmatpush3.bf16.msra.mxu1 %v14598_v36  ;;  %v14592_v44 = vld [vmem:[#allocation12 + $0xb0] sm:$0xff]   ;;  %v14631_v21 = vld [vmem:[#allocation12 + $0x318] sm:$0xff]  }
 0x1f2   :  { %819 = vst [vmem:[#allocation3 + $0x214] sm:$0xf] %v13627_v48  ;;  %946 = vst [vmem:[#allocation3 + $0x158] sm:$0xf] %v13613_v46  ;;  %3729 = vmatprep.mubr.bf16.mxu0 %v12346_v35  ;;  %13954 = vmatprep.subr.bf16.mxu1 %v14604_v39  ;;  %v14618_v20 = vld [vmem:[#allocation12 + $0x1d0] sm:$0xff]   ;;  %v14636_v22 = vld [vmem:[#allocation12 + $0x360] sm:$0xff]  }
 0x1f3   :  { %989 = vst [vmem:[#allocation3 + $0x15c] sm:$0xf] %v13620_v47  ;;  %1032 = vst [vmem:[#allocation3 + $0x160] sm:$0xf] %v13627_v48  ;;  %3858 = vmatmul.mubr.bf16.gmra.mrb[12].mxu1 %v12349_v38  ;;  %13831 = vmatpush3.bf16.msra.mxu0 %v14587_v37  ;;  %v14620_v24 = vld [vmem:[#allocation12 + $0x190] sm:$0xff]   ;;  %v14642_v34 = vld [vmem:[#allocation12 + $0x328] sm:$0xff]  }
 0x1f4   :  { %1159 = vst [vmem:[#allocation3 + $0xa4] sm:$0xf] %v13613_v46  ;;  %1202 = vst [vmem:[#allocation3 + $0xa8] sm:$0xf] %v13620_v47  ;;  %3961 = vmatprep.mubr.bf16.mxu1 %v14601_v40  ;;  %13832 = vmatprep.subr.bf16.mxu0 %v14590_v41  ;;  %v12345_v46 = vcombine.low %v1587_v25, %v1587_v25  ;;  %v14613_v47 = vld [vmem:[#allocation12 + $0x300] sm:$0xff]   ;;  %v14648_v35 = vld [vmem:[#allocation12 + $0x370] sm:$0xff]  }
 0x1f5   :  { %1245 = vst [vmem:[#allocation3 + $0xac] sm:$0xf] %v13627_v48  ;;  %949 = vst [vmem:[#allocation3 + $0x284] sm:$0xf] %v13649_v53  ;;  %v14597_v48 = vld [vmem:[#allocation3 + $0xc] ss:$100 sps:$4 sm:$0xff]   ;;  %13955 = vmatpush3.bf16.msra.mxu1 %v14605_v42 }
 0x1f6   :  { %992 = vst [vmem:[#allocation3 + $0x288] sm:$0xf] %v13656_v54  ;;  %1035 = vst [vmem:[#allocation3 + $0x28c] sm:$0xf] %v13663_v55  ;;  %v1127_v26 = vld [vmem:[#allocation2 + $0x5a] sm:$0xff]  ;;  %14020 = vmatprep.subr.bf16.mxu1 %v14608_v43  ;;  %v14634_v37 = vld [vmem:[#allocation12 + $0x1a0] sm:$0xff]  }
 0x1f7   :  { %1162 = vst [vmem:[#allocation3 + $0x1d0] sm:$0xf] %v13649_v53  ;;  %1205 = vst [vmem:[#allocation3 + $0x1d4] sm:$0xf] %v13656_v54  ;;  %v1170_v27 = vld [vmem:[#allocation2 + $0x5c] sm:$0xff]  ;;  %v13683_v31 = vpack.c.bf16 %v1127_v26, %v1127_v26  ;;  %13833 = vmatpush3.bf16.msra.mxu0 %v14592_v44  ;;  %v1343_v59 = vld [vmem:[#allocation2 + $0x72] sm:$0xff] }
 0x1f8   :  { %1248 = vst [vmem:[#allocation3 + $0x1d8] sm:$0xf] %v13663_v55  ;;  %1375 = vst [vmem:[#allocation3 + $0x11c] sm:$0xf] %v13649_v53  ;;  %v1213_v28 = vld [vmem:[#allocation2 + $0x5e] sm:$0xff]  ;;  %v13690_v32 = vpack.c.bf16 %v1170_v27, %v1170_v27  ;;  %13834 = vmatprep.subr.bf16.mxu0 %v14602_v45  ;;  %v1386_v60 = vld [vmem:[#allocation2 + $0x74] sm:$0xff]  ;;  %v13719_v63 = vpack.c.bf16 %v1343_v59, %v1343_v59 }
 0x1f9   :  { %1418 = vst [vmem:[#allocation3 + $0x120] sm:$0xf] %v13656_v54  ;;  %1461 = vst [vmem:[#allocation3 + $0x124] sm:$0xf] %v13663_v55  ;;  %v13697_v33 = vpack.c.bf16 %v1213_v28, %v1213_v28  ;;  %3730 = vmatmul.mubr.bf16.gmra.mrb[28].mxu0 %v12345_v46  ;;  %v14611_v53 = vld [vmem:[#allocation3 + $0xec] ss:$100 sps:$4 sm:$0xff]   ;;  %v13726_v0 = vpack.c.bf16 %v1386_v60, %v1386_v60 }
 0x1fa   :  { %431 = vst [vmem:[#allocation2 + $0x68] sm:$0xff] %v415_v49  ;;  %1505 = vst [vmem:[#allocation3 + $0x18c] sm:$0xf] %v13677_v61  ;;  %3769 = vmatprep.mubr.bf16.mxu0 %v14597_v48  ;;  %v14606_v54 = vld [vmem:[#allocation12 + $0x1c0] sm:$0xff]   ;;  %v14617_v55 = vld [vmem:[#allocation12 + $0x308] sm:$0xff]  }
 0x1fb   :  { %1121 = vst [vmem:[#allocation3 + $0x294] sm:$0xf] %v13677_v61  ;;  %1292 = vst [vmem:[#allocation3 + $0x240] sm:$0xf] %v13677_v61  ;;  %3962 = vmatmul.mubr.bf16.vlgmr.msra.gmra.mrb[16].mxu1 %v14599_v50  ;;  %v14595_v49 = vld [vmem:[#allocation3 + $0x8] ss:$100 sps:$4 sm:$0xff]   ;;  %13835 = vmatpush3.bf16.msra.mxu0 %v14603_v52 }
 0x1fc   :  { %1334 = vst [vmem:[#allocation3 + $0x1e0] sm:$0xf] %v13677_v61  ;;  %1508 = vst [vmem:[#allocation3 + $0x2b8] sm:$0xf] %v13740_v62  ;;  %3969 = vmatprep.mubr.bf16.mxu1 %v14611_v53  ;;  %14021 = vmatpush3.bf16.msra.mxu1 %v14613_v47  ;;  %v14609_v61 = vld [vmem:[#allocation3 + $0xd4] ss:$100 sps:$4 sm:$0xff]  }
 0x1fd   :  { %734 = vst [vmem:[#allocation3 + $0x270] sm:$0xf] %v13614_v4  ;;  %777 = vst [vmem:[#allocation3 + $0x274] sm:$0xf] %v13621_v6  ;;  %14022 = vmatprep.subr.bf16.mxu1 %v14616_v51  ;;  %v14627_v62 = vld [vmem:[#allocation12 + $0x310] sm:$0xff]   ;;  %13900 = vmatprep.subr.bf16.mxu0 %v14606_v54  ;;  %v14628_v26 = vld [vmem:[#allocation12 + $0x1d8] sm:$0xff]  }
 0x1fe   :  { %820 = vst [vmem:[#allocation3 + $0x278] sm:$0xf] %v13628_v7  ;;  %947 = vst [vmem:[#allocation3 + $0x1bc] sm:$0xf] %v13614_v4  ;;  %v1429_v1 = vld [vmem:[#allocation2 + $0x76] sm:$0xff]  ;;  %v14638_v28 = vld [vmem:[#allocation12 + $0x320] sm:$0xff]  }
 0x1ff   :  { %990 = vst [vmem:[#allocation3 + $0x1c0] sm:$0xf] %v13621_v6  ;;  %1033 = vst [vmem:[#allocation3 + $0x1c4] sm:$0xf] %v13628_v7  ;;  %v14619_v25 = vld [vmem:[#allocation3 + $0xd0] ss:$100 sps:$4 sm:$0xff]  }
 0x200   :  { %1160 = vst [vmem:[#allocation3 + $0x108] sm:$0xf] %v13614_v4  ;;  %1203 = vst [vmem:[#allocation3 + $0x10c] sm:$0xf] %v13621_v6  ;;  %14023 = vmatpush3.bf16.msra.mxu1 %v14617_v55  ;;  %v14623_v27 = vld [vmem:[#allocation3 + $0x19c] ss:$100 sps:$4 sm:$0xff]  }
 0x201   :  { %1246 = vst [vmem:[#allocation3 + $0x110] sm:$0xf] %v13628_v7  ;;  %1373 = vst [vmem:[#allocation3 + $0x54] sm:$0xf] %v13614_v4  ;;  %v1128_v2 = vld [vmem:[#allocation2 + $0x62] sm:$0xff]  ;;  %v1342_v10 = vld [vmem:[#allocation2 + $0x6a] sm:$0xff]  ;;  %3770 = vmatmul.mubr.bf16.vlgmr.msra.gmra.mrb[32].mxu0 %v14595_v49  ;;  %14024 = vmatprep.subr.bf16.mxu1 %v14622_v57 }
 0x202   :  { %1416 = vst [vmem:[#allocation3 + $0x58] sm:$0xf] %v13621_v6  ;;  %1459 = vst [vmem:[#allocation3 + $0x5c] sm:$0xf] %v13628_v7  ;;  %v1171_v3 = vld [vmem:[#allocation2 + $0x64] sm:$0xff]  ;;  %v13733_v6 = vpack.c.bf16 %v1429_v1, %v1429_v1  ;;  %v13684_v7 = vpack.c.bf16 %v1128_v2, %v1128_v2  ;;  %v1385_v11 = vld [vmem:[#allocation2 + $0x6c] sm:$0xff]  ;;  %13901 = vmatpush3.bf16.msra.mxu0 %v14607_v56  ;;  %3777 = vmatprep.mubr.bf16.mxu0 %v14609_v61 }
 0x203   :  { %948 = vst [vmem:[#allocation3 + $0x220] sm:$0xf] %v13648_v12  ;;  %991 = vst [vmem:[#allocation3 + $0x224] sm:$0xf] %v13655_v13  ;;  %v14630_v4 = vld [vmem:[#allocation12 + $0x358] sm:$0xff]   ;;  %v13691_v8 = vpack.c.bf16 %v1171_v3, %v1171_v3  ;;  %v1214_v9 = vld [vmem:[#allocation2 + $0x66] sm:$0xff]  ;;  %13902 = vmatprep.subr.bf16.mxu0 %v14614_v58 }
 0x204   :  { %1034 = vst [vmem:[#allocation3 + $0x228] sm:$0xf] %v13662_v14  ;;  %1161 = vst [vmem:[#allocation3 + $0x16c] sm:$0xf] %v13648_v12  ;;  %v1428_v15 = vld [vmem:[#allocation2 + $0x6e] sm:$0xff]  ;;  %14025 = vmatpush3.bf16.msra.mxu1 %v14627_v62  ;;  %v1588_v36 = vld [vmem:[#allocation3 + $0x260] sm:$0xff] }
 0x205   :  { %1204 = vst [vmem:[#allocation3 + $0x170] sm:$0xf] %v13655_v13  ;;  %1247 = vst [vmem:[#allocation3 + $0x174] sm:$0xf] %v13662_v14  ;;  %v13732_v17 = vpack.c.bf16 %v1428_v15, %v1428_v15  ;;  %14026 = vmatprep.subr.bf16.mxu1 %v14630_v4  ;;  %v1591_v23 = vld [vmem:[#allocation3 + $0x278] sm:$0xff]  ;;  %v14639_v39 = vld [vmem:[#allocation12 + $0x1e8] sm:$0xff]   ;;  %v12348_v41 = vcombine.high %v1588_v36, %v1588_v36  ;;  %v12347_v51 = vcombine.low %v1588_v36, %v1588_v36 }
 0x206   :  { %1374 = vst [vmem:[#allocation3 + $0xb8] sm:$0xf] %v13648_v12  ;;  %1417 = vst [vmem:[#allocation3 + $0xbc] sm:$0xf] %v13655_v13  ;;  %v13698_v12 = vpack.c.bf16 %v1214_v9, %v1214_v9  ;;  %v13718_v13 = vpack.c.bf16 %v1342_v10, %v1342_v10  ;;  %13903 = vmatpush3.bf16.msra.mxu0 %v14615_v18  ;;  %v12354_v29 = vcombine.high %v1591_v23, %v1591_v23  ;;  %v14635_v30 = vld [vmem:[#allocation3 + $0x1b0] ss:$100 sps:$4 sm:$0xff]  }
 0x207   :  { %1460 = vst [vmem:[#allocation3 + $0xc0] sm:$0xf] %v13662_v14  ;;  %1293 = vst [vmem:[#allocation3 + $0x2a4] sm:$0xf] %v13705_v16  ;;  %v13725_v14 = vpack.c.bf16 %v1385_v11, %v1385_v11  ;;  %13904 = vmatprep.subr.bf16.mxu0 %v14618_v20  ;;  %v14633_v38 = vld [vmem:[#allocation3 + $0x198] ss:$100 sps:$4 sm:$0xff]   ;;  %v12353_v40 = vcombine.low %v1591_v23, %v1591_v23 }
 0x208   :  { %1335 = vst [vmem:[#allocation3 + $0x244] sm:$0xf] %v13705_v16  ;;  %1506 = vst [vmem:[#allocation3 + $0x1f0] sm:$0xf] %v13705_v16  ;;  %v14621_v16 = vld [vmem:[#allocation3 + $0xe8] ss:$100 sps:$4 sm:$0xff]   ;;  %14027 = vmatpush3.bf16.msra.mxu1 %v14631_v21 }
 0x209   :  { %1163 = vst [vmem:[#allocation3 + $0x234] sm:$0xf] %v13683_v31  ;;  %1206 = vst [vmem:[#allocation3 + $0x238] sm:$0xf] %v13690_v32  ;;  %3970 = vmatmul.mubr.bf16.gmra.mrb[20].mxu1 %v14621_v16  ;;  %3778 = vmatmul.mubr.bf16.gmra.mrb[36].mxu0 %v14619_v25  ;;  %v14652_v42 = vld [vmem:[#allocation12 + $0x330] sm:$0xff]   ;;  %v14658_v43 = vld [vmem:[#allocation12 + $0x378] sm:$0xff]  }
 0x20a   :  { %1249 = vst [vmem:[#allocation3 + $0x23c] sm:$0xf] %v13697_v33  ;;  %1376 = vst [vmem:[#allocation3 + $0x180] sm:$0xf] %v13683_v31  ;;  %3977 = vmatprep.mubr.bf16.mxu1 %v14625_v19  ;;  %14028 = vmatprep.subr.bf16.mxu1 %v14636_v22  ;;  %v14641_v31 = vld [vmem:[#allocation12 + $0x368] sm:$0xff]   ;;  %v14643_v46 = vld [vmem:[#allocation12 + $0x1f0] sm:$0xff]  }
 0x20b   :  { %1419 = vst [vmem:[#allocation3 + $0x184] sm:$0xf] %v13690_v32  ;;  %1462 = vst [vmem:[#allocation3 + $0x188] sm:$0xf] %v13697_v33  ;;  %13905 = vmatpush3.bf16.msra.mxu0 %v14620_v24  ;;  %3785 = vmatprep.mubr.bf16.mxu0 %v14623_v27  ;;  %v14629_v32 = vld [vmem:[#allocation12 + $0x198] sm:$0xff]   ;;  %v14632_v33 = vld [vmem:[#allocation12 + $0x1e0] sm:$0xff]  }
 0x20c   :  { %1379 = vst [vmem:[#allocation3 + $0x2ac] sm:$0xf] %v13719_v63  ;;  %1422 = vst [vmem:[#allocation3 + $0x2b0] sm:$0xf] %v13726_v0  ;;  %13906 = vmatprep.subr.bf16.mxu0 %v14628_v26  ;;  %14029 = vmatpush3.bf16.msra.mxu1 %v14638_v28  ;;  %v14640_v44 = vld [vmem:[#allocation12 + $0x1a8] sm:$0xff]   ;;  %v14659_v47 = vld [vmem:[#allocation12 + $0x338] sm:$0xff]  }
 0x20d   :  { %1465 = vst [vmem:[#allocation3 + $0x2b4] sm:$0xf] %v13733_v6  ;;  %1164 = vst [vmem:[#allocation3 + $0x298] sm:$0xf] %v13684_v7  ;;  %14030 = vmatprep.subr.bf16.mxu1 %v14641_v31  ;;  %v14655_v45 = vld [vmem:[#allocation3 + $0x34] ss:$100 sps:$4 sm:$0xff]  }
 0x20e   :  { %1207 = vst [vmem:[#allocation3 + $0x29c] sm:$0xf] %v13691_v8  ;;  %1377 = vst [vmem:[#allocation3 + $0x1e4] sm:$0xf] %v13684_v7  ;;  %v14662_v48 = vld [vmem:[#allocation12 + $0x440] sm:$0xff]   ;;  %v14646_v50 = vld [vmem:[#allocation12 + $0x1b0] sm:$0xff]  }
 0x20f   :  { %1420 = vst [vmem:[#allocation3 + $0x1e8] sm:$0xf] %v13691_v8  ;;  %1250 = vst [vmem:[#allocation3 + $0x2a0] sm:$0xf] %v13698_v12  ;;  %13907 = vmatpush3.bf16.msra.mxu0 %v14629_v32  ;;  %v14656_v52 = vld [vmem:[#allocation12 + $0x1f8] sm:$0xff]   ;;  %v14667_v53 = vld [vmem:[#allocation12 + $0x400] sm:$0xff]  }
 0x210   :  { %1378 = vst [vmem:[#allocation3 + $0x248] sm:$0xf] %v13718_v13  ;;  %1421 = vst [vmem:[#allocation3 + $0x24c] sm:$0xf] %v13725_v14  ;;  %13908 = vmatprep.subr.bf16.mxu0 %v14632_v33  ;;  %14031 = vmatpush3.bf16.msra.mxu1 %v14642_v34  ;;  %v14651_v54 = vld [vmem:[#allocation3 + $0x1c] ss:$100 sps:$4 sm:$0xff]  }
 0x211   :  { %1463 = vst [vmem:[#allocation3 + $0x1ec] sm:$0xf] %v13698_v12  ;;  %1464 = vst [vmem:[#allocation3 + $0x250] sm:$0xf] %v13732_v17  ;;  %3978 = vmatmul.mubr.bf16.gmra.mrb[24].mxu1 %v14635_v30  ;;  %3786 = vmatmul.mubr.bf16.gmra.mrb[40].mxu0 %v14633_v38  ;;  %v14653_v55 = vld [vmem:[#allocation3 + $0x30] ss:$100 sps:$4 sm:$0xff]  }
 0x212   :  { %3985 = vmatprep.mubr.bf16.mxu1 %v12354_v29  ;;  %14032 = vmatprep.subr.bf16.mxu1 %v14648_v35  ;;  %v14670_v56 = vld [vmem:[#allocation12 + $0x448] sm:$0xff]   ;;  %v14657_v57 = vld [vmem:[#allocation12 + $0x1b8] sm:$0xff]   ;;  %v14660_v58 = vld [vmem:[#allocation12 + $0x2c0] sm:$0xff]  }
 0x213   :  { %13909 = vmatpush3.bf16.msra.mxu0 %v14634_v37  ;;  %3793 = vmatprep.mubr.bf16.mxu0 %v12348_v41  ;;  %v14665_v49 = vld [vmem:[#allocation3 + $0xfc] ss:$100 sps:$4 sm:$0xff]   ;;  %v14671_v59 = vld [vmem:[#allocation12 + $0x408] sm:$0xff]   ;;  %v14661_v61 = vld [vmem:[#allocation12 + $0x280] sm:$0xff]  }
 0x214   :  { %13910 = vmatprep.subr.bf16.mxu0 %v14639_v39  ;;  %14033 = vmatpush3.bf16.msra.mxu1 %v14652_v42  ;;  %v14676_v60 = vld [vmem:[#allocation12 + $0x450] sm:$0xff]   ;;  %v14668_v63 = vld [vmem:[#allocation12 + $0x2c8] sm:$0xff]   ;;  %v14663_v1 = vld [vmem:[#allocation3 + $0xe4] ss:$100 sps:$4 sm:$0xff]  }
 0x215   :  { %14034 = vmatprep.subr.bf16.mxu1 %v14658_v43  ;;  %v14649_v62 = vld [vmem:[#allocation3 + $0x18] ss:$100 sps:$4 sm:$0xff]   ;;  %v14679_v2 = vld [vmem:[#allocation3 + $0x1c4] ss:$100 sps:$4 sm:$0xff]   ;;  %v14669_v6 = vld [vmem:[#allocation12 + $0x288] sm:$0xff]  }
 0x216   :  { %v14681_v0 = vld [vmem:[#allocation12 + $0x410] sm:$0xff]   ;;  %v14684_v3 = vld [vmem:[#allocation12 + $0x458] sm:$0xff]   ;;  %v14690_v10 = vld [vmem:[#allocation12 + $0x460] sm:$0xff]  }
 0x217   :  { %13911 = vmatpush3.bf16.msra.mxu0 %v14640_v44  ;;  %v14675_v4 = vld [vmem:[#allocation3 + $0xf8] ss:$100 sps:$4 sm:$0xff]   ;;  %v1593_v11 = vld [vmem:[#allocation3 + $0x288] sm:$0xff]  ;;  %v14673_v13 = vld [vmem:[#allocation3 + $0xe0] ss:$100 sps:$4 sm:$0xff]  }
 0x218   :  { %13912 = vmatprep.subr.bf16.mxu0 %v14643_v46  ;;  %14035 = vmatpush3.bf16.msra.mxu1 %v14659_v47  ;;  %v14672_v7 = vld [vmem:[#allocation12 + $0x2d0] sm:$0xff]   ;;  %v14685_v8 = vld [vmem:[#allocation12 + $0x418] sm:$0xff]   ;;  %v14693_v15 = vld [vmem:[#allocation12 + $0x420] sm:$0xff]   ;;  %v12358_v17 = vcombine.high %v1593_v11, %v1593_v11  ;;  %v12357_v33 = vcombine.low %v1593_v11, %v1593_v11 }
 0x219   :  { %3986 = vmatmul.mubr.bf16.gmra.mrb[28].mxu1 %v12353_v40  ;;  %3794 = vmatmul.mubr.bf16.gmra.mrb[44].mxu0 %v12347_v51  ;;  %v14674_v9 = vld [vmem:[#allocation12 + $0x290] sm:$0xff]   ;;  %v14682_v12 = vld [vmem:[#allocation12 + $0x2d8] sm:$0xff]   ;;  %v14677_v16 = vld [vmem:[#allocation3 + $0x1ac] ss:$100 sps:$4 sm:$0xff]  }
 0x21a   :  { %4089 = vmatprep.mubr.bf16.mxu1 %v14655_v45  ;;  %14100 = vmatprep.subr.bf16.mxu1 %v14662_v48  ;;  %v14689_v14 = vld [vmem:[#allocation3 + $0x1c0] ss:$100 sps:$4 sm:$0xff]   ;;  %v14696_v18 = vld [vmem:[#allocation12 + $0x468] sm:$0xff]   ;;  %v14702_v23 = vld [vmem:[#allocation12 + $0x470] sm:$0xff]  }
 0x21b   :  { %13913 = vmatpush3.bf16.msra.mxu0 %v14646_v50  ;;  %3897 = vmatprep.mubr.bf16.mxu0 %v14651_v54  ;;  %v14683_v19 = vld [vmem:[#allocation12 + $0x298] sm:$0xff]   ;;  %v14686_v20 = vld [vmem:[#allocation12 + $0x2e0] sm:$0xff]   ;;  %v14697_v21 = vld [vmem:[#allocation12 + $0x428] sm:$0xff]  }
 0x21c   :  { %13914 = vmatprep.subr.bf16.mxu0 %v14656_v52  ;;  %v1590_v22 = vld [vmem:[#allocation3 + $0x270] sm:$0xff]  ;;  %v14688_v24 = vld [vmem:[#allocation12 + $0x2a0] sm:$0xff]   ;;  %v14712_v28 = vld [vmem:[#allocation12 + $0x478] sm:$0xff]  }
 0x21d   :  { %v14687_v25 = vld [vmem:[#allocation3 + $0x1a8] ss:$100 sps:$4 sm:$0xff]   ;;  %v14706_v27 = vld [vmem:[#allocation12 + $0x430] sm:$0xff]   ;;  %v12352_v29 = vcombine.high %v1590_v22, %v1590_v22  ;;  %v14713_v34 = vld [vmem:[#allocation12 + $0x438] sm:$0xff]   ;;  %v12351_v40 = vcombine.low %v1590_v22, %v1590_v22 }
 0x21e   :  { %v14694_v26 = vld [vmem:[#allocation12 + $0x2e8] sm:$0xff]   ;;  %v14709_v31 = vld [vmem:[#allocation3 + $0x44] ss:$100 sps:$4 sm:$0xff]   ;;  %v14698_v32 = vld [vmem:[#allocation12 + $0x2f0] sm:$0xff]  }
 0x21f   :  { %13915 = vmatpush3.bf16.msra.mxu0 %v14657_v57  ;;  %v14695_v30 = vld [vmem:[#allocation12 + $0x2a8] sm:$0xff]   ;;  %v14700_v35 = vld [vmem:[#allocation12 + $0x2b0] sm:$0xff]   ;;  %v14716_v36 = vld [vmem:[#allocation12 + $0x540] sm:$0xff]  }
 0x220   :  { %13980 = vmatprep.subr.bf16.mxu0 %v14660_v58  ;;  %v14710_v37 = vld [vmem:[#allocation12 + $0x2f8] sm:$0xff]   ;;  %v14705_v38 = vld [vmem:[#allocation3 + $0x2c] ss:$100 sps:$4 sm:$0xff]   ;;  %v14730_v47 = vld [vmem:[#allocation12 + $0x550] sm:$0xff]  }
 0x221   :  { %4090 = vmatmul.mubr.bf16.vlgmr.msra.gmra.mrb[32].mxu1 %v14653_v55  ;;  %v14721_v39 = vld [vmem:[#allocation12 + $0x500] sm:$0xff]   ;;  %v14724_v42 = vld [vmem:[#allocation12 + $0x548] sm:$0xff]   ;;  %v14711_v43 = vld [vmem:[#allocation12 + $0x2b8] sm:$0xff]  }
 0x222   :  { %4097 = vmatprep.mubr.bf16.mxu1 %v14665_v49  ;;  %14101 = vmatpush3.bf16.msra.mxu1 %v14667_v53  ;;  %v14707_v41 = vld [vmem:[#allocation3 + $0x40] ss:$100 sps:$4 sm:$0xff]   ;;  %v14719_v44 = vld [vmem:[#allocation3 + $0x10c] ss:$100 sps:$4 sm:$0xff]   ;;  %v14717_v52 = vld [vmem:[#allocation3 + $0xf4] ss:$100 sps:$4 sm:$0xff]  }
 0x223   :  { %14102 = vmatprep.subr.bf16.mxu1 %v14670_v56  ;;  %3898 = vmatmul.mubr.bf16.vlgmr.msra.gmra.mrb[48].mxu0 %v14649_v62  ;;  %v14714_v45 = vld [vmem:[#allocation12 + $0x3c0] sm:$0xff]   ;;  %v14725_v46 = vld [vmem:[#allocation12 + $0x508] sm:$0xff]   ;;  %v14735_v53 = vld [vmem:[#allocation12 + $0x510] sm:$0xff]  }
 0x224   :  { %13981 = vmatpush3.bf16.msra.mxu0 %v14661_v61  ;;  %3905 = vmatprep.mubr.bf16.mxu0 %v14663_v1  ;;  %v14715_v48 = vld [vmem:[#allocation12 + $0x380] sm:$0xff]   ;;  %v14722_v51 = vld [vmem:[#allocation12 + $0x3c8] sm:$0xff]   ;;  %v14738_v55 = vld [vmem:[#allocation12 + $0x558] sm:$0xff]  }
 0x225   :  { %13982 = vmatprep.subr.bf16.mxu0 %v14668_v63  ;;  %v14703_v50 = vld [vmem:[#allocation3 + $0x28] ss:$100 sps:$4 sm:$0xff]   ;;  %v14733_v57 = vld [vmem:[#allocation3 + $0x1d4] ss:$100 sps:$4 sm:$0xff]   ;;  %v14739_v58 = vld [vmem:[#allocation12 + $0x518] sm:$0xff]  }
 0x226   :  { %14103 = vmatpush3.bf16.msra.mxu1 %v14671_v59  ;;  %v14729_v54 = vld [vmem:[#allocation3 + $0x108] ss:$100 sps:$4 sm:$0xff]   ;;  %v14726_v49 = vld [vmem:[#allocation12 + $0x3d0] sm:$0xff]   ;;  %v14736_v63 = vld [vmem:[#allocation12 + $0x3d8] sm:$0xff]  }
 0x227   :  { %14104 = vmatprep.subr.bf16.mxu1 %v14676_v60  ;;  %v14723_v56 = vld [vmem:[#allocation12 + $0x388] sm:$0xff]   ;;  %v14744_v59 = vld [vmem:[#allocation12 + $0x560] sm:$0xff]   ;;  %v1595_v60 = vld [vmem:[#allocation3 + $0x298] sm:$0xff] }
 0x228   :  { %13983 = vmatpush3.bf16.msra.mxu0 %v14669_v6  ;;  %v14728_v61 = vld [vmem:[#allocation12 + $0x390] sm:$0xff]   ;;  %v14746_v1 = vld [vmem:[#allocation12 + $0x520] sm:$0xff]   ;;  %v12362_v6 = vcombine.high %v1595_v60, %v1595_v60 }
 0x229   :  { %4098 = vmatmul.mubr.bf16.gmra.mrb[36].mxu1 %v14675_v4  ;;  %13984 = vmatprep.subr.bf16.mxu0 %v14672_v7  ;;  %v14727_v62 = vld [vmem:[#allocation3 + $0xf0] ss:$100 sps:$4 sm:$0xff]   ;;  %v14737_v4 = vld [vmem:[#allocation12 + $0x398] sm:$0xff]   ;;  %v14740_v7 = vld [vmem:[#allocation12 + $0x3e0] sm:$0xff]  }
 0x22a   :  { %4105 = vmatprep.mubr.bf16.mxu1 %v14679_v2  ;;  %14105 = vmatpush3.bf16.msra.mxu1 %v14681_v0  ;;  %v14731_v0 = vld [vmem:[#allocation3 + $0x1bc] ss:$100 sps:$4 sm:$0xff]   ;;  %v14743_v2 = vld [vmem:[#allocation3 + $0x1d0] ss:$100 sps:$4 sm:$0xff]   ;;  %v14742_v11 = vld [vmem:[#allocation12 + $0x3a0] sm:$0xff]  }
 0x22b   :  { %14106 = vmatprep.subr.bf16.mxu1 %v14684_v3  ;;  %3906 = vmatmul.mubr.bf16.gmra.mrb[52].mxu0 %v14673_v13  ;;  %v14749_v3 = vld [vmem:[#allocation12 + $0x568] sm:$0xff]   ;;  %v14770_v22 = vld [vmem:[#allocation12 + $0x600] sm:$0xff]  }
 0x22c   :  { %13985 = vmatpush3.bf16.msra.mxu0 %v14674_v9  ;;  %3913 = vmatprep.mubr.bf16.mxu0 %v14677_v16  ;;  %v1592_v9 = vld [vmem:[#allocation3 + $0x280] sm:$0xff]  ;;  %v14747_v13 = vld [vmem:[#allocation12 + $0x3e8] sm:$0xff]  }
 0x22d   :  { %13986 = vmatprep.subr.bf16.mxu0 %v14682_v12  ;;  %v14741_v12 = vld [vmem:[#allocation3 + $0x1b8] ss:$100 sps:$4 sm:$0xff]  }
 0x22e   :  { %14107 = vmatpush3.bf16.msra.mxu1 %v14685_v8  ;;  %v14750_v8 = vld [vmem:[#allocation12 + $0x528] sm:$0xff]   ;;  %v14766_v16 = vld [vmem:[#allocation12 + $0x578] sm:$0xff]  }
 0x22f   :  { %14108 = vmatprep.subr.bf16.mxu1 %v14690_v10  ;;  %v14756_v10 = vld [vmem:[#allocation12 + $0x570] sm:$0xff]  }
 0x230   :  { %13987 = vmatpush3.bf16.msra.mxu0 %v14683_v19  ;;  %v14763_v19 = vld [vmem:[#allocation3 + $0x54] ss:$100 sps:$4 sm:$0xff]  }
 0x231   :  { %4106 = vmatmul.mubr.bf16.gmra.mrb[40].mxu1 %v14689_v14  ;;  %13988 = vmatprep.subr.bf16.mxu0 %v14686_v20  ;;  %v14760_v14 = vld [vmem:[#allocation12 + $0x530] sm:$0xff]  }
 0x232   :  { %4113 = vmatprep.mubr.bf16.mxu1 %v12358_v17  ;;  %14109 = vmatpush3.bf16.msra.mxu1 %v14693_v15  ;;  %v12361_v15 = vcombine.low %v1595_v60, %v1595_v60  ;;  %v12356_v17 = vcombine.high %v1592_v9, %v1592_v9  ;;  %v14751_v20 = vld [vmem:[#allocation12 + $0x3f0] sm:$0xff]  }
 0x233   :  { %14110 = vmatprep.subr.bf16.mxu1 %v14696_v18  ;;  %3914 = vmatmul.mubr.bf16.gmra.mrb[56].mxu0 %v14687_v25  ;;  %v14748_v18 = vld [vmem:[#allocation12 + $0x3a8] sm:$0xff]   ;;  %v14759_v25 = vld [vmem:[#allocation3 + $0x3c] ss:$100 sps:$4 sm:$0xff]  }
 0x234   :  { %13989 = vmatpush3.bf16.msra.mxu0 %v14688_v24  ;;  %3921 = vmatprep.mubr.bf16.mxu0 %v12352_v29  ;;  %v14764_v24 = vld [vmem:[#allocation12 + $0x3f8] sm:$0xff]  }
 0x235   :  { %13990 = vmatprep.subr.bf16.mxu0 %v14694_v26  ;;  %v12355_v26 = vcombine.low %v1592_v9, %v1592_v9  ;;  %v14765_v29 = vld [vmem:[#allocation12 + $0x3b8] sm:$0xff]   ;;  %v14813_v9 = vld [vmem:[#allocation12 + $0x580] sm:$0xff]  }
 0x236   :  { %14111 = vmatpush3.bf16.msra.mxu1 %v14697_v21  ;;  %v14767_v21 = vld [vmem:[#allocation12 + $0x538] sm:$0xff]  }
 0x237   :  { %14112 = vmatprep.subr.bf16.mxu1 %v14702_v23  ;;  %v14754_v23 = vld [vmem:[#allocation12 + $0x3b0] sm:$0xff]  }
 0x238   :  { %13991 = vmatpush3.bf16.msra.mxu0 %v14695_v30  ;;  %v14773_v30 = vld [vmem:[#allocation3 + $0x11c] ss:$100 sps:$4 sm:$0xff]  }
 0x239   :  { %4114 = vmatmul.mubr.bf16.gmra.mrb[44].mxu1 %v12357_v33  ;;  %13992 = vmatprep.subr.bf16.mxu0 %v14698_v32  ;;  %v14782_v32 = vld [vmem:[#allocation12 + $0x610] sm:$0xff]   ;;  %v14769_v33 = vld [vmem:[#allocation12 + $0x480] sm:$0xff]  }
 0x23a   :  { %14113 = vmatpush3.bf16.msra.mxu1 %v14706_v27  ;;  %4217 = vmatprep.mubr.bf16.mxu1 %v14709_v31  ;;  %v14761_v27 = vld [vmem:[#allocation3 + $0x50] ss:$100 sps:$4 sm:$0xff]   ;;  %v14768_v31 = vld [vmem:[#allocation12 + $0x4c0] sm:$0xff]  }
 0x23b   :  { %14114 = vmatprep.subr.bf16.mxu1 %v14712_v28  ;;  %3922 = vmatmul.mubr.bf16.gmra.mrb[60].mxu0 %v12351_v40  ;;  %v14777_v28 = vld [vmem:[#allocation12 + $0x608] sm:$0xff]  }
 0x23c   :  { %13993 = vmatpush3.bf16.msra.mxu0 %v14700_v35  ;;  %4025 = vmatprep.mubr.bf16.mxu0 %v14705_v38  ;;  %v14775_v35 = vld [vmem:[#allocation12 + $0x4c8] sm:$0xff]   ;;  %v14781_v38 = vld [vmem:[#allocation3 + $0x118] ss:$100 sps:$4 sm:$0xff]  }
 0x23d   :  { %13994 = vmatprep.subr.bf16.mxu0 %v14710_v37  ;;  %v14789_v37 = vld [vmem:[#allocation3 + $0x1e4] ss:$100 sps:$4 sm:$0xff]   ;;  %v14776_v40 = vld [vmem:[#allocation12 + $0x488] sm:$0xff]  }
 0x23e   :  { %14115 = vmatpush3.bf16.msra.mxu1 %v14713_v34  ;;  %v14757_v34 = vld [vmem:[#allocation3 + $0x38] ss:$100 sps:$4 sm:$0xff]  }
 0x23f   :  { %14180 = vmatprep.subr.bf16.mxu1 %v14716_v36  ;;  %v14771_v36 = vld [vmem:[#allocation3 + $0x104] ss:$100 sps:$4 sm:$0xff]  }
 0x240   :  { %13995 = vmatpush3.bf16.msra.mxu0 %v14711_v43  ;;  %v1597_v43 = vld [vmem:[#allocation3 + $0x2a8] sm:$0xff] }
 0x241   :  { %4218 = vmatmul.mubr.bf16.vlgmr.msra.gmra.mrb[48].mxu1 %v14707_v41  ;;  %14060 = vmatprep.subr.bf16.mxu0 %v14714_v45  ;;  %v14778_v41 = vld [vmem:[#allocation12 + $0x4d0] sm:$0xff]   ;;  %v14779_v45 = vld [vmem:[#allocation3 + $0x100] ss:$100 sps:$4 sm:$0xff]  }
 0x242   :  { %4225 = vmatprep.mubr.bf16.mxu1 %v14719_v44  ;;  %14181 = vmatpush3.bf16.msra.mxu1 %v14721_v39  ;;  %v14787_v39 = vld [vmem:[#allocation12 + $0x618] sm:$0xff]   ;;  %v14780_v44 = vld [vmem:[#allocation12 + $0x490] sm:$0xff]  }
 0x243   :  { %14182 = vmatprep.subr.bf16.mxu1 %v14724_v42  ;;  %4026 = vmatmul.mubr.bf16.vlgmr.msra.gmra.mrb[64].mxu0 %v14703_v50  ;;  %v14794_v42 = vld [vmem:[#allocation12 + $0x620] sm:$0xff]   ;;  %v14798_v50 = vld [vmem:[#allocation12 + $0x628] sm:$0xff]  }
 0x244   :  { %14061 = vmatpush3.bf16.msra.mxu0 %v14715_v48  ;;  %4033 = vmatprep.mubr.bf16.mxu0 %v14717_v52  ;;  %v14783_v48 = vld [vmem:[#allocation3 + $0x1cc] ss:$100 sps:$4 sm:$0xff]   ;;  %v12366_v52 = vcombine.high %v1597_v43, %v1597_v43 }
 0x245   :  { %14062 = vmatprep.subr.bf16.mxu0 %v14722_v51  ;;  %v14786_v51 = vld [vmem:[#allocation12 + $0x498] sm:$0xff]  }
 0x246   :  { %14183 = vmatpush3.bf16.msra.mxu1 %v14725_v46  ;;  %v14785_v46 = vld [vmem:[#allocation12 + $0x4d8] sm:$0xff]  }
 0x247   :  { %14184 = vmatprep.subr.bf16.mxu1 %v14730_v47  ;;  %v14793_v47 = vld [vmem:[#allocation3 + $0x1e0] ss:$100 sps:$4 sm:$0xff]  }
 0x248   :  { %14063 = vmatpush3.bf16.msra.mxu0 %v14723_v56  ;;  %v14792_v56 = vld [vmem:[#allocation12 + $0x4a0] sm:$0xff]  }
 0x249   :  { %4226 = vmatmul.mubr.bf16.gmra.mrb[52].mxu1 %v14729_v54  ;;  %14064 = vmatprep.subr.bf16.mxu0 %v14726_v49  ;;  %v1594_v54 = vld [vmem:[#allocation3 + $0x290] sm:$0xff] }
 0x24a   :  { %4233 = vmatprep.mubr.bf16.mxu1 %v14733_v57  ;;  %14185 = vmatpush3.bf16.msra.mxu1 %v14735_v53  ;;  %v14788_v53 = vld [vmem:[#allocation12 + $0x4e0] sm:$0xff]   ;;  %v14796_v49 = vld [vmem:[#allocation12 + $0x4e8] sm:$0xff]   ;;  %v12360_v60 = vcombine.high %v1594_v54, %v1594_v54 }
 0x24b   :  { %14186 = vmatprep.subr.bf16.mxu1 %v14738_v55  ;;  %4034 = vmatmul.mubr.bf16.gmra.mrb[68].mxu0 %v14727_v62  ;;  %v14804_v55 = vld [vmem:[#allocation12 + $0x630] sm:$0xff]   ;;  %v14791_v57 = vld [vmem:[#allocation3 + $0x1c8] ss:$100 sps:$4 sm:$0xff]   ;;  %v14808_v62 = vld [vmem:[#allocation3 + $0x60] ss:$100 sps:$4 sm:$0xff]  }
 0x24c   :  { %14065 = vmatpush3.bf16.msra.mxu0 %v14728_v61  ;;  %4041 = vmatprep.mubr.bf16.mxu0 %v14731_v0  ;;  %v14797_v61 = vld [vmem:[#allocation12 + $0x4a8] sm:$0xff]   ;;  %v14802_v0 = vld [vmem:[#allocation12 + $0x4b0] sm:$0xff]  }
 0x24d   :  { %14066 = vmatprep.subr.bf16.mxu0 %v14736_v63  ;;  %v14800_v63 = vld [vmem:[#allocation12 + $0x4f0] sm:$0xff]  }
 0x24e   :  { %14187 = vmatpush3.bf16.msra.mxu1 %v14739_v58  ;;  %v12365_v58 = vcombine.low %v1597_v43, %v1597_v43  ;;  %v14847_v43 = vld [vmem:[#allocation3 + $0x1e8] ss:$100 sps:$4 sm:$0xff]  }
 0x24f   :  { %14188 = vmatprep.subr.bf16.mxu1 %v14744_v59  ;;  %v14811_v59 = vld [vmem:[#allocation12 + $0x638] sm:$0xff]  }
 0x250   :  { %14067 = vmatpush3.bf16.msra.mxu0 %v14737_v4  ;;  %v14814_v4 = vld [vmem:[#allocation3 + $0x128] ss:$100 sps:$4 sm:$0xff]  }
 0x251   :  { %4234 = vmatmul.mubr.bf16.gmra.mrb[56].mxu1 %v14743_v2  ;;  %14068 = vmatprep.subr.bf16.mxu0 %v14740_v7  ;;  %v14807_v2 = vld [vmem:[#allocation3 + $0x4c] ss:$100 sps:$4 sm:$0xff]  }
 0x252   :  { %14189 = vmatpush3.bf16.msra.mxu1 %v14746_v1  ;;  %4241 = vmatprep.mubr.bf16.mxu1 %v12362_v6  ;;  %v14809_v1 = vld [vmem:[#allocation12 + $0x4f8] sm:$0xff]   ;;  %v14817_v7 = vld [vmem:[#allocation3 + $0x1f0] ss:$100 sps:$4 sm:$0xff]  }
 0x253   :  { %14190 = vmatprep.subr.bf16.mxu1 %v14749_v3  ;;  %4042 = vmatmul.mubr.bf16.gmra.mrb[72].mxu0 %v14741_v12  ;;  %v12359_v3 = vcombine.low %v1594_v54, %v1594_v54  ;;  %v14810_v6 = vld [vmem:[#allocation12 + $0x4b8] sm:$0xff]   ;;  %v14815_v12 = vld [vmem:[#allocation3 + $0x114] ss:$100 sps:$4 sm:$0xff]  }
 0x254   :  { %14069 = vmatpush3.bf16.msra.mxu0 %v14742_v11  ;;  %4049 = vmatprep.mubr.bf16.mxu0 %v12356_v17  ;;  %v14818_v11 = vld [vmem:[#allocation12 + $0x5c8] sm:$0xff]  }
 0x255   :  { %14070 = vmatprep.subr.bf16.mxu0 %v14747_v13  ;;  %v14823_v13 = vld [vmem:[#allocation3 + $0x2b8] ss:$0 sps:$4 sm:$0xff]   ;;  %v14821_v17 = vld [vmem:[#allocation3 + $0x110] ss:$100 sps:$4 sm:$0xff]  }
 0x256   :  { %14191 = vmatpush3.bf16.msra.mxu1 %v14750_v8  ;;  %v14812_v8 = vld [vmem:[#allocation12 + $0x5c0] sm:$0xff]  }
 0x257   :  { %14192 = vmatprep.subr.bf16.mxu1 %v14756_v10  ;;  %v14805_v10 = vld [vmem:[#allocation3 + $0x48] ss:$100 sps:$4 sm:$0xff]  }
 0x258   :  { %14071 = vmatpush3.bf16.msra.mxu0 %v14748_v18  ;;  %v14826_v18 = vld [vmem:[#allocation12 + $0x5d8] sm:$0xff]  }
 0x259   :  { %4242 = vmatmul.mubr.bf16.gmra.mrb[60].mxu1 %v12361_v15  ;;  %14072 = vmatprep.subr.bf16.mxu0 %v14751_v20  ;;  %v14820_v15 = vld [vmem:[#allocation12 + $0x5d0] sm:$0xff]   ;;  %v14827_v20 = vld [vmem:[#allocation12 + $0x598] sm:$0xff]  }
 0x25a   :  { %14193 = vmatpush3.bf16.msra.mxu1 %v14760_v14  ;;  %4345 = vmatprep.mubr.bf16.mxu1 %v14763_v19  ;;  %v14819_v14 = vld [vmem:[#allocation12 + $0x588] sm:$0xff]   ;;  %v14824_v19 = vld [vmem:[#allocation3 + $0x1dc] ss:$100 sps:$4 sm:$0xff]  }
 0x25b   :  { %14194 = vmatprep.subr.bf16.mxu1 %v14766_v16  ;;  %4050 = vmatmul.mubr.bf16.gmra.mrb[76].mxu0 %v12355_v26  ;;  %v14822_v16 = vld [vmem:[#allocation12 + $0x590] sm:$0xff]  }
 0x25c   :  { %14073 = vmatpush3.bf16.msra.mxu0 %v14754_v23  ;;  %4153 = vmatprep.mubr.bf16.mxu0 %v14759_v25  ;;  %v14830_v23 = vld [vmem:[#allocation12 + $0x5a0] sm:$0xff]   ;;  %v14832_v25 = vld [vmem:[#allocation12 + $0x5e8] sm:$0xff]  }
 0x25d   :  { %14074 = vmatprep.subr.bf16.mxu0 %v14764_v24  ;;  %v14829_v24 = vld [vmem:[#allocation3 + $0x1d8] ss:$100 sps:$4 sm:$0xff]  }
 0x25e   :  { %14195 = vmatpush3.bf16.msra.mxu1 %v14767_v21  ;;  %v14828_v21 = vld [vmem:[#allocation12 + $0x5e0] sm:$0xff]  }
 0x25f   :  { %14340 = vmatprep.subr.bf16.mxu1 %v14770_v22 }
 0x260   :  { %14075 = vmatpush3.bf16.msra.mxu0 %v14765_v29  ;;  %v14836_v29 = vld [vmem:[#allocation12 + $0x5b0] sm:$0xff]  }
 0x261   :  { %4346 = vmatmul.mubr.bf16.vlgmr.msra.gmra.mrb[64].mxu1 %v14761_v27  ;;  %14140 = vmatprep.subr.bf16.mxu0 %v14768_v31  ;;  %v14833_v27 = vld [vmem:[#allocation12 + $0x5a8] sm:$0xff]   ;;  %v14840_v31 = vld [vmem:[#allocation12 + $0x5f8] sm:$0xff]  }
 0x262   :  { %4353 = vmatprep.mubr.bf16.mxu1 %v14773_v30  ;;  %14341 = vmatpush3.bf16.msra.mxu1 %v14770_v22  ;;  %v1596_v22 = vld [vmem:[#allocation3 + $0x2a0] sm:$0xff] }
 0x263   :  { %14342 = vmatprep.subr.bf16.mxu1 %v14777_v28  ;;  %4154 = vmatmul.mubr.bf16.vlgmr.msra.gmra.mrb[80].mxu0 %v14757_v34  ;;  %v12364_v26 = vcombine.high %v1596_v22, %v1596_v22  ;;  %v12363_v30 = vcombine.low %v1596_v22, %v1596_v22  ;;  %v14837_v34 = vld [vmem:[#allocation3 + $0x58] ss:$100 sps:$4 sm:$0xff]  }
 0x264   :  { %14141 = vmatpush3.bf16.msra.mxu0 %v14769_v33  ;;  %4161 = vmatprep.mubr.bf16.mxu0 %v14771_v36  ;;  %v14841_v33 = vld [vmem:[#allocation12 + $0x5b8] sm:$0xff]  }
 0x265   :  { %14142 = vmatprep.subr.bf16.mxu0 %v14775_v35  ;;  %v14842_v35 = vld [vmem:[#allocation3 + $0x124] ss:$100 sps:$4 sm:$0xff]  }
 0x266   :  { %14343 = vmatpush3.bf16.msra.mxu1 %v14777_v28  ;;  %v14834_v28 = vld [vmem:[#allocation12 + $0x5f0] sm:$0xff]   ;;  %v14844_v36 = vld [vmem:[#allocation3 + $0x120] ss:$100 sps:$4 sm:$0xff]  }
 0x267   :  { %14344 = vmatprep.subr.bf16.mxu1 %v14782_v32 }
 0x268   :  { %14143 = vmatpush3.bf16.msra.mxu0 %v14776_v40 }
 0x269   :  { %4354 = vmatmul.mubr.bf16.gmra.mrb[68].mxu1 %v14781_v38  ;;  %14144 = vmatprep.subr.bf16.mxu0 %v14778_v41 }
 0x26a   :  { %14345 = vmatpush3.bf16.msra.mxu1 %v14782_v32  ;;  %4361 = vmatprep.mubr.bf16.mxu1 %v14789_v37  ;;  %v14839_v32 = vld [vmem:[#allocation3 + $0x5c] ss:$100 sps:$4 sm:$0xff]   ;;  %v14845_v37 = vld [vmem:[#allocation3 + $0x1ec] ss:$100 sps:$4 sm:$0xff]  }
 0x26b   :  { %14346 = vmatprep.subr.bf16.mxu1 %v14787_v39  ;;  %4162 = vmatmul.mubr.bf16.gmra.mrb[84].mxu0 %v14779_v45 }
 0x26c   :  { %14145 = vmatpush3.bf16.msra.mxu0 %v14780_v44  ;;  %4169 = vmatprep.mubr.bf16.mxu0 %v14783_v48 }
 0x26d   :  { %14146 = vmatprep.subr.bf16.mxu0 %v14785_v46 }
 0x26e   :  { %14347 = vmatpush3.bf16.msra.mxu1 %v14787_v39  ;;  %v1598_v39 = vld [vmem:[#allocation3 + $0x2b0] sm:$0xff] }
 0x26f   :  { %14348 = vmatprep.subr.bf16.mxu1 %v14794_v42  ;;  %v12368_v45 = vcombine.high %v1598_v39, %v1598_v39 }
 0x270   :  { %14147 = vmatpush3.bf16.msra.mxu0 %v14786_v51 }
 0x271   :  { %4362 = vmatmul.mubr.bf16.gmra.mrb[72].mxu1 %v14793_v47  ;;  %14148 = vmatprep.subr.bf16.mxu0 %v14788_v53 }
 0x272   :  { %14349 = vmatpush3.bf16.msra.mxu1 %v14794_v42  ;;  %4369 = vmatprep.mubr.bf16.mxu1 %v12366_v52 }
 0x273   :  { %14350 = vmatprep.subr.bf16.mxu1 %v14798_v50  ;;  %4170 = vmatmul.mubr.bf16.gmra.mrb[88].mxu0 %v14791_v57 }
 0x274   :  { %14149 = vmatpush3.bf16.msra.mxu0 %v14792_v56  ;;  %4177 = vmatprep.mubr.bf16.mxu0 %v12360_v60 }
 0x275   :  { %14150 = vmatprep.subr.bf16.mxu0 %v14796_v49 }
 0x276   :  { %14351 = vmatpush3.bf16.msra.mxu1 %v14798_v50 }
 0x277   :  { %14352 = vmatprep.subr.bf16.mxu1 %v14804_v55 }
 0x278   :  { %14151 = vmatpush3.bf16.msra.mxu0 %v14797_v61 }
 0x279   :  { %4370 = vmatmul.mubr.bf16.gmra.mrb[76].mxu1 %v12365_v58  ;;  %14152 = vmatprep.subr.bf16.mxu0 %v14800_v63 }
 0x27a   :  { %14353 = vmatpush3.bf16.msra.mxu1 %v14804_v55  ;;  %14356 = vmatprep.mubr.bf16.mxu1 %v14808_v62  ;;  %v12367_v55 = vcombine.low %v1598_v39, %v1598_v39 }
 0x27b   :  { %14354 = vmatprep.subr.bf16.mxu1 %v14811_v59  ;;  %4178 = vmatmul.mubr.bf16.gmra.mrb[92].mxu0 %v12359_v3 }
 0x27c   :  { %14153 = vmatpush3.bf16.msra.mxu0 %v14802_v0  ;;  %4281 = vmatprep.mubr.bf16.mxu0 %v14807_v2 }
 0x27d   :  { %14154 = vmatprep.subr.bf16.mxu0 %v14809_v1 }
 0x27e   :  { %14355 = vmatpush3.bf16.msra.mxu1 %v14811_v59 }
 0x280   :  { %14155 = vmatpush3.bf16.msra.mxu0 %v14810_v6 }
 0x281   :  { %14357 = vmatmul.mubr.bf16.vlgmr.msra.gmra.mrb[80].mxu1 %v14814_v4  ;;  %14220 = vmatprep.subr.bf16.mxu0 %v14812_v8 }
 0x282   :  { %14360 = vmatprep.mubr.bf16.mxu1 %v14817_v7 }
 0x283   :  { %4282 = vmatmul.mubr.bf16.vlgmr.msra.gmra.mrb[96].mxu0 %v14805_v10 }
 0x284   :  { %14221 = vmatpush3.bf16.msra.mxu0 %v14813_v9  ;;  %4289 = vmatprep.mubr.bf16.mxu0 %v14815_v12 }
 0x285   :  { %14222 = vmatprep.subr.bf16.mxu0 %v14818_v11 }
 0x288   :  { %14223 = vmatpush3.bf16.msra.mxu0 %v14819_v14 }
 0x289   :  { %14361 = vmatmul.mubr.bf16.gmra.mrb[84].mxu1 %v14823_v13  ;;  %14224 = vmatprep.subr.bf16.mxu0 %v14820_v15 }
 0x28b   :  { %4290 = vmatmul.mubr.bf16.gmra.mrb[100].mxu0 %v14821_v17 }
 0x28c   :  { %14225 = vmatpush3.bf16.msra.mxu0 %v14822_v16  ;;  %4297 = vmatprep.mubr.bf16.mxu0 %v14824_v19 }
 0x28d   :  { %14226 = vmatprep.subr.bf16.mxu0 %v14826_v18 }
 0x290   :  { %14227 = vmatpush3.bf16.msra.mxu0 %v14827_v20 }
 0x291   :  { %14228 = vmatprep.subr.bf16.mxu0 %v14828_v21 }
 0x293   :  { %4298 = vmatmul.mubr.bf16.gmra.mrb[104].mxu0 %v14829_v24 }
 0x294   :  { %14229 = vmatpush3.bf16.msra.mxu0 %v14830_v23  ;;  %4305 = vmatprep.mubr.bf16.mxu0 %v12364_v26 }
 0x295   :  { %14230 = vmatprep.subr.bf16.mxu0 %v14832_v25  ;;  %v13876_v38 = vpop.f32.mrb[0].mxu1 }
 0x296   :  { %v13877_v40 = vpop.f32.mrb[1].mxu1 }
 0x297   :  { %v16118_v41 = vadd.f32 %v13877_v40, %v13876_v38  ;;  %v13879_v42 = vpop.f32.mrb[2].mxu1 }
 0x298   :  { %14231 = vmatpush3.bf16.msra.mxu0 %v14833_v27  ;;  %v13880_v44 = vpop.f32.mrb[3].mxu1 }
 0x299   :  { %14232 = vmatprep.subr.bf16.mxu0 %v14834_v28  ;;  %v16120_v46 = vadd.f32 %v13880_v44, %v13879_v42 }
 0x29b   :  { %4306 = vmatmul.mubr.bf16.gmra.mrb[108].mxu0 %v12363_v30 }
 0x29c   :  { %14233 = vmatpush3.bf16.msra.mxu0 %v14836_v29  ;;  %4409 = vmatprep.mubr.bf16.mxu0 %v14839_v32 }
 0x29d   :  { %14234 = vmatprep.subr.bf16.mxu0 %v14840_v31  ;;  %v16142_v31 = vld [vmem:[#allocation13] ss:$0 sm:$0xff] }
 0x2a0   :  { %14235 = vmatpush3.bf16.msra.mxu0 %v14841_v33 }
 0x2a3   :  { %4410 = vmatmul.mubr.bf16.vlgmr.msra.gmra.mrb[112].mxu0 %v14837_v34 }
 0x2a4   :  { %4417 = vmatprep.mubr.bf16.mxu0 %v14842_v35  ;;  %v13796_v47 = vpop.f32.mrb[16].mxu0 }
 0x2a5   :  { %v13797_v48 = vpop.f32.mrb[17].mxu0 }
 0x2a6   :  { %v13882_v50 = vpop.f32.mrb[4].mxu1  ;;  %v13798_v51 = vadd.f32 %v13797_v48, %v13796_v47  ;;  %v13799_v52 = vpop.f32.mrb[18].mxu0 }
 0x2a7   :  { %v13883_v53 = vpop.f32.mrb[5].mxu1  ;;  %v13800_v54 = vpop.f32.mrb[19].mxu0 }
 0x2a8   :  { %v16122_v56 = vadd.f32 %v13883_v53, %v13882_v50  ;;  %v13885_v57 = vpop.f32.mrb[6].mxu1  ;;  %v13801_v49 = vadd.f32 %v13800_v54, %v13799_v52  ;;  %v3708_v34 = vadd.f32 %v13798_v51, %v16142_v31  ;;  %v14850_v51 = vld [vmem:[#allocation15] ss:$8 sps:$4 sm:$0xff]   ;;  %v14852_v53 = vld [vmem:[#allocation15 + $0x4] ss:$8 sps:$4 sm:$0xff]  }
 0x2a9   :  { %v13886_v58 = vpop.f32.mrb[7].mxu1  ;;  %5659 = vmatprep.subr.bf16.mxu0 %v14852_v53 }
 0x2aa   :  { %v16124_v59 = vadd.f32 %v13886_v58, %v13885_v57  ;;  %v3711_v40 = vadd.f32 %v13801_v49, %v16142_v31  ;;  %5660 = vmatpush1.bf16.msra.mxu0 %v14850_v51 }
 0x2ab   :  { %4418 = vmatmul.mubr.bf16.gmra.mrb[116].mxu0 %v14844_v36 }
 0x2ac   :  { %4425 = vmatprep.mubr.bf16.mxu0 %v14845_v37 }
 0x2b1   :  { %v13802_v60 = vpop.f32.mrb[20].mxu0 }
 0x2b2   :  { %v13803_v61 = vpop.f32.mrb[21].mxu0 }
 0x2b3   :  { %4426 = vmatmul.mubr.bf16.gmra.mrb[120].mxu0 %v14847_v43  ;;  %v13804_v62 = vadd.f32 %v13803_v61, %v13802_v60  ;;  %v13805_v63 = vpop.f32.mrb[22].mxu0 }
 0x2b4   :  { %4433 = vmatprep.mubr.bf16.mxu0 %v12368_v45  ;;  %v13806_v1 = vpop.f32.mrb[23].mxu0 }
 0x2b5   :  { %v13807_v3 = vadd.f32 %v13806_v1, %v13805_v63  ;;  %v3716_v49 = vadd.f32 %v13804_v62, %v16142_v31 }
 0x2b7   :  { %v3719_v1 = vadd.f32 %v13807_v3, %v16142_v31 }
 0x2bb   :  { %4434 = vmatmul.mubr.bf16.gmra.mrb[124].mxu0 %v12367_v55 }
 0x2be   :  { %v13888_v0 = vpop.f32.mrb[8].mxu1 }
 0x2bf   :  { %v13889_v2 = vpop.f32.mrb[9].mxu1 }
 0x2c0   :  { %v16126_v4 = vadd.f32 %v13889_v2, %v13888_v0  ;;  %v13891_v6 = vpop.f32.mrb[10].mxu1 }
 0x2c1   :  { %v13892_v7 = vpop.f32.mrb[11].mxu1 }
 0x2c2   :  { %v16128_v8 = vadd.f32 %v13892_v7, %v13891_v6 }
 0x2c4   :  { %v13808_v9 = vpop.f32.mrb[24].mxu0 }
 0x2c5   :  { %v13809_v10 = vpop.f32.mrb[25].mxu0 }
 0x2c6   :  { %v16130_v11 = vadd.f32 %v13809_v10, %v13808_v9  ;;  %v13811_v12 = vpop.f32.mrb[26].mxu0  ;;  %v13894_v13 = vpop.f32.mrb[12].mxu1  ;;  %v14853_v9 = vld [vmem:[#allocation15 + $0x10] ss:$8 sps:$4 sm:$0xff]  }
 0x2c7   :  { %v13812_v14 = vpop.f32.mrb[27].mxu0  ;;  %v13895_v15 = vpop.f32.mrb[13].mxu1 }
 0x2c8   :  { %v16132_v16 = vadd.f32 %v13812_v14, %v13811_v12  ;;  %v16134_v17 = vadd.f32 %v13895_v15, %v13894_v13  ;;  %v13897_v18 = vpop.f32.mrb[14].mxu1  ;;  %v14858_v14 = vld [vmem:[#allocation15 + $0x24] ss:$8 sps:$4 sm:$0xff]   ;;  %v14856_v15 = vld [vmem:[#allocation15 + $0x20] ss:$8 sps:$4 sm:$0xff]  }
 0x2c9   :  { %v13898_v19 = vpop.f32.mrb[15].mxu1 }
 0x2cc   :  { %v13814_v20 = vpop.f32.mrb[28].mxu0 }
 0x2cd   :  { %v13815_v21 = vpop.f32.mrb[29].mxu0 }
 0x2ce   :  { %v16136_v22 = vadd.f32 %v13815_v21, %v13814_v20  ;;  %v13817_v23 = vpop.f32.mrb[30].mxu0  ;;  %v13956_v24 = vpop.f32.mrb[16].mxu1  ;;  %v3724_v20 = vadd.f32 %v16130_v11, %v16142_v31 }
 0x2cf   :  { %v13818_v25 = vpop.f32.mrb[31].mxu0  ;;  %v13957_v26 = vpop.f32.mrb[17].mxu1 }
 0x2d0   :  { %v16138_v27 = vadd.f32 %v13957_v26, %v13956_v24  ;;  %v13959_v28 = vpop.f32.mrb[18].mxu1 }
 0x2d1   :  { %v13960_v29 = vpop.f32.mrb[19].mxu1 }
 0x2d2   :  { %v16140_v30 = vadd.f32 %v13960_v29, %v13959_v28 }
 0x2d4   :  { %v13836_v32 = vpop.f32.mrb[32].mxu0 }
 0x2d5   :  { %v13837_v33 = vpop.f32.mrb[33].mxu0 }
 0x2d6   :  { %v13838_v35 = vadd.f32 %v13837_v33, %v13836_v32  ;;  %v13839_v36 = vpop.f32.mrb[34].mxu0  ;;  %v14859_v33 = vld [vmem:[#allocation15 + $0x30] ss:$8 sps:$4 sm:$0xff]  }
 0x2d7   :  { %v13840_v38 = vpop.f32.mrb[35].mxu0 }
 0x2d8   :  { %v3772_v42 = vadd.f32 %v13838_v35, %v3708_v34  ;;  %v13841_v43 = vadd.f32 %v13840_v38, %v13839_v36  ;;  %v14861_v34 = vld [vmem:[#allocation15 + $0x34] ss:$8 sps:$4 sm:$0xff]   ;;  %v14862_v38 = vld [vmem:[#allocation15 + $0x40] ss:$8 sps:$4 sm:$0xff]  }
 0x2da   :  { %v3775_v48 = vadd.f32 %v13841_v43, %v3711_v40  ;;  %v16151_v52 = vadd.f32 %v16118_v41, %v3772_v42  ;;  %v3732_v42 = vadd.f32 %v16136_v22, %v16142_v31  ;;  %v14868_v22 = vld [vmem:[#allocation15 + $0x60] ss:$8 sps:$4 sm:$0xff]  }
 0x2dc   :  { %v13962_v37 = vpop.f32.mrb[20].mxu1  ;;  %v13842_v54 = vpop.f32.mrb[36].mxu0  ;;  %v16154_v55 = vadd.f32 %v16120_v46, %v3775_v48  ;;  %v14855_v46 = vld [vmem:[#allocation15 + $0x14] ss:$8 sps:$4 sm:$0xff]  }
 0x2dd   :  { %v13963_v39 = vpop.f32.mrb[21].mxu1  ;;  %v13843_v57 = vpop.f32.mrb[37].mxu0  ;;  %5661 = vmatprep.subr.bf16.mxu0 %v14855_v46 }
 0x2de   :  { %v16146_v44 = vadd.f32 %v13963_v39, %v13962_v37  ;;  %v13965_v45 = vpop.f32.mrb[22].mxu1  ;;  %v13844_v58 = vadd.f32 %v13843_v57, %v13842_v54  ;;  %v13845_v60 = vpop.f32.mrb[38].mxu0  ;;  %5662 = vmatpush1.bf16.msra.mxu0 %v14853_v9  ;;  %v14864_v37 = vld [vmem:[#allocation15 + $0x44] ss:$8 sps:$4 sm:$0xff]   ;;  %v14865_v57 = vld [vmem:[#allocation15 + $0x50] ss:$8 sps:$4 sm:$0xff]  }
 0x2df   :  { %v13966_v47 = vpop.f32.mrb[23].mxu1  ;;  %v13846_v63 = vpop.f32.mrb[39].mxu0  ;;  %5663 = vmatprep.subr.bf16.mxu0 %v14858_v14 }
 0x2e0   :  { %v16148_v50 = vadd.f32 %v13966_v47, %v13965_v45  ;;  %v3780_v41 = vadd.f32 %v13844_v58, %v3716_v49  ;;  %v13847_v2 = vadd.f32 %v13846_v63, %v13845_v60  ;;  %v14867_v49 = vld [vmem:[#allocation15 + $0x54] ss:$8 sps:$4 sm:$0xff]  }
 0x2e2   :  { %v3783_v12 = vadd.f32 %v13847_v2, %v3719_v1  ;;  %v16163_v62 = vadd.f32 %v16122_v56, %v3780_v41  ;;  %5664 = vmatpush1.bf16.msra.mxu0 %v14856_v15  ;;  %v3727_v56 = vadd.f32 %v16132_v16, %v16142_v31 }
 0x2e3   :  { %5665 = vmatprep.subr.bf16.mxu0 %v14861_v34 }
 0x2e4   :  { %v13968_v61 = vpop.f32.mrb[24].mxu1  ;;  %v13848_v18 = vpop.f32.mrb[40].mxu0  ;;  %v16166_v3 = vadd.f32 %v16124_v59, %v3783_v12 }
 0x2e5   :  { %v13969_v0 = vpop.f32.mrb[25].mxu1  ;;  %v13849_v19 = vpop.f32.mrb[41].mxu0 }
 0x2e6   :  { %v16158_v6 = vadd.f32 %v13969_v0, %v13968_v61  ;;  %v13971_v7 = vpop.f32.mrb[26].mxu1  ;;  %v13850_v21 = vadd.f32 %v13849_v19, %v13848_v18  ;;  %v13851_v23 = vpop.f32.mrb[42].mxu0  ;;  %5666 = vmatpush1.bf16.msra.mxu0 %v14859_v33 }
 0x2e7   :  { %v13972_v10 = vpop.f32.mrb[27].mxu1  ;;  %v13852_v25 = vpop.f32.mrb[43].mxu0  ;;  %5667 = vmatprep.subr.bf16.mxu0 %v14864_v37 }
 0x2e8   :  { %v16160_v13 = vadd.f32 %v13972_v10, %v13971_v7  ;;  %v3788_v28 = vadd.f32 %v13850_v21, %v3724_v20  ;;  %v13853_v29 = vadd.f32 %v13852_v25, %v13851_v23  ;;  %v14871_v25 = vld [vmem:[#allocation15 + $0x70] ss:$8 sps:$4 sm:$0xff]  }
 0x2ea   :  { %v3791_v36 = vadd.f32 %v13853_v29, %v3727_v56  ;;  %v16175_v11 = vadd.f32 %v16126_v4, %v3788_v28  ;;  %5668 = vmatpush1.bf16.msra.mxu0 %v14862_v38 }
 0x2eb   :  { %5669 = vmatprep.subr.bf16.mxu0 %v14867_v49 }
 0x2ec   :  { %v13974_v24 = vpop.f32.mrb[28].mxu1  ;;  %v13854_v39 = vpop.f32.mrb[44].mxu0  ;;  %v16178_v40 = vadd.f32 %v16128_v8, %v3791_v36  ;;  %v14870_v8 = vld [vmem:[#allocation15 + $0x64] ss:$8 sps:$4 sm:$0xff]  }
 0x2ed   :  { %v13975_v26 = vpop.f32.mrb[29].mxu1  ;;  %v13855_v16 = vpop.f32.mrb[45].mxu0 }
 0x2ee   :  { %v16172_v32 = vadd.f32 %v13975_v26, %v13974_v24  ;;  %v13977_v59 = vpop.f32.mrb[30].mxu1  ;;  %v13856_v43 = vadd.f32 %v13855_v16, %v13854_v39  ;;  %v13857_v45 = vpop.f32.mrb[46].mxu0  ;;  %5670 = vmatpush1.bf16.msra.mxu0 %v14865_v57  ;;  %v14873_v26 = vld [vmem:[#allocation15 + $0x74] ss:$8 sps:$4 sm:$0xff]  }
 0x2ef   :  { %v13978_v35 = vpop.f32.mrb[31].mxu1  ;;  %v13858_v48 = vpop.f32.mrb[47].mxu0  ;;  %5671 = vmatprep.subr.bf16.mxu0 %v14870_v8  ;;  %v14874_v45 = vld [vmem:[#allocation15 + $0x80] ss:$8 sps:$4 sm:$0xff]  }
 0x2f0   :  { %v3796_v4 = vadd.f32 %v13856_v43, %v3732_v42 }
 0x2f2   :  { %v16187_v61 = vadd.f32 %v16134_v17, %v3796_v4  ;;  %5672 = vmatpush1.bf16.msra.mxu0 %v14868_v22 }
 0x2f3   :  { %5673 = vmatprep.subr.bf16.mxu0 %v14873_v26 }
 0x2f4   :  { %v14036_v47 = vpop.f32.mrb[32].mxu1 }
 0x2f5   :  { %v14037_v51 = vpop.f32.mrb[33].mxu1 }
 0x2f6   :  { %v16182_v53 = vadd.f32 %v14037_v51, %v14036_v47  ;;  %v14039_v54 = vpop.f32.mrb[34].mxu1  ;;  %v13916_v31 = vpop.f32.mrb[48].mxu0  ;;  %5674 = vmatpush1.bf16.msra.mxu0 %v14871_v25  ;;  %v14876_v47 = vld [vmem:[#allocation15 + $0x84] ss:$8 sps:$4 sm:$0xff]  }
 0x2f7   :  { %v14040_v58 = vpop.f32.mrb[35].mxu1  ;;  %v13917_v63 = vpop.f32.mrb[49].mxu0  ;;  %5675 = vmatprep.subr.bf16.mxu0 %v14876_v47 }
 0x2f8   :  { %v16184_v60 = vadd.f32 %v14040_v58, %v14039_v54  ;;  %v13918_v0 = vadd.f32 %v13917_v63, %v13916_v31  ;;  %v13919_v1 = vpop.f32.mrb[50].mxu0  ;;  %v14877_v31 = vld [vmem:[#allocation15 + $0x90] ss:$8 sps:$4 sm:$0xff]   ;;  %v14879_v63 = vld [vmem:[#allocation15 + $0x94] ss:$8 sps:$4 sm:$0xff]  }
 0x2f9   :  { %v13920_v2 = vpop.f32.mrb[51].mxu0 }
 0x2fa   :  { %v3900_v9 = vadd.f32 %v13918_v0, %v16151_v52  ;;  %v13921_v46 = vadd.f32 %v13920_v2, %v13919_v1  ;;  %5676 = vmatpush1.bf16.msra.mxu0 %v14874_v45 }
 0x2fb   :  { %5677 = vmatprep.subr.bf16.mxu0 %v14879_v63 }
 0x2fc   :  { %v14042_v41 = vpop.f32.mrb[36].mxu1  ;;  %v3903_v14 = vadd.f32 %v13921_v46, %v16154_v55  ;;  %v16196_v18 = vadd.f32 %v16138_v27, %v3900_v9  ;;  %v14880_v9 = vld [vmem:[#allocation15 + $0xa0] ss:$8 sps:$4 sm:$0xff]  }
 0x2fd   :  { %v14043_v7 = vpop.f32.mrb[37].mxu1 }
 0x2fe   :  { %v16190_v10 = vadd.f32 %v14043_v7, %v14042_v41  ;;  %v14045_v12 = vpop.f32.mrb[38].mxu1  ;;  %v13922_v19 = vpop.f32.mrb[52].mxu0  ;;  %v16199_v20 = vadd.f32 %v16140_v30, %v3903_v14  ;;  %v14882_v41 = vld [vmem:[#allocation15 + $0xa4] ss:$8 sps:$4 sm:$0xff]   ;;  %5678 = vmatpush1.bf16.msra.mxu0 %v14877_v31 }
 0x2ff   :  { %v14046_v17 = vpop.f32.mrb[39].mxu1  ;;  %v13923_v21 = vpop.f32.mrb[53].mxu0  ;;  %5679 = vmatprep.subr.bf16.mxu0 %v14882_v41 }
 0x300   :  { %v16193_v15 = vadd.f32 %v14046_v17, %v14045_v12  ;;  %v13924_v23 = vadd.f32 %v13923_v21, %v13922_v19  ;;  %v13925_v24 = vpop.f32.mrb[54].mxu0 }
 0x301   :  { %v13926_v56 = vpop.f32.mrb[55].mxu0 }
 0x302   :  { %v3908_v29 = vadd.f32 %v13924_v23, %v16163_v62  ;;  %v13927_v55 = vadd.f32 %v13926_v56, %v13925_v24  ;;  %5680 = vmatpush1.bf16.msra.mxu0 %v14880_v9  ;;  %v14885_v23 = vld [vmem:[#allocation15 + $0xb4] ss:$8 sps:$4 sm:$0xff]   ;;  %v14903_v9 = vld [vmem:[#allocation15 + $0x104] ss:$8 sps:$4 sm:$0xff]  }
 0x303   :  { %5681 = vmatprep.subr.bf16.mxu0 %v14885_v23 }
 0x304   :  { %v14048_v52 = vpop.f32.mrb[40].mxu1  ;;  %v3911_v30 = vadd.f32 %v13927_v55, %v16166_v3  ;;  %v16208_v35 = vadd.f32 %v16146_v44, %v3908_v29 }
 0x305   :  { %v14049_v28 = vpop.f32.mrb[41].mxu1 }
 0x306   :  { %v16202_v59 = vadd.f32 %v14049_v28, %v14048_v52  ;;  %v14051_v33 = vpop.f32.mrb[42].mxu1  ;;  %v13928_v36 = vpop.f32.mrb[56].mxu0  ;;  %v16211_v37 = vadd.f32 %v16148_v50, %v3911_v30  ;;  %v14888_v30 = vld [vmem:[#allocation15 + $0xc4] ss:$8 sps:$4 sm:$0xff]  }
 0x307   :  { %v14052_v27 = vpop.f32.mrb[43].mxu1  ;;  %v13929_v38 = vpop.f32.mrb[57].mxu0 }
 0x308   :  { %v16205_v34 = vadd.f32 %v14052_v27, %v14051_v33  ;;  %v13930_v62 = vadd.f32 %v13929_v38, %v13928_v36  ;;  %v13931_v39 = vpop.f32.mrb[58].mxu0  ;;  %v14886_v27 = vld [vmem:[#allocation15 + $0xc0] ss:$8 sps:$4 sm:$0xff]  }
 0x309   :  { %v13932_v42 = vpop.f32.mrb[59].mxu0 }
 0x30a   :  { %v3916_v48 = vadd.f32 %v13930_v62, %v16175_v11  ;;  %v13933_v3 = vadd.f32 %v13932_v42, %v13931_v39 }
 0x30c   :  { %v14054_v16 = vpop.f32.mrb[44].mxu1  ;;  %v3919_v54 = vadd.f32 %v13933_v3, %v16178_v40  ;;  %v16218_v50 = vadd.f32 %v16158_v6, %v3916_v48  ;;  %v14889_v3 = vld [vmem:[#allocation15 + $0xd0] ss:$8 sps:$4 sm:$0xff]  }
 0x30d   :  { %v14055_v43 = vpop.f32.mrb[45].mxu1 }
 0x30e   :  { %v16214_v51 = vadd.f32 %v14055_v43, %v14054_v16  ;;  %v14057_v4 = vpop.f32.mrb[46].mxu1  ;;  %v13934_v57 = vpop.f32.mrb[60].mxu0  ;;  %v16221_v49 = vadd.f32 %v16160_v13, %v3919_v54 }
 0x30f   :  { %v14058_v44 = vpop.f32.mrb[47].mxu1  ;;  %v13935_v58 = vpop.f32.mrb[61].mxu0  ;;  %v14891_v4 = vld [vmem:[#allocation15 + $0xd4] ss:$8 sps:$4 sm:$0xff]  }
 0x310   :  { %v13936_v8 = vadd.f32 %v13935_v58, %v13934_v57  ;;  %v13937_v22 = vpop.f32.mrb[62].mxu0  ;;  %v14894_v57 = vld [vmem:[#allocation15 + $0xe4] ss:$8 sps:$4 sm:$0xff]  }
 0x311   :  { %v13938_v0 = vpop.f32.mrb[63].mxu0 }
 0x312   :  { %v3924_v2 = vadd.f32 %v13936_v8, %v16187_v61  ;;  %v14883_v61 = vld [vmem:[#allocation15 + $0xb0] ss:$8 sps:$4 sm:$0xff]  }
 0x313   :  { %5682 = vmatpush1.bf16.msra.mxu0 %v14883_v61 }
 0x314   :  { %v14116_v11 = vpop.f32.mrb[48].mxu1  ;;  %v16229_v46 = vadd.f32 %v16172_v32, %v3924_v2  ;;  %5683 = vmatprep.subr.bf16.mxu0 %v14888_v30 }
 0x315   :  { %v14117_v1 = vpop.f32.mrb[49].mxu1 }
 0x316   :  { %v16224_v40 = vadd.f32 %v14117_v1, %v14116_v11  ;;  %v14119_v6 = vpop.f32.mrb[50].mxu1  ;;  %v13996_v12 = vpop.f32.mrb[64].mxu0  ;;  %v14897_v11 = vld [vmem:[#allocation15 + $0xf4] ss:$8 sps:$4 sm:$0xff]  }
 0x317   :  { %v14120_v7 = vpop.f32.mrb[51].mxu1  ;;  %v13997_v17 = vpop.f32.mrb[65].mxu0  ;;  %5684 = vmatpush1.bf16.msra.mxu0 %v14886_v27 }
 0x318   :  { %v16226_v13 = vadd.f32 %v14120_v7, %v14119_v6  ;;  %v13998_v14 = vadd.f32 %v13997_v17, %v13996_v12  ;;  %v13999_v19 = vpop.f32.mrb[66].mxu0  ;;  %5685 = vmatprep.subr.bf16.mxu0 %v14891_v4  ;;  %v14895_v7 = vld [vmem:[#allocation15 + $0xf0] ss:$8 sps:$4 sm:$0xff]  }
 0x319   :  { %v14000_v24 = vpop.f32.mrb[67].mxu0 }
 0x31a   :  { %v4028_v25 = vadd.f32 %v13998_v14, %v16196_v18  ;;  %v14001_v26 = vadd.f32 %v14000_v24, %v13999_v19 }
 0x31b   :  { %5686 = vmatpush1.bf16.msra.mxu0 %v14889_v3 }
 0x31c   :  { %v14122_v21 = vpop.f32.mrb[52].mxu1  ;;  %v4031_v29 = vadd.f32 %v14001_v26, %v16199_v20  ;;  %v16238_v33 = vadd.f32 %v16182_v53, %v4028_v25  ;;  %5687 = vmatprep.subr.bf16.mxu0 %v14894_v57 }
 0x31d   :  { %v14123_v52 = vpop.f32.mrb[53].mxu1 }
 0x31e   :  { %v16232_v56 = vadd.f32 %v14123_v52, %v14122_v21  ;;  %v14125_v28 = vpop.f32.mrb[54].mxu1  ;;  %v14002_v36 = vpop.f32.mrb[68].mxu0  ;;  %v16241_v38 = vadd.f32 %v16184_v60, %v4031_v29 }
 0x31f   :  { %v14126_v32 = vpop.f32.mrb[55].mxu1  ;;  %v14003_v18 = vpop.f32.mrb[69].mxu0 }
 0x320   :  { %v16235_v55 = vadd.f32 %v14126_v32, %v14125_v28  ;;  %v14004_v62 = vadd.f32 %v14003_v18, %v14002_v36  ;;  %v14005_v39 = vpop.f32.mrb[70].mxu0 }
 0x321   :  { %v14006_v42 = vpop.f32.mrb[71].mxu0 }
 0x322   :  { %v4036_v20 = vadd.f32 %v14004_v62, %v16208_v35  ;;  %v14007_v45 = vadd.f32 %v14006_v42, %v14005_v39  ;;  %v14892_v35 = vld [vmem:[#allocation15 + $0xe0] ss:$8 sps:$4 sm:$0xff]  }
 0x323   :  { %5688 = vmatpush1.bf16.msra.mxu0 %v14892_v35 }
 0x324   :  { %v14128_v16 = vpop.f32.mrb[56].mxu1  ;;  %v4039_v60 = vadd.f32 %v14007_v45, %v16211_v37  ;;  %v16250_v54 = vadd.f32 %v16190_v10, %v4036_v20  ;;  %5689 = vmatprep.subr.bf16.mxu0 %v14897_v11 }
 0x325   :  { %v14129_v43 = vpop.f32.mrb[57].mxu1 }
 0x326   :  { %v16244_v47 = vadd.f32 %v14129_v43, %v14128_v16  ;;  %v14131_v53 = vpop.f32.mrb[58].mxu1  ;;  %v14008_v58 = vpop.f32.mrb[72].mxu0  ;;  %v16253_v8 = vadd.f32 %v16193_v15, %v4039_v60 }
 0x327   :  { %v14132_v48 = vpop.f32.mrb[59].mxu1  ;;  %v14009_v22 = vpop.f32.mrb[73].mxu0  ;;  %5690 = vmatpush1.bf16.msra.mxu0 %v14895_v7 }
 0x328   :  { %v16247_v44 = vadd.f32 %v14132_v48, %v14131_v53  ;;  %v14010_v31 = vadd.f32 %v14009_v22, %v14008_v58  ;;  %v14011_v63 = vpop.f32.mrb[74].mxu0  ;;  %5708 = vmatprep.subr.bf16.mxu0 %v14903_v9 }
 0x329   :  { %v14012_v37 = vpop.f32.mrb[75].mxu0 }
 0x32a   :  { %v4044_v41 = vadd.f32 %v14010_v31, %v16218_v50  ;;  %v14013_v10 = vadd.f32 %v14012_v37, %v14011_v63 }
 0x32c   :  { %v14134_v0 = vpop.f32.mrb[60].mxu1  ;;  %v4047_v12 = vadd.f32 %v14013_v10, %v16221_v49  ;;  %v4108_v17 = vadd.f32 %v16202_v59, %v4044_v41 }
 0x32d   :  { %v14135_v1 = vpop.f32.mrb[61].mxu1 }
 0x32e   :  { %v16256_v2 = vadd.f32 %v14135_v1, %v14134_v0  ;;  %v14137_v6 = vpop.f32.mrb[62].mxu1  ;;  %v14014_v14 = vpop.f32.mrb[76].mxu0  ;;  %v4111_v19 = vadd.f32 %v16205_v34, %v4047_v12 }
 0x32f   :  { %v14138_v15 = vpop.f32.mrb[63].mxu1  ;;  %v14015_v21 = vpop.f32.mrb[77].mxu0 }
 0x330   :  { %v14016_v50 = vadd.f32 %v14015_v21, %v14014_v14  ;;  %v14017_v61 = vpop.f32.mrb[78].mxu0 }
 0x331   :  { %v14018_v24 = vpop.f32.mrb[79].mxu0 }
 0x332   :  { %v4052_v25 = vadd.f32 %v14016_v50, %v16229_v46 }
 0x334   :  { %v14196_v23 = vpop.f32.mrb[64].mxu1  ;;  %v4116_v59 = vadd.f32 %v16214_v51, %v4052_v25 }
 0x335   :  { %v14197_v52 = vpop.f32.mrb[65].mxu1 }
 0x336   :  { %v16262_v26 = vadd.f32 %v14197_v52, %v14196_v23  ;;  %v14199_v28 = vpop.f32.mrb[66].mxu1  ;;  %v14076_v29 = vpop.f32.mrb[80].mxu0 }
 0x337   :  { %v14200_v32 = vpop.f32.mrb[67].mxu1  ;;  %v14077_v34 = vpop.f32.mrb[81].mxu0 }
 0x338   :  { %v16264_v49 = vadd.f32 %v14200_v32, %v14199_v28  ;;  %v14078_v27 = vadd.f32 %v14077_v34, %v14076_v29  ;;  %v14079_v30 = vpop.f32.mrb[82].mxu0 }
 0x339   :  { %v14080_v18 = vpop.f32.mrb[83].mxu0 }
 0x33a   :  { %v4156_v39 = vadd.f32 %v14078_v27, %v16238_v33  ;;  %v14081_v16 = vadd.f32 %v14080_v18, %v14079_v30 }
 0x33c   :  { %v14202_v36 = vpop.f32.mrb[68].mxu1  ;;  %v4159_v20 = vadd.f32 %v14081_v16, %v16241_v38  ;;  %v4220_v51 = vadd.f32 %v16224_v40, %v4156_v39 }
 0x33d   :  { %v14203_v62 = vpop.f32.mrb[69].mxu1 }
 0x33e   :  { %v16268_v42 = vadd.f32 %v14203_v62, %v14202_v36  ;;  %v14205_v46 = vpop.f32.mrb[70].mxu1  ;;  %v14082_v53 = vpop.f32.mrb[84].mxu0  ;;  %v4223_v48 = vadd.f32 %v16226_v13, %v4159_v20 }
 0x33f   :  { %v14206_v43 = vpop.f32.mrb[71].mxu1  ;;  %v14083_v3 = vpop.f32.mrb[85].mxu0 }
 0x340   :  { %v16271_v45 = vadd.f32 %v14206_v43, %v14205_v46  ;;  %v14084_v4 = vadd.f32 %v14083_v3, %v14082_v53  ;;  %v14085_v60 = vpop.f32.mrb[86].mxu0 }
 0x341   :  { %v14086_v58 = vpop.f32.mrb[87].mxu0 }
 0x342   :  { %v4164_v35 = vadd.f32 %v14084_v4, %v16250_v54  ;;  %v14087_v22 = vadd.f32 %v14086_v58, %v14085_v60 }
 0x344   :  { %v14208_v57 = vpop.f32.mrb[72].mxu1  ;;  %v4167_v63 = vadd.f32 %v14087_v22, %v16253_v8  ;;  %v4228_v40 = vadd.f32 %v16232_v56, %v4164_v35 }
 0x345   :  { %v14209_v33 = vpop.f32.mrb[73].mxu1 }
 0x346   :  { %v16276_v11 = vadd.f32 %v14209_v33, %v14208_v57  ;;  %v14211_v31 = vpop.f32.mrb[74].mxu1  ;;  %v14088_v13 = vpop.f32.mrb[88].mxu0  ;;  %v4231_v37 = vadd.f32 %v16235_v55, %v4167_v63 }
 0x347   :  { %v14212_v38 = vpop.f32.mrb[75].mxu1  ;;  %v14089_v1 = vpop.f32.mrb[89].mxu0 }
 0x348   :  { %v16279_v0 = vadd.f32 %v14212_v38, %v14211_v31  ;;  %v14090_v41 = vadd.f32 %v14089_v1, %v14088_v13  ;;  %v14091_v10 = vpop.f32.mrb[90].mxu0 }
 0x349   :  { %v14092_v7 = vpop.f32.mrb[91].mxu0 }
 0x34a   :  { %v4172_v15 = vadd.f32 %v14090_v41, %v4108_v17  ;;  %v14093_v9 = vadd.f32 %v14092_v7, %v14091_v10 }
 0x34c   :  { %v14214_v6 = vpop.f32.mrb[76].mxu1  ;;  %v4175_v50 = vadd.f32 %v14093_v9, %v4111_v19  ;;  %v4236_v8 = vadd.f32 %v16244_v47, %v4172_v15 }
 0x34d   :  { %v14215_v54 = vpop.f32.mrb[77].mxu1 }
 0x34e   :  { %v14216_v12 = vadd.f32 %v14215_v54, %v14214_v6  ;;  %v14217_v14 = vpop.f32.mrb[78].mxu1  ;;  %v14094_v61 = vpop.f32.mrb[92].mxu0  ;;  %v4239_v56 = vadd.f32 %v16247_v44, %v4175_v50 }
 0x34f   :  { %v14218_v21 = vpop.f32.mrb[79].mxu1  ;;  %v14095_v23 = vpop.f32.mrb[93].mxu0 }
 0x350   :  { %v14096_v24 = vadd.f32 %v14095_v23, %v14094_v61  ;;  %v14097_v55 = vpop.f32.mrb[94].mxu0 }
 0x351   :  { %v14098_v25 = vpop.f32.mrb[95].mxu0 }
 0x352   :  { %v4180_v32 = vadd.f32 %v14096_v24, %v4116_v59 }
 0x354   :  { %v16285_v52 = vpop.f32.mrb[80].mxu1  ;;  %v4244_v34 = vadd.f32 %v16256_v2, %v4180_v32 }
 0x355   :  { %v4475_v28 = vpop.f32.mrb[81].mxu1 }
 0x356   :  { %v16287_v29 = vpop.f32.mrb[82].mxu1  ;;  %v14156_v27 = vpop.f32.mrb[96].mxu0 }
 0x357   :  { %v4478_v17 = vpop.f32.mrb[83].mxu1  ;;  %v14157_v19 = vpop.f32.mrb[97].mxu0 }
 0x358   :  { %v14158_v30 = vadd.f32 %v14157_v19, %v14156_v27  ;;  %v14159_v47 = vpop.f32.mrb[98].mxu0 }
 0x359   :  { %v14160_v44 = vpop.f32.mrb[99].mxu0 }
 0x35a   :  { %v4284_v62 = vadd.f32 %v14158_v30, %v4220_v51  ;;  %v14161_v39 = vadd.f32 %v14160_v44, %v14159_v47 }
 0x35c   :  { %v16290_v36 = vpop.f32.mrb[84].mxu1  ;;  %v4287_v59 = vadd.f32 %v14161_v39, %v4223_v48  ;;  %v4348_v43 = vadd.f32 %v16262_v26, %v4284_v62 }
 0x35d   :  { %v16292_v18 = vpop.f32.mrb[85].mxu1 }
 0x35e   :  { %v14363_v16 = vpop.f32.mrb[86].mxu1  ;;  %v14162_v20 = vpop.f32.mrb[100].mxu0  ;;  %v4351_v2 = vadd.f32 %v16264_v49, %v4287_v59 }
 0x35f   :  { %v16294_v46 = vpop.f32.mrb[87].mxu1  ;;  %v14163_v53 = vpop.f32.mrb[101].mxu0 }
 0x360   :  { %v14164_v3 = vadd.f32 %v14163_v53, %v14162_v20  ;;  %v14165_v4 = vpop.f32.mrb[102].mxu0 }
 0x361   :  { %v14166_v60 = vpop.f32.mrb[103].mxu0 }
 0x362   :  { %v4292_v57 = vadd.f32 %v14164_v3, %v4228_v40  ;;  %v14167_v58 = vadd.f32 %v14166_v60, %v14165_v4 }
 0x364   :  { %v4295_v33 = vadd.f32 %v14167_v58, %v4231_v37  ;;  %v4356_v35 = vadd.f32 %v16268_v42, %v4292_v57 }
 0x366   :  { %v14168_v51 = vpop.f32.mrb[104].mxu0  ;;  %v4359_v22 = vadd.f32 %v16271_v45, %v4295_v33 }
 0x367   :  { %v14169_v31 = vpop.f32.mrb[105].mxu0 }
 0x368   :  { %v14170_v38 = vadd.f32 %v14169_v31, %v14168_v51  ;;  %v14171_v48 = vpop.f32.mrb[106].mxu0 }
 0x369   :  { %v14172_v63 = vpop.f32.mrb[107].mxu0 }
 0x36a   :  { %v4300_v26 = vadd.f32 %v14170_v38, %v4236_v8  ;;  %v14173_v13 = vadd.f32 %v14172_v63, %v14171_v48 }
 0x36c   :  { %v4303_v1 = vadd.f32 %v14173_v13, %v4239_v56  ;;  %v4364_v49 = vadd.f32 %v16276_v11, %v4300_v26 }
 0x36e   :  { %v14174_v41 = vpop.f32.mrb[108].mxu0  ;;  %v4367_v10 = vadd.f32 %v16279_v0, %v4303_v1 }
 0x36f   :  { %v14175_v40 = vpop.f32.mrb[109].mxu0 }
 0x370   :  { %v14176_v6 = vadd.f32 %v14175_v40, %v14174_v41  ;;  %v14177_v37 = vpop.f32.mrb[110].mxu0 }
 0x371   :  { %v14178_v7 = vpop.f32.mrb[111].mxu0 }
 0x372   :  { %v4308_v42 = vadd.f32 %v14176_v6, %v4244_v34 }
 0x374   :  { %v16302_v54 = vadd.f32 %v14216_v12, %v4308_v42 }
 0x376   :  { %v14236_v45 = vpop.f32.mrb[112].mxu0 }
 0x377   :  { %v14237_v15 = vpop.f32.mrb[113].mxu0 }
 0x378   :  { %v14238_v9 = vadd.f32 %v14237_v15, %v14236_v45  ;;  %v14239_v14 = vpop.f32.mrb[114].mxu0 }
 0x379   :  { %v14240_v21 = vpop.f32.mrb[115].mxu0 }
 0x37a   :  { %v4412_v50 = vadd.f32 %v14238_v9, %v4348_v43  ;;  %v14241_v8 = vadd.f32 %v14240_v21, %v14239_v14 }
 0x37c   :  { %v4476_v61 = vadd.f32 %v4475_v28, %v4412_v50  ;;  %v4415_v56 = vadd.f32 %v14241_v8, %v4351_v2 }
 0x37e   :  { %v4505_v11 = vmax.f32 %v4476_v61, 0.0  ;;  %v4479_v23 = vadd.f32 %v4478_v17, %v4415_v56  ;;  %v14242_v24 = vpop.f32.mrb[116].mxu0 }
 0x37f   :  { %v14243_v0 = vpop.f32.mrb[117].mxu0 }
 0x380   :  { %4512 = vst [vmem:[#allocation4] sm:$0xff] %v4505_v11  ;;  %v4506_v55 = vmax.f32 %v4479_v23, 0.0  ;;  %v14244_v25 = vadd.f32 %v14243_v0, %v14242_v24  ;;  %v14245_v32 = vpop.f32.mrb[118].mxu0  ;;  %v13741_v34 = vpack.c.bf16 %v4505_v11, %v4505_v11  ;;  %v14901_v24 = vld [vmem:[#allocation15 + $0x100] ss:$8 sps:$4 sm:$0xff]  }
 0x381   :  { %v14246_v12 = vpop.f32.mrb[119].mxu0 }
 0x382   :  { %4513 = vst [vmem:[#allocation4 + $0x8] sm:$0xff] %v4506_v55  ;;  %v4420_v27 = vadd.f32 %v14244_v25, %v4356_v35  ;;  %v14247_v19 = vadd.f32 %v14246_v12, %v14245_v32  ;;  %v13742_v30 = vpack.c.bf16 %v4506_v55, %v4506_v55  ;;  %4535 = vst [vmem:[#allocation5] sm:$0xf] %v13741_v34 }
 0x384   :  { %v4484_v47 = vadd.f32 %v16285_v52, %v4420_v27  ;;  %v4423_v44 = vadd.f32 %v14247_v19, %v4359_v22  ;;  %4536 = vst [vmem:[#allocation5 + $0x24] sm:$0xf] %v13742_v30 }
 0x386   :  { %v4507_v28 = vmax.f32 %v4484_v47, 0.0  ;;  %v4487_v17 = vadd.f32 %v16287_v29, %v4423_v44  ;;  %v14248_v62 = vpop.f32.mrb[120].mxu0 }
 0x387   :  { %v14249_v39 = vpop.f32.mrb[121].mxu0 }
 0x388   :  { %4514 = vst [vmem:[#allocation4 + $0x10] sm:$0xff] %v4507_v28  ;;  %v4508_v16 = vmax.f32 %v4487_v17, 0.0  ;;  %v14250_v59 = vadd.f32 %v14249_v39, %v14248_v62  ;;  %v14251_v43 = vpop.f32.mrb[122].mxu0  ;;  %v13750_v20 = vpack.c.bf16 %v4507_v28, %v4507_v28  ;;  %v14907_v17 = vld [vmem:[#allocation15 + $0x114] ss:$8 sps:$4 sm:$0xff]  }
 0x389   :  { %v4538_v2 = vld [vmem:[#allocation4 + $0x2] sm:$0xff]  ;;  %v14252_v3 = vpop.f32.mrb[123].mxu0  ;;  %v14910_v39 = vld [vmem:[#allocation15 + $0x124] ss:$8 sps:$4 sm:$0xff]  }
 0x38a   :  { %v4557_v53 = vld [vmem:[#allocation4 + $0x4] sm:$0xff]  ;;  %4515 = vst [vmem:[#allocation4 + $0x18] sm:$0xff] %v4508_v16  ;;  %v4428_v4 = vadd.f32 %v14250_v59, %v4364_v49  ;;  %v14253_v60 = vadd.f32 %v14252_v3, %v14251_v43  ;;  %v13744_v57 = vpack.c.bf16 %v4538_v2, %v4538_v2  ;;  %4592 = vst [vmem:[#allocation5 + $0xc] sm:$0xf] %v13750_v20 }
 0x38b   :  { %v13747_v52 = vpack.c.bf16 %v4557_v53, %v4557_v53  ;;  %v13751_v58 = vpack.c.bf16 %v4508_v16, %v4508_v16  ;;  %v14905_v62 = vld [vmem:[#allocation15 + $0x110] ss:$8 sps:$4 sm:$0xff]  }
 0x38c   :  { %v4492_v33 = vadd.f32 %v16292_v18, %v4428_v4  ;;  %v4431_v29 = vadd.f32 %v14253_v60, %v4367_v10  ;;  %4554 = vst [vmem:[#allocation5 + $0x4] sm:$0xf] %v13744_v57 }
 0x38d   :  { %4573 = vst [vmem:[#allocation5 + $0x8] sm:$0xf] %v13747_v52  ;;  %4593 = vst [vmem:[#allocation5 + $0x30] sm:$0xf] %v13751_v58  ;;  %v14908_v52 = vld [vmem:[#allocation15 + $0x120] ss:$8 sps:$4 sm:$0xff]  }
 0x38e   :  { %v4509_v35 = vmax.f32 %v4492_v33, 0.0  ;;  %v4495_v51 = vadd.f32 %v16294_v46, %v4431_v29  ;;  %v14254_v22 = vpop.f32.mrb[124].mxu0  ;;  %v14917_v33 = vld [vmem:[#allocation15 + $0x134] ss:$8 sps:$4 sm:$0xff]  }
 0x38f   :  { %v4521_v31 = vld [vmem:[#allocation4 + $0x10] sm:$0xf]  ;;  %v14255_v63 = vpop.f32.mrb[125].mxu0  ;;  %v4559_v13 = vld [vmem:[#allocation4 + $0x14] sm:$0xf] }
 0x390   :  { %v4539_v38 = vld [vmem:[#allocation4 + $0xa] sm:$0xff]  ;;  %v4540_v48 = vld [vmem:[#allocation4 + $0x12] sm:$0xf]  ;;  %4516 = vst [vmem:[#allocation4 + $0x20] sm:$0xff] %v4509_v35  ;;  %v4510_v1 = vmax.f32 %v4495_v51, 0.0  ;;  %v14256_v49 = vadd.f32 %v14255_v63, %v14254_v22  ;;  %v14257_v41 = vpop.f32.mrb[126].mxu0  ;;  %v13743_v18 = vpack.c.bf16 %v4521_v31, %v4521_v31  ;;  %v13749_v45 = vpack.c.bf16 %v4559_v13, %v4559_v13 }
 0x391   :  { %v4558_v26 = vld [vmem:[#allocation4 + $0xc] sm:$0xff]  ;;  %v13745_v40 = vpack.c.bf16 %v4539_v38, %v4539_v38  ;;  %v4614_v6 = vld [vmem:[#allocation4 + $0x14] sm:$0xff]  ;;  %v14258_v37 = vpop.f32.mrb[127].mxu0  ;;  %v13746_v7 = vpack.c.bf16 %v4540_v48, %v4540_v48  ;;  %v13759_v46 = vpack.c.bf16 %v4509_v35, %v4509_v35  ;;  %v14915_v35 = vld [vmem:[#allocation15 + $0x130] ss:$8 sps:$4 sm:$0xff]  }
 0x392   :  { %v4595_v10 = vld [vmem:[#allocation4 + $0x12] sm:$0xff]  ;;  %v13748_v42 = vpack.c.bf16 %v4558_v26, %v4558_v26  ;;  %4517 = vst [vmem:[#allocation4 + $0x28] sm:$0xff] %v4510_v1  ;;  %v4436_v15 = vadd.f32 %v14256_v49, %v16302_v54  ;;  %4537 = vst [vmem:[#allocation5 + $0x48] sm:$0x3] %v13743_v18  ;;  %v13756_v14 = vpack.c.bf16 %v4614_v6, %v4614_v6  ;;  %v14923_v31 = vld [vmem:[#allocation15 + $0x154] ss:$8 sps:$4 sm:$0xff]  }
 0x393   :  { %4555 = vst [vmem:[#allocation5 + $0x28] sm:$0xf] %v13745_v40  ;;  %v13753_v9 = vpack.c.bf16 %v4595_v10, %v4595_v10  ;;  %v13760_v21 = vpack.c.bf16 %v4510_v1, %v4510_v1  ;;  %4556 = vst [vmem:[#allocation5 + $0x4c] sm:$0x3] %v13746_v7  ;;  %v14920_v51 = vld [vmem:[#allocation15 + $0x144] ss:$8 sps:$4 sm:$0xff]  }
 0x394   :  { %4574 = vst [vmem:[#allocation5 + $0x2c] sm:$0xf] %v13748_v42  ;;  %4575 = vst [vmem:[#allocation5 + $0x50] sm:$0x3] %v13749_v45  ;;  %v4500_v50 = vadd.f32 %v16290_v36, %v4436_v15  ;;  %v14898_v36 = vld [vmem:[#allocation5] ss:$36 sps:$4 sm:$0xff]  }
 0x395   :  { %4649 = vst [vmem:[#allocation5 + $0x18] sm:$0xf] %v13759_v46  ;;  %4611 = vst [vmem:[#allocation5 + $0x10] sm:$0xf] %v13753_v9  ;;  %v14914_v29 = vld [vmem:[#allocation5 + $0xc] ss:$36 sps:$4 sm:$0xff]  }
 0x396   :  { %4630 = vst [vmem:[#allocation5 + $0x14] sm:$0xf] %v13756_v14  ;;  %4650 = vst [vmem:[#allocation5 + $0x3c] sm:$0xf] %v13760_v21  ;;  %v4511_v8 = vmax.f32 %v4500_v50, 0.0 }
 0x397   :  { %v4578_v61 = vld [vmem:[#allocation4 + $0x20] sm:$0xf]  ;;  %v4616_v54 = vld [vmem:[#allocation4 + $0x24] sm:$0xf]  ;;  %v14918_v22 = vld [vmem:[#allocation15 + $0x140] ss:$8 sps:$4 sm:$0xff]  }
 0x398   :  { %v4596_v56 = vld [vmem:[#allocation4 + $0x1a] sm:$0xff]  ;;  %v4597_v11 = vld [vmem:[#allocation4 + $0x22] sm:$0xf]  ;;  %4518 = vst [vmem:[#allocation4 + $0x30] sm:$0xff] %v4511_v8  ;;  %v13752_v0 = vpack.c.bf16 %v4578_v61, %v4578_v61  ;;  %v13758_v27 = vpack.c.bf16 %v4616_v54, %v4616_v54  ;;  %v14924_v63 = vld [vmem:[#allocation15 + $0x160] ss:$8 sps:$4 sm:$0xff]  }
 0x399   :  { %v4615_v23 = vld [vmem:[#allocation4 + $0x1c] sm:$0xff]  ;;  %v13754_v55 = vpack.c.bf16 %v4596_v56, %v4596_v56  ;;  %v13755_v25 = vpack.c.bf16 %v4597_v11, %v4597_v11  ;;  %v4671_v34 = vld [vmem:[#allocation4 + $0x24] sm:$0xff]  ;;  %v14926_v48 = vld [vmem:[#allocation15 + $0x164] ss:$8 sps:$4 sm:$0xff]  }
 0x39a   :  { %v4652_v32 = vld [vmem:[#allocation4 + $0x22] sm:$0xff]  ;;  %v13757_v12 = vpack.c.bf16 %v4615_v23, %v4615_v23  ;;  %v13765_v19 = vpack.c.bf16 %v4671_v34, %v4671_v34  ;;  %4594 = vst [vmem:[#allocation5 + $0x54] sm:$0x3] %v13752_v0  ;;  %4632 = vst [vmem:[#allocation5 + $0x5c] sm:$0x3] %v13758_v27 }
 0x39b   :  { %v14900_v30 = vld [vmem:[#allocation5 + $0x4] ss:$36 sps:$4 sm:$0xff]   ;;  %4612 = vst [vmem:[#allocation5 + $0x34] sm:$0xf] %v13754_v55  ;;  %4613 = vst [vmem:[#allocation5 + $0x58] sm:$0x3] %v13755_v25  ;;  %v13762_v44 = vpack.c.bf16 %v4652_v32, %v4652_v32 }
 0x39c   :  { %v4700_v47 = vld [vmem:[#allocation5 + $0x48] sm:$0x33]  ;;  %4631 = vst [vmem:[#allocation5 + $0x38] sm:$0xf] %v13757_v12  ;;  %4687 = vst [vmem:[#allocation5 + $0x20] sm:$0xf] %v13765_v19  ;;  %5691 = vmatprep.mubr.bf16.mxu0 %v14900_v30 }
 0x39d   :  { %v12607_v28 = vcombine.high %v4700_v47, %v4700_v47  ;;  %4668 = vst [vmem:[#allocation5 + $0x1c] sm:$0xf] %v13762_v44  ;;  %5692 = vmatmul.mubr.bf16.vlgmr.msra.gmra.mrb[128].mxu0 %v14898_v36  ;;  %v12606_v58 = vcombine.low %v4700_v47, %v4700_v47  ;;  %v14921_v38 = vld [vmem:[#allocation15 + $0x150] ss:$8 sps:$4 sm:$0xff]   ;;  %v14929_v26 = vld [vmem:[#allocation15 + $0x174] ss:$8 sps:$4 sm:$0xff]  }
 0x39e   :  { %5709 = vmatpush1.bf16.msra.mxu0 %v14901_v24  ;;  %v14927_v13 = vld [vmem:[#allocation15 + $0x170] ss:$8 sps:$4 sm:$0xff]   ;;  %v14932_v1 = vld [vmem:[#allocation15 + $0x184] ss:$8 sps:$4 sm:$0xff]   ;;  %v14930_v49 = vld [vmem:[#allocation15 + $0x180] ss:$8 sps:$4 sm:$0xff]  }
 0x39f   :  { %5699 = vmatprep.mubr.bf16.mxu0 %v12607_v28  ;;  %v4635_v16 = vld [vmem:[#allocation4 + $0x30] sm:$0xf]  ;;  %5710 = vmatprep.subr.bf16.mxu0 %v14907_v17  ;;  %v4673_v4 = vld [vmem:[#allocation4 + $0x34] sm:$0xf]  ;;  %v14935_v41 = vld [vmem:[#allocation15 + $0x194] ss:$8 sps:$4 sm:$0xff]  }
 0x3a0   :  { %v4653_v59 = vld [vmem:[#allocation4 + $0x2a] sm:$0xff]  ;;  %v4654_v43 = vld [vmem:[#allocation4 + $0x32] sm:$0xf]  ;;  %v13761_v53 = vpack.c.bf16 %v4635_v16, %v4635_v16  ;;  %v13767_v57 = vpack.c.bf16 %v4673_v4, %v4673_v4  ;;  %v14933_v40 = vld [vmem:[#allocation15 + $0x190] ss:$8 sps:$4 sm:$0xff]  }
 0x3a1   :  { %v4672_v20 = vld [vmem:[#allocation4 + $0x2c] sm:$0xff]  ;;  %v13763_v2 = vpack.c.bf16 %v4653_v59, %v4653_v59  ;;  %v13764_v3 = vpack.c.bf16 %v4654_v43, %v4654_v43  ;;  %v14941_v6 = vld [vmem:[#allocation15 + $0x1b4] ss:$8 sps:$4 sm:$0xff]   ;;  %v14939_v37 = vld [vmem:[#allocation15 + $0x1b0] ss:$8 sps:$4 sm:$0xff]  }
 0x3a2   :  { %v13766_v60 = vpack.c.bf16 %v4672_v20, %v4672_v20  ;;  %5711 = vmatpush1.bf16.msra.mxu0 %v14905_v62  ;;  %4651 = vst [vmem:[#allocation5 + $0x60] sm:$0x3] %v13761_v53  ;;  %4689 = vst [vmem:[#allocation5 + $0x68] sm:$0x3] %v13767_v57  ;;  %v14938_v18 = vld [vmem:[#allocation15 + $0x1a4] ss:$8 sps:$4 sm:$0xff]  }
 0x3a3   :  { %4669 = vst [vmem:[#allocation5 + $0x40] sm:$0xf] %v13763_v2  ;;  %4670 = vst [vmem:[#allocation5 + $0x64] sm:$0x3] %v13764_v3  ;;  %5712 = vmatprep.subr.bf16.mxu0 %v14910_v39  ;;  %v14936_v10 = vld [vmem:[#allocation15 + $0x1a0] ss:$8 sps:$4 sm:$0xff]  }
 0x3a4   :  { %4688 = vst [vmem:[#allocation5 + $0x44] sm:$0xf] %v13766_v60  ;;  %v14944_v7 = vld [vmem:[#allocation15 + $0x1c4] ss:$8 sps:$4 sm:$0xff]   ;;  %v14942_v42 = vld [vmem:[#allocation15 + $0x1c0] ss:$8 sps:$4 sm:$0xff]  }
 0x3a5   :  { %5700 = vmatmul.mubr.bf16.gmra.mrb[132].mxu0 %v12606_v58  ;;  %v14947_v45 = vld [vmem:[#allocation15 + $0x1d4] ss:$8 sps:$4 sm:$0xff]   ;;  %v14945_v46 = vld [vmem:[#allocation15 + $0x1d0] ss:$8 sps:$4 sm:$0xff]   ;;  %v14950_v15 = vld [vmem:[#allocation15 + $0x1e4] ss:$8 sps:$4 sm:$0xff]  }
 0x3a6   :  { %5713 = vmatpush1.bf16.msra.mxu0 %v14908_v52  ;;  %5740 = vmatprep.mubr.bf16.mxu0 %v14914_v29  ;;  %v14948_v9 = vld [vmem:[#allocation15 + $0x1e0] ss:$8 sps:$4 sm:$0xff]   ;;  %v14953_v14 = vld [vmem:[#allocation15 + $0x1f4] ss:$8 sps:$4 sm:$0xff]   ;;  %v14951_v21 = vld [vmem:[#allocation15 + $0x1f0] ss:$8 sps:$4 sm:$0xff]  }
 0x3a7   :  { %5714 = vmatprep.subr.bf16.mxu0 %v14917_v33  ;;  %v14956_v50 = vld [vmem:[#allocation15 + $0x204] ss:$8 sps:$4 sm:$0xff]   ;;  %v4701_v8 = vld [vmem:[#allocation5 + $0x50] sm:$0x33]  ;;  %v14912_v56 = vld [vmem:[#allocation5 + $0x8] ss:$36 sps:$4 sm:$0xff]  }
 0x3a8   :  { %v14954_v61 = vld [vmem:[#allocation15 + $0x200] ss:$8 sps:$4 sm:$0xff]   ;;  %v14960_v11 = vld [vmem:[#allocation15 + $0x214] ss:$8 sps:$4 sm:$0xff]   ;;  %v12609_v23 = vcombine.high %v4701_v8, %v4701_v8  ;;  %v14958_v54 = vld [vmem:[#allocation15 + $0x210] ss:$8 sps:$4 sm:$0xff]   ;;  %v12608_v55 = vcombine.low %v4701_v8, %v4701_v8 }
 0x3a9   :  { %v14964_v24 = vld [vmem:[#allocation15 + $0x224] ss:$8 sps:$4 sm:$0xff]   ;;  %v14962_v0 = vld [vmem:[#allocation15 + $0x220] ss:$8 sps:$4 sm:$0xff]   ;;  %v14970_v25 = vld [vmem:[#allocation15 + $0x234] ss:$8 sps:$4 sm:$0xff]  }
 0x3aa   :  { %5715 = vmatpush1.bf16.msra.mxu0 %v14915_v35  ;;  %v14967_v32 = vld [vmem:[#allocation5 + $0x14] ss:$36 sps:$4 sm:$0xff]   ;;  %v14968_v34 = vld [vmem:[#allocation15 + $0x230] ss:$8 sps:$4 sm:$0xff]   ;;  %v14976_v19 = vld [vmem:[#allocation15 + $0x254] ss:$8 sps:$4 sm:$0xff]  }
 0x3ab   :  { %5716 = vmatprep.subr.bf16.mxu0 %v14920_v51  ;;  %v14973_v12 = vld [vmem:[#allocation15 + $0x244] ss:$8 sps:$4 sm:$0xff]   ;;  %v14971_v27 = vld [vmem:[#allocation15 + $0x240] ss:$8 sps:$4 sm:$0xff]   ;;  %v14974_v36 = vld [vmem:[#allocation15 + $0x250] ss:$8 sps:$4 sm:$0xff]  }
 0x3ac   :  { %v14979_v30 = vld [vmem:[#allocation15 + $0x264] ss:$8 sps:$4 sm:$0xff]   ;;  %v14977_v47 = vld [vmem:[#allocation15 + $0x260] ss:$8 sps:$4 sm:$0xff]   ;;  %v14982_v44 = vld [vmem:[#allocation15 + $0x274] ss:$8 sps:$4 sm:$0xff]  }
 0x3ad   :  { %v14980_v28 = vld [vmem:[#allocation15 + $0x270] ss:$8 sps:$4 sm:$0xff]   ;;  %v14985_v17 = vld [vmem:[#allocation15 + $0x284] ss:$8 sps:$4 sm:$0xff]   ;;  %v14983_v62 = vld [vmem:[#allocation15 + $0x280] ss:$8 sps:$4 sm:$0xff]  }
 0x3ae   :  { %5717 = vmatpush1.bf16.msra.mxu0 %v14918_v22  ;;  %v14988_v39 = vld [vmem:[#allocation15 + $0x294] ss:$8 sps:$4 sm:$0xff]   ;;  %v14986_v16 = vld [vmem:[#allocation15 + $0x290] ss:$8 sps:$4 sm:$0xff]   ;;  %v14991_v59 = vld [vmem:[#allocation15 + $0x2a4] ss:$8 sps:$4 sm:$0xff]  }
 0x3af   :  { %5718 = vmatprep.subr.bf16.mxu0 %v14923_v31  ;;  %v14989_v43 = vld [vmem:[#allocation15 + $0x2a0] ss:$8 sps:$4 sm:$0xff]   ;;  %v14994_v20 = vld [vmem:[#allocation15 + $0x2b4] ss:$8 sps:$4 sm:$0xff]   ;;  %v14992_v53 = vld [vmem:[#allocation15 + $0x2b0] ss:$8 sps:$4 sm:$0xff]  }
 0x3b0   :  { %v6099_v2 = vld [vmem:[#allocation18 + $0x400] sm:$0xff]  ;;  %v15000_v31 = vld [vmem:[#allocation15 + $0x2d4] ss:$8 sps:$4 sm:$0xff]  }
 0x3b1   :  { %v6103_v3 = vld [vmem:[#allocation18 + $0x420] sm:$0xff] }
 0x3b2   :  { %5719 = vmatpush1.bf16.msra.mxu0 %v14921_v38  ;;  %v14997_v4 = vld [vmem:[#allocation15 + $0x2c4] ss:$8 sps:$4 sm:$0xff]   ;;  %v12893_v60 = vcombine.low %v6099_v2, %v6103_v3  ;;  %v12894_v57 = vcombine.high %v6099_v2, %v6103_v3  ;;  %v14995_v51 = vld [vmem:[#allocation15 + $0x2c0] ss:$8 sps:$4 sm:$0xff]   ;;  %v15045_v3 = vld [vmem:[#allocation15 + $0x3b0] ss:$8 sps:$4 sm:$0xff]  }
 0x3b3   :  { %5720 = vmatprep.subr.bf16.mxu0 %v14926_v48  ;;  %v6107_v52 = vld [vmem:[#allocation18 + $0x440] sm:$0xff] }
 0x3b4   :  { %v6111_v58 = vld [vmem:[#allocation18 + $0x460] sm:$0xff]  ;;  %9184 = vmatprep.subr.bf16.mxu1 %v12894_v57  ;;  %v15053_v57 = vld [vmem:[#allocation15 + $0x3d4] ss:$8 sps:$4 sm:$0xff]  }
 0x3b5   :  { %v12902_v33 = vcombine.high %v6107_v52, %v6111_v58  ;;  %v6115_v29 = vld [vmem:[#allocation18 + $0x480] sm:$0xff]  ;;  %9185 = vmatpush1.bf16.msra.mxu1 %v12893_v60  ;;  %v12901_v22 = vcombine.low %v6107_v52, %v6111_v58  ;;  %v15051_v52 = vld [vmem:[#allocation15 + $0x3d0] ss:$8 sps:$4 sm:$0xff]  }
 0x3b6   :  { %5721 = vmatpush1.bf16.msra.mxu0 %v14924_v63  ;;  %v6119_v35 = vld [vmem:[#allocation18 + $0x4a0] sm:$0xff] }
 0x3b7   :  { %5722 = vmatprep.subr.bf16.mxu0 %v14929_v26  ;;  %9186 = vmatprep.subr.bf16.mxu1 %v12902_v33  ;;  %v12910_v38 = vcombine.high %v6115_v29, %v6119_v35  ;;  %v6123_v48 = vld [vmem:[#allocation18 + $0x4c0] sm:$0xff]  ;;  %v14998_v26 = vld [vmem:[#allocation15 + $0x2d0] ss:$8 sps:$4 sm:$0xff]  }
 0x3b8   :  { %v6127_v63 = vld [vmem:[#allocation18 + $0x4e0] sm:$0xff] }
 0x3b9   :  { %9187 = vmatpush1.bf16.msra.mxu1 %v12901_v22  ;;  %v15007_v8 = vld [vmem:[#allocation15 + $0x300] ss:$8 sps:$4 sm:$0xff]   ;;  %v15056_v58 = vld [vmem:[#allocation15 + $0x3e4] ss:$8 sps:$4 sm:$0xff]  }
 0x3ba   :  { %5723 = vmatpush1.bf16.msra.mxu0 %v14927_v13  ;;  %v12909_v13 = vcombine.low %v6115_v29, %v6119_v35  ;;  %9188 = vmatprep.subr.bf16.mxu1 %v12910_v38  ;;  %v15042_v2 = vld [vmem:[#allocation15 + $0x3a0] ss:$8 sps:$4 sm:$0xff]   ;;  %v15059_v29 = vld [vmem:[#allocation15 + $0x3f4] ss:$8 sps:$4 sm:$0xff]   ;;  %v15057_v35 = vld [vmem:[#allocation15 + $0x3f0] ss:$8 sps:$4 sm:$0xff]  }
 0x3bb   :  { %5724 = vmatprep.subr.bf16.mxu0 %v14932_v1  ;;  %v15003_v1 = vld [vmem:[#allocation15 + $0x2e4] ss:$8 sps:$4 sm:$0xff]   ;;  %v15048_v60 = vld [vmem:[#allocation15 + $0x3c0] ss:$8 sps:$4 sm:$0xff]  }
 0x3bc   :  { %v15054_v33 = vld [vmem:[#allocation15 + $0x3e0] ss:$8 sps:$4 sm:$0xff]   ;;  %v4703_v22 = vld [vmem:[#allocation5 + $0x60] sm:$0x33] }
 0x3bd   :  { %9189 = vmatpush1.bf16.msra.mxu1 %v12909_v13  ;;  %v15018_v38 = vld [vmem:[#allocation5 + $0x18] ss:$36 sps:$4 sm:$0xff]  }
 0x3be   :  { %5725 = vmatpush1.bf16.msra.mxu0 %v14930_v49  ;;  %v12918_v49 = vcombine.high %v6123_v48, %v6127_v63  ;;  %v15070_v13 = vld [vmem:[#allocation15 + $0x424] ss:$8 sps:$4 sm:$0xff]  }
 0x3bf   :  { %5726 = vmatprep.subr.bf16.mxu0 %v14935_v41  ;;  %v6131_v41 = vld [vmem:[#allocation18 + $0x500] sm:$0xff] }
 0x3c0   :  { %9190 = vmatprep.subr.bf16.mxu1 %v12918_v49  ;;  %v12612_v49 = vcombine.low %v4703_v22, %v4703_v22 }
 0x3c2   :  { %5727 = vmatpush1.bf16.msra.mxu0 %v14933_v40  ;;  %v6135_v40 = vld [vmem:[#allocation18 + $0x520] sm:$0xff] }
 0x3c3   :  { %5728 = vmatprep.subr.bf16.mxu0 %v14938_v18  ;;  %v15001_v18 = vld [vmem:[#allocation15 + $0x2e0] ss:$8 sps:$4 sm:$0xff]  }
 0x3c6   :  { %5729 = vmatpush1.bf16.msra.mxu0 %v14936_v10  ;;  %v12917_v10 = vcombine.low %v6123_v48, %v6127_v63  ;;  %v15066_v48 = vld [vmem:[#allocation15 + $0x414] ss:$8 sps:$4 sm:$0xff]   ;;  %v12613_v63 = vcombine.high %v4703_v22, %v4703_v22  ;;  %v6047_v22 = vld [vmem:[#allocation18 + $0x260] sm:$0xff] }
 0x3c7   :  { %5730 = vmatprep.subr.bf16.mxu0 %v14941_v6  ;;  %v15006_v6 = vld [vmem:[#allocation15 + $0x2f4] ss:$8 sps:$4 sm:$0xff]  }
 0x3c8   :  { %9191 = vmatpush1.bf16.msra.mxu1 %v12917_v10  ;;  %v15074_v10 = vld [vmem:[#allocation15 + $0x440] ss:$8 sps:$4 sm:$0xff]  }
 0x3ca   :  { %5731 = vmatpush1.bf16.msra.mxu0 %v14939_v37  ;;  %v12926_v37 = vcombine.high %v6131_v41, %v6135_v40 }
 0x3cb   :  { %5732 = vmatprep.subr.bf16.mxu0 %v14944_v7  ;;  %v6139_v7 = vld [vmem:[#allocation18 + $0x540] sm:$0xff] }
 0x3cc   :  { %9192 = vmatprep.subr.bf16.mxu1 %v12926_v37  ;;  %v15077_v37 = vld [vmem:[#allocation15 + $0x450] ss:$8 sps:$4 sm:$0xff]  }
 0x3ce   :  { %5733 = vmatpush1.bf16.msra.mxu0 %v14942_v42  ;;  %v6143_v42 = vld [vmem:[#allocation18 + $0x560] sm:$0xff] }
 0x3cf   :  { %5734 = vmatprep.subr.bf16.mxu0 %v14947_v45  ;;  %v15004_v45 = vld [vmem:[#allocation15 + $0x2f0] ss:$8 sps:$4 sm:$0xff]  }
 0x3d2   :  { %5735 = vmatpush1.bf16.msra.mxu0 %v14945_v46  ;;  %v12925_v46 = vcombine.low %v6131_v41, %v6135_v40  ;;  %v15073_v41 = vld [vmem:[#allocation15 + $0x434] ss:$8 sps:$4 sm:$0xff]   ;;  %v15071_v40 = vld [vmem:[#allocation15 + $0x430] ss:$8 sps:$4 sm:$0xff]  }
 0x3d3   :  { %5736 = vmatprep.subr.bf16.mxu0 %v14950_v15  ;;  %v15009_v15 = vld [vmem:[#allocation15 + $0x304] ss:$8 sps:$4 sm:$0xff]  }
 0x3d4   :  { %9193 = vmatpush1.bf16.msra.mxu1 %v12925_v46  ;;  %v5971_v46 = vld [vmem:[#allocation18] sm:$0xff] }
 0x3d6   :  { %5737 = vmatpush1.bf16.msra.mxu0 %v14948_v9  ;;  %v12934_v9 = vcombine.high %v6139_v7, %v6143_v42 }
 0x3d7   :  { %5738 = vmatprep.subr.bf16.mxu0 %v14953_v14  ;;  %v4702_v14 = vld [vmem:[#allocation5 + $0x58] sm:$0x33] }
 0x3d8   :  { %9194 = vmatprep.subr.bf16.mxu1 %v12934_v9  ;;  %v15083_v9 = vld [vmem:[#allocation15 + $0x470] ss:$8 sps:$4 sm:$0xff]  }
 0x3da   :  { %5739 = vmatpush1.bf16.msra.mxu0 %v14951_v21  ;;  %v6147_v21 = vld [vmem:[#allocation18 + $0x580] sm:$0xff] }
 0x3db   :  { %5757 = vmatprep.subr.bf16.mxu0 %v14956_v50  ;;  %v6151_v50 = vld [vmem:[#allocation18 + $0x5a0] sm:$0xff] }
 0x3dd   :  { %5741 = vmatmul.mubr.bf16.vlgmr.msra.gmra.mrb[128].mxu0 %v14912_v56  ;;  %v15013_v56 = vld [vmem:[#allocation15 + $0x314] ss:$8 sps:$4 sm:$0xff]  }
 0x3de   :  { %5748 = vmatprep.mubr.bf16.mxu0 %v12609_v23  ;;  %5758 = vmatpush1.bf16.msra.mxu0 %v14954_v61  ;;  %v14965_v61 = vld [vmem:[#allocation5 + $0x10] ss:$36 sps:$4 sm:$0xff]   ;;  %v12611_v23 = vcombine.high %v4702_v14, %v4702_v14 }
 0x3df   :  { %5759 = vmatprep.subr.bf16.mxu0 %v14960_v11  ;;  %v12933_v11 = vcombine.low %v6139_v7, %v6143_v42  ;;  %v15082_v7 = vld [vmem:[#allocation15 + $0x464] ss:$8 sps:$4 sm:$0xff]   ;;  %v15080_v42 = vld [vmem:[#allocation15 + $0x460] ss:$8 sps:$4 sm:$0xff]  }
 0x3e1   :  { %9195 = vmatpush1.bf16.msra.mxu1 %v12933_v11  ;;  %v5987_v11 = vld [vmem:[#allocation18 + $0x80] sm:$0xff] }
 0x3e2   :  { %5760 = vmatpush1.bf16.msra.mxu0 %v14958_v54  ;;  %v12942_v54 = vcombine.high %v6147_v21, %v6151_v50 }
 0x3e3   :  { %5761 = vmatprep.subr.bf16.mxu0 %v14964_v24  ;;  %v15011_v24 = vld [vmem:[#allocation15 + $0x310] ss:$8 sps:$4 sm:$0xff]  }
 0x3e4   :  { %9196 = vmatprep.subr.bf16.mxu1 %v12942_v54 }
 0x3e5   :  { %5749 = vmatmul.mubr.bf16.gmra.mrb[132].mxu0 %v12608_v55  ;;  %v12941_v55 = vcombine.low %v6147_v21, %v6151_v50  ;;  %v5979_v21 = vld [vmem:[#allocation18 + $0x40] sm:$0xff] }
 0x3e6   :  { %5762 = vmatpush1.bf16.msra.mxu0 %v14962_v0  ;;  %5789 = vmatprep.mubr.bf16.mxu0 %v14967_v32  ;;  %v15017_v0 = vld [vmem:[#allocation15 + $0x324] ss:$8 sps:$4 sm:$0xff]   ;;  %v12610_v32 = vcombine.low %v4702_v14, %v4702_v14 }
 0x3e7   :  { %5763 = vmatprep.subr.bf16.mxu0 %v14970_v25  ;;  %v15015_v25 = vld [vmem:[#allocation15 + $0x320] ss:$8 sps:$4 sm:$0xff]   ;;  %9197 = vmatpush1.bf16.msra.mxu1 %v12941_v55 }
 0x3e8   :  { %v5983_v50 = vld [vmem:[#allocation18 + $0x60] sm:$0xff] }
 0x3e9   :  { %v12773_v54 = vcombine.low %v5979_v21, %v5983_v50  ;;  %v5999_v55 = vld [vmem:[#allocation18 + $0xe0] sm:$0xff] }
 0x3ea   :  { %5764 = vmatpush1.bf16.msra.mxu0 %v14968_v34  ;;  %v15023_v34 = vld [vmem:[#allocation15 + $0x334] ss:$8 sps:$4 sm:$0xff]  }
 0x3eb   :  { %5765 = vmatprep.subr.bf16.mxu0 %v14973_v12  ;;  %v15020_v12 = vld [vmem:[#allocation5 + $0x1c] ss:$36 sps:$4 sm:$0xff]  }
 0x3ee   :  { %5766 = vmatpush1.bf16.msra.mxu0 %v14971_v27  ;;  %v15021_v27 = vld [vmem:[#allocation15 + $0x330] ss:$8 sps:$4 sm:$0xff]  }
 0x3ef   :  { %5767 = vmatprep.subr.bf16.mxu0 %v14976_v19  ;;  %v15026_v19 = vld [vmem:[#allocation15 + $0x344] ss:$8 sps:$4 sm:$0xff]  }
 0x3f2   :  { %5768 = vmatpush1.bf16.msra.mxu0 %v14974_v36  ;;  %v15024_v36 = vld [vmem:[#allocation15 + $0x340] ss:$8 sps:$4 sm:$0xff]  }
 0x3f3   :  { %5769 = vmatprep.subr.bf16.mxu0 %v14979_v30  ;;  %v15029_v30 = vld [vmem:[#allocation15 + $0x354] ss:$8 sps:$4 sm:$0xff]  }
 0x3f6   :  { %5770 = vmatpush1.bf16.msra.mxu0 %v14977_v47  ;;  %v15027_v47 = vld [vmem:[#allocation15 + $0x350] ss:$8 sps:$4 sm:$0xff]  }
 0x3f7   :  { %5771 = vmatprep.subr.bf16.mxu0 %v14982_v44  ;;  %v15032_v44 = vld [vmem:[#allocation15 + $0x364] ss:$8 sps:$4 sm:$0xff]  }
 0x3fa   :  { %5772 = vmatpush1.bf16.msra.mxu0 %v14980_v28  ;;  %v15030_v28 = vld [vmem:[#allocation15 + $0x360] ss:$8 sps:$4 sm:$0xff]  }
 0x3fb   :  { %5773 = vmatprep.subr.bf16.mxu0 %v14985_v17  ;;  %v15035_v17 = vld [vmem:[#allocation15 + $0x374] ss:$8 sps:$4 sm:$0xff]  }
 0x3fe   :  { %5774 = vmatpush1.bf16.msra.mxu0 %v14983_v62  ;;  %v15033_v62 = vld [vmem:[#allocation15 + $0x370] ss:$8 sps:$4 sm:$0xff]  }
 0x3ff   :  { %5775 = vmatprep.subr.bf16.mxu0 %v14988_v39  ;;  %v15038_v39 = vld [vmem:[#allocation15 + $0x384] ss:$8 sps:$4 sm:$0xff]  }
 0x402   :  { %5776 = vmatpush1.bf16.msra.mxu0 %v14986_v16  ;;  %v15036_v16 = vld [vmem:[#allocation15 + $0x380] ss:$8 sps:$4 sm:$0xff]  }
 0x403   :  { %5777 = vmatprep.subr.bf16.mxu0 %v14991_v59  ;;  %v15041_v59 = vld [vmem:[#allocation15 + $0x394] ss:$8 sps:$4 sm:$0xff]  }
 0x406   :  { %5778 = vmatpush1.bf16.msra.mxu0 %v14989_v43  ;;  %v15039_v43 = vld [vmem:[#allocation15 + $0x390] ss:$8 sps:$4 sm:$0xff]  }
 0x407   :  { %5779 = vmatprep.subr.bf16.mxu0 %v14994_v20  ;;  %v15044_v20 = vld [vmem:[#allocation15 + $0x3a4] ss:$8 sps:$4 sm:$0xff]  }
 0x40a   :  { %5780 = vmatpush1.bf16.msra.mxu0 %v14992_v53  ;;  %v15047_v53 = vld [vmem:[#allocation15 + $0x3b4] ss:$8 sps:$4 sm:$0xff]  }
 0x40b   :  { %5781 = vmatprep.subr.bf16.mxu0 %v14997_v4  ;;  %v15050_v4 = vld [vmem:[#allocation15 + $0x3c4] ss:$8 sps:$4 sm:$0xff]  }
 0x40e   :  { %5782 = vmatpush1.bf16.msra.mxu0 %v14995_v51  ;;  %v15062_v51 = vld [vmem:[#allocation15 + $0x404] ss:$8 sps:$4 sm:$0xff]  }
 0x40f   :  { %5783 = vmatprep.subr.bf16.mxu0 %v15000_v31  ;;  %v15060_v31 = vld [vmem:[#allocation15 + $0x400] ss:$8 sps:$4 sm:$0xff]  }
 0x412   :  { %5784 = vmatpush1.bf16.msra.mxu0 %v14998_v26  ;;  %v15064_v26 = vld [vmem:[#allocation15 + $0x410] ss:$8 sps:$4 sm:$0xff]  }
 0x413   :  { %5785 = vmatprep.subr.bf16.mxu0 %v15003_v1  ;;  %v15068_v1 = vld [vmem:[#allocation15 + $0x420] ss:$8 sps:$4 sm:$0xff]  }
 0x416   :  { %5786 = vmatpush1.bf16.msra.mxu0 %v15001_v18  ;;  %v15076_v18 = vld [vmem:[#allocation15 + $0x444] ss:$8 sps:$4 sm:$0xff]  }
 0x417   :  { %5787 = vmatprep.subr.bf16.mxu0 %v15006_v6  ;;  %v15079_v6 = vld [vmem:[#allocation15 + $0x454] ss:$8 sps:$4 sm:$0xff]  }
 0x41a   :  { %5788 = vmatpush1.bf16.msra.mxu0 %v15004_v45  ;;  %v15085_v45 = vld [vmem:[#allocation15 + $0x474] ss:$8 sps:$4 sm:$0xff]  }
 0x41b   :  { %5806 = vmatprep.subr.bf16.mxu0 %v15009_v15  ;;  %v5975_v15 = vld [vmem:[#allocation18 + $0x20] sm:$0xff] }
 0x41c   :  { %v12766_v14 = vcombine.high %v5971_v46, %v5975_v15 }
 0x41d   :  { %5790 = vmatmul.mubr.bf16.vlgmr.msra.gmra.mrb[128].mxu0 %v14965_v61  ;;  %v15086_v61 = vld [vmem:[#allocation5 + $0x20] ss:$36 sps:$4 sm:$0xff]  }
 0x41e   :  { %5797 = vmatprep.mubr.bf16.mxu0 %v12611_v23  ;;  %5807 = vmatpush1.bf16.msra.mxu0 %v15007_v8  ;;  %v12765_v8 = vcombine.low %v5971_v46, %v5975_v15  ;;  %v5991_v23 = vld [vmem:[#allocation18 + $0xa0] sm:$0xff] }
 0x41f   :  { %5808 = vmatprep.subr.bf16.mxu0 %v15013_v56  ;;  %v12774_v56 = vcombine.high %v5979_v21, %v5983_v50  ;;  %v6067_v21 = vld [vmem:[#allocation18 + $0x300] sm:$0xff] }
 0x422   :  { %5809 = vmatpush1.bf16.msra.mxu0 %v15011_v24  ;;  %v12782_v24 = vcombine.high %v5987_v11, %v5991_v23 }
 0x423   :  { %5810 = vmatprep.subr.bf16.mxu0 %v15017_v0  ;;  %v5995_v0 = vld [vmem:[#allocation18 + $0xc0] sm:$0xff] }
 0x425   :  { %5798 = vmatmul.mubr.bf16.gmra.mrb[132].mxu0 %v12610_v32  ;;  %v15087_v32 = vld [vmem:[#allocation5 + $0x68] ss:$0 sps:$4 sm:$0x33]  }
 0x426   :  { %5811 = vmatpush1.bf16.msra.mxu0 %v15015_v25  ;;  %5838 = vmatprep.mubr.bf16.mxu0 %v15020_v12  ;;  %v12781_v25 = vcombine.low %v5987_v11, %v5991_v23  ;;  %v6003_v12 = vld [vmem:[#allocation18 + $0x100] sm:$0xff] }
 0x427   :  { %5812 = vmatprep.subr.bf16.mxu0 %v15023_v34  ;;  %v12790_v34 = vcombine.high %v5995_v0, %v5999_v55 }
 0x42a   :  { %5813 = vmatpush1.bf16.msra.mxu0 %v15021_v27  ;;  %v6007_v27 = vld [vmem:[#allocation18 + $0x120] sm:$0xff] }
 0x42b   :  { %5814 = vmatprep.subr.bf16.mxu0 %v15026_v19  ;;  %v12789_v19 = vcombine.low %v5995_v0, %v5999_v55  ;;  %v6075_v0 = vld [vmem:[#allocation18 + $0x340] sm:$0xff] }
 0x42c   :  { %v6079_v55 = vld [vmem:[#allocation18 + $0x360] sm:$0xff] }
 0x42e   :  { %5815 = vmatpush1.bf16.msra.mxu0 %v15024_v36  ;;  %v12798_v36 = vcombine.high %v6003_v12, %v6007_v27 }
 0x42f   :  { %5816 = vmatprep.subr.bf16.mxu0 %v15029_v30  ;;  %v6011_v30 = vld [vmem:[#allocation18 + $0x140] sm:$0xff] }
 0x432   :  { %5817 = vmatpush1.bf16.msra.mxu0 %v15027_v47  ;;  %v12797_v47 = vcombine.low %v6003_v12, %v6007_v27  ;;  %v12870_v27 = vcombine.high %v6075_v0, %v6079_v55 }
 0x433   :  { %5818 = vmatprep.subr.bf16.mxu0 %v15032_v44 }
 0x436   :  { %5819 = vmatpush1.bf16.msra.mxu0 %v15030_v28  ;;  %v6019_v28 = vld [vmem:[#allocation18 + $0x180] sm:$0xff] }
 0x437   :  { %5820 = vmatprep.subr.bf16.mxu0 %v15035_v17  ;;  %v6023_v17 = vld [vmem:[#allocation18 + $0x1a0] sm:$0xff] }
 0x43a   :  { %5821 = vmatpush1.bf16.msra.mxu0 %v15033_v62 }
 0x43b   :  { %5822 = vmatprep.subr.bf16.mxu0 %v15038_v39  ;;  %v12814_v39 = vcombine.high %v6019_v28, %v6023_v17 }
 0x43e   :  { %5823 = vmatpush1.bf16.msra.mxu0 %v15036_v16  ;;  %v6027_v16 = vld [vmem:[#allocation18 + $0x1c0] sm:$0xff] }
 0x43f   :  { %5824 = vmatprep.subr.bf16.mxu0 %v15041_v59  ;;  %v6031_v59 = vld [vmem:[#allocation18 + $0x1e0] sm:$0xff] }
 0x442   :  { %5825 = vmatpush1.bf16.msra.mxu0 %v15039_v43  ;;  %v12813_v43 = vcombine.low %v6019_v28, %v6023_v17 }
 0x443   :  { %5826 = vmatprep.subr.bf16.mxu0 %v15044_v20  ;;  %v12822_v20 = vcombine.high %v6027_v16, %v6031_v59 }
 0x446   :  { %5827 = vmatpush1.bf16.msra.mxu0 %v15042_v2  ;;  %v12821_v2 = vcombine.low %v6027_v16, %v6031_v59  ;;  %v6095_v16 = vld [vmem:[#allocation18 + $0x3e0] sm:$0xff]  ;;  %v16312_v59 = vld [vmem:[#allocation18 + $0x10] sm:$0xff] }
 0x447   :  { %5828 = vmatprep.subr.bf16.mxu0 %v15047_v53  ;;  %v6155_v53 = vld [vmem:[#allocation18 + $0x5c0] sm:$0xff] }
 0x44a   :  { %5829 = vmatpush1.bf16.msra.mxu0 %v15045_v3  ;;  %v6159_v3 = vld [vmem:[#allocation18 + $0x5e0] sm:$0xff] }
 0x44b   :  { %5830 = vmatprep.subr.bf16.mxu0 %v15050_v4  ;;  %v12949_v4 = vcombine.low %v6155_v53, %v6159_v3 }
 0x44e   :  { %5831 = vmatpush1.bf16.msra.mxu0 %v15048_v60  ;;  %v12950_v60 = vcombine.high %v6155_v53, %v6159_v3 }
 0x44f   :  { %5832 = vmatprep.subr.bf16.mxu0 %v15053_v57  ;;  %v6035_v57 = vld [vmem:[#allocation18 + $0x200] sm:$0xff] }
 0x450   :  { %9198 = vmatprep.subr.bf16.mxu1 %v12950_v60  ;;  %v16320_v60 = vld [vmem:[#allocation18 + $0x820] sm:$0xff] }
 0x451   :  { %9199 = vmatpush1.bf16.msra.mxu1 %v12949_v4  ;;  %v16318_v4 = vld [vmem:[#allocation18 + $0x800] sm:$0xff] }
 0x452   :  { %5833 = vmatpush1.bf16.msra.mxu0 %v15051_v52  ;;  %v6039_v52 = vld [vmem:[#allocation18 + $0x220] sm:$0xff] }
 0x453   :  { %5834 = vmatprep.subr.bf16.mxu0 %v15056_v58  ;;  %v6163_v58 = vld [vmem:[#allocation18 + $0x600] sm:$0xff] }
 0x456   :  { %5835 = vmatpush1.bf16.msra.mxu0 %v15054_v33  ;;  %v12829_v33 = vcombine.low %v6035_v57, %v6039_v52 }
 0x457   :  { %5836 = vmatprep.subr.bf16.mxu0 %v15059_v29  ;;  %v12830_v29 = vcombine.high %v6035_v57, %v6039_v52 }
 0x45a   :  { %5837 = vmatpush1.bf16.msra.mxu0 %v15057_v35  ;;  %v6167_v35 = vld [vmem:[#allocation18 + $0x620] sm:$0xff] }
 0x45b   :  { %5855 = vmatprep.subr.bf16.mxu0 %v15062_v51  ;;  %v6043_v51 = vld [vmem:[#allocation18 + $0x240] sm:$0xff] }
 0x45d   :  { %5839 = vmatmul.mubr.bf16.vlgmr.msra.gmra.mrb[128].mxu0 %v15018_v38  ;;  %v12958_v38 = vcombine.high %v6163_v58, %v6167_v35 }
 0x45e   :  { %5846 = vmatprep.mubr.bf16.mxu0 %v12613_v63  ;;  %5856 = vmatpush1.bf16.msra.mxu0 %v15060_v31  ;;  %v12957_v31 = vcombine.low %v6163_v58, %v6167_v35  ;;  %v6171_v63 = vld [vmem:[#allocation18 + $0x640] sm:$0xff]  ;;  %v13021_v58 = vcombine.low %v16318_v4, %v16320_v60 }
 0x45f   :  { %5857 = vmatprep.subr.bf16.mxu0 %v15066_v48  ;;  %v12838_v48 = vcombine.high %v6043_v51, %v6047_v22  ;;  %9200 = vmatprep.subr.bf16.mxu1 %v12958_v38 }
 0x460   :  { %9201 = vmatpush1.bf16.msra.mxu1 %v12957_v31  ;;  %v4851_v31 = vlaneseq }
 0x462   :  { %5858 = vmatpush1.bf16.msra.mxu0 %v15064_v26  ;;  %v6175_v26 = vld [vmem:[#allocation18 + $0x660] sm:$0xff]  ;;  %v16328_v38 = vshrl.u32 %v4851_v31, 7 }
 0x463   :  { %5859 = vmatprep.subr.bf16.mxu0 %v15070_v13  ;;  %v12966_v13 = vcombine.high %v6171_v63, %v6175_v26 }
 0x465   :  { %5847 = vmatmul.mubr.bf16.gmra.mrb[132].mxu0 %v12612_v49  ;;  %v12965_v49 = vcombine.low %v6171_v63, %v6175_v26  ;;  %9202 = vmatprep.subr.bf16.mxu1 %v12966_v13  ;;  %v4849_v63 = vld [vmem:[#allocation16] sm:$0x3]  ;;  %v16334_v26 = vsub.s32 1, %v16328_v38  ;;  %v15802_v13 = vmov 1966171168  }
 0x466   :  { %5860 = vmatpush1.bf16.msra.mxu0 %v15068_v1  ;;  %5887 = vmatprep.mubr.bf16.mxu0 %v15801_v5  ;;  %v12837_v1 = vcombine.low %v6043_v51, %v6047_v22  ;;  %v13022_v22 = vcombine.high %v16318_v4, %v16320_v60 }
 0x467   :  { %5861 = vmatprep.subr.bf16.mxu0 %v15073_v41  ;;  %v6051_v41 = vld [vmem:[#allocation18 + $0x280] sm:$0xff]  ;;  %9203 = vmatpush1.bf16.msra.mxu1 %v12965_v49 }
 0x46a   :  { %5862 = vmatpush1.bf16.msra.mxu0 %v15071_v40  ;;  %v6055_v40 = vld [vmem:[#allocation18 + $0x2a0] sm:$0xff] }
 0x46b   :  { %5863 = vmatprep.subr.bf16.mxu0 %v15076_v18  ;;  %v6179_v18 = vld [vmem:[#allocation18 + $0x680] sm:$0xff] }
 0x46e   :  { %5864 = vmatpush1.bf16.msra.mxu0 %v15074_v10  ;;  %v12845_v10 = vcombine.low %v6051_v41, %v6055_v40 }
 0x46f   :  { %5865 = vmatprep.subr.bf16.mxu0 %v15079_v6  ;;  %v12846_v6 = vcombine.high %v6051_v41, %v6055_v40  ;;  %v4858_v41 = vrot.slane %v4849_v63, %v16334_v26 }
 0x472   :  { %5866 = vmatpush1.bf16.msra.mxu0 %v15077_v37  ;;  %v6183_v37 = vld [vmem:[#allocation18 + $0x6a0] sm:$0xff] }
 0x473   :  { %5867 = vmatprep.subr.bf16.mxu0 %v15082_v7  ;;  %v6059_v7 = vld [vmem:[#allocation18 + $0x2c0] sm:$0xff]  ;;  %v12974_v46 = vcombine.high %v6179_v18, %v6183_v37 }
 0x475   :  { %9204 = vmatprep.subr.bf16.mxu1 %v12974_v46 }
 0x476   :  { %5868 = vmatpush1.bf16.msra.mxu0 %v15080_v42  ;;  %v6063_v42 = vld [vmem:[#allocation18 + $0x2e0] sm:$0xff] }
 0x477   :  { %5869 = vmatprep.subr.bf16.mxu0 %v15085_v45  ;;  %v12973_v45 = vcombine.low %v6179_v18, %v6183_v37  ;;  %v12854_v15 = vcombine.high %v6059_v7, %v6063_v42  ;;  %v12853_v11 = vcombine.low %v6059_v7, %v6063_v42 }
 0x479   :  { %9205 = vmatpush1.bf16.msra.mxu1 %v12973_v45 }
 0x47a   :  { %5870 = vmatpush1.bf16.msra.mxu0 %v15083_v9  ;;  %v6187_v9 = vld [vmem:[#allocation18 + $0x6c0] sm:$0xff] }
 0x47b   :  { %9143 = vmatprep.subr.bf16.mxu0 %v12766_v14  ;;  %v6191_v14 = vld [vmem:[#allocation18 + $0x6e0] sm:$0xff] }
 0x47c   :  { %v12982_v50 = vcombine.high %v6187_v9, %v6191_v14  ;;  %v12981_v23 = vcombine.low %v6187_v9, %v6191_v14 }
 0x47d   :  { %5888 = vmatmul.mubr.bf16.vlgmr.msra.gmra.mrb[128].mxu0 %v15086_v61  ;;  %v6195_v61 = vld [vmem:[#allocation18 + $0x700] sm:$0xff] }
 0x47e   :  { %5895 = vmatprep.mubr.bf16.mxu0 %v15801_v5  ;;  %9144 = vmatpush1.bf16.msra.mxu0 %v12765_v8  ;;  %v6015_v5 = vld [vmem:[#allocation18 + $0x160] sm:$0xff] }
 0x47f   :  { %9145 = vmatprep.subr.bf16.mxu0 %v12774_v56  ;;  %v12806_v44 = vcombine.high %v6011_v30, %v6015_v5  ;;  %v12805_v62 = vcombine.low %v6011_v30, %v6015_v5  ;;  %v6071_v8 = vld [vmem:[#allocation18 + $0x320] sm:$0xff]  ;;  %9206 = vmatprep.subr.bf16.mxu1 %v12982_v50 }
 0x480   :  { %v6199_v56 = vld [vmem:[#allocation18 + $0x720] sm:$0xff]  ;;  %9207 = vmatpush1.bf16.msra.mxu1 %v12981_v23 }
 0x481   :  { %v12989_v12 = vcombine.low %v6195_v61, %v6199_v56  ;;  %v6087_v30 = vld [vmem:[#allocation18 + $0x3a0] sm:$0xff] }
 0x482   :  { %9146 = vmatpush1.bf16.msra.mxu0 %v12773_v54  ;;  %v12862_v54 = vcombine.high %v6067_v21, %v6071_v8  ;;  %v6211_v5 = vld [vmem:[#allocation18 + $0x780] sm:$0xff] }
 0x483   :  { %9147 = vmatprep.subr.bf16.mxu0 %v12782_v24  ;;  %v12990_v24 = vcombine.high %v6195_v61, %v6199_v56 }
 0x485   :  { %5896 = vmatmul.mubr.bf16.gmra.mrb[132].mxu0 %v15087_v32  ;;  %v6207_v32 = vld [vmem:[#allocation18 + $0x760] sm:$0xff]  ;;  %9208 = vmatprep.subr.bf16.mxu1 %v12990_v24 }
 0x486   :  { %9148 = vmatpush1.bf16.msra.mxu0 %v12781_v25  ;;  %v6203_v25 = vld [vmem:[#allocation18 + $0x740] sm:$0xff]  ;;  %9209 = vmatpush1.bf16.msra.mxu1 %v12989_v12 }
 0x487   :  { %9149 = vmatprep.subr.bf16.mxu0 %v12790_v34  ;;  %v12861_v34 = vcombine.low %v6067_v21, %v6071_v8  ;;  %v12997_v28 = vcombine.low %v6203_v25, %v6207_v32 }
 0x48a   :  { %9150 = vmatpush1.bf16.msra.mxu0 %v12789_v19  ;;  %v12998_v19 = vcombine.high %v6203_v25, %v6207_v32 }
 0x48b   :  { %9151 = vmatprep.subr.bf16.mxu0 %v12798_v36  ;;  %v6083_v36 = vld [vmem:[#allocation18 + $0x380] sm:$0xff] }
 0x48c   :  { %v12878_v17 = vcombine.high %v6083_v36, %v6087_v30  ;;  %9210 = vmatprep.subr.bf16.mxu1 %v12998_v19  ;;  %v12877_v3 = vcombine.low %v6083_v36, %v6087_v30  ;;  %v5981_v30 = vld [vmem:[#allocation18 + $0x50] sm:$0xff] }
 0x48d   :  { %9211 = vmatpush1.bf16.msra.mxu1 %v12997_v28  ;;  %v6235_v28 = vld [vmem:[#allocation18 + $0x840] sm:$0xff] }
 0x48e   :  { %9152 = vmatpush1.bf16.msra.mxu0 %v12797_v47  ;;  %v6215_v47 = vld [vmem:[#allocation18 + $0x7a0] sm:$0xff] }
 0x48f   :  { %9153 = vmatprep.subr.bf16.mxu0 %v12806_v44  ;;  %v12869_v44 = vcombine.low %v6075_v0, %v6079_v55  ;;  %v13005_v57 = vcombine.low %v6211_v5, %v6215_v47 }
 0x492   :  { %9154 = vmatpush1.bf16.msra.mxu0 %v12805_v62  ;;  %v6091_v62 = vld [vmem:[#allocation18 + $0x3c0] sm:$0xff] }
 0x493   :  { %9155 = vmatprep.subr.bf16.mxu0 %v12814_v39  ;;  %v13006_v39 = vcombine.high %v6211_v5, %v6215_v47  ;;  %v12886_v52 = vcombine.high %v6091_v62, %v6095_v16 }
 0x495   :  { %9212 = vmatprep.subr.bf16.mxu1 %v13006_v39 }
 0x496   :  { %9156 = vmatpush1.bf16.msra.mxu0 %v12813_v43  ;;  %v16314_v43 = vld [vmem:[#allocation18 + $0x30] sm:$0xff]  ;;  %9213 = vmatpush1.bf16.msra.mxu1 %v13005_v57 }
 0x497   :  { %9157 = vmatprep.subr.bf16.mxu0 %v12822_v20  ;;  %v6219_v20 = vld [vmem:[#allocation18 + $0x7c0] sm:$0xff]  ;;  %v12769_v53 = vcombine.low %v16312_v59, %v16314_v43  ;;  %v12770_v51 = vcombine.high %v16312_v59, %v16314_v43  ;;  %v5997_v43 = vld [vmem:[#allocation18 + $0xd0] sm:$0xff] }
 0x49a   :  { %9158 = vmatpush1.bf16.msra.mxu0 %v12821_v2  ;;  %v6223_v2 = vld [vmem:[#allocation18 + $0x7e0] sm:$0xff] }
 0x49b   :  { %9159 = vmatprep.subr.bf16.mxu0 %v12830_v29  ;;  %v12885_v29 = vcombine.low %v6091_v62, %v6095_v16  ;;  %v13013_v35 = vcombine.low %v6219_v20, %v6223_v2  ;;  %v5989_v16 = vld [vmem:[#allocation18 + $0x90] sm:$0xff] }
 0x49e   :  { %9160 = vmatpush1.bf16.msra.mxu0 %v12829_v33  ;;  %v13014_v33 = vcombine.high %v6219_v20, %v6223_v2  ;;  %v5993_v20 = vld [vmem:[#allocation18 + $0xb0] sm:$0xff] }
 0x49f   :  { %9161 = vmatprep.subr.bf16.mxu0 %v12838_v48  ;;  %v16331_v48 = vsub.s32 0, %v16328_v38  ;;  %v12785_v31 = vcombine.low %v5989_v16, %v5993_v20 }
 0x4a0   :  { %9214 = vmatprep.subr.bf16.mxu1 %v13014_v33 }
 0x4a1   :  { %9215 = vmatpush1.bf16.msra.mxu1 %v13013_v35  ;;  %v4854_v49 = vrot.slane %v4849_v63, %v16331_v48  ;;  %v6247_v35 = vld [vmem:[#allocation18 + $0x8a0] sm:$0xff] }
 0x4a2   :  { %9162 = vmatpush1.bf16.msra.mxu0 %v12837_v1  ;;  %9225 = vmatprep.subr.bf16.mxu1 %v13022_v22  ;;  %v5914_v1 = vunpack.c.l.s4 %v15802_v13  ;;  %v6251_v63 = vld [vmem:[#allocation18 + $0x8c0] sm:$0xff] }
 0x4a3   :  { %9163 = vmatprep.subr.bf16.mxu0 %v12846_v6  ;;  %v6255_v13 = vld [vmem:[#allocation18 + $0x8e0] sm:$0xff] }
 0x4a4   :  { %v5915_v18 = vunpack.c.0.s8 %v5914_v1  ;;  %v13046_v4 = vcombine.high %v6251_v63, %v6255_v13 }
 0x4a6   :  { %9164 = vmatpush1.bf16.msra.mxu0 %v12845_v10 }
 0x4a7   :  { %9165 = vmatprep.subr.bf16.mxu0 %v12854_v15  ;;  %v5918_v15 = vsub.s32 %v5915_v18, %v16328_v38  ;;  %v6263_v18 = vld [vmem:[#allocation18 + $0x920] sm:$0xff] }
 0x4aa   :  { %9166 = vmatpush1.bf16.msra.mxu0 %v12853_v11 }
 0x4ab   :  { %9167 = vmatprep.subr.bf16.mxu0 %v12862_v54 }
 0x4ae   :  { %9168 = vmatpush1.bf16.msra.mxu0 %v12861_v34 }
 0x4af   :  { %9169 = vmatprep.subr.bf16.mxu0 %v12870_v27 }
 0x4b2   :  { %9170 = vmatpush1.bf16.msra.mxu0 %v12869_v44  ;;  %v5985_v44 = vld [vmem:[#allocation18 + $0x70] sm:$0xff] }
 0x4b3   :  { %9171 = vmatprep.subr.bf16.mxu0 %v12878_v17  ;;  %v6239_v17 = vld [vmem:[#allocation18 + $0x860] sm:$0xff]  ;;  %v12777_v33 = vcombine.low %v5981_v30, %v5985_v44 }
 0x4b4   :  { %v13030_v57 = vcombine.high %v6235_v28, %v6239_v17  ;;  %v13029_v59 = vcombine.low %v6235_v28, %v6239_v17  ;;  %v6291_v28 = vld [vmem:[#allocation18 + $0xa00] sm:$0xff] }
 0x4b5   :  { %v6295_v17 = vld [vmem:[#allocation18 + $0xa20] sm:$0xff] }
 0x4b6   :  { %9172 = vmatpush1.bf16.msra.mxu0 %v12877_v3  ;;  %v12778_v3 = vcombine.high %v5981_v30, %v5985_v44  ;;  %v6041_v30 = vld [vmem:[#allocation18 + $0x230] sm:$0xff] }
 0x4b7   :  { %9173 = vmatprep.subr.bf16.mxu0 %v12886_v52 }
 0x4ba   :  { %9174 = vmatpush1.bf16.msra.mxu0 %v12885_v29  ;;  %v6243_v29 = vld [vmem:[#allocation18 + $0x880] sm:$0xff] }
 0x4bb   :  { %9471 = vmatprep.subr.bf16.mxu0 %v12770_v51  ;;  %v12786_v51 = vcombine.high %v5989_v16, %v5993_v20  ;;  %v13038_v22 = vcombine.high %v6243_v29, %v6247_v35 }
 0x550   :  { %v5889_v40 = vpop.f32.mrb[128].mxu0 }
 0x551   :  { %v14364_v10 = vadd.f32 %v5889_v40, %v4854_v49  ;;  %v5891_v6 = vpop.f32.mrb[129].mxu0  ;;  %v6009_v40 = vld [vmem:[#allocation18 + $0x130] sm:$0xff] }
 0x552   :  { %v14365_v37 = vadd.f32 %v5891_v6, %v4858_v41  ;;  %v5893_v7 = vpop.f32.mrb[130].mxu0  ;;  %v13045_v6 = vcombine.low %v6251_v63, %v6255_v13  ;;  %v6307_v13 = vld [vmem:[#allocation18 + $0xa80] sm:$0xff] }
 0x553   :  { %v5904_v42 = vmax.f32 %v14364_v10, 0.0  ;;  %v5894_v45 = vpop.f32.mrb[131].mxu0  ;;  %v6017_v7 = vld [vmem:[#allocation18 + $0x170] sm:$0xff] }
 0x554   :  { %v5905_v46 = vmax.f32 %v14365_v37, 0.0  ;;  %v6013_v37 = vld [vmem:[#allocation18 + $0x150] sm:$0xff] }
 0x556   :  { %v12759_v9 = vpack.c.bf16 %v5905_v46, %v5904_v42  ;;  %v6267_v46 = vld [vmem:[#allocation18 + $0x940] sm:$0xff] }
 0x558   :  { %v5919_v14 = vrot.slane %v12759_v9, %v5918_v15  ;;  %v5897_v21 = vpop.f32.mrb[132].mxu0  ;;  %v12810_v9 = vcombine.high %v6013_v37, %v6017_v7 }
 0x559   :  { %v14366_v50 = vadd.f32 %v5897_v21, %v4854_v49  ;;  %v5899_v8 = vpop.f32.mrb[133].mxu0  ;;  %v13037_v49 = vcombine.low %v6243_v29, %v6247_v35  ;;  %v6021_v21 = vld [vmem:[#allocation18 + $0x190] sm:$0xff]  ;;  %v6299_v35 = vld [vmem:[#allocation18 + $0xa40] sm:$0xff] }
 0x55a   :  { %12760 = vst.sshfl [vmem:[#allocation6] sm:$0x5 pattern:$0x73625140] %v5919_v14  ;;  %v5929_v61 = vcombine.high %v5919_v14, %v5919_v14  ;;  %v14367_v56 = vadd.f32 %v5899_v8, %v4858_v41  ;;  %v5901_v11 = vpop.f32.mrb[134].mxu0  ;;  %v6005_v41 = vld [vmem:[#allocation18 + $0x110] sm:$0xff] }
 0x55b   :  { %v5906_v23 = vmax.f32 %v14366_v50, 0.0  ;;  %v5902_v54 = vpop.f32.mrb[135].mxu0  ;;  %v12802_v10 = vcombine.high %v6005_v41, %v6009_v40  ;;  %v12801_v45 = vcombine.low %v6005_v41, %v6009_v40  ;;  %v6025_v50 = vld [vmem:[#allocation18 + $0x1b0] sm:$0xff]  ;;  %v6279_v11 = vld [vmem:[#allocation18 + $0x9a0] sm:$0xff] }
 0x55c   :  { %12761 = vst.sshfl [vmem:[#allocation6 + $0x2] sm:$0x5 pattern:$0x73625140] %v5929_v61  ;;  %v5907_v24 = vmax.f32 %v14367_v56, 0.0  ;;  %v12809_v61 = vcombine.low %v6013_v37, %v6017_v7  ;;  %v6275_v56 = vld [vmem:[#allocation18 + $0x980] sm:$0xff] }
 0x55d   :  { %v6061_v40 = vld [vmem:[#allocation18 + $0x2d0] sm:$0xff] }
 0x55e   :  { %v12762_v0 = vpack.c.bf16 %v5907_v24, %v5906_v23  ;;  %v12818_v23 = vcombine.high %v6021_v21, %v6025_v50  ;;  %v6029_v24 = vld [vmem:[#allocation18 + $0x1d0] sm:$0xff] }
 0x55f   :  { %v6069_v7 = vld [vmem:[#allocation18 + $0x310] sm:$0xff] }
 0x560   :  { %v5950_v55 = vrot.slane %v12762_v0, %v5918_v15  ;;  %v6033_v0 = vld [vmem:[#allocation18 + $0x1f0] sm:$0xff] }
 0x561   :  { %v12825_v44 = vcombine.low %v6029_v24, %v6033_v0 }
 0x562   :  { %12763 = vst.sshfl [vmem:[#allocation6 + $0x4] sm:$0x5 pattern:$0x73625140] %v5950_v55  ;;  %v5960_v25 = vcombine.high %v5950_v55, %v5950_v55  ;;  %v13070_v55 = vcombine.high %v6275_v56, %v6279_v11 }
 0x564   :  { %12764 = vst.sshfl [vmem:[#allocation6 + $0x6] sm:$0x5 pattern:$0x73625140] %v5960_v25  ;;  %v12817_v25 = vcombine.low %v6021_v21, %v6025_v50  ;;  %v6077_v50 = vld [vmem:[#allocation18 + $0x350] sm:$0xff] }
 0x56b   :  { %v5970_v32 = vld [vmem:[#allocation6] sm:$0xff] }
 0x56c   :  { %v6533_v34 = vrot.slane %v5970_v32, %v5918_v15  ;;  %v6526_v12 = vcombine.high %v5970_v32, %v5970_v32  ;;  %v6283_v32 = vld [vmem:[#allocation18 + $0x9c0] sm:$0xff] }
 0x56e   :  { %v6541_v27 = vcombine.high %v6533_v34, %v6533_v34  ;;  %v6540_v19 = vrot.slane %v6526_v12, %v5918_v15  ;;  %v16339_v36 = vrot.slane %v6533_v34, %v5918_v15  ;;  %v6287_v34 = vld [vmem:[#allocation18 + $0x9e0] sm:$0xff]  ;;  %v12826_v12 = vcombine.high %v6029_v24, %v6033_v0  ;;  %v6085_v0 = vld [vmem:[#allocation18 + $0x390] sm:$0xff] }
 0x56f   :  { %v13077_v20 = vcombine.low %v6283_v32, %v6287_v34 }
 0x570   :  { %v16341_v5 = vrot.slane %v6541_v27, %v5918_v15  ;;  %v6542_v47 = vcombine.high %v6540_v19, %v6540_v19  ;;  %v16343_v62 = vrot.slane %v6540_v19, %v5918_v15  ;;  %v16353_v2 = vcombine.high %v16339_v36, %v16339_v36  ;;  %v6037_v19 = vld [vmem:[#allocation18 + $0x210] sm:$0xff] }
 0x571   :  { %v13069_v27 = vcombine.low %v6275_v56, %v6279_v11  ;;  %v12834_v16 = vcombine.high %v6037_v19, %v6041_v30  ;;  %v12833_v29 = vcombine.low %v6037_v19, %v6041_v30  ;;  %v6331_v11 = vld [vmem:[#allocation18 + $0xb40] sm:$0xff]  ;;  %v6093_v30 = vld [vmem:[#allocation18 + $0x3d0] sm:$0xff] }
 0x572   :  { %9175 = vmatprep.mubr.bf16.mxu0 %v16341_v5  ;;  %v16348_v39 = vcombine.high %v16341_v5, %v16341_v5  ;;  %v16359_v52 = vrot.slane %v6542_v47, %v5918_v15  ;;  %v6271_v15 = vld [vmem:[#allocation18 + $0x960] sm:$0xff]  ;;  %v13078_v47 = vcombine.high %v6283_v32, %v6287_v34 }
 0x573   :  { %9176 = vmatmul.mubr.bf16.vlgmr.msra.gmra.mrb[136].mxu0 %v16339_v36  ;;  %v13062_v8 = vcombine.high %v6267_v46, %v6271_v15  ;;  %v13061_v54 = vcombine.low %v6267_v46, %v6271_v15  ;;  %v6323_v15 = vld [vmem:[#allocation18 + $0xb00] sm:$0xff] }
 0x574   :  { %9472 = vmatpush1.bf16.msra.mxu0 %v12769_v53  ;;  %9216 = vmatprep.mubr.bf16.mxu1 %v16348_v39  ;;  %v6001_v53 = vld [vmem:[#allocation18 + $0xf0] sm:$0xff]  ;;  %v6339_v34 = vld [vmem:[#allocation18 + $0xb80] sm:$0xff] }
 0x575   :  { %9503 = vmatprep.mubr.bf16.mxu0 %v16341_v5  ;;  %9217 = vmatmul.mubr.bf16.vlgmr.msra.gmra.mrb[88].mxu1 %v16353_v2  ;;  %v12794_v1 = vcombine.high %v5997_v43, %v6001_v53  ;;  %v12793_v60 = vcombine.low %v5997_v43, %v6001_v53  ;;  %v13085_v43 = vcombine.low %v6291_v28, %v6295_v17  ;;  %v6053_v53 = vld [vmem:[#allocation18 + $0x290] sm:$0xff] }
 0x576   :  { %9226 = vmatpush1.bf16.msra.mxu1 %v13021_v58  ;;  %9257 = vmatprep.mubr.bf16.mxu1 %v16359_v52  ;;  %v6259_v58 = vld [vmem:[#allocation18 + $0x900] sm:$0xff] }
 0x577   :  { %9473 = vmatprep.subr.bf16.mxu0 %v12778_v3  ;;  %9227 = vmatprep.subr.bf16.mxu1 %v13030_v57  ;;  %v13054_v42 = vcombine.high %v6259_v58, %v6263_v18  ;;  %v13053_v14 = vcombine.low %v6259_v58, %v6263_v18  ;;  %v6045_v3 = vld [vmem:[#allocation18 + $0x250] sm:$0xff]  ;;  %v6315_v18 = vld [vmem:[#allocation18 + $0xac0] sm:$0xff] }
 0x578   :  { %9474 = vmatpush1.bf16.msra.mxu0 %v12777_v33  ;;  %v6049_v57 = vld [vmem:[#allocation18 + $0x270] sm:$0xff]  ;;  %v13086_v33 = vcombine.high %v6291_v28, %v6295_v17  ;;  %v6347_v17 = vld [vmem:[#allocation18 + $0xbc0] sm:$0xff] }
 0x579   :  { %9475 = vmatprep.subr.bf16.mxu0 %v12786_v51  ;;  %v6303_v51 = vld [vmem:[#allocation18 + $0xa60] sm:$0xff]  ;;  %v12841_v63 = vcombine.low %v6045_v3, %v6049_v57 }
 0x57a   :  { %9228 = vmatpush1.bf16.msra.mxu1 %v13029_v59  ;;  %v12842_v59 = vcombine.high %v6045_v3, %v6049_v57  ;;  %v13093_v41 = vcombine.low %v6299_v35, %v6303_v51  ;;  %v6101_v57 = vld [vmem:[#allocation18 + $0x410] sm:$0xff] }
 0x57b   :  { %9229 = vmatprep.subr.bf16.mxu1 %v13038_v22  ;;  %v6057_v22 = vld [vmem:[#allocation18 + $0x2b0] sm:$0xff] }
 0x57c   :  { %9476 = vmatpush1.bf16.msra.mxu0 %v12785_v31  ;;  %v13094_v31 = vcombine.high %v6299_v35, %v6303_v51  ;;  %v12849_v58 = vcombine.low %v6053_v53, %v6057_v22  ;;  %v6355_v51 = vld [vmem:[#allocation18 + $0xc00] sm:$0xff] }
 0x57d   :  { %9477 = vmatprep.subr.bf16.mxu0 %v12794_v1  ;;  %v6311_v1 = vld [vmem:[#allocation18 + $0xaa0] sm:$0xff] }
 0x57e   :  { %9230 = vmatpush1.bf16.msra.mxu1 %v13037_v49  ;;  %v12850_v49 = vcombine.high %v6053_v53, %v6057_v22  ;;  %v13101_v37 = vcombine.low %v6307_v13, %v6311_v1  ;;  %v6109_v22 = vld [vmem:[#allocation18 + $0x450] sm:$0xff] }
 0x57f   :  { %9231 = vmatprep.subr.bf16.mxu1 %v13046_v4  ;;  %v6065_v4 = vld [vmem:[#allocation18 + $0x2f0] sm:$0xff] }
 0x580   :  { %9478 = vmatpush1.bf16.msra.mxu0 %v12793_v60  ;;  %v13102_v60 = vcombine.high %v6307_v13, %v6311_v1  ;;  %v12857_v46 = vcombine.low %v6061_v40, %v6065_v4  ;;  %v6363_v1 = vld [vmem:[#allocation18 + $0xc40] sm:$0xff] }
 0x581   :  { %9479 = vmatprep.subr.bf16.mxu0 %v12802_v10  ;;  %v6319_v10 = vld [vmem:[#allocation18 + $0xae0] sm:$0xff] }
 0x582   :  { %9232 = vmatpush1.bf16.msra.mxu1 %v13045_v6  ;;  %v12858_v6 = vcombine.high %v6061_v40, %v6065_v4  ;;  %v13109_v21 = vcombine.low %v6315_v18, %v6319_v10  ;;  %v6117_v4 = vld [vmem:[#allocation18 + $0x490] sm:$0xff] }
 0x583   :  { %9233 = vmatprep.subr.bf16.mxu1 %v13054_v42  ;;  %v6073_v42 = vld [vmem:[#allocation18 + $0x330] sm:$0xff] }
 0x584   :  { %9480 = vmatpush1.bf16.msra.mxu0 %v12801_v45  ;;  %v13110_v45 = vcombine.high %v6315_v18, %v6319_v10  ;;  %v12865_v56 = vcombine.low %v6069_v7, %v6073_v42  ;;  %v16371_v18 = vcombine.high %v16359_v52, %v16359_v52 }
 0x585   :  { %9481 = vmatprep.subr.bf16.mxu0 %v12810_v9  ;;  %v6327_v9 = vld [vmem:[#allocation18 + $0xb20] sm:$0xff] }
 0x586   :  { %9234 = vmatpush1.bf16.msra.mxu1 %v13053_v14  ;;  %v12866_v14 = vcombine.high %v6069_v7, %v6073_v42  ;;  %v13117_v24 = vcombine.low %v6323_v15, %v6327_v9 }
 0x587   :  { %9235 = vmatprep.subr.bf16.mxu1 %v13062_v8  ;;  %v6081_v8 = vld [vmem:[#allocation18 + $0x370] sm:$0xff] }
 0x588   :  { %9482 = vmatpush1.bf16.msra.mxu0 %v12809_v61  ;;  %v13118_v61 = vcombine.high %v6323_v15, %v6327_v9  ;;  %v12873_v32 = vcombine.low %v6077_v50, %v6081_v8 }
 0x589   :  { %9483 = vmatprep.subr.bf16.mxu0 %v12818_v23  ;;  %v6335_v23 = vld [vmem:[#allocation18 + $0xb60] sm:$0xff] }
 0x58a   :  { %9236 = vmatpush1.bf16.msra.mxu1 %v13061_v54  ;;  %v12874_v54 = vcombine.high %v6077_v50, %v6081_v8  ;;  %v13125_v19 = vcombine.low %v6331_v11, %v6335_v23 }
 0x58b   :  { %9237 = vmatprep.subr.bf16.mxu1 %v13070_v55  ;;  %v6089_v55 = vld [vmem:[#allocation18 + $0x3b0] sm:$0xff] }
 0x58c   :  { %9484 = vmatpush1.bf16.msra.mxu0 %v12817_v25  ;;  %v13126_v25 = vcombine.high %v6331_v11, %v6335_v23  ;;  %v12881_v28 = vcombine.low %v6085_v0, %v6089_v55 }
 0x58d   :  { %9485 = vmatprep.subr.bf16.mxu0 %v12826_v12  ;;  %v6343_v12 = vld [vmem:[#allocation18 + $0xba0] sm:$0xff] }
 0x58e   :  { %9238 = vmatpush1.bf16.msra.mxu1 %v13069_v27  ;;  %v12882_v27 = vcombine.high %v6085_v0, %v6089_v55  ;;  %v13133_v3 = vcombine.low %v6339_v34, %v6343_v12 }
 0x58f   :  { %9239 = vmatprep.subr.bf16.mxu1 %v13078_v47  ;;  %v6097_v47 = vld [vmem:[#allocation18 + $0x3f0] sm:$0xff] }
 0x590   :  { %9486 = vmatpush1.bf16.msra.mxu0 %v12825_v44  ;;  %v13134_v44 = vcombine.high %v6339_v34, %v6343_v12  ;;  %v12889_v35 = vcombine.low %v6093_v30, %v6097_v47 }
 0x591   :  { %9487 = vmatprep.subr.bf16.mxu0 %v12834_v16  ;;  %v6351_v16 = vld [vmem:[#allocation18 + $0xbe0] sm:$0xff] }
 0x592   :  { %9240 = vmatpush1.bf16.msra.mxu1 %v13077_v20  ;;  %v12890_v20 = vcombine.high %v6093_v30, %v6097_v47  ;;  %v13141_v53 = vcombine.low %v6347_v17, %v6351_v16 }
 0x593   :  { %9241 = vmatprep.subr.bf16.mxu1 %v13086_v33  ;;  %v6105_v33 = vld [vmem:[#allocation18 + $0x430] sm:$0xff] }
 0x594   :  { %9488 = vmatpush1.bf16.msra.mxu0 %v12833_v29  ;;  %v13142_v29 = vcombine.high %v6347_v17, %v6351_v16  ;;  %v12897_v13 = vcombine.low %v6101_v57, %v6105_v33 }
 0x595   :  { %9489 = vmatprep.subr.bf16.mxu0 %v12842_v59  ;;  %v6359_v59 = vld [vmem:[#allocation18 + $0xc20] sm:$0xff] }
 0x596   :  { %9242 = vmatpush1.bf16.msra.mxu1 %v13085_v43  ;;  %v12898_v43 = vcombine.high %v6101_v57, %v6105_v33  ;;  %v13149_v40 = vcombine.low %v6355_v51, %v6359_v59 }
 0x597   :  { %9243 = vmatprep.subr.bf16.mxu1 %v13094_v31  ;;  %v6113_v31 = vld [vmem:[#allocation18 + $0x470] sm:$0xff] }
 0x598   :  { %9490 = vmatpush1.bf16.msra.mxu0 %v12841_v63  ;;  %v13150_v63 = vcombine.high %v6355_v51, %v6359_v59  ;;  %v12905_v10 = vcombine.low %v6109_v22, %v6113_v31 }
 0x599   :  { %9491 = vmatprep.subr.bf16.mxu0 %v12850_v49  ;;  %v6367_v49 = vld [vmem:[#allocation18 + $0xc60] sm:$0xff] }
 0x59a   :  { %9244 = vmatpush1.bf16.msra.mxu1 %v13093_v41  ;;  %v12906_v41 = vcombine.high %v6109_v22, %v6113_v31  ;;  %v13157_v42 = vcombine.low %v6363_v1, %v6367_v49 }
 0x59b   :  { %9245 = vmatprep.subr.bf16.mxu1 %v13102_v60  ;;  %v6121_v60 = vld [vmem:[#allocation18 + $0x4b0] sm:$0xff] }
 0x59c   :  { %9492 = vmatpush1.bf16.msra.mxu0 %v12849_v58  ;;  %v13158_v58 = vcombine.high %v6363_v1, %v6367_v49  ;;  %v12914_v7 = vcombine.high %v6117_v4, %v6121_v60  ;;  %v12913_v9 = vcombine.low %v6117_v4, %v6121_v60 }
 0x59d   :  { %9493 = vmatprep.subr.bf16.mxu0 %v12858_v6  ;;  %v6371_v6 = vld [vmem:[#allocation18 + $0xc80] sm:$0xff] }
 0x59e   :  { %9246 = vmatpush1.bf16.msra.mxu1 %v13101_v37  ;;  %v6375_v37 = vld [vmem:[#allocation18 + $0xca0] sm:$0xff] }
 0x59f   :  { %9247 = vmatprep.subr.bf16.mxu1 %v13110_v45  ;;  %v6125_v45 = vld [vmem:[#allocation18 + $0x4d0] sm:$0xff]  ;;  %v13166_v15 = vcombine.high %v6371_v6, %v6375_v37  ;;  %v13165_v8 = vcombine.low %v6371_v6, %v6375_v37 }
 0x5a0   :  { %9494 = vmatpush1.bf16.msra.mxu0 %v12857_v46  ;;  %v6129_v46 = vld [vmem:[#allocation18 + $0x4f0] sm:$0xff] }
 0x5a1   :  { %9495 = vmatprep.subr.bf16.mxu0 %v12866_v14  ;;  %v6379_v14 = vld [vmem:[#allocation18 + $0xcc0] sm:$0xff]  ;;  %v12922_v50 = vcombine.high %v6125_v45, %v6129_v46  ;;  %v12921_v23 = vcombine.low %v6125_v45, %v6129_v46 }
 0x5a2   :  { %9248 = vmatpush1.bf16.msra.mxu1 %v13109_v21  ;;  %v6383_v21 = vld [vmem:[#allocation18 + $0xce0] sm:$0xff] }
 0x5a3   :  { %9249 = vmatprep.subr.bf16.mxu1 %v13118_v61  ;;  %v6133_v61 = vld [vmem:[#allocation18 + $0x510] sm:$0xff]  ;;  %v13174_v11 = vcombine.high %v6379_v14, %v6383_v21  ;;  %v13173_v55 = vcombine.low %v6379_v14, %v6383_v21 }
 0x5a4   :  { %9496 = vmatpush1.bf16.msra.mxu0 %v12865_v56  ;;  %v6137_v56 = vld [vmem:[#allocation18 + $0x530] sm:$0xff] }
 0x5a5   :  { %9497 = vmatprep.subr.bf16.mxu0 %v12874_v54  ;;  %v6387_v54 = vld [vmem:[#allocation18 + $0xd00] sm:$0xff]  ;;  %v12930_v0 = vcombine.high %v6133_v61, %v6137_v56  ;;  %v12929_v12 = vcombine.low %v6133_v61, %v6137_v56 }
 0x5a6   :  { %9250 = vmatpush1.bf16.msra.mxu1 %v13117_v24  ;;  %v6391_v24 = vld [vmem:[#allocation18 + $0xd20] sm:$0xff] }
 0x5a7   :  { %9251 = vmatprep.subr.bf16.mxu1 %v13126_v25  ;;  %v6141_v25 = vld [vmem:[#allocation18 + $0x550] sm:$0xff]  ;;  %v13182_v34 = vcombine.high %v6387_v54, %v6391_v24  ;;  %v13181_v47 = vcombine.low %v6387_v54, %v6391_v24 }
 0x5a8   :  { %9498 = vmatpush1.bf16.msra.mxu0 %v12873_v32  ;;  %v6145_v32 = vld [vmem:[#allocation18 + $0x570] sm:$0xff] }
 0x5a9   :  { %9499 = vmatprep.subr.bf16.mxu0 %v12882_v27  ;;  %v6395_v27 = vld [vmem:[#allocation18 + $0xd40] sm:$0xff]  ;;  %v12938_v30 = vcombine.high %v6141_v25, %v6145_v32  ;;  %v12937_v16 = vcombine.low %v6141_v25, %v6145_v32 }
 0x5aa   :  { %9252 = vmatpush1.bf16.msra.mxu1 %v13125_v19  ;;  %v6399_v19 = vld [vmem:[#allocation18 + $0xd60] sm:$0xff] }
 0x5ab   :  { %9253 = vmatprep.subr.bf16.mxu1 %v13134_v44  ;;  %v6149_v44 = vld [vmem:[#allocation18 + $0x590] sm:$0xff]  ;;  %v13190_v17 = vcombine.high %v6395_v27, %v6399_v19  ;;  %v13189_v33 = vcombine.low %v6395_v27, %v6399_v19 }
 0x5ac   :  { %9500 = vmatpush1.bf16.msra.mxu0 %v12881_v28  ;;  %v6153_v28 = vld [vmem:[#allocation18 + $0x5b0] sm:$0xff] }
 0x5ad   :  { %9501 = vmatprep.subr.bf16.mxu0 %v12890_v20  ;;  %v6403_v20 = vld [vmem:[#allocation18 + $0xd80] sm:$0xff]  ;;  %v12946_v57 = vcombine.high %v6149_v44, %v6153_v28  ;;  %v12945_v59 = vcombine.low %v6149_v44, %v6153_v28 }
 0x5ae   :  { %9254 = vmatpush1.bf16.msra.mxu1 %v13133_v3  ;;  %v6407_v3 = vld [vmem:[#allocation18 + $0xda0] sm:$0xff] }
 0x5af   :  { %9255 = vmatprep.subr.bf16.mxu1 %v13142_v29  ;;  %v6157_v29 = vld [vmem:[#allocation18 + $0x5d0] sm:$0xff]  ;;  %v13198_v51 = vcombine.high %v6403_v20, %v6407_v3  ;;  %v13197_v31 = vcombine.low %v6403_v20, %v6407_v3 }
 0x5b0   :  { %9502 = vmatpush1.bf16.msra.mxu0 %v12889_v35  ;;  %v6161_v35 = vld [vmem:[#allocation18 + $0x5f0] sm:$0xff] }
 0x5b1   :  { %9512 = vmatprep.subr.bf16.mxu0 %v12898_v43  ;;  %v6411_v43 = vld [vmem:[#allocation18 + $0xdc0] sm:$0xff]  ;;  %v12954_v22 = vcombine.high %v6157_v29, %v6161_v35  ;;  %v12953_v49 = vcombine.low %v6157_v29, %v6161_v35 }
 0x5b2   :  { %9256 = vmatpush1.bf16.msra.mxu1 %v13141_v53  ;;  %v6415_v53 = vld [vmem:[#allocation18 + $0xde0] sm:$0xff] }
 0x5b3   :  { %9504 = vmatmul.mubr.bf16.vlgmr.msra.gmra.mrb[140].mxu0 %v16339_v36  ;;  %9266 = vmatprep.subr.bf16.mxu1 %v13150_v63  ;;  %v6165_v63 = vld [vmem:[#allocation18 + $0x610] sm:$0xff]  ;;  %v13206_v1 = vcombine.high %v6411_v43, %v6415_v53  ;;  %v13205_v60 = vcombine.low %v6411_v43, %v6415_v53 }
 0x5b4   :  { %9513 = vmatpush1.bf16.msra.mxu0 %v12897_v13  ;;  %9544 = vmatprep.mubr.bf16.mxu0 %v16348_v39  ;;  %v6169_v13 = vld [vmem:[#allocation18 + $0x630] sm:$0xff] }
 0x5b5   :  { %9258 = vmatmul.mubr.bf16.vlgmr.msra.gmra.mrb[88].mxu1 %v16343_v62  ;;  %9514 = vmatprep.subr.bf16.mxu0 %v12906_v41  ;;  %v6419_v41 = vld [vmem:[#allocation18 + $0xe00] sm:$0xff]  ;;  %v12962_v4 = vcombine.high %v6165_v63, %v6169_v13  ;;  %v12961_v37 = vcombine.low %v6165_v63, %v6169_v13 }
 0x5b6   :  { %9267 = vmatpush1.bf16.msra.mxu1 %v13149_v40  ;;  %9298 = vmatprep.mubr.bf16.mxu1 %v16371_v18  ;;  %v6423_v40 = vld [vmem:[#allocation18 + $0xe20] sm:$0xff] }
 0x5b7   :  { %9268 = vmatprep.subr.bf16.mxu1 %v13158_v58  ;;  %v6173_v58 = vld [vmem:[#allocation18 + $0x650] sm:$0xff]  ;;  %v13214_v6 = vcombine.high %v6419_v41, %v6423_v40  ;;  %v13213_v46 = vcombine.low %v6419_v41, %v6423_v40 }
 0x5b8   :  { %9515 = vmatpush1.bf16.msra.mxu0 %v12905_v10  ;;  %v6177_v10 = vld [vmem:[#allocation18 + $0x670] sm:$0xff] }
 0x5b9   :  { %9516 = vmatprep.subr.bf16.mxu0 %v12914_v7  ;;  %v6427_v7 = vld [vmem:[#allocation18 + $0xe40] sm:$0xff]  ;;  %v12970_v45 = vcombine.high %v6173_v58, %v6177_v10  ;;  %v12969_v21 = vcombine.low %v6173_v58, %v6177_v10 }
 0x5ba   :  { %9269 = vmatpush1.bf16.msra.mxu1 %v13157_v42  ;;  %v6431_v42 = vld [vmem:[#allocation18 + $0xe60] sm:$0xff] }
 0x5bb   :  { %9270 = vmatprep.subr.bf16.mxu1 %v13166_v15  ;;  %v6181_v15 = vld [vmem:[#allocation18 + $0x690] sm:$0xff]  ;;  %v13222_v14 = vcombine.high %v6427_v7, %v6431_v42  ;;  %v13221_v56 = vcombine.low %v6427_v7, %v6431_v42 }
 0x5bc   :  { %9517 = vmatpush1.bf16.msra.mxu0 %v12913_v9  ;;  %v6185_v9 = vld [vmem:[#allocation18 + $0x6b0] sm:$0xff] }
 0x5bd   :  { %9518 = vmatprep.subr.bf16.mxu0 %v12922_v50  ;;  %v6435_v50 = vld [vmem:[#allocation18 + $0xe80] sm:$0xff]  ;;  %v12978_v61 = vcombine.high %v6181_v15, %v6185_v9  ;;  %v12977_v24 = vcombine.low %v6181_v15, %v6185_v9 }
 0x5be   :  { %9271 = vmatpush1.bf16.msra.mxu1 %v13165_v8  ;;  %v6439_v8 = vld [vmem:[#allocation18 + $0xea0] sm:$0xff] }
 0x5bf   :  { %9272 = vmatprep.subr.bf16.mxu1 %v13174_v11  ;;  %v6189_v11 = vld [vmem:[#allocation18 + $0x6d0] sm:$0xff]  ;;  %v13230_v54 = vcombine.high %v6435_v50, %v6439_v8  ;;  %v13229_v32 = vcombine.low %v6435_v50, %v6439_v8 }
 0x5c0   :  { %9519 = vmatpush1.bf16.msra.mxu0 %v12921_v23  ;;  %v6193_v23 = vld [vmem:[#allocation18 + $0x6f0] sm:$0xff] }
 0x5c1   :  { %9520 = vmatprep.subr.bf16.mxu0 %v12930_v0  ;;  %v6443_v0 = vld [vmem:[#allocation18 + $0xec0] sm:$0xff]  ;;  %v12986_v25 = vcombine.high %v6189_v11, %v6193_v23  ;;  %v12985_v19 = vcombine.low %v6189_v11, %v6193_v23 }
 0x5c2   :  { %9273 = vmatpush1.bf16.msra.mxu1 %v13173_v55  ;;  %v6447_v55 = vld [vmem:[#allocation18 + $0xee0] sm:$0xff] }
 0x5c3   :  { %9274 = vmatprep.subr.bf16.mxu1 %v13182_v34  ;;  %v6197_v34 = vld [vmem:[#allocation18 + $0x710] sm:$0xff]  ;;  %v13238_v27 = vcombine.high %v6443_v0, %v6447_v55  ;;  %v13237_v28 = vcombine.low %v6443_v0, %v6447_v55  ;;  %v16378_v0 = vcombine.high %v16343_v62, %v16343_v62 }
 0x5c4   :  { %9521 = vmatpush1.bf16.msra.mxu0 %v12929_v12  ;;  %v6201_v12 = vld [vmem:[#allocation18 + $0x730] sm:$0xff] }
 0x5c5   :  { %9522 = vmatprep.subr.bf16.mxu0 %v12938_v30  ;;  %v6451_v30 = vld [vmem:[#allocation18 + $0xf00] sm:$0xff]  ;;  %v12994_v44 = vcombine.high %v6197_v34, %v6201_v12  ;;  %v12993_v3 = vcombine.low %v6197_v34, %v6201_v12  ;;  %v5992_v34 = vld [vmem:[#allocation18 + $0xa8] sm:$0xff] }
 0x5c6   :  { %9275 = vmatpush1.bf16.msra.mxu1 %v13181_v47  ;;  %v6455_v47 = vld [vmem:[#allocation18 + $0xf20] sm:$0xff] }
 0x5c7   :  { %9276 = vmatprep.subr.bf16.mxu1 %v13190_v17  ;;  %v6205_v17 = vld [vmem:[#allocation18 + $0x750] sm:$0xff]  ;;  %v13246_v20 = vcombine.high %v6451_v30, %v6455_v47  ;;  %v13245_v35 = vcombine.low %v6451_v30, %v6455_v47 }
 0x5c8   :  { %9523 = vmatpush1.bf16.msra.mxu0 %v12937_v16  ;;  %v6209_v16 = vld [vmem:[#allocation18 + $0x770] sm:$0xff] }
 0x5c9   :  { %9524 = vmatprep.subr.bf16.mxu0 %v12946_v57  ;;  %v6459_v57 = vld [vmem:[#allocation18 + $0xf40] sm:$0xff]  ;;  %v13002_v29 = vcombine.high %v6205_v17, %v6209_v16  ;;  %v13001_v53 = vcombine.low %v6205_v17, %v6209_v16  ;;  %v6257_v30 = vld [vmem:[#allocation18 + $0x8f0] sm:$0xff]  ;;  %v6000_v17 = vld [vmem:[#allocation18 + $0xe8] sm:$0xff] }
 0x5ca   :  { %9277 = vmatpush1.bf16.msra.mxu1 %v13189_v33  ;;  %v6463_v33 = vld [vmem:[#allocation18 + $0xf60] sm:$0xff] }
 0x5cb   :  { %9278 = vmatprep.subr.bf16.mxu1 %v13198_v51  ;;  %v6213_v51 = vld [vmem:[#allocation18 + $0x790] sm:$0xff]  ;;  %v13254_v43 = vcombine.high %v6459_v57, %v6463_v33  ;;  %v13253_v13 = vcombine.low %v6459_v57, %v6463_v33 }
 0x5cc   :  { %9525 = vmatpush1.bf16.msra.mxu0 %v12945_v59  ;;  %v6217_v59 = vld [vmem:[#allocation18 + $0x7b0] sm:$0xff] }
 0x5cd   :  { %9526 = vmatprep.subr.bf16.mxu0 %v12954_v22  ;;  %v6467_v22 = vld [vmem:[#allocation18 + $0xf80] sm:$0xff]  ;;  %v13010_v63 = vcombine.high %v6213_v51, %v6217_v59  ;;  %v13009_v40 = vcombine.low %v6213_v51, %v6217_v59  ;;  %v6265_v57 = vld [vmem:[#allocation18 + $0x930] sm:$0xff]  ;;  %v6008_v51 = vld [vmem:[#allocation18 + $0x128] sm:$0xff] }
 0x5ce   :  { %9279 = vmatpush1.bf16.msra.mxu1 %v13197_v31  ;;  %v6471_v31 = vld [vmem:[#allocation18 + $0xfa0] sm:$0xff] }
 0x5cf   :  { %9280 = vmatprep.subr.bf16.mxu1 %v13206_v1  ;;  %v6221_v1 = vld [vmem:[#allocation18 + $0x7d0] sm:$0xff]  ;;  %v13262_v41 = vcombine.high %v6467_v22, %v6471_v31  ;;  %v13261_v10 = vcombine.low %v6467_v22, %v6471_v31 }
 0x5d0   :  { %9527 = vmatpush1.bf16.msra.mxu0 %v12953_v49  ;;  %v6225_v49 = vld [vmem:[#allocation18 + $0x7f0] sm:$0xff] }
 0x5d1   :  { %9528 = vmatprep.subr.bf16.mxu0 %v12962_v4  ;;  %v6475_v4 = vld [vmem:[#allocation18 + $0xfc0] sm:$0xff]  ;;  %v13018_v58 = vcombine.high %v6221_v1, %v6225_v49  ;;  %v13017_v42 = vcombine.low %v6221_v1, %v6225_v49  ;;  %v6273_v22 = vld [vmem:[#allocation18 + $0x970] sm:$0xff]  ;;  %v6016_v1 = vld [vmem:[#allocation18 + $0x168] sm:$0xff] }
 0x5d2   :  { %9281 = vmatpush1.bf16.msra.mxu1 %v13205_v60  ;;  %v6479_v60 = vld [vmem:[#allocation18 + $0xfe0] sm:$0xff] }
 0x5d3   :  { %9282 = vmatprep.subr.bf16.mxu1 %v13214_v6  ;;  %v6229_v6 = vld [vmem:[#allocation18 + $0x810] sm:$0xff]  ;;  %v13270_v7 = vcombine.high %v6475_v4, %v6479_v60  ;;  %v13269_v9 = vcombine.low %v6475_v4, %v6479_v60 }
 0x5d4   :  { %9529 = vmatpush1.bf16.msra.mxu0 %v12961_v37  ;;  %v6233_v37 = vld [vmem:[#allocation18 + $0x830] sm:$0xff] }
 0x5d5   :  { %9530 = vmatprep.subr.bf16.mxu0 %v12970_v45  ;;  %v5972_v45 = vld [vmem:[#allocation18 + $0x8] sm:$0xff]  ;;  %v13026_v15 = vcombine.high %v6229_v6, %v6233_v37  ;;  %v13025_v8 = vcombine.low %v6229_v6, %v6233_v37  ;;  %v6281_v4 = vld [vmem:[#allocation18 + $0x9b0] sm:$0xff] }
 0x5d6   :  { %9283 = vmatpush1.bf16.msra.mxu1 %v13213_v46  ;;  %v5976_v46 = vld [vmem:[#allocation18 + $0x28] sm:$0xff] }
 0x5d7   :  { %9284 = vmatprep.subr.bf16.mxu1 %v13222_v14  ;;  %v6237_v14 = vld [vmem:[#allocation18 + $0x850] sm:$0xff]  ;;  %v12768_v50 = vcombine.high %v5972_v45, %v5976_v46  ;;  %v12767_v23 = vcombine.low %v5972_v45, %v5976_v46  ;;  %v6024_v6 = vld [vmem:[#allocation18 + $0x1a8] sm:$0xff] }
 0x5d8   :  { %9531 = vmatpush1.bf16.msra.mxu0 %v12969_v21  ;;  %v6241_v21 = vld [vmem:[#allocation18 + $0x870] sm:$0xff] }
 0x5d9   :  { %9532 = vmatprep.subr.bf16.mxu0 %v12978_v61  ;;  %v5980_v61 = vld [vmem:[#allocation18 + $0x48] sm:$0xff]  ;;  %v13034_v11 = vcombine.high %v6237_v14, %v6241_v21  ;;  %v6289_v45 = vld [vmem:[#allocation18 + $0x9f0] sm:$0xff] }
 0x5da   :  { %9285 = vmatpush1.bf16.msra.mxu1 %v13221_v56  ;;  %v5984_v56 = vld [vmem:[#allocation18 + $0x68] sm:$0xff] }
 0x5db   :  { %9286 = vmatprep.subr.bf16.mxu1 %v13230_v54  ;;  %v6245_v54 = vld [vmem:[#allocation18 + $0x890] sm:$0xff]  ;;  %v12776_v55 = vcombine.high %v5980_v61, %v5984_v56 }
 0x5dc   :  { %9533 = vmatpush1.bf16.msra.mxu0 %v12977_v24  ;;  %v6249_v24 = vld [vmem:[#allocation18 + $0x8b0] sm:$0xff] }
 0x5dd   :  { %9534 = vmatprep.subr.bf16.mxu0 %v12986_v25  ;;  %v13033_v25 = vcombine.low %v6237_v14, %v6241_v21  ;;  %v13042_v12 = vcombine.high %v6245_v54, %v6249_v24  ;;  %v6032_v14 = vld [vmem:[#allocation18 + $0x1e8] sm:$0xff] }
 0x5de   :  { %9287 = vmatpush1.bf16.msra.mxu1 %v13229_v32  ;;  %v5988_v32 = vld [vmem:[#allocation18 + $0x88] sm:$0xff] }
 0x5df   :  { %9288 = vmatprep.subr.bf16.mxu1 %v13238_v27  ;;  %v12775_v27 = vcombine.low %v5980_v61, %v5984_v56  ;;  %v12784_v47 = vcombine.high %v5988_v32, %v5992_v34  ;;  %v6297_v61 = vld [vmem:[#allocation18 + $0xa30] sm:$0xff] }
 0x5e0   :  { %9535 = vmatpush1.bf16.msra.mxu0 %v12985_v19  ;;  %v6253_v19 = vld [vmem:[#allocation18 + $0x8d0] sm:$0xff] }
 0x5e1   :  { %9536 = vmatprep.subr.bf16.mxu0 %v12994_v44  ;;  %v13041_v44 = vcombine.low %v6245_v54, %v6249_v24  ;;  %v13050_v16 = vcombine.high %v6253_v19, %v6257_v30  ;;  %v6040_v54 = vld [vmem:[#allocation18 + $0x228] sm:$0xff] }
 0x5e2   :  { %9289 = vmatpush1.bf16.msra.mxu1 %v13237_v28  ;;  %v5996_v28 = vld [vmem:[#allocation18 + $0xc8] sm:$0xff] }
 0x5e3   :  { %9290 = vmatprep.subr.bf16.mxu1 %v13246_v20  ;;  %v12783_v20 = vcombine.low %v5988_v32, %v5992_v34  ;;  %v12792_v33 = vcombine.high %v5996_v28, %v6000_v17  ;;  %v6305_v32 = vld [vmem:[#allocation18 + $0xa70] sm:$0xff] }
 0x5e4   :  { %9537 = vmatpush1.bf16.msra.mxu0 %v12993_v3  ;;  %v6261_v3 = vld [vmem:[#allocation18 + $0x910] sm:$0xff] }
 0x5e5   :  { %9538 = vmatprep.subr.bf16.mxu0 %v13002_v29  ;;  %v13049_v29 = vcombine.low %v6253_v19, %v6257_v30  ;;  %v13058_v59 = vcombine.high %v6261_v3, %v6265_v57  ;;  %v6048_v19 = vld [vmem:[#allocation18 + $0x268] sm:$0xff] }
 0x5e6   :  { %9291 = vmatpush1.bf16.msra.mxu1 %v13245_v35  ;;  %v6004_v35 = vld [vmem:[#allocation18 + $0x108] sm:$0xff] }
 0x5e7   :  { %9292 = vmatprep.subr.bf16.mxu1 %v13254_v43  ;;  %v12791_v43 = vcombine.low %v5996_v28, %v6000_v17  ;;  %v12800_v31 = vcombine.high %v6004_v35, %v6008_v51  ;;  %v6313_v28 = vld [vmem:[#allocation18 + $0xab0] sm:$0xff] }
 0x5e8   :  { %9539 = vmatpush1.bf16.msra.mxu0 %v13001_v53  ;;  %v6269_v53 = vld [vmem:[#allocation18 + $0x950] sm:$0xff] }
 0x5e9   :  { %9540 = vmatprep.subr.bf16.mxu0 %v13010_v63  ;;  %v13057_v63 = vcombine.low %v6261_v3, %v6265_v57  ;;  %v13066_v49 = vcombine.high %v6269_v53, %v6273_v22  ;;  %v6056_v3 = vld [vmem:[#allocation18 + $0x2a8] sm:$0xff] }
 0x5ea   :  { %9293 = vmatpush1.bf16.msra.mxu1 %v13253_v13  ;;  %v6012_v13 = vld [vmem:[#allocation18 + $0x148] sm:$0xff] }
 0x5eb   :  { %9294 = vmatprep.subr.bf16.mxu1 %v13262_v41  ;;  %v12799_v41 = vcombine.low %v6004_v35, %v6008_v51  ;;  %v12808_v60 = vcombine.high %v6012_v13, %v6016_v1  ;;  %v6321_v35 = vld [vmem:[#allocation18 + $0xaf0] sm:$0xff] }
 0x5ec   :  { %9541 = vmatpush1.bf16.msra.mxu0 %v13009_v40  ;;  %v6277_v40 = vld [vmem:[#allocation18 + $0x990] sm:$0xff] }
 0x5ed   :  { %9542 = vmatprep.subr.bf16.mxu0 %v13018_v58  ;;  %v13065_v58 = vcombine.low %v6269_v53, %v6273_v22  ;;  %v13074_v37 = vcombine.high %v6277_v40, %v6281_v4  ;;  %v6064_v53 = vld [vmem:[#allocation18 + $0x2e8] sm:$0xff] }
 0x5ee   :  { %9295 = vmatpush1.bf16.msra.mxu1 %v13261_v10  ;;  %v6020_v10 = vld [vmem:[#allocation18 + $0x188] sm:$0xff] }
 0x5ef   :  { %9296 = vmatprep.subr.bf16.mxu1 %v13270_v7  ;;  %v12807_v7 = vcombine.low %v6012_v13, %v6016_v1  ;;  %v12816_v46 = vcombine.high %v6020_v10, %v6024_v6  ;;  %v6329_v13 = vld [vmem:[#allocation18 + $0xb30] sm:$0xff] }
 0x5f0   :  { %9543 = vmatpush1.bf16.msra.mxu0 %v13017_v42  ;;  %v6285_v42 = vld [vmem:[#allocation18 + $0x9d0] sm:$0xff] }
 0x5f1   :  { %9553 = vmatprep.subr.bf16.mxu0 %v13026_v15  ;;  %v13073_v15 = vcombine.low %v6277_v40, %v6281_v4  ;;  %v13082_v21 = vcombine.high %v6285_v42, %v6289_v45  ;;  %v6072_v40 = vld [vmem:[#allocation18 + $0x328] sm:$0xff] }
 0x5f2   :  { %9297 = vmatpush1.bf16.msra.mxu1 %v13269_v9  ;;  %v6028_v9 = vld [vmem:[#allocation18 + $0x1c8] sm:$0xff] }
 0x5f3   :  { %9545 = vmatmul.mubr.bf16.vlgmr.msra.gmra.mrb[140].mxu0 %v16353_v2  ;;  %9307 = vmatprep.subr.bf16.mxu1 %v12768_v50  ;;  %v12815_v50 = vcombine.low %v6020_v10, %v6024_v6  ;;  %v12824_v56 = vcombine.high %v6028_v9, %v6032_v14  ;;  %v6337_v10 = vld [vmem:[#allocation18 + $0xb70] sm:$0xff] }
 0x5f4   :  { %9554 = vmatpush1.bf16.msra.mxu0 %v13025_v8  ;;  %9585 = vmatprep.mubr.bf16.mxu0 %v16359_v52  ;;  %v6293_v8 = vld [vmem:[#allocation18 + $0xa10] sm:$0xff] }
 0x5f5   :  { %9299 = vmatmul.mubr.bf16.vlgmr.msra.gmra.mrb[88].mxu1 %v16378_v0  ;;  %9555 = vmatprep.subr.bf16.mxu0 %v13034_v11  ;;  %v13081_v11 = vcombine.low %v6285_v42, %v6289_v45  ;;  %v13090_v24 = vcombine.high %v6293_v8, %v6297_v61  ;;  %v6080_v42 = vld [vmem:[#allocation18 + $0x368] sm:$0xff] }
 0x5f6   :  { %9308 = vmatpush1.bf16.msra.mxu1 %v12767_v23  ;;  %9339 = vmatprep.mubr.bf16.mxu1 %v16341_v5  ;;  %v6036_v23 = vld [vmem:[#allocation18 + $0x208] sm:$0xff] }
 0x5f7   :  { %9309 = vmatprep.subr.bf16.mxu1 %v12776_v55  ;;  %v12823_v55 = vcombine.low %v6028_v9, %v6032_v14  ;;  %v12832_v34 = vcombine.high %v6036_v23, %v6040_v54  ;;  %v6345_v9 = vld [vmem:[#allocation18 + $0xbb0] sm:$0xff] }
 0x5f8   :  { %9556 = vmatpush1.bf16.msra.mxu0 %v13033_v25  ;;  %v6301_v25 = vld [vmem:[#allocation18 + $0xa50] sm:$0xff] }
 0x5f9   :  { %9557 = vmatprep.subr.bf16.mxu0 %v13042_v12  ;;  %v13089_v12 = vcombine.low %v6293_v8, %v6297_v61  ;;  %v13098_v30 = vcombine.high %v6301_v25, %v6305_v32  ;;  %v6088_v8 = vld [vmem:[#allocation18 + $0x3a8] sm:$0xff] }
 0x5fa   :  { %9310 = vmatpush1.bf16.msra.mxu1 %v12775_v27  ;;  %v6044_v27 = vld [vmem:[#allocation18 + $0x248] sm:$0xff] }
 0x5fb   :  { %9311 = vmatprep.subr.bf16.mxu1 %v12784_v47  ;;  %v12831_v47 = vcombine.low %v6036_v23, %v6040_v54  ;;  %v12840_v17 = vcombine.high %v6044_v27, %v6048_v19  ;;  %v6353_v23 = vld [vmem:[#allocation18 + $0xbf0] sm:$0xff] }
 0x5fc   :  { %9558 = vmatpush1.bf16.msra.mxu0 %v13041_v44  ;;  %v6309_v44 = vld [vmem:[#allocation18 + $0xa90] sm:$0xff] }
 0x5fd   :  { %9559 = vmatprep.subr.bf16.mxu0 %v13050_v16  ;;  %v13097_v16 = vcombine.low %v6301_v25, %v6305_v32  ;;  %v13106_v57 = vcombine.high %v6309_v44, %v6313_v28  ;;  %v6096_v25 = vld [vmem:[#allocation18 + $0x3e8] sm:$0xff] }
 0x5fe   :  { %9312 = vmatpush1.bf16.msra.mxu1 %v12783_v20  ;;  %v6052_v20 = vld [vmem:[#allocation18 + $0x288] sm:$0xff] }
 0x5ff   :  { %9313 = vmatprep.subr.bf16.mxu1 %v12792_v33  ;;  %v12839_v33 = vcombine.low %v6044_v27, %v6048_v19  ;;  %v12848_v51 = vcombine.high %v6052_v20, %v6056_v3  ;;  %v6361_v27 = vld [vmem:[#allocation18 + $0xc30] sm:$0xff] }
 0x600   :  { %9560 = vmatpush1.bf16.msra.mxu0 %v13049_v29  ;;  %v6317_v29 = vld [vmem:[#allocation18 + $0xad0] sm:$0xff] }
 0x601   :  { %9561 = vmatprep.subr.bf16.mxu0 %v13058_v59  ;;  %v13105_v59 = vcombine.low %v6309_v44, %v6313_v28  ;;  %v13114_v22 = vcombine.high %v6317_v29, %v6321_v35  ;;  %v6104_v44 = vld [vmem:[#allocation18 + $0x428] sm:$0xff] }
 0x602   :  { %9314 = vmatpush1.bf16.msra.mxu1 %v12791_v43  ;;  %v6060_v43 = vld [vmem:[#allocation18 + $0x2c8] sm:$0xff] }
 0x603   :  { %9315 = vmatprep.subr.bf16.mxu1 %v12800_v31  ;;  %v12847_v31 = vcombine.low %v6052_v20, %v6056_v3  ;;  %v12856_v1 = vcombine.high %v6060_v43, %v6064_v53  ;;  %v6369_v20 = vld [vmem:[#allocation18 + $0xc70] sm:$0xff] }
 0x604   :  { %9562 = vmatpush1.bf16.msra.mxu0 %v13057_v63  ;;  %v6325_v63 = vld [vmem:[#allocation18 + $0xb10] sm:$0xff] }
 0x605   :  { %9563 = vmatprep.subr.bf16.mxu0 %v13066_v49  ;;  %v13113_v49 = vcombine.low %v6317_v29, %v6321_v35  ;;  %v13122_v4 = vcombine.high %v6325_v63, %v6329_v13  ;;  %v6112_v29 = vld [vmem:[#allocation18 + $0x468] sm:$0xff] }
 0x606   :  { %9316 = vmatpush1.bf16.msra.mxu1 %v12799_v41  ;;  %v6068_v41 = vld [vmem:[#allocation18 + $0x308] sm:$0xff] }
 0x607   :  { %9317 = vmatprep.subr.bf16.mxu1 %v12808_v60  ;;  %v12855_v60 = vcombine.low %v6060_v43, %v6064_v53  ;;  %v12864_v6 = vcombine.high %v6068_v41, %v6072_v40  ;;  %v6377_v43 = vld [vmem:[#allocation18 + $0xcb0] sm:$0xff] }
 0x608   :  { %9564 = vmatpush1.bf16.msra.mxu0 %v13065_v58  ;;  %v6333_v58 = vld [vmem:[#allocation18 + $0xb50] sm:$0xff] }
 0x609   :  { %9565 = vmatprep.subr.bf16.mxu0 %v13074_v37  ;;  %v13121_v37 = vcombine.low %v6325_v63, %v6329_v13  ;;  %v13130_v45 = vcombine.high %v6333_v58, %v6337_v10  ;;  %v6120_v63 = vld [vmem:[#allocation18 + $0x4a8] sm:$0xff] }
 0x60a   :  { %9318 = vmatpush1.bf16.msra.mxu1 %v12807_v7  ;;  %v6076_v7 = vld [vmem:[#allocation18 + $0x348] sm:$0xff] }
 0x60b   :  { %9319 = vmatprep.subr.bf16.mxu1 %v12816_v46  ;;  %v12863_v46 = vcombine.low %v6068_v41, %v6072_v40  ;;  %v12872_v14 = vcombine.high %v6076_v7, %v6080_v42  ;;  %v6385_v41 = vld [vmem:[#allocation18 + $0xcf0] sm:$0xff] }
 0x60c   :  { %9566 = vmatpush1.bf16.msra.mxu0 %v13073_v15  ;;  %v6341_v15 = vld [vmem:[#allocation18 + $0xb90] sm:$0xff] }
 0x60d   :  { %9567 = vmatprep.subr.bf16.mxu0 %v13082_v21  ;;  %v13129_v21 = vcombine.low %v6333_v58, %v6337_v10  ;;  %v13138_v61 = vcombine.high %v6341_v15, %v6345_v9  ;;  %v6128_v58 = vld [vmem:[#allocation18 + $0x4e8] sm:$0xff] }
 0x60e   :  { %9320 = vmatpush1.bf16.msra.mxu1 %v12815_v50  ;;  %v6084_v50 = vld [vmem:[#allocation18 + $0x388] sm:$0xff] }
 0x60f   :  { %9321 = vmatprep.subr.bf16.mxu1 %v12824_v56  ;;  %v12871_v56 = vcombine.low %v6076_v7, %v6080_v42  ;;  %v12880_v54 = vcombine.high %v6084_v50, %v6088_v8  ;;  %v6393_v7 = vld [vmem:[#allocation18 + $0xd30] sm:$0xff] }
 0x610   :  { %9568 = vmatpush1.bf16.msra.mxu0 %v13081_v11  ;;  %v6349_v11 = vld [vmem:[#allocation18 + $0xbd0] sm:$0xff] }
 0x611   :  { %9569 = vmatprep.subr.bf16.mxu0 %v13090_v24  ;;  %v13137_v24 = vcombine.low %v6341_v15, %v6345_v9  ;;  %v13146_v32 = vcombine.high %v6349_v11, %v6353_v23  ;;  %v6136_v15 = vld [vmem:[#allocation18 + $0x528] sm:$0xff] }
 0x612   :  { %9322 = vmatpush1.bf16.msra.mxu1 %v12823_v55  ;;  %v6092_v55 = vld [vmem:[#allocation18 + $0x3c8] sm:$0xff] }
 0x613   :  { %9323 = vmatprep.subr.bf16.mxu1 %v12832_v34  ;;  %v12879_v34 = vcombine.low %v6084_v50, %v6088_v8  ;;  %v12888_v19 = vcombine.high %v6092_v55, %v6096_v25  ;;  %v6401_v50 = vld [vmem:[#allocation18 + $0xd70] sm:$0xff] }
 0x614   :  { %9570 = vmatpush1.bf16.msra.mxu0 %v13089_v12  ;;  %v6357_v12 = vld [vmem:[#allocation18 + $0xc10] sm:$0xff] }
 0x615   :  { %9571 = vmatprep.subr.bf16.mxu0 %v13098_v30  ;;  %v13145_v30 = vcombine.low %v6349_v11, %v6353_v23  ;;  %v13154_v28 = vcombine.high %v6357_v12, %v6361_v27  ;;  %v6144_v11 = vld [vmem:[#allocation18 + $0x568] sm:$0xff] }
 0x616   :  { %9324 = vmatpush1.bf16.msra.mxu1 %v12831_v47  ;;  %v6100_v47 = vld [vmem:[#allocation18 + $0x408] sm:$0xff] }
 0x617   :  { %9325 = vmatprep.subr.bf16.mxu1 %v12840_v17  ;;  %v12887_v17 = vcombine.low %v6092_v55, %v6096_v25  ;;  %v12896_v3 = vcombine.high %v6100_v47, %v6104_v44  ;;  %v6409_v55 = vld [vmem:[#allocation18 + $0xdb0] sm:$0xff] }
 0x618   :  { %9572 = vmatpush1.bf16.msra.mxu0 %v13097_v16  ;;  %v6365_v16 = vld [vmem:[#allocation18 + $0xc50] sm:$0xff] }
 0x619   :  { %9573 = vmatprep.subr.bf16.mxu0 %v13106_v57  ;;  %v13153_v57 = vcombine.low %v6357_v12, %v6361_v27  ;;  %v13162_v35 = vcombine.high %v6365_v16, %v6369_v20  ;;  %v6152_v12 = vld [vmem:[#allocation18 + $0x5a8] sm:$0xff] }
 0x61a   :  { %9326 = vmatpush1.bf16.msra.mxu1 %v12839_v33  ;;  %v6108_v33 = vld [vmem:[#allocation18 + $0x448] sm:$0xff] }
 0x61b   :  { %9327 = vmatprep.subr.bf16.mxu1 %v12848_v51  ;;  %v12895_v51 = vcombine.low %v6100_v47, %v6104_v44  ;;  %v12904_v53 = vcombine.high %v6108_v33, %v6112_v29  ;;  %v6413_v47 = vld [vmem:[#allocation18 + $0xdd0] sm:$0xff] }
 0x61c   :  { %9574 = vmatpush1.bf16.msra.mxu0 %v13105_v59  ;;  %v6373_v59 = vld [vmem:[#allocation18 + $0xc90] sm:$0xff] }
 0x61d   :  { %9575 = vmatprep.subr.bf16.mxu0 %v13114_v22  ;;  %v13161_v22 = vcombine.low %v6365_v16, %v6369_v20  ;;  %v13170_v13 = vcombine.high %v6373_v59, %v6377_v43  ;;  %v6417_v44 = vld [vmem:[#allocation18 + $0xdf0] sm:$0xff] }
 0x61e   :  { %9328 = vmatpush1.bf16.msra.mxu1 %v12847_v31  ;;  %v6116_v31 = vld [vmem:[#allocation18 + $0x488] sm:$0xff] }
 0x61f   :  { %9329 = vmatprep.subr.bf16.mxu1 %v12856_v1  ;;  %v12903_v1 = vcombine.low %v6108_v33, %v6112_v29  ;;  %v12912_v40 = vcombine.high %v6116_v31, %v6120_v63  ;;  %v13210_v29 = vcombine.high %v6413_v47, %v6417_v44 }
 0x620   :  { %9576 = vmatpush1.bf16.msra.mxu0 %v13113_v49  ;;  %v6381_v49 = vld [vmem:[#allocation18 + $0xcd0] sm:$0xff] }
 0x621   :  { %9577 = vmatprep.subr.bf16.mxu0 %v13122_v4  ;;  %v13169_v4 = vcombine.low %v6373_v59, %v6377_v43  ;;  %v13178_v10 = vcombine.high %v6381_v49, %v6385_v41  ;;  %v6425_v59 = vld [vmem:[#allocation18 + $0xe30] sm:$0xff] }
 0x622   :  { %9330 = vmatpush1.bf16.msra.mxu1 %v12855_v60  ;;  %v6124_v60 = vld [vmem:[#allocation18 + $0x4c8] sm:$0xff] }
 0x623   :  { %9331 = vmatprep.subr.bf16.mxu1 %v12864_v6  ;;  %v12911_v6 = vcombine.low %v6116_v31, %v6120_v63  ;;  %v12920_v42 = vcombine.high %v6124_v60, %v6128_v58  ;;  %v6168_v31 = vld [vmem:[#allocation18 + $0x628] sm:$0xff] }
 0x624   :  { %9578 = vmatpush1.bf16.msra.mxu0 %v13121_v37  ;;  %v6389_v37 = vld [vmem:[#allocation18 + $0xd10] sm:$0xff] }
 0x625   :  { %9579 = vmatprep.subr.bf16.mxu0 %v13130_v45  ;;  %v13177_v45 = vcombine.low %v6381_v49, %v6385_v41  ;;  %v13186_v9 = vcombine.high %v6389_v37, %v6393_v7  ;;  %v6433_v49 = vld [vmem:[#allocation18 + $0xe70] sm:$0xff] }
 0x626   :  { %9332 = vmatpush1.bf16.msra.mxu1 %v12863_v46  ;;  %v6132_v46 = vld [vmem:[#allocation18 + $0x508] sm:$0xff] }
 0x627   :  { %9333 = vmatprep.subr.bf16.mxu1 %v12872_v14  ;;  %v12919_v14 = vcombine.low %v6124_v60, %v6128_v58  ;;  %v12928_v8 = vcombine.high %v6132_v46, %v6136_v15  ;;  %v6176_v60 = vld [vmem:[#allocation18 + $0x668] sm:$0xff] }
 0x628   :  { %9580 = vmatpush1.bf16.msra.mxu0 %v13129_v21  ;;  %v6397_v21 = vld [vmem:[#allocation18 + $0xd50] sm:$0xff] }
 0x629   :  { %9581 = vmatprep.subr.bf16.mxu0 %v13138_v61  ;;  %v13185_v61 = vcombine.low %v6389_v37, %v6393_v7  ;;  %v13194_v23 = vcombine.high %v6397_v21, %v6401_v50  ;;  %v6441_v37 = vld [vmem:[#allocation18 + $0xeb0] sm:$0xff] }
 0x62a   :  { %9334 = vmatpush1.bf16.msra.mxu1 %v12871_v56  ;;  %v6140_v56 = vld [vmem:[#allocation18 + $0x548] sm:$0xff] }
 0x62b   :  { %9335 = vmatprep.subr.bf16.mxu1 %v12880_v54  ;;  %v12927_v54 = vcombine.low %v6132_v46, %v6136_v15  ;;  %v12936_v25 = vcombine.high %v6140_v56, %v6144_v11  ;;  %v6184_v46 = vld [vmem:[#allocation18 + $0x6a8] sm:$0xff] }
 0x62c   :  { %9582 = vmatpush1.bf16.msra.mxu0 %v13137_v24  ;;  %v6405_v24 = vld [vmem:[#allocation18 + $0xd90] sm:$0xff] }
 0x62d   :  { %9583 = vmatprep.subr.bf16.mxu0 %v13146_v32  ;;  %v13193_v32 = vcombine.low %v6397_v21, %v6401_v50  ;;  %v13202_v27 = vcombine.high %v6405_v24, %v6409_v55  ;;  %v13201_v20 = vcombine.low %v6405_v24, %v6409_v55  ;;  %v6449_v21 = vld [vmem:[#allocation18 + $0xef0] sm:$0xff] }
 0x62e   :  { %9336 = vmatpush1.bf16.msra.mxu1 %v12879_v34  ;;  %v6148_v34 = vld [vmem:[#allocation18 + $0x588] sm:$0xff]  ;;  %v6457_v24 = vld [vmem:[#allocation18 + $0xf30] sm:$0xff] }
 0x62f   :  { %9337 = vmatprep.subr.bf16.mxu1 %v12888_v19 }
 0x630   :  { %9584 = vmatpush1.bf16.msra.mxu0 %v13145_v30  ;;  %v12935_v30 = vcombine.low %v6140_v56, %v6144_v11  ;;  %v6192_v56 = vld [vmem:[#allocation18 + $0x6e8] sm:$0xff] }
 0x631   :  { %9594 = vmatprep.subr.bf16.mxu0 %v13154_v28 }
 0x632   :  { %9338 = vmatpush1.bf16.msra.mxu1 %v12887_v17  ;;  %v12944_v17 = vcombine.high %v6148_v34, %v6152_v12 }
 0x633   :  { %9586 = vmatmul.mubr.bf16.vlgmr.msra.gmra.mrb[140].mxu0 %v16343_v62  ;;  %9348 = vmatprep.subr.bf16.mxu1 %v12896_v3  ;;  %v6156_v3 = vld [vmem:[#allocation18 + $0x5c8] sm:$0xff] }
 0x634   :  { %9595 = vmatpush1.bf16.msra.mxu0 %v13153_v57  ;;  %9626 = vmatprep.mubr.bf16.mxu0 %v16371_v18  ;;  %v6160_v57 = vld [vmem:[#allocation18 + $0x5e8] sm:$0xff] }
 0x635   :  { %9340 = vmatmul.mubr.bf16.vlgmr.msra.gmra.mrb[92].mxu1 %v16339_v36  ;;  %9596 = vmatprep.subr.bf16.mxu0 %v13162_v35  ;;  %v12943_v35 = vcombine.low %v6148_v34, %v6152_v12  ;;  %v12952_v43 = vcombine.high %v6156_v3, %v6160_v57  ;;  %v6200_v34 = vld [vmem:[#allocation18 + $0x728] sm:$0xff] }
 0x636   :  { %9349 = vmatpush1.bf16.msra.mxu1 %v12895_v51  ;;  %9380 = vmatprep.mubr.bf16.mxu1 %v16348_v39  ;;  %v6421_v51 = vld [vmem:[#allocation18 + $0xe10] sm:$0xff] }
 0x637   :  { %9350 = vmatprep.subr.bf16.mxu1 %v12904_v53  ;;  %v13209_v53 = vcombine.low %v6413_v47, %v6417_v44  ;;  %v13218_v63 = vcombine.high %v6421_v51, %v6425_v59  ;;  %v6465_v47 = vld [vmem:[#allocation18 + $0xf70] sm:$0xff] }
 0x638   :  { %9597 = vmatpush1.bf16.msra.mxu0 %v13161_v22  ;;  %v6164_v22 = vld [vmem:[#allocation18 + $0x608] sm:$0xff] }
 0x639   :  { %9598 = vmatprep.subr.bf16.mxu0 %v13170_v13  ;;  %v12951_v13 = vcombine.low %v6156_v3, %v6160_v57  ;;  %v12960_v41 = vcombine.high %v6164_v22, %v6168_v31 }
 0x63a   :  { %9351 = vmatpush1.bf16.msra.mxu1 %v12903_v1  ;;  %v6429_v1 = vld [vmem:[#allocation18 + $0xe50] sm:$0xff] }
 0x63b   :  { %9352 = vmatprep.subr.bf16.mxu1 %v12912_v40  ;;  %v13217_v40 = vcombine.low %v6421_v51, %v6425_v59  ;;  %v13226_v58 = vcombine.high %v6429_v1, %v6433_v49  ;;  %v6212_v59 = vld [vmem:[#allocation18 + $0x788] sm:$0xff] }
 0x63c   :  { %9599 = vmatpush1.bf16.msra.mxu0 %v13169_v4  ;;  %v6172_v4 = vld [vmem:[#allocation18 + $0x648] sm:$0xff] }
 0x63d   :  { %9600 = vmatprep.subr.bf16.mxu0 %v13178_v10  ;;  %v12959_v10 = vcombine.low %v6164_v22, %v6168_v31  ;;  %v12968_v7 = vcombine.high %v6172_v4, %v6176_v60  ;;  %v6477_v31 = vld [vmem:[#allocation18 + $0xfd0] sm:$0xff] }
 0x63e   :  { %9353 = vmatpush1.bf16.msra.mxu1 %v12911_v6  ;;  %v6437_v6 = vld [vmem:[#allocation18 + $0xe90] sm:$0xff] }
 0x63f   :  { %9354 = vmatprep.subr.bf16.mxu1 %v12920_v42  ;;  %v13225_v42 = vcombine.low %v6429_v1, %v6433_v49  ;;  %v13234_v15 = vcombine.high %v6437_v6, %v6441_v37  ;;  %v6220_v49 = vld [vmem:[#allocation18 + $0x7c8] sm:$0xff] }
 0x640   :  { %9601 = vmatpush1.bf16.msra.mxu0 %v13177_v45  ;;  %v6180_v45 = vld [vmem:[#allocation18 + $0x688] sm:$0xff] }
 0x641   :  { %9602 = vmatprep.subr.bf16.mxu0 %v13186_v9  ;;  %v12967_v9 = vcombine.low %v6172_v4, %v6176_v60  ;;  %v12976_v50 = vcombine.high %v6180_v45, %v6184_v46 }
 0x642   :  { %9355 = vmatpush1.bf16.msra.mxu1 %v12919_v14  ;;  %v6445_v14 = vld [vmem:[#allocation18 + $0xed0] sm:$0xff] }
 0x643   :  { %9356 = vmatprep.subr.bf16.mxu1 %v12928_v8  ;;  %v13233_v8 = vcombine.low %v6437_v6, %v6441_v37  ;;  %v13242_v11 = vcombine.high %v6445_v14, %v6449_v21  ;;  %v6232_v6 = vld [vmem:[#allocation18 + $0x828] sm:$0xff] }
 0x644   :  { %9603 = vmatpush1.bf16.msra.mxu0 %v13185_v61  ;;  %v6188_v61 = vld [vmem:[#allocation18 + $0x6c8] sm:$0xff] }
 0x645   :  { %9604 = vmatprep.subr.bf16.mxu0 %v13194_v23  ;;  %v12975_v23 = vcombine.low %v6180_v45, %v6184_v46  ;;  %v12984_v55 = vcombine.high %v6188_v61, %v6192_v56  ;;  %v15091_v37 = vld [vmem:[%s17256_s9 + $0x4] ss:$16 sps:$4 sm:$0xff]  }
 0x646   :  { %9357 = vmatpush1.bf16.msra.mxu1 %v12927_v54  ;;  %v16387_v19 = vpop.f32.mrb[136].mxu0  ;;  %v6453_v54 = vld [vmem:[#allocation18 + $0xf10] sm:$0xff]  ;;  %v6236_v45 = vld [vmem:[#allocation18 + $0x848] sm:$0xff] }
 0x647   :  { %v16389_v28 = vpop.f32.mrb[137].mxu0  ;;  %9358 = vmatprep.subr.bf16.mxu1 %v12936_v25  ;;  %v13241_v25 = vcombine.low %v6445_v14, %v6449_v21  ;;  %v13250_v12 = vcombine.high %v6453_v54, %v6457_v24  ;;  %v6240_v46 = vld [vmem:[#allocation18 + $0x868] sm:$0xff] }
 0x648   :  { %9605 = vmatpush1.bf16.msra.mxu0 %v13193_v32  ;;  %v9181_v16 = vpop.f32.mrb[138].mxu0  ;;  %v6196_v32 = vld [vmem:[#allocation18 + $0x708] sm:$0xff]  ;;  %v13032_v21 = vcombine.high %v6236_v45, %v6240_v46 }
 0x649   :  { %v9182_v33 = vpop.f32.mrb[139].mxu0  ;;  %9606 = vmatprep.subr.bf16.mxu0 %v13202_v27  ;;  %v12983_v27 = vcombine.low %v6188_v61, %v6192_v56  ;;  %v12992_v44 = vcombine.high %v6196_v32, %v6200_v34  ;;  %v6204_v16 = vld [vmem:[#allocation18 + $0x748] sm:$0xff]  ;;  %v12991_v57 = vcombine.low %v6196_v32, %v6200_v34 }
 0x64a   :  { %9359 = vmatpush1.bf16.msra.mxu1 %v12935_v30  ;;  %v6461_v30 = vld [vmem:[#allocation18 + $0xf50] sm:$0xff]  ;;  %v15097_v56 = vld [vmem:[%s17256_s9 + $0x44] ss:$16 sps:$4 sm:$0xff]  }
 0x64b   :  { %9360 = vmatprep.subr.bf16.mxu1 %v12944_v17  ;;  %v13249_v17 = vcombine.low %v6453_v54, %v6457_v24  ;;  %v13258_v3 = vcombine.high %v6461_v30, %v6465_v47  ;;  %v6469_v33 = vld [vmem:[#allocation18 + $0xf90] sm:$0xff]  ;;  %v13257_v51 = vcombine.low %v6461_v30, %v6465_v47  ;;  %v6252_v54 = vld [vmem:[#allocation18 + $0x8c8] sm:$0xff] }
 0x64c   :  { %9607 = vmatpush1.bf16.msra.mxu0 %v13201_v20  ;;  %v6208_v20 = vld [vmem:[#allocation18 + $0x768] sm:$0xff] }
 0x64d   :  { %9608 = vmatprep.subr.bf16.mxu0 %v13210_v29  ;;  %v6473_v29 = vld [vmem:[#allocation18 + $0xfb0] sm:$0xff]  ;;  %v12999_v22 = vcombine.low %v6204_v16, %v6208_v20  ;;  %v6256_v24 = vld [vmem:[#allocation18 + $0x8e8] sm:$0xff] }
 0x64e   :  { %9361 = vmatpush1.bf16.msra.mxu1 %v12943_v35  ;;  %v13000_v35 = vcombine.high %v6204_v16, %v6208_v20  ;;  %v13265_v1 = vcombine.low %v6469_v33, %v6473_v29  ;;  %v15092_v61 = vld [vmem:[%s17256_s9 + $0x20] ss:$16 sps:$4 sm:$0xff]   ;;  %v13048_v34 = vcombine.high %v6252_v54, %v6256_v24  ;;  %v15103_v47 = vld [vmem:[%s17256_s9 + $0x84] ss:$16 sps:$4 sm:$0xff]  }
 0x64f   :  { %9362 = vmatprep.subr.bf16.mxu1 %v12952_v43  ;;  %v6216_v43 = vld [vmem:[#allocation18 + $0x7a8] sm:$0xff] }
 0x650   :  { %9609 = vmatpush1.bf16.msra.mxu0 %v13209_v53  ;;  %v13266_v53 = vcombine.high %v6469_v33, %v6473_v29  ;;  %v13007_v4 = vcombine.low %v6212_v59, %v6216_v43  ;;  %v15098_v30 = vld [vmem:[%s17256_s9 + $0x60] ss:$16 sps:$4 sm:$0xff]  }
 0x651   :  { %9610 = vmatprep.subr.bf16.mxu0 %v13218_v63  ;;  %v6481_v63 = vld [vmem:[#allocation18 + $0xff0] sm:$0xff]  ;;  %v6268_v16 = vld [vmem:[#allocation18 + $0x948] sm:$0xff] }
 0x652   :  { %9363 = vmatpush1.bf16.msra.mxu1 %v12951_v13  ;;  %v13008_v13 = vcombine.high %v6212_v59, %v6216_v43  ;;  %v6272_v20 = vld [vmem:[#allocation18 + $0x968] sm:$0xff] }
 0x653   :  { %9364 = vmatprep.subr.bf16.mxu1 %v12960_v41  ;;  %v6224_v41 = vld [vmem:[#allocation18 + $0x7e8] sm:$0xff]  ;;  %v13064_v29 = vcombine.high %v6268_v16, %v6272_v20 }
 0x654   :  { %9611 = vmatpush1.bf16.msra.mxu0 %v13217_v40  ;;  %v13274_v40 = vcombine.high %v6477_v31, %v6481_v63  ;;  %v13016_v60 = vcombine.high %v6220_v49, %v6224_v41  ;;  %v15104_v59 = vld [vmem:[%s17256_s9 + $0xa0] ss:$16 sps:$4 sm:$0xff]   ;;  %v15109_v43 = vld [vmem:[%s17256_s9 + $0xc4] ss:$16 sps:$4 sm:$0xff]  }
 0x655   :  { %9612 = vmatprep.subr.bf16.mxu0 %v13226_v58  ;;  %v13273_v58 = vcombine.low %v6477_v31, %v6481_v63  ;;  %v6284_v31 = vld [vmem:[#allocation18 + $0x9c8] sm:$0xff] }
 0x656   :  { %9365 = vmatpush1.bf16.msra.mxu1 %v12959_v10  ;;  %v6228_v10 = vld [vmem:[#allocation18 + $0x808] sm:$0xff] }
 0x657   :  { %9366 = vmatprep.subr.bf16.mxu1 %v12968_v7  ;;  %v13015_v7 = vcombine.low %v6220_v49, %v6224_v41  ;;  %v13023_v14 = vcombine.low %v6228_v10, %v6232_v6  ;;  %v6288_v63 = vld [vmem:[#allocation18 + $0x9e8] sm:$0xff] }
 0x658   :  { %9613 = vmatpush1.bf16.msra.mxu0 %v13225_v42  ;;  %v13024_v42 = vcombine.high %v6228_v10, %v6232_v6  ;;  %v13080_v41 = vcombine.high %v6284_v31, %v6288_v63  ;;  %v13079_v10 = vcombine.low %v6284_v31, %v6288_v63  ;;  %v15136_v31 = vld [vmem:[%s17256_s9 + $0x1e4] ss:$16 sps:$4 sm:$0xff]  }
 0x659   :  { %9614 = vmatprep.subr.bf16.mxu0 %v13234_v15  ;;  %v15089_v15 = vld [vmem:[%s17256_s9] ss:$16 sps:$4 sm:$0xff]  }
 0x65a   :  { %9367 = vmatpush1.bf16.msra.mxu1 %v12967_v9  ;;  %v15094_v9 = vld [vmem:[%s17256_s9 + $0x24] ss:$16 sps:$4 sm:$0xff]  }
 0x65b   :  { %9368 = vmatprep.subr.bf16.mxu1 %v12976_v50  ;;  %v6244_v50 = vld [vmem:[#allocation18 + $0x888] sm:$0xff] }
 0x65c   :  { %9615 = vmatpush1.bf16.msra.mxu0 %v13233_v8  ;;  %v6248_v8 = vld [vmem:[#allocation18 + $0x8a8] sm:$0xff] }
 0x65d   :  { %9616 = vmatprep.subr.bf16.mxu0 %v13242_v11  ;;  %v13031_v11 = vcombine.low %v6236_v45, %v6240_v46  ;;  %v13039_v32 = vcombine.low %v6244_v50, %v6248_v8  ;;  %v15118_v45 = vld [vmem:[%s17256_s9 + $0x124] ss:$16 sps:$4 sm:$0xff]  }
 0x65e   :  { %9369 = vmatpush1.bf16.msra.mxu1 %v12975_v23  ;;  %v13040_v23 = vcombine.high %v6244_v50, %v6248_v8  ;;  %v15121_v50 = vld [vmem:[%s17256_s9 + $0x144] ss:$16 sps:$4 sm:$0xff]  }
 0x65f   :  { %9370 = vmatprep.subr.bf16.mxu1 %v12984_v55  ;;  %v15095_v55 = vld [vmem:[%s17256_s9 + $0x40] ss:$16 sps:$4 sm:$0xff]  }
 0x660   :  { %9617 = vmatpush1.bf16.msra.mxu0 %v13241_v25  ;;  %v15100_v25 = vld [vmem:[%s17256_s9 + $0x64] ss:$16 sps:$4 sm:$0xff]  }
 0x661   :  { %9618 = vmatprep.subr.bf16.mxu0 %v13250_v12  ;;  %v6260_v12 = vld [vmem:[#allocation18 + $0x908] sm:$0xff] }
 0x662   :  { %9371 = vmatpush1.bf16.msra.mxu1 %v12983_v27  ;;  %v6264_v27 = vld [vmem:[#allocation18 + $0x928] sm:$0xff] }
 0x663   :  { %9372 = vmatprep.subr.bf16.mxu1 %v12992_v44  ;;  %v13047_v44 = vcombine.low %v6252_v54, %v6256_v24  ;;  %v13055_v33 = vcombine.low %v6260_v12, %v6264_v27  ;;  %v15124_v54 = vld [vmem:[%s17256_s9 + $0x164] ss:$16 sps:$4 sm:$0xff]  }
 0x664   :  { %9619 = vmatpush1.bf16.msra.mxu0 %v13249_v17  ;;  %v13056_v17 = vcombine.high %v6260_v12, %v6264_v27  ;;  %v15127_v12 = vld [vmem:[%s17256_s9 + $0x184] ss:$16 sps:$4 sm:$0xff]  }
 0x665   :  { %9620 = vmatprep.subr.bf16.mxu0 %v13258_v3  ;;  %v15101_v3 = vld [vmem:[%s17256_s9 + $0x80] ss:$16 sps:$4 sm:$0xff]  }
 0x666   :  { %9373 = vmatpush1.bf16.msra.mxu1 %v12991_v57  ;;  %v15106_v57 = vld [vmem:[%s17256_s9 + $0xa4] ss:$16 sps:$4 sm:$0xff]  }
 0x667   :  { %9374 = vmatprep.subr.bf16.mxu1 %v13000_v35  ;;  %v6276_v35 = vld [vmem:[#allocation18 + $0x988] sm:$0xff] }
 0x668   :  { %9621 = vmatpush1.bf16.msra.mxu0 %v13257_v51  ;;  %v6280_v51 = vld [vmem:[#allocation18 + $0x9a8] sm:$0xff] }
 0x669   :  { %9622 = vmatprep.subr.bf16.mxu0 %v13266_v53  ;;  %v13063_v53 = vcombine.low %v6268_v16, %v6272_v20  ;;  %v13071_v49 = vcombine.low %v6276_v35, %v6280_v51  ;;  %v15130_v16 = vld [vmem:[%s17256_s9 + $0x1a4] ss:$16 sps:$4 sm:$0xff]  }
 0x66a   :  { %9375 = vmatpush1.bf16.msra.mxu1 %v12999_v22  ;;  %v13072_v22 = vcombine.high %v6276_v35, %v6280_v51  ;;  %v15133_v35 = vld [vmem:[%s17256_s9 + $0x1c4] ss:$16 sps:$4 sm:$0xff]  }
 0x66b   :  { %9376 = vmatprep.subr.bf16.mxu1 %v13008_v13  ;;  %v15107_v13 = vld [vmem:[%s17256_s9 + $0xc0] ss:$16 sps:$4 sm:$0xff]  }
 0x66c   :  { %9623 = vmatpush1.bf16.msra.mxu0 %v13265_v1  ;;  %v15112_v1 = vld [vmem:[%s17256_s9 + $0xe4] ss:$16 sps:$4 sm:$0xff]  }
 0x66d   :  { %9624 = vmatprep.subr.bf16.mxu0 %v13274_v40  ;;  %v6292_v40 = vld [vmem:[#allocation18 + $0xa08] sm:$0xff] }
 0x66e   :  { %9377 = vmatpush1.bf16.msra.mxu1 %v13007_v4  ;;  %v6296_v4 = vld [vmem:[#allocation18 + $0xa28] sm:$0xff] }
 0x66f   :  { %9378 = vmatprep.subr.bf16.mxu1 %v13016_v60  ;;  %v15110_v60 = vld [vmem:[%s17256_s9 + $0xe0] ss:$16 sps:$4 sm:$0xff]   ;;  %v13088_v6 = vcombine.high %v6292_v40, %v6296_v4  ;;  %v13087_v46 = vcombine.low %v6292_v40, %v6296_v4 }
 0x670   :  { %9625 = vmatpush1.bf16.msra.mxu0 %v13273_v58  ;;  %v15115_v58 = vld [vmem:[%s17256_s9 + $0x104] ss:$16 sps:$4 sm:$0xff]  }
 0x671   :  { %11373 = vmatprep.subr.bf16.mxu0 %v15091_v37  ;;  %v6300_v37 = vld [vmem:[#allocation18 + $0xa48] sm:$0xff] }
 0x672   :  { %9379 = vmatpush1.bf16.msra.mxu1 %v13015_v7  ;;  %v6304_v7 = vld [vmem:[#allocation18 + $0xa68] sm:$0xff] }
 0x673   :  { %9627 = vmatmul.mubr.bf16.vlgmr.msra.gmra.mrb[140].mxu0 %v16378_v0  ;;  %9389 = vmatprep.subr.bf16.mxu1 %v13024_v42  ;;  %v15113_v42 = vld [vmem:[%s17256_s9 + $0x100] ss:$16 sps:$4 sm:$0xff]   ;;  %v13095_v8 = vcombine.low %v6300_v37, %v6304_v7 }
 0x674   :  { %11374 = vmatpush1.bf16.msra.mxu0 %v15089_v15  ;;  %v13096_v15 = vcombine.high %v6300_v37, %v6304_v7  ;;  %v6372_v37 = vld [vmem:[#allocation18 + $0xc88] sm:$0xff] }
 0x675   :  { %9381 = vmatmul.mubr.bf16.vlgmr.msra.gmra.mrb[92].mxu1 %v16353_v2  ;;  %11375 = vmatprep.subr.bf16.mxu0 %v15094_v9  ;;  %v6308_v9 = vld [vmem:[#allocation18 + $0xa88] sm:$0xff] }
 0x676   :  { %9390 = vmatpush1.bf16.msra.mxu1 %v13023_v14  ;;  %9421 = vmatprep.mubr.bf16.mxu1 %v16359_v52  ;;  %v6312_v14 = vld [vmem:[#allocation18 + $0xaa8] sm:$0xff] }
 0x677   :  { %9391 = vmatprep.subr.bf16.mxu1 %v13032_v21  ;;  %v15116_v21 = vld [vmem:[%s17256_s9 + $0x120] ss:$16 sps:$4 sm:$0xff]   ;;  %v13103_v24 = vcombine.low %v6308_v9, %v6312_v14 }
 0x678   :  { %11376 = vmatpush1.bf16.msra.mxu0 %v15092_v61  ;;  %v13104_v61 = vcombine.high %v6308_v9, %v6312_v14  ;;  %v6376_v7 = vld [vmem:[#allocation18 + $0xca8] sm:$0xff] }
 0x679   :  { %11377 = vmatprep.subr.bf16.mxu0 %v15097_v56  ;;  %v6316_v56 = vld [vmem:[#allocation18 + $0xac8] sm:$0xff]  ;;  %v13167_v9 = vcombine.low %v6372_v37, %v6376_v7 }
 0x67a   :  { %9392 = vmatpush1.bf16.msra.mxu1 %v13031_v11  ;;  %v6320_v11 = vld [vmem:[#allocation18 + $0xae8] sm:$0xff] }
 0x67b   :  { %9393 = vmatprep.subr.bf16.mxu1 %v13040_v23  ;;  %v15119_v23 = vld [vmem:[%s17256_s9 + $0x140] ss:$16 sps:$4 sm:$0xff]   ;;  %v13111_v27 = vcombine.low %v6316_v56, %v6320_v11 }
 0x67c   :  { %11378 = vmatpush1.bf16.msra.mxu0 %v15095_v55  ;;  %v13112_v55 = vcombine.high %v6316_v56, %v6320_v11  ;;  %v16492_v56 = vld [vmem:[#allocation19] sm:$0xff]  ;;  %v6396_v11 = vld [vmem:[#allocation18 + $0xd48] sm:$0xff] }
 0x67d   :  { %11379 = vmatprep.subr.bf16.mxu0 %v15100_v25  ;;  %v6324_v25 = vld [vmem:[#allocation18 + $0xb08] sm:$0xff] }
 0x67e   :  { %9394 = vmatpush1.bf16.msra.mxu1 %v13039_v32  ;;  %v6328_v32 = vld [vmem:[#allocation18 + $0xb28] sm:$0xff] }
 0x67f   :  { %9395 = vmatprep.subr.bf16.mxu1 %v13048_v34  ;;  %v15122_v34 = vld [vmem:[%s17256_s9 + $0x160] ss:$16 sps:$4 sm:$0xff]   ;;  %v13119_v20 = vcombine.low %v6324_v25, %v6328_v32 }
 0x680   :  { %11380 = vmatpush1.bf16.msra.mxu0 %v15098_v30  ;;  %v13120_v30 = vcombine.high %v6324_v25, %v6328_v32  ;;  %v6492_v25 = vrot.slane %v16492_v56, %v16334_v26  ;;  %v6404_v32 = vld [vmem:[#allocation18 + $0xd88] sm:$0xff] }
 0x681   :  { %11381 = vmatprep.subr.bf16.mxu0 %v15103_v47  ;;  %v6332_v47 = vld [vmem:[#allocation18 + $0xb48] sm:$0xff] }
 0x682   :  { %9396 = vmatpush1.bf16.msra.mxu1 %v13047_v44  ;;  %v6336_v44 = vld [vmem:[#allocation18 + $0xb68] sm:$0xff] }
 0x683   :  { %9397 = vmatprep.subr.bf16.mxu1 %v13056_v17  ;;  %v15125_v17 = vld [vmem:[%s17256_s9 + $0x180] ss:$16 sps:$4 sm:$0xff]   ;;  %v13127_v51 = vcombine.low %v6332_v47, %v6336_v44 }
 0x684   :  { %11382 = vmatpush1.bf16.msra.mxu0 %v15101_v3  ;;  %v13128_v3 = vcombine.high %v6332_v47, %v6336_v44  ;;  %v9180_v47 = vadd.f32 %v16389_v28, %v6492_v25 }
 0x685   :  { %11383 = vmatprep.subr.bf16.mxu0 %v15106_v57  ;;  %v6340_v57 = vld [vmem:[#allocation18 + $0xb88] sm:$0xff] }
 0x686   :  { %9398 = vmatpush1.bf16.msra.mxu1 %v13055_v33  ;;  %v6344_v33 = vld [vmem:[#allocation18 + $0xba8] sm:$0xff] }
 0x687   :  { %9399 = vmatprep.subr.bf16.mxu1 %v13064_v29  ;;  %v15128_v29 = vld [vmem:[%s17256_s9 + $0x1a0] ss:$16 sps:$4 sm:$0xff]   ;;  %v13135_v63 = vcombine.low %v6340_v57, %v6344_v33 }
 0x688   :  { %11384 = vmatpush1.bf16.msra.mxu0 %v15104_v59  ;;  %v13136_v59 = vcombine.high %v6340_v57, %v6344_v33 }
 0x689   :  { %11385 = vmatprep.subr.bf16.mxu0 %v15109_v43  ;;  %v6348_v43 = vld [vmem:[#allocation18 + $0xbc8] sm:$0xff] }
 0x68a   :  { %9400 = vmatpush1.bf16.msra.mxu1 %v13063_v53  ;;  %v6352_v53 = vld [vmem:[#allocation18 + $0xbe8] sm:$0xff] }
 0x68b   :  { %9401 = vmatprep.subr.bf16.mxu1 %v13072_v22  ;;  %v15131_v22 = vld [vmem:[%s17256_s9 + $0x1c0] ss:$16 sps:$4 sm:$0xff]   ;;  %v13143_v40 = vcombine.low %v6348_v43, %v6352_v53 }
 0x68c   :  { %11386 = vmatpush1.bf16.msra.mxu0 %v15107_v13  ;;  %v13144_v13 = vcombine.high %v6348_v43, %v6352_v53  ;;  %v6420_v53 = vld [vmem:[#allocation18 + $0xe08] sm:$0xff] }
 0x68d   :  { %11387 = vmatprep.subr.bf16.mxu0 %v15112_v1  ;;  %v6356_v1 = vld [vmem:[#allocation18 + $0xc08] sm:$0xff] }
 0x68e   :  { %9402 = vmatpush1.bf16.msra.mxu1 %v13071_v49  ;;  %v6360_v49 = vld [vmem:[#allocation18 + $0xc28] sm:$0xff] }
 0x68f   :  { %9403 = vmatprep.subr.bf16.mxu1 %v13080_v41  ;;  %v15134_v41 = vld [vmem:[%s17256_s9 + $0x1e0] ss:$16 sps:$4 sm:$0xff]   ;;  %v13152_v4 = vcombine.high %v6356_v1, %v6360_v49 }
 0x690   :  { %11388 = vmatpush1.bf16.msra.mxu0 %v15110_v60  ;;  %v6364_v60 = vld [vmem:[#allocation18 + $0xc48] sm:$0xff] }
 0x691   :  { %11389 = vmatprep.subr.bf16.mxu0 %v15115_v58  ;;  %v6368_v58 = vld [vmem:[#allocation18 + $0xc68] sm:$0xff] }
 0x692   :  { %9404 = vmatpush1.bf16.msra.mxu1 %v13079_v10  ;;  %v13151_v10 = vcombine.low %v6356_v1, %v6360_v49  ;;  %v6432_v1 = vld [vmem:[#allocation18 + $0xe68] sm:$0xff] }
 0x693   :  { %9405 = vmatprep.subr.bf16.mxu1 %v13088_v6  ;;  %v13160_v6 = vcombine.high %v6364_v60, %v6368_v58 }
 0x694   :  { %11390 = vmatpush1.bf16.msra.mxu0 %v15113_v42  ;;  %v13159_v42 = vcombine.low %v6364_v60, %v6368_v58 }
 0x695   :  { %11391 = vmatprep.subr.bf16.mxu0 %v15118_v45  ;;  %v13168_v45 = vcombine.high %v6372_v37, %v6376_v7 }
 0x696   :  { %9406 = vmatpush1.bf16.msra.mxu1 %v13087_v46  ;;  %v6380_v46 = vld [vmem:[#allocation18 + $0xcc8] sm:$0xff] }
 0x697   :  { %9407 = vmatprep.subr.bf16.mxu1 %v13096_v15  ;;  %v6384_v15 = vld [vmem:[#allocation18 + $0xce8] sm:$0xff] }
 0x698   :  { %11392 = vmatpush1.bf16.msra.mxu0 %v15116_v21  ;;  %v13176_v14 = vcombine.high %v6380_v46, %v6384_v15  ;;  %v6388_v21 = vld [vmem:[#allocation18 + $0xd08] sm:$0xff] }
 0x699   :  { %11393 = vmatprep.subr.bf16.mxu0 %v15121_v50  ;;  %v6392_v50 = vld [vmem:[#allocation18 + $0xd28] sm:$0xff] }
 0x69a   :  { %9408 = vmatpush1.bf16.msra.mxu1 %v13095_v8  ;;  %v13175_v8 = vcombine.low %v6380_v46, %v6384_v15 }
 0x69b   :  { %9409 = vmatprep.subr.bf16.mxu1 %v13104_v61  ;;  %v13184_v61 = vcombine.high %v6388_v21, %v6392_v50 }
 0x69c   :  { %11394 = vmatpush1.bf16.msra.mxu0 %v15119_v23  ;;  %v6400_v23 = vld [vmem:[#allocation18 + $0xd68] sm:$0xff] }
 0x69d   :  { %11395 = vmatprep.subr.bf16.mxu0 %v15124_v54  ;;  %v13183_v54 = vcombine.low %v6388_v21, %v6392_v50 }
 0x69e   :  { %9410 = vmatpush1.bf16.msra.mxu1 %v13103_v24  ;;  %v6488_v24 = vrot.slane %v16492_v56, %v16331_v48 }
 0x69f   :  { %9411 = vmatprep.subr.bf16.mxu1 %v13112_v55  ;;  %v13192_v55 = vcombine.high %v6396_v11, %v6400_v23 }
 0x6a0   :  { %11396 = vmatpush1.bf16.msra.mxu0 %v15122_v34  ;;  %v6408_v34 = vld [vmem:[#allocation18 + $0xda8] sm:$0xff] }
 0x6a1   :  { %11397 = vmatprep.subr.bf16.mxu0 %v15127_v12  ;;  %v13191_v12 = vcombine.low %v6396_v11, %v6400_v23 }
 0x6a2   :  { %9412 = vmatpush1.bf16.msra.mxu1 %v13111_v27  ;;  %v9178_v27 = vadd.f32 %v16387_v19, %v6488_v24  ;;  %v6424_v19 = vld [vmem:[#allocation18 + $0xe28] sm:$0xff] }
 0x6a3   :  { %9413 = vmatprep.subr.bf16.mxu1 %v13120_v30  ;;  %v13200_v30 = vcombine.high %v6404_v32, %v6408_v34  ;;  %v13215_v49 = vcombine.low %v6420_v53, %v6424_v19  ;;  %v6480_v24 = vld [vmem:[#allocation18 + $0xfe8] sm:$0xff] }
 0x6a4   :  { %11398 = vmatpush1.bf16.msra.mxu0 %v15125_v17  ;;  %v6412_v17 = vld [vmem:[#allocation18 + $0xdc8] sm:$0xff] }
 0x6a5   :  { %11399 = vmatprep.subr.bf16.mxu0 %v15130_v16  ;;  %v6416_v16 = vld [vmem:[#allocation18 + $0xde8] sm:$0xff] }
 0x6a6   :  { %9414 = vmatpush1.bf16.msra.mxu1 %v13119_v20  ;;  %v13207_v28 = vcombine.low %v6412_v17, %v6416_v16 }
 0x6a7   :  { %9415 = vmatprep.subr.bf16.mxu1 %v13128_v3 }
 0x6a8   :  { %11400 = vmatpush1.bf16.msra.mxu0 %v15128_v29  ;;  %v13199_v29 = vcombine.low %v6404_v32, %v6408_v34  ;;  %v5974_v32 = vld [vmem:[#allocation18 + $0x18] sm:$0xff] }
 0x6a9   :  { %11401 = vmatprep.subr.bf16.mxu0 %v15133_v35  ;;  %v5978_v34 = vld [vmem:[#allocation18 + $0x38] sm:$0xff] }
 0x6aa   :  { %9416 = vmatpush1.bf16.msra.mxu1 %v13127_v51 }
 0x6ab   :  { %9417 = vmatprep.subr.bf16.mxu1 %v13136_v59  ;;  %v13208_v59 = vcombine.high %v6412_v17, %v6416_v16  ;;  %v5990_v16 = vld [vmem:[#allocation18 + $0x98] sm:$0xff] }
 0x6ac   :  { %11402 = vmatpush1.bf16.msra.mxu0 %v15131_v22 }
 0x6ad   :  { %11403 = vmatprep.subr.bf16.mxu0 %v15136_v31 }
 0x6ae   :  { %9418 = vmatpush1.bf16.msra.mxu1 %v13135_v63  ;;  %v13216_v63 = vcombine.high %v6420_v53, %v6424_v19 }
 0x6af   :  { %9419 = vmatprep.subr.bf16.mxu1 %v13144_v13  ;;  %v6428_v13 = vld [vmem:[#allocation18 + $0xe48] sm:$0xff] }
 0x6b0   :  { %11404 = vmatpush1.bf16.msra.mxu0 %v15134_v41  ;;  %v13224_v41 = vcombine.high %v6428_v13, %v6432_v1  ;;  %v13223_v60 = vcombine.low %v6428_v13, %v6432_v1  ;;  %v6022_v1 = vld [vmem:[#allocation18 + $0x198] sm:$0xff] }
 0x6b2   :  { %9420 = vmatpush1.bf16.msra.mxu1 %v13143_v40  ;;  %v6436_v40 = vld [vmem:[#allocation18 + $0xe88] sm:$0xff] }
 0x6b3   :  { %9430 = vmatprep.subr.bf16.mxu1 %v13152_v4  ;;  %v6440_v4 = vld [vmem:[#allocation18 + $0xea8] sm:$0xff] }
 0x6b4   :  { %v13232_v58 = vcombine.high %v6436_v40, %v6440_v4  ;;  %v13231_v37 = vcombine.low %v6436_v40, %v6440_v4  ;;  %v6030_v4 = vld [vmem:[#allocation18 + $0x1d8] sm:$0xff] }
 0x6b5   :  { %9422 = vmatmul.mubr.bf16.vlgmr.msra.gmra.mrb[92].mxu1 %v16343_v62 }
 0x6b6   :  { %9431 = vmatpush1.bf16.msra.mxu1 %v13151_v10  ;;  %9462 = vmatprep.mubr.bf16.mxu1 %v16371_v18  ;;  %v6444_v10 = vld [vmem:[#allocation18 + $0xec8] sm:$0xff] }
 0x6b7   :  { %9432 = vmatprep.subr.bf16.mxu1 %v13160_v6  ;;  %v6448_v6 = vld [vmem:[#allocation18 + $0xee8] sm:$0xff] }
 0x6b8   :  { %v13240_v7 = vcombine.high %v6444_v10, %v6448_v6  ;;  %v13239_v46 = vcombine.low %v6444_v10, %v6448_v6  ;;  %v6038_v6 = vld [vmem:[#allocation18 + $0x218] sm:$0xff] }
 0x6ba   :  { %9433 = vmatpush1.bf16.msra.mxu1 %v13159_v42  ;;  %v6452_v42 = vld [vmem:[#allocation18 + $0xf08] sm:$0xff] }
 0x6bb   :  { %9434 = vmatprep.subr.bf16.mxu1 %v13168_v45  ;;  %v6456_v45 = vld [vmem:[#allocation18 + $0xf28] sm:$0xff] }
 0x6bc   :  { %v13248_v15 = vcombine.high %v6452_v42, %v6456_v45  ;;  %v13247_v21 = vcombine.low %v6452_v42, %v6456_v45  ;;  %v15137_v42 = vld [vmem:[%s17256_s9 + $0x200] ss:$16 sps:$4 sm:$0xff]   ;;  %v15139_v45 = vld [vmem:[%s17256_s9 + $0x204] ss:$16 sps:$4 sm:$0xff]  }
 0x6bd   :  { %11414 = vmatprep.subr.bf16.mxu0 %v15139_v45  ;;  %v6114_v45 = vld [vmem:[#allocation18 + $0x478] sm:$0xff] }
 0x6be   :  { %9435 = vmatpush1.bf16.msra.mxu1 %v13167_v9  ;;  %v6460_v9 = vld [vmem:[#allocation18 + $0xf48] sm:$0xff] }
 0x6bf   :  { %9436 = vmatprep.subr.bf16.mxu1 %v13176_v14  ;;  %v6464_v14 = vld [vmem:[#allocation18 + $0xf68] sm:$0xff] }
 0x6c0   :  { %v13256_v50 = vcombine.high %v6460_v9, %v6464_v14  ;;  %v13255_v11 = vcombine.low %v6460_v9, %v6464_v14  ;;  %v6050_v9 = vld [vmem:[#allocation18 + $0x278] sm:$0xff] }
 0x6c2   :  { %9437 = vmatpush1.bf16.msra.mxu1 %v13175_v8  ;;  %v6468_v8 = vld [vmem:[#allocation18 + $0xf88] sm:$0xff] }
 0x6c3   :  { %9438 = vmatprep.subr.bf16.mxu1 %v13184_v61  ;;  %v6472_v61 = vld [vmem:[#allocation18 + $0xfa8] sm:$0xff] }
 0x6c4   :  { %v13264_v23 = vcombine.high %v6468_v8, %v6472_v61 }
 0x6c6   :  { %9439 = vmatpush1.bf16.msra.mxu1 %v13183_v54  ;;  %v6476_v54 = vld [vmem:[#allocation18 + $0xfc8] sm:$0xff] }
 0x6c7   :  { %9440 = vmatprep.subr.bf16.mxu1 %v13192_v55  ;;  %v13263_v55 = vcombine.low %v6468_v8, %v6472_v61  ;;  %v13272_v25 = vcombine.high %v6476_v54, %v6480_v24  ;;  %v6054_v61 = vld [vmem:[#allocation18 + $0x298] sm:$0xff] }
 0x6c8   :  { %v9300_v44 = vpop.f32.mrb[88].mxu1 }
 0x6c9   :  { %v14369_v20 = vadd.f32 %v9300_v44, %v9178_v27  ;;  %v9302_v3 = vpop.f32.mrb[89].mxu1  ;;  %v12772_v27 = vcombine.high %v5974_v32, %v5978_v34  ;;  %v12771_v44 = vcombine.low %v5974_v32, %v5978_v34  ;;  %v6066_v32 = vld [vmem:[#allocation18 + $0x2f8] sm:$0xff] }
 0x6ca   :  { %v14371_v57 = vadd.f32 %v9302_v3, %v9180_v47  ;;  %v9304_v33 = vpop.f32.mrb[90].mxu1  ;;  %9441 = vmatpush1.bf16.msra.mxu1 %v13191_v12  ;;  %v13271_v12 = vcombine.low %v6476_v54, %v6480_v24  ;;  %v5986_v47 = vld [vmem:[#allocation18 + $0x78] sm:$0xff] }
 0x6cb   :  { %v9799_v35 = vmax.f32 %v14369_v20, 0.0  ;;  %v9305_v51 = vpop.f32.mrb[91].mxu1  ;;  %9442 = vmatprep.subr.bf16.mxu1 %v13200_v30  ;;  %v5982_v30 = vld [vmem:[#allocation18 + $0x58] sm:$0xff] }
 0x6cc   :  { %v9800_v43 = vmax.f32 %v14371_v57, 0.0  ;;  %v12780_v17 = vcombine.high %v5982_v30, %v5986_v47  ;;  %v5994_v20 = vld [vmem:[#allocation18 + $0xb8] sm:$0xff]  ;;  %v12779_v3 = vcombine.low %v5982_v30, %v5986_v47 }
 0x6cd   :  { %v16502_v31 = vpack.c.bf16 %v9799_v35, %v9799_v35  ;;  %v12788_v57 = vcombine.high %v5990_v16, %v5994_v20  ;;  %v5998_v33 = vld [vmem:[#allocation18 + $0xd8] sm:$0xff]  ;;  %v12787_v35 = vcombine.low %v5990_v16, %v5994_v20 }
 0x6ce   :  { %v16500_v22 = vpack.c.bf16 %v9800_v43, %v9800_v43  ;;  %9443 = vmatpush1.bf16.msra.mxu1 %v13199_v29  ;;  %v6002_v29 = vld [vmem:[#allocation18 + $0xf8] sm:$0xff] }
 0x6cf   :  { %9444 = vmatprep.subr.bf16.mxu1 %v13208_v59  ;;  %v12796_v51 = vcombine.high %v5998_v33, %v6002_v29  ;;  %v6006_v59 = vld [vmem:[#allocation18 + $0x118] sm:$0xff]  ;;  %v12795_v53 = vcombine.low %v5998_v33, %v6002_v29 }
 0x6d0   :  { %11405 = vmatprep.mubr.bf16.mxu0 %v16500_v22  ;;  %v6010_v43 = vld [vmem:[#allocation18 + $0x138] sm:$0xff] }
 0x6d1   :  { %11406 = vmatmul.mubr.bf16.vlgmr.msra.gmra.mrb[144].mxu0 %v16502_v31  ;;  %v12804_v19 = vcombine.high %v6006_v59, %v6010_v43  ;;  %v12803_v13 = vcombine.low %v6006_v59, %v6010_v43  ;;  %v15143_v54 = vld [vmem:[%s17256_s9 + $0x240] ss:$16 sps:$4 sm:$0xff]   ;;  %v15145_v24 = vld [vmem:[%s17256_s9 + $0x244] ss:$16 sps:$4 sm:$0xff]  }
 0x6d2   :  { %9445 = vmatpush1.bf16.msra.mxu1 %v13207_v28  ;;  %v6014_v28 = vld [vmem:[#allocation18 + $0x158] sm:$0xff]  ;;  %11415 = vmatpush1.bf16.msra.mxu0 %v15137_v42 }
 0x6d3   :  { %9446 = vmatprep.subr.bf16.mxu1 %v13216_v63  ;;  %v6018_v63 = vld [vmem:[#allocation18 + $0x178] sm:$0xff] }
 0x6d4   :  { %v6070_v47 = vld [vmem:[#allocation18 + $0x318] sm:$0xff] }
 0x6d5   :  { %v15149_v16 = vld [vmem:[%s17256_s9 + $0x280] ss:$16 sps:$4 sm:$0xff]   ;;  %v15151_v20 = vld [vmem:[%s17256_s9 + $0x284] ss:$16 sps:$4 sm:$0xff]  }
 0x6d6   :  { %9447 = vmatpush1.bf16.msra.mxu1 %v13215_v49  ;;  %v6026_v49 = vld [vmem:[#allocation18 + $0x1b8] sm:$0xff] }
 0x6d7   :  { %9448 = vmatprep.subr.bf16.mxu1 %v13224_v41  ;;  %v12811_v41 = vcombine.low %v6014_v28, %v6018_v63  ;;  %v12820_v40 = vcombine.high %v6022_v1, %v6026_v49  ;;  %v6082_v33 = vld [vmem:[#allocation18 + $0x378] sm:$0xff] }
 0x6d8   :  { %v6086_v43 = vld [vmem:[#allocation18 + $0x398] sm:$0xff] }
 0x6d9   :  { %v6110_v42 = vld [vmem:[#allocation18 + $0x458] sm:$0xff] }
 0x6da   :  { %9449 = vmatpush1.bf16.msra.mxu1 %v13223_v60  ;;  %v6034_v60 = vld [vmem:[#allocation18 + $0x1f8] sm:$0xff] }
 0x6db   :  { %9450 = vmatprep.subr.bf16.mxu1 %v13232_v58  ;;  %v12819_v58 = vcombine.low %v6022_v1, %v6026_v49  ;;  %v12828_v10 = vcombine.high %v6030_v4, %v6034_v60  ;;  %v6098_v1 = vld [vmem:[#allocation18 + $0x3f8] sm:$0xff] }
 0x6de   :  { %9451 = vmatpush1.bf16.msra.mxu1 %v13231_v37  ;;  %v6042_v37 = vld [vmem:[#allocation18 + $0x238] sm:$0xff] }
 0x6df   :  { %9452 = vmatprep.subr.bf16.mxu1 %v13240_v7  ;;  %v12827_v7 = vcombine.low %v6030_v4, %v6034_v60  ;;  %v12835_v14 = vcombine.low %v6038_v6, %v6042_v37  ;;  %v6102_v60 = vld [vmem:[#allocation18 + $0x418] sm:$0xff] }
 0x6e2   :  { %9453 = vmatpush1.bf16.msra.mxu1 %v13239_v46  ;;  %v12836_v46 = vcombine.high %v6038_v6, %v6042_v37  ;;  %v15161_v6 = vld [vmem:[%s17256_s9 + $0x300] ss:$16 sps:$4 sm:$0xff]   ;;  %v15163_v37 = vld [vmem:[%s17256_s9 + $0x304] ss:$16 sps:$4 sm:$0xff]  }
 0x6e3   :  { %9454 = vmatprep.subr.bf16.mxu1 %v13248_v15  ;;  %v6046_v15 = vld [vmem:[#allocation18 + $0x258] sm:$0xff] }
 0x6e4   :  { %v12844_v8 = vcombine.high %v6046_v15, %v6050_v9 }
 0x6e6   :  { %9455 = vmatpush1.bf16.msra.mxu1 %v13247_v21  ;;  %v15140_v21 = vld [vmem:[%s17256_s9 + $0x220] ss:$16 sps:$4 sm:$0xff]  }
 0x6e7   :  { %9456 = vmatprep.subr.bf16.mxu1 %v13256_v50  ;;  %v15142_v50 = vld [vmem:[%s17256_s9 + $0x224] ss:$16 sps:$4 sm:$0xff]  }
 0x6e8   :  { %11416 = vmatprep.subr.bf16.mxu0 %v15142_v50  ;;  %v6122_v50 = vld [vmem:[#allocation18 + $0x4b8] sm:$0xff] }
 0x6e9   :  { %11417 = vmatpush1.bf16.msra.mxu0 %v15140_v21  ;;  %v6118_v21 = vld [vmem:[#allocation18 + $0x498] sm:$0xff] }
 0x6ea   :  { %9457 = vmatpush1.bf16.msra.mxu1 %v13255_v11  ;;  %v6058_v11 = vld [vmem:[#allocation18 + $0x2b8] sm:$0xff]  ;;  %11418 = vmatprep.subr.bf16.mxu0 %v15145_v24 }
 0x6eb   :  { %9458 = vmatprep.subr.bf16.mxu1 %v13264_v23  ;;  %v12843_v23 = vcombine.low %v6046_v15, %v6050_v9  ;;  %v12851_v34 = vcombine.low %v6054_v61, %v6058_v11  ;;  %v15164_v15 = vld [vmem:[%s17256_s9 + $0x320] ss:$16 sps:$4 sm:$0xff]   ;;  %v15166_v9 = vld [vmem:[%s17256_s9 + $0x324] ss:$16 sps:$4 sm:$0xff]  }
 0x6ec   :  { %v6130_v24 = vld [vmem:[#allocation18 + $0x4f8] sm:$0xff] }
 0x6ed   :  { %11419 = vmatpush1.bf16.msra.mxu0 %v15143_v54  ;;  %v6126_v54 = vld [vmem:[#allocation18 + $0x4d8] sm:$0xff] }
 0x6ee   :  { %9459 = vmatpush1.bf16.msra.mxu1 %v13263_v55  ;;  %v12852_v55 = vcombine.high %v6054_v61, %v6058_v11  ;;  %v15167_v61 = vld [vmem:[%s17256_s9 + $0x340] ss:$16 sps:$4 sm:$0xff]   ;;  %v15169_v11 = vld [vmem:[%s17256_s9 + $0x344] ss:$16 sps:$4 sm:$0xff]  }
 0x6ef   :  { %9460 = vmatprep.subr.bf16.mxu1 %v13272_v25  ;;  %v6062_v25 = vld [vmem:[#allocation18 + $0x2d8] sm:$0xff] }
 0x6f0   :  { %v12860_v30 = vcombine.high %v6062_v25, %v6066_v32 }
 0x6f2   :  { %9461 = vmatpush1.bf16.msra.mxu1 %v13271_v12  ;;  %v15146_v12 = vld [vmem:[%s17256_s9 + $0x260] ss:$16 sps:$4 sm:$0xff]  }
 0x6f3   :  { %9635 = vmatprep.subr.bf16.mxu1 %v12772_v27  ;;  %v15148_v27 = vld [vmem:[%s17256_s9 + $0x264] ss:$16 sps:$4 sm:$0xff]  }
 0x6f4   :  { %11420 = vmatprep.subr.bf16.mxu0 %v15148_v27  ;;  %v15173_v27 = vld [vmem:[%s17256_s9 + $0x380] ss:$16 sps:$4 sm:$0xff]  }
 0x6f5   :  { %9463 = vmatmul.mubr.bf16.vlgmr.msra.gmra.mrb[92].mxu1 %v16378_v0  ;;  %11421 = vmatpush1.bf16.msra.mxu0 %v15146_v12  ;;  %v12923_v12 = vcombine.low %v6126_v54, %v6130_v24 }
 0x6f6   :  { %9636 = vmatpush1.bf16.msra.mxu1 %v12771_v44  ;;  %9667 = vmatprep.mubr.bf16.mxu1 %v16341_v5  ;;  %v12812_v5 = vcombine.high %v6014_v28, %v6018_v63  ;;  %v6074_v44 = vld [vmem:[#allocation18 + $0x338] sm:$0xff] }
 0x6f7   :  { %9637 = vmatprep.subr.bf16.mxu1 %v12780_v17  ;;  %v12859_v17 = vcombine.low %v6062_v25, %v6066_v32  ;;  %11422 = vmatprep.subr.bf16.mxu0 %v15151_v20  ;;  %v12867_v29 = vcombine.low %v6070_v47, %v6074_v44  ;;  %v15155_v28 = vld [vmem:[%s17256_s9 + $0x2c0] ss:$16 sps:$4 sm:$0xff]   ;;  %v15157_v63 = vld [vmem:[%s17256_s9 + $0x2c4] ss:$16 sps:$4 sm:$0xff]   ;;  %v12924_v25 = vcombine.high %v6126_v54, %v6130_v24 }
 0x6f8   :  { %v6134_v32 = vld [vmem:[#allocation18 + $0x518] sm:$0xff] }
 0x6f9   :  { %11423 = vmatpush1.bf16.msra.mxu0 %v15149_v16  ;;  %v15176_v20 = vld [vmem:[%s17256_s9 + $0x3a0] ss:$16 sps:$4 sm:$0xff]  }
 0x6fa   :  { %9638 = vmatpush1.bf16.msra.mxu1 %v12779_v3  ;;  %v12868_v3 = vcombine.high %v6070_v47, %v6074_v44  ;;  %v6142_v44 = vld [vmem:[#allocation18 + $0x558] sm:$0xff] }
 0x6fb   :  { %9639 = vmatprep.subr.bf16.mxu1 %v12788_v57  ;;  %v6078_v57 = vld [vmem:[#allocation18 + $0x358] sm:$0xff] }
 0x6fc   :  { %v12876_v59 = vcombine.high %v6078_v57, %v6082_v33 }
 0x6fe   :  { %9640 = vmatpush1.bf16.msra.mxu1 %v12787_v35  ;;  %v15152_v35 = vld [vmem:[%s17256_s9 + $0x2a0] ss:$16 sps:$4 sm:$0xff]  }
 0x6ff   :  { %9641 = vmatprep.subr.bf16.mxu1 %v12796_v51  ;;  %v15154_v51 = vld [vmem:[%s17256_s9 + $0x2a4] ss:$16 sps:$4 sm:$0xff]  }
 0x700   :  { %11424 = vmatprep.subr.bf16.mxu0 %v15154_v51 }
 0x701   :  { %11425 = vmatpush1.bf16.msra.mxu0 %v15152_v35 }
 0x702   :  { %9642 = vmatpush1.bf16.msra.mxu1 %v12795_v53  ;;  %v6090_v53 = vld [vmem:[#allocation18 + $0x3b8] sm:$0xff]  ;;  %11426 = vmatprep.subr.bf16.mxu0 %v15157_v63 }
 0x703   :  { %9643 = vmatprep.subr.bf16.mxu1 %v12804_v19  ;;  %v12875_v19 = vcombine.low %v6078_v57, %v6082_v33  ;;  %v12883_v49 = vcombine.low %v6086_v43, %v6090_v53  ;;  %v6150_v33 = vld [vmem:[#allocation18 + $0x598] sm:$0xff] }
 0x705   :  { %11427 = vmatpush1.bf16.msra.mxu0 %v15155_v28  ;;  %v6162_v28 = vld [vmem:[#allocation18 + $0x5f8] sm:$0xff] }
 0x706   :  { %9644 = vmatpush1.bf16.msra.mxu1 %v12803_v13  ;;  %v12884_v13 = vcombine.high %v6086_v43, %v6090_v53 }
 0x707   :  { %9645 = vmatprep.subr.bf16.mxu1 %v12812_v5  ;;  %v6094_v5 = vld [vmem:[#allocation18 + $0x3d8] sm:$0xff] }
 0x708   :  { %v12892_v4 = vcombine.high %v6094_v5, %v6098_v1 }
 0x70a   :  { %9646 = vmatpush1.bf16.msra.mxu1 %v12811_v41  ;;  %v15158_v41 = vld [vmem:[%s17256_s9 + $0x2e0] ss:$16 sps:$4 sm:$0xff]  }
 0x70b   :  { %9647 = vmatprep.subr.bf16.mxu1 %v12820_v40  ;;  %v15160_v40 = vld [vmem:[%s17256_s9 + $0x2e4] ss:$16 sps:$4 sm:$0xff]  }
 0x70c   :  { %11428 = vmatprep.subr.bf16.mxu0 %v15160_v40  ;;  %v15181_v40 = vld [vmem:[%s17256_s9 + $0x3c4] ss:$16 sps:$4 sm:$0xff]  }
 0x70d   :  { %11429 = vmatpush1.bf16.msra.mxu0 %v15158_v41  ;;  %v15179_v41 = vld [vmem:[%s17256_s9 + $0x3c0] ss:$16 sps:$4 sm:$0xff]  }
 0x70e   :  { %9648 = vmatpush1.bf16.msra.mxu1 %v12819_v58  ;;  %v6106_v58 = vld [vmem:[#allocation18 + $0x438] sm:$0xff]  ;;  %11430 = vmatprep.subr.bf16.mxu0 %v15163_v37 }
 0x70f   :  { %9649 = vmatprep.subr.bf16.mxu1 %v12828_v10  ;;  %v12891_v10 = vcombine.low %v6094_v5, %v6098_v1  ;;  %v6166_v1 = vld [vmem:[#allocation18 + $0x618] sm:$0xff] }
 0x710   :  { %v15182_v37 = vld [vmem:[%s17256_s9 + $0x3e0] ss:$16 sps:$4 sm:$0xff]  }
 0x711   :  { %11431 = vmatpush1.bf16.msra.mxu0 %v15161_v6  ;;  %v6178_v6 = vld [vmem:[#allocation18 + $0x678] sm:$0xff] }
 0x712   :  { %9650 = vmatpush1.bf16.msra.mxu1 %v12827_v7  ;;  %v12900_v7 = vcombine.high %v6102_v60, %v6106_v58  ;;  %11432 = vmatprep.subr.bf16.mxu0 %v15166_v9 }
 0x713   :  { %9651 = vmatprep.subr.bf16.mxu1 %v12836_v46  ;;  %v12899_v46 = vcombine.low %v6102_v60, %v6106_v58  ;;  %v15184_v58 = vld [vmem:[%s17256_s9 + $0x3e4] ss:$16 sps:$4 sm:$0xff]  }
 0x715   :  { %11433 = vmatpush1.bf16.msra.mxu0 %v15164_v15  ;;  %v6186_v15 = vld [vmem:[#allocation18 + $0x6b8] sm:$0xff] }
 0x716   :  { %9652 = vmatpush1.bf16.msra.mxu1 %v12835_v14  ;;  %v12908_v14 = vcombine.high %v6110_v42, %v6114_v45  ;;  %11434 = vmatprep.subr.bf16.mxu0 %v15169_v11  ;;  %v6198_v11 = vld [vmem:[#allocation18 + $0x718] sm:$0xff] }
 0x717   :  { %9653 = vmatprep.subr.bf16.mxu1 %v12844_v8  ;;  %v12907_v8 = vcombine.low %v6110_v42, %v6114_v45 }
 0x719   :  { %11435 = vmatpush1.bf16.msra.mxu0 %v15167_v61 }
 0x71a   :  { %9654 = vmatpush1.bf16.msra.mxu1 %v12843_v23  ;;  %v12916_v23 = vcombine.high %v6118_v21, %v6122_v50 }
 0x71b   :  { %9655 = vmatprep.subr.bf16.mxu1 %v12852_v55  ;;  %v15172_v55 = vld [vmem:[%s17256_s9 + $0x364] ss:$16 sps:$4 sm:$0xff]  }
 0x71c   :  { %11436 = vmatprep.subr.bf16.mxu0 %v15172_v55 }
 0x71e   :  { %9656 = vmatpush1.bf16.msra.mxu1 %v12851_v34  ;;  %v6138_v34 = vld [vmem:[#allocation18 + $0x538] sm:$0xff] }
 0x71f   :  { %9657 = vmatprep.subr.bf16.mxu1 %v12860_v30  ;;  %v15175_v30 = vld [vmem:[%s17256_s9 + $0x384] ss:$16 sps:$4 sm:$0xff]   ;;  %v12932_v47 = vcombine.high %v6134_v32, %v6138_v34  ;;  %v12931_v16 = vcombine.low %v6134_v32, %v6138_v34 }
 0x720   :  { %v6214_v32 = vld [vmem:[#allocation18 + $0x798] sm:$0xff] }
 0x721   :  { %v6218_v34 = vld [vmem:[#allocation18 + $0x7b8] sm:$0xff] }
 0x722   :  { %9658 = vmatpush1.bf16.msra.mxu1 %v12859_v17  ;;  %v6146_v17 = vld [vmem:[#allocation18 + $0x578] sm:$0xff] }
 0x723   :  { %9659 = vmatprep.subr.bf16.mxu1 %v12868_v3  ;;  %v15178_v3 = vld [vmem:[%s17256_s9 + $0x3a4] ss:$16 sps:$4 sm:$0xff]   ;;  %v12940_v57 = vcombine.high %v6142_v44, %v6146_v17  ;;  %v12939_v51 = vcombine.low %v6142_v44, %v6146_v17  ;;  %v13011_v44 = vcombine.low %v6214_v32, %v6218_v34 }
 0x726   :  { %9660 = vmatpush1.bf16.msra.mxu1 %v12867_v29  ;;  %v6154_v29 = vld [vmem:[#allocation18 + $0x5b8] sm:$0xff] }
 0x727   :  { %9661 = vmatprep.subr.bf16.mxu1 %v12876_v59  ;;  %v12948_v43 = vcombine.high %v6150_v33, %v6154_v29 }
 0x72a   :  { %9662 = vmatpush1.bf16.msra.mxu1 %v12875_v19  ;;  %v6158_v19 = vld [vmem:[#allocation18 + $0x5d8] sm:$0xff] }
 0x72b   :  { %9663 = vmatprep.subr.bf16.mxu1 %v12884_v13  ;;  %v12947_v13 = vcombine.low %v6150_v33, %v6154_v29  ;;  %v12956_v5 = vcombine.high %v6158_v19, %v6162_v28  ;;  %v6238_v33 = vld [vmem:[#allocation18 + $0x858] sm:$0xff] }
 0x72c   :  { %v6242_v29 = vld [vmem:[#allocation18 + $0x878] sm:$0xff] }
 0x72e   :  { %9664 = vmatpush1.bf16.msra.mxu1 %v12883_v49  ;;  %v6170_v49 = vld [vmem:[#allocation18 + $0x638] sm:$0xff] }
 0x72f   :  { %9665 = vmatprep.subr.bf16.mxu1 %v12892_v4  ;;  %v12955_v4 = vcombine.low %v6158_v19, %v6162_v28  ;;  %v12964_v60 = vcombine.high %v6166_v1, %v6170_v49  ;;  %v12963_v42 = vcombine.low %v6166_v1, %v6170_v49  ;;  %v6250_v19 = vld [vmem:[#allocation18 + $0x8b8] sm:$0xff]  ;;  %v13035_v28 = vcombine.low %v6238_v33, %v6242_v29 }
 0x732   :  { %9666 = vmatpush1.bf16.msra.mxu1 %v12891_v10  ;;  %v6174_v10 = vld [vmem:[#allocation18 + $0x658] sm:$0xff] }
 0x733   :  { %9676 = vmatprep.subr.bf16.mxu1 %v12900_v7  ;;  %v15187_v7 = vld [vmem:[%s17256_s9 + $0x404] ss:$16 sps:$4 sm:$0xff]   ;;  %v12972_v45 = vcombine.high %v6174_v10, %v6178_v6  ;;  %v12971_v9 = vcombine.low %v6174_v10, %v6178_v6 }
 0x734   :  { %v6278_v6 = vld [vmem:[#allocation18 + $0x998] sm:$0xff] }
 0x735   :  { %9668 = vmatmul.mubr.bf16.vlgmr.msra.gmra.mrb[96].mxu1 %v16339_v36  ;;  %v12915_v36 = vcombine.low %v6118_v21, %v6122_v50  ;;  %v6190_v21 = vld [vmem:[#allocation18 + $0x6d8] sm:$0xff] }
 0x736   :  { %9677 = vmatpush1.bf16.msra.mxu1 %v12899_v46  ;;  %9708 = vmatprep.mubr.bf16.mxu1 %v16348_v39  ;;  %v15170_v39 = vld [vmem:[%s17256_s9 + $0x360] ss:$16 sps:$4 sm:$0xff]  }
 0x737   :  { %9678 = vmatprep.subr.bf16.mxu1 %v12908_v14  ;;  %11437 = vmatpush1.bf16.msra.mxu0 %v15170_v39  ;;  %v6182_v46 = vld [vmem:[#allocation18 + $0x698] sm:$0xff] }
 0x738   :  { %11438 = vmatprep.subr.bf16.mxu0 %v15175_v30  ;;  %v12980_v14 = vcombine.high %v6182_v46, %v6186_v15  ;;  %v6194_v50 = vld [vmem:[#allocation18 + $0x6f8] sm:$0xff] }
 0x739   :  { %v12988_v61 = vcombine.high %v6190_v21, %v6194_v50  ;;  %v12987_v54 = vcombine.low %v6190_v21, %v6194_v50  ;;  %v6210_v39 = vld [vmem:[#allocation18 + $0x778] sm:$0xff] }
 0x73a   :  { %9679 = vmatpush1.bf16.msra.mxu1 %v12907_v8  ;;  %v12979_v8 = vcombine.low %v6182_v46, %v6186_v15  ;;  %v6222_v30 = vld [vmem:[#allocation18 + $0x7d8] sm:$0xff] }
 0x73b   :  { %9680 = vmatprep.subr.bf16.mxu1 %v12916_v23  ;;  %11439 = vmatpush1.bf16.msra.mxu0 %v15173_v27  ;;  %v6202_v23 = vld [vmem:[#allocation18 + $0x738] sm:$0xff]  ;;  %v13012_v27 = vcombine.high %v6214_v32, %v6218_v34 }
 0x73c   :  { %11440 = vmatprep.subr.bf16.mxu0 %v15178_v3  ;;  %v12996_v24 = vcombine.high %v6198_v11, %v6202_v23  ;;  %v12995_v55 = vcombine.low %v6198_v11, %v6202_v23  ;;  %v6290_v46 = vld [vmem:[#allocation18 + $0x9f8] sm:$0xff] }
 0x73d   :  { %v6298_v21 = vld [vmem:[#allocation18 + $0xa38] sm:$0xff] }
 0x73e   :  { %9681 = vmatpush1.bf16.msra.mxu1 %v12915_v36  ;;  %v6206_v36 = vld [vmem:[#allocation18 + $0x758] sm:$0xff] }
 0x73f   :  { %9682 = vmatprep.subr.bf16.mxu1 %v12924_v25  ;;  %11441 = vmatpush1.bf16.msra.mxu0 %v15176_v20  ;;  %v13004_v25 = vcombine.high %v6206_v36, %v6210_v39  ;;  %v6234_v20 = vld [vmem:[#allocation18 + $0x838] sm:$0xff] }
 0x740   :  { %11442 = vmatprep.subr.bf16.mxu0 %v15181_v40  ;;  %v6266_v40 = vld [vmem:[#allocation18 + $0x938] sm:$0xff] }
 0x741   :  { %v6306_v11 = vld [vmem:[#allocation18 + $0xa78] sm:$0xff] }
 0x742   :  { %9683 = vmatpush1.bf16.msra.mxu1 %v12923_v12  ;;  %v13003_v12 = vcombine.low %v6206_v36, %v6210_v39  ;;  %v6314_v36 = vld [vmem:[#allocation18 + $0xab8] sm:$0xff] }
 0x743   :  { %9684 = vmatprep.subr.bf16.mxu1 %v12932_v47  ;;  %11443 = vmatpush1.bf16.msra.mxu0 %v15179_v41  ;;  %v6226_v47 = vld [vmem:[#allocation18 + $0x7f8] sm:$0xff] }
 0x744   :  { %11444 = vmatprep.subr.bf16.mxu0 %v15184_v58  ;;  %v13020_v17 = vcombine.high %v6222_v30, %v6226_v47  ;;  %v13019_v3 = vcombine.low %v6222_v30, %v6226_v47  ;;  %v6262_v41 = vld [vmem:[#allocation18 + $0x918] sm:$0xff] }
 0x745   :  { %v6270_v58 = vld [vmem:[#allocation18 + $0x958] sm:$0xff]  ;;  %v13059_v10 = vcombine.low %v6262_v41, %v6266_v40 }
 0x746   :  { %v16594_v35 = vpop.f32.mrb[140].mxu0  ;;  %9685 = vmatpush1.bf16.msra.mxu1 %v12931_v16  ;;  %v6230_v16 = vld [vmem:[#allocation18 + $0x818] sm:$0xff] }
 0x747   :  { %v16596_v59 = vpop.f32.mrb[141].mxu0  ;;  %9686 = vmatprep.subr.bf16.mxu1 %v12940_v57  ;;  %11445 = vmatpush1.bf16.msra.mxu0 %v15182_v37  ;;  %v13028_v57 = vcombine.high %v6230_v16, %v6234_v20  ;;  %v6282_v37 = vld [vmem:[#allocation18 + $0x9b8] sm:$0xff] }
 0x748   :  { %v9632_v53 = vpop.f32.mrb[142].mxu0  ;;  %11455 = vmatprep.subr.bf16.mxu0 %v15187_v7  ;;  %v13075_v15 = vcombine.low %v6278_v6, %v6282_v37  ;;  %v6322_v32 = vld [vmem:[#allocation18 + $0xaf8] sm:$0xff] }
 0x749   :  { %v9633_v63 = vpop.f32.mrb[143].mxu0  ;;  %v6246_v53 = vld [vmem:[#allocation18 + $0x898] sm:$0xff] }
 0x74a   :  { %9687 = vmatpush1.bf16.msra.mxu1 %v12939_v51  ;;  %v13027_v51 = vcombine.low %v6230_v16, %v6234_v20  ;;  %v13044_v63 = vcombine.high %v6246_v53, %v6250_v19  ;;  %v13043_v1 = vcombine.low %v6246_v53, %v6250_v19  ;;  %v6330_v30 = vld [vmem:[#allocation18 + $0xb38] sm:$0xff] }
 0x74b   :  { %9688 = vmatprep.subr.bf16.mxu1 %v12948_v43  ;;  %v13036_v43 = vcombine.high %v6238_v33, %v6242_v29  ;;  %v6338_v16 = vld [vmem:[#allocation18 + $0xb78] sm:$0xff] }
 0x74c   :  { %v6346_v33 = vld [vmem:[#allocation18 + $0xbb8] sm:$0xff] }
 0x74d   :  { %v6354_v53 = vld [vmem:[#allocation18 + $0xbf8] sm:$0xff] }
 0x74e   :  { %9689 = vmatpush1.bf16.msra.mxu1 %v12947_v13  ;;  %v6254_v13 = vld [vmem:[#allocation18 + $0x8d8] sm:$0xff] }
 0x74f   :  { %9690 = vmatprep.subr.bf16.mxu1 %v12956_v5  ;;  %v6258_v5 = vld [vmem:[#allocation18 + $0x8f8] sm:$0xff] }
 0x750   :  { %v13052_v49 = vcombine.high %v6254_v13, %v6258_v5 }
 0x752   :  { %9691 = vmatpush1.bf16.msra.mxu1 %v12955_v4  ;;  %v13051_v4 = vcombine.low %v6254_v13, %v6258_v5  ;;  %v6362_v13 = vld [vmem:[#allocation18 + $0xc38] sm:$0xff] }
 0x753   :  { %9692 = vmatprep.subr.bf16.mxu1 %v12964_v60  ;;  %v13060_v60 = vcombine.high %v6262_v41, %v6266_v40  ;;  %v6370_v41 = vld [vmem:[#allocation18 + $0xc78] sm:$0xff] }
 0x756   :  { %9693 = vmatpush1.bf16.msra.mxu1 %v12963_v42  ;;  %v13076_v42 = vcombine.high %v6278_v6, %v6282_v37  ;;  %v6386_v6 = vld [vmem:[#allocation18 + $0xcf8] sm:$0xff] }
 0x757   :  { %9694 = vmatprep.subr.bf16.mxu1 %v12972_v45  ;;  %v6286_v45 = vld [vmem:[#allocation18 + $0x9d8] sm:$0xff] }
 0x758   :  { %v13083_v50 = vcombine.low %v6286_v45, %v6290_v46 }
 0x75a   :  { %9695 = vmatpush1.bf16.msra.mxu1 %v12971_v9  ;;  %v13084_v9 = vcombine.high %v6286_v45, %v6290_v46  ;;  %v6394_v45 = vld [vmem:[#allocation18 + $0xd38] sm:$0xff] }
 0x75b   :  { %9696 = vmatprep.subr.bf16.mxu1 %v12980_v14  ;;  %v6294_v14 = vld [vmem:[#allocation18 + $0xa18] sm:$0xff] }
 0x75c   :  { %v13091_v23 = vcombine.low %v6294_v14, %v6298_v21 }
 0x75e   :  { %9697 = vmatpush1.bf16.msra.mxu1 %v12979_v8  ;;  %v13092_v8 = vcombine.high %v6294_v14, %v6298_v21  ;;  %v6507_v14 = vsub.s32 5, %v16328_v38 }
 0x75f   :  { %9698 = vmatprep.subr.bf16.mxu1 %v12988_v61  ;;  %v6302_v61 = vld [vmem:[#allocation18 + $0xa58] sm:$0xff] }
 0x760   :  { %v13099_v39 = vcombine.low %v6302_v61, %v6306_v11 }
 0x762   :  { %9699 = vmatpush1.bf16.msra.mxu1 %v12987_v54  ;;  %v13100_v54 = vcombine.high %v6302_v61, %v6306_v11  ;;  %v6406_v61 = vld [vmem:[#allocation18 + $0xd98] sm:$0xff] }
 0x763   :  { %9700 = vmatprep.subr.bf16.mxu1 %v12996_v24  ;;  %v6310_v24 = vld [vmem:[#allocation18 + $0xa98] sm:$0xff] }
 0x764   :  { %v13107_v34 = vcombine.low %v6310_v24, %v6314_v36  ;;  %v6410_v11 = vld [vmem:[#allocation18 + $0xdb8] sm:$0xff] }
 0x766   :  { %9701 = vmatpush1.bf16.msra.mxu1 %v12995_v55  ;;  %v13108_v55 = vcombine.high %v6310_v24, %v6314_v36 }
 0x767   :  { %9702 = vmatprep.subr.bf16.mxu1 %v13004_v25  ;;  %v6318_v25 = vld [vmem:[#allocation18 + $0xad8] sm:$0xff] }
 0x768   :  { %v13115_v47 = vcombine.low %v6318_v25, %v6322_v32 }
 0x76a   :  { %9703 = vmatpush1.bf16.msra.mxu1 %v13003_v12  ;;  %v13116_v12 = vcombine.high %v6318_v25, %v6322_v32  ;;  %v6414_v25 = vld [vmem:[#allocation18 + $0xdd8] sm:$0xff] }
 0x76b   :  { %9704 = vmatprep.subr.bf16.mxu1 %v13012_v27  ;;  %v6326_v27 = vld [vmem:[#allocation18 + $0xb18] sm:$0xff] }
 0x76c   :  { %v13123_v20 = vcombine.low %v6326_v27, %v6330_v30  ;;  %v6418_v32 = vld [vmem:[#allocation18 + $0xdf8] sm:$0xff] }
 0x76e   :  { %9705 = vmatpush1.bf16.msra.mxu1 %v13011_v44  ;;  %v13124_v44 = vcombine.high %v6326_v27, %v6330_v30 }
 0x76f   :  { %9706 = vmatprep.subr.bf16.mxu1 %v13020_v17  ;;  %v6334_v17 = vld [vmem:[#allocation18 + $0xb58] sm:$0xff] }
 0x770   :  { %v13131_v29 = vcombine.low %v6334_v17, %v6338_v16 }
 0x772   :  { %9707 = vmatpush1.bf16.msra.mxu1 %v13019_v3  ;;  %v13132_v3 = vcombine.high %v6334_v17, %v6338_v16 }
 0x773   :  { %9717 = vmatprep.subr.bf16.mxu1 %v13028_v57  ;;  %v6342_v57 = vld [vmem:[#allocation18 + $0xb98] sm:$0xff] }
 0x774   :  { %v13139_v19 = vcombine.low %v6342_v57, %v6346_v33 }
 0x775   :  { %9709 = vmatmul.mubr.bf16.vlgmr.msra.gmra.mrb[96].mxu1 %v16353_v2  ;;  %v6274_v2 = vld [vmem:[#allocation18 + $0x978] sm:$0xff] }
 0x776   :  { %9718 = vmatpush1.bf16.msra.mxu1 %v13027_v51  ;;  %9749 = vmatprep.mubr.bf16.mxu1 %v16359_v52  ;;  %v13068_v52 = vcombine.high %v6270_v58, %v6274_v2  ;;  %v13067_v7 = vcombine.low %v6270_v58, %v6274_v2  ;;  %v13140_v51 = vcombine.high %v6342_v57, %v6346_v33  ;;  %v6378_v58 = vld [vmem:[#allocation18 + $0xcb8] sm:$0xff] }
 0x777   :  { %9719 = vmatprep.subr.bf16.mxu1 %v13036_v43  ;;  %v6350_v43 = vld [vmem:[#allocation18 + $0xbd8] sm:$0xff] }
 0x778   :  { %v13147_v5 = vcombine.low %v6350_v43, %v6354_v53  ;;  %v6422_v57 = vld [vmem:[#allocation18 + $0xe18] sm:$0xff] }
 0x779   :  { %v6426_v33 = vld [vmem:[#allocation18 + $0xe38] sm:$0xff] }
 0x77a   :  { %9720 = vmatpush1.bf16.msra.mxu1 %v13035_v28  ;;  %v13148_v28 = vcombine.high %v6350_v43, %v6354_v53  ;;  %v15190_v53 = vld [vmem:[%s17256_s9 + $0x424] ss:$16 sps:$4 sm:$0xff]  }
 0x77b   :  { %9721 = vmatprep.subr.bf16.mxu1 %v13044_v63  ;;  %v6358_v63 = vld [vmem:[#allocation18 + $0xc18] sm:$0xff] }
 0x77c   :  { %v13155_v40 = vcombine.low %v6358_v63, %v6362_v13 }
 0x77e   :  { %9722 = vmatpush1.bf16.msra.mxu1 %v13043_v1  ;;  %v13156_v1 = vcombine.high %v6358_v63, %v6362_v13  ;;  %v6434_v63 = vld [vmem:[#allocation18 + $0xe78] sm:$0xff] }
 0x77f   :  { %9723 = vmatprep.subr.bf16.mxu1 %v13052_v49  ;;  %v6366_v49 = vld [vmem:[#allocation18 + $0xc58] sm:$0xff] }
 0x780   :  { %v13163_v2 = vcombine.low %v6366_v49, %v6370_v41 }
 0x782   :  { %9724 = vmatpush1.bf16.msra.mxu1 %v13051_v4  ;;  %v13164_v4 = vcombine.high %v6366_v49, %v6370_v41  ;;  %v15193_v49 = vld [vmem:[%s17256_s9 + $0x444] ss:$16 sps:$4 sm:$0xff]  }
 0x783   :  { %9725 = vmatprep.subr.bf16.mxu1 %v13060_v60  ;;  %v6374_v60 = vld [vmem:[#allocation18 + $0xc98] sm:$0xff] }
 0x784   :  { %v13171_v37 = vcombine.low %v6374_v60, %v6378_v58 }
 0x786   :  { %9726 = vmatpush1.bf16.msra.mxu1 %v13059_v10  ;;  %v13172_v10 = vcombine.high %v6374_v60, %v6378_v58  ;;  %v15191_v60 = vld [vmem:[%s17256_s9 + $0x440] ss:$16 sps:$4 sm:$0xff]  }
 0x787   :  { %9727 = vmatprep.subr.bf16.mxu1 %v13068_v52  ;;  %v6382_v52 = vld [vmem:[#allocation18 + $0xcd8] sm:$0xff] }
 0x788   :  { %v13179_v46 = vcombine.low %v6382_v52, %v6386_v6 }
 0x78a   :  { %9728 = vmatpush1.bf16.msra.mxu1 %v13067_v7  ;;  %v13180_v7 = vcombine.high %v6382_v52, %v6386_v6  ;;  %v6446_v52 = vld [vmem:[#allocation18 + $0xed8] sm:$0xff] }
 0x78b   :  { %9729 = vmatprep.subr.bf16.mxu1 %v13076_v42  ;;  %v6390_v42 = vld [vmem:[#allocation18 + $0xd18] sm:$0xff] }
 0x78c   :  { %v13187_v21 = vcombine.low %v6390_v42, %v6394_v45  ;;  %v6450_v6 = vld [vmem:[#allocation18 + $0xef8] sm:$0xff] }
 0x78e   :  { %9730 = vmatpush1.bf16.msra.mxu1 %v13075_v15  ;;  %v13188_v15 = vcombine.high %v6390_v42, %v6394_v45  ;;  %v15199_v42 = vld [vmem:[%s17256_s9 + $0x484] ss:$16 sps:$4 sm:$0xff]   ;;  %v13244_v45 = vcombine.high %v6446_v52, %v6450_v6 }
 0x78f   :  { %9731 = vmatprep.subr.bf16.mxu1 %v13084_v9  ;;  %v6398_v9 = vld [vmem:[#allocation18 + $0xd58] sm:$0xff] }
 0x792   :  { %9732 = vmatpush1.bf16.msra.mxu1 %v13083_v50  ;;  %v6499_v50 = vsub.s32 3, %v16328_v38 }
 0x793   :  { %9733 = vmatprep.subr.bf16.mxu1 %v13092_v8 }
 0x794   :  { %v6500_v24 = vrot.slane %v16492_v56, %v6499_v50 }
 0x796   :  { %9734 = vmatpush1.bf16.msra.mxu1 %v13091_v23  ;;  %v6508_v23 = vrot.slane %v16492_v56, %v6507_v14  ;;  %v15202_v14 = vld [vmem:[%s17256_s9 + $0x4a4] ss:$16 sps:$4 sm:$0xff]  }
 0x797   :  { %9735 = vmatprep.subr.bf16.mxu1 %v13100_v54 }
 0x79a   :  { %9736 = vmatpush1.bf16.msra.mxu1 %v13099_v39  ;;  %v13204_v39 = vcombine.high %v6406_v61, %v6410_v11 }
 0x79b   :  { %9737 = vmatprep.subr.bf16.mxu1 %v13108_v55 }
 0x79e   :  { %9738 = vmatpush1.bf16.msra.mxu1 %v13107_v34  ;;  %v14375_v34 = vadd.f32 %v16596_v59, %v6508_v23  ;;  %v15185_v59 = vld [vmem:[%s17256_s9 + $0x400] ss:$16 sps:$4 sm:$0xff]  }
 0x79f   :  { %9739 = vmatprep.subr.bf16.mxu1 %v13116_v12 }
 0x7a2   :  { %9740 = vmatpush1.bf16.msra.mxu1 %v13115_v47 }
 0x7a3   :  { %9741 = vmatprep.subr.bf16.mxu1 %v13124_v44  ;;  %v13203_v44 = vcombine.low %v6406_v61, %v6410_v11  ;;  %v6466_v61 = vld [vmem:[#allocation18 + $0xf78] sm:$0xff] }
 0x7a4   :  { %v15200_v11 = vld [vmem:[%s17256_s9 + $0x4a0] ss:$16 sps:$4 sm:$0xff]  }
 0x7a6   :  { %9742 = vmatpush1.bf16.msra.mxu1 %v13123_v20  ;;  %v13212_v20 = vcombine.high %v6414_v25, %v6418_v32 }
 0x7a7   :  { %9743 = vmatprep.subr.bf16.mxu1 %v13132_v3 }
 0x7aa   :  { %9744 = vmatpush1.bf16.msra.mxu1 %v13131_v29 }
 0x7ab   :  { %9745 = vmatprep.subr.bf16.mxu1 %v13140_v51  ;;  %v13211_v51 = vcombine.low %v6414_v25, %v6418_v32  ;;  %v15208_v32 = vld [vmem:[%s17256_s9 + $0x4e4] ss:$16 sps:$4 sm:$0xff]  }
 0x7ae   :  { %9746 = vmatpush1.bf16.msra.mxu1 %v13139_v19  ;;  %v13220_v19 = vcombine.high %v6422_v57, %v6426_v33 }
 0x7af   :  { %9747 = vmatprep.subr.bf16.mxu1 %v13148_v28  ;;  %v6430_v28 = vld [vmem:[#allocation18 + $0xe58] sm:$0xff] }
 0x7b0   :  { %v13228_v41 = vcombine.high %v6430_v28, %v6434_v63  ;;  %v13227_v58 = vcombine.low %v6430_v28, %v6434_v63  ;;  %v15226_v28 = vld [vmem:[%s17256_s9 + $0x564] ss:$16 sps:$4 sm:$0xff]   ;;  %v15224_v63 = vld [vmem:[%s17256_s9 + $0x560] ss:$16 sps:$4 sm:$0xff]  }
 0x7b2   :  { %9748 = vmatpush1.bf16.msra.mxu1 %v13147_v5  ;;  %v15188_v5 = vld [vmem:[%s17256_s9 + $0x420] ss:$16 sps:$4 sm:$0xff]  }
 0x7b3   :  { %9758 = vmatprep.subr.bf16.mxu1 %v13156_v1  ;;  %v13219_v1 = vcombine.low %v6422_v57, %v6426_v33  ;;  %v15212_v57 = vld [vmem:[%s17256_s9 + $0x520] ss:$16 sps:$4 sm:$0xff]   ;;  %v15215_v33 = vld [vmem:[%s17256_s9 + $0x8] ss:$16 sps:$4 sm:$0xff]  }
 0x7b5   :  { %9750 = vmatmul.mubr.bf16.vlgmr.msra.gmra.mrb[96].mxu1 %v16343_v62  ;;  %v6402_v62 = vld [vmem:[#allocation18 + $0xd78] sm:$0xff] }
 0x7b6   :  { %9759 = vmatpush1.bf16.msra.mxu1 %v13155_v40  ;;  %9790 = vmatprep.mubr.bf16.mxu1 %v16371_v18  ;;  %v6495_v18 = vsub.s32 2, %v16328_v38  ;;  %v13196_v8 = vcombine.high %v6398_v9, %v6402_v62  ;;  %v13195_v36 = vcombine.low %v6398_v9, %v6402_v62  ;;  %v6438_v40 = vld [vmem:[#allocation18 + $0xe98] sm:$0xff]  ;;  %v13243_v62 = vcombine.low %v6446_v52, %v6450_v6 }
 0x7b7   :  { %9760 = vmatprep.subr.bf16.mxu1 %v13164_v4  ;;  %v6442_v4 = vld [vmem:[#allocation18 + $0xeb8] sm:$0xff] }
 0x7b8   :  { %v6496_v54 = vrot.slane %v16492_v56, %v6495_v18  ;;  %v9804_v56 = vmax.f32 %v14375_v34, 0.0  ;;  %v15197_v9 = vld [vmem:[%s17256_s9 + $0x480] ss:$16 sps:$4 sm:$0xff]   ;;  %v15244_v6 = vld [vmem:[%s17256_s9 + $0x5c4] ss:$16 sps:$4 sm:$0xff]  }
 0x7ba   :  { %9761 = vmatpush1.bf16.msra.mxu1 %v13163_v2  ;;  %v16639_v13 = vpack.c.bf16 %v9804_v56, %v9804_v56  ;;  %v15196_v2 = vld [vmem:[%s17256_s9 + $0x464] ss:$16 sps:$4 sm:$0xff]   ;;  %v15217_v56 = vld [vmem:[%s17256_s9 + $0xc] ss:$16 sps:$4 sm:$0xff]  }
 0x7bb   :  { %9762 = vmatprep.subr.bf16.mxu1 %v13172_v10  ;;  %v13236_v10 = vcombine.high %v6438_v40, %v6442_v4 }
 0x7be   :  { %9763 = vmatpush1.bf16.msra.mxu1 %v13171_v37  ;;  %v15194_v37 = vld [vmem:[%s17256_s9 + $0x460] ss:$16 sps:$4 sm:$0xff]  }
 0x7bf   :  { %9764 = vmatprep.subr.bf16.mxu1 %v13180_v7  ;;  %v13235_v7 = vcombine.low %v6438_v40, %v6442_v4  ;;  %v6503_v40 = vsub.s32 4, %v16328_v38  ;;  %v15238_v4 = vld [vmem:[%s17256_s9 + $0x5a4] ss:$16 sps:$4 sm:$0xff]  }
 0x7c2   :  { %9765 = vmatpush1.bf16.msra.mxu1 %v13179_v46  ;;  %v6454_v46 = vld [vmem:[#allocation18 + $0xf18] sm:$0xff] }
 0x7c3   :  { %9766 = vmatprep.subr.bf16.mxu1 %v13188_v15  ;;  %v6458_v15 = vld [vmem:[#allocation18 + $0xf38] sm:$0xff] }
 0x7c4   :  { %v13251_v23 = vcombine.low %v6454_v46, %v6458_v15 }
 0x7c6   :  { %9767 = vmatpush1.bf16.msra.mxu1 %v13187_v21  ;;  %v13252_v21 = vcombine.high %v6454_v46, %v6458_v15  ;;  %v15250_v46 = vld [vmem:[%s17256_s9 + $0x5e4] ss:$16 sps:$4 sm:$0xff]   ;;  %v15253_v15 = vld [vmem:[%s17256_s9 + $0xcc] ss:$16 sps:$4 sm:$0xff]  }
 0x7c7   :  { %9768 = vmatprep.subr.bf16.mxu1 %v13196_v8  ;;  %v6462_v8 = vld [vmem:[#allocation18 + $0xf58] sm:$0xff] }
 0x7c8   :  { %v9464_v55 = vpop.f32.mrb[92].mxu1  ;;  %v13259_v25 = vcombine.low %v6462_v8, %v6466_v61 }
 0x7c9   :  { %v14372_v12 = vadd.f32 %v9464_v55, %v6496_v54  ;;  %v9466_v27 = vpop.f32.mrb[93].mxu1  ;;  %v15205_v54 = vld [vmem:[%s17256_s9 + $0x4c4] ss:$16 sps:$4 sm:$0xff]   ;;  %v15203_v55 = vld [vmem:[%s17256_s9 + $0x4c0] ss:$16 sps:$4 sm:$0xff]  }
 0x7ca   :  { %v14373_v30 = vadd.f32 %v9466_v27, %v6500_v24  ;;  %v9468_v47 = vpop.f32.mrb[94].mxu1  ;;  %9769 = vmatpush1.bf16.msra.mxu1 %v13195_v36  ;;  %v13260_v24 = vcombine.high %v6462_v8, %v6466_v61  ;;  %v6470_v36 = vld [vmem:[#allocation18 + $0xf98] sm:$0xff] }
 0x7cb   :  { %v9801_v17 = vmax.f32 %v14372_v12, 0.0  ;;  %v9469_v16 = vpop.f32.mrb[95].mxu1  ;;  %9770 = vmatprep.subr.bf16.mxu1 %v13204_v39  ;;  %v6474_v39 = vld [vmem:[#allocation18 + $0xfb8] sm:$0xff] }
 0x7cc   :  { %v9802_v3 = vmax.f32 %v14373_v30, 0.0  ;;  %v13268_v34 = vcombine.high %v6470_v36, %v6474_v39  ;;  %v6478_v12 = vld [vmem:[#allocation18 + $0xfd8] sm:$0xff]  ;;  %v13267_v47 = vcombine.low %v6470_v36, %v6474_v39  ;;  %v15262_v39 = vld [vmem:[%s17256_s9 + $0x12c] ss:$16 sps:$4 sm:$0xff]  }
 0x7cd   :  { %v16633_v43 = vpack.c.bf16 %v9801_v17, %v9801_v17  ;;  %v6482_v27 = vld [vmem:[#allocation18 + $0xff8] sm:$0xff] }
 0x7ce   :  { %v16628_v29 = vpack.c.bf16 %v9802_v3, %v9802_v3  ;;  %9771 = vmatpush1.bf16.msra.mxu1 %v13203_v44  ;;  %v15206_v30 = vld [vmem:[%s17256_s9 + $0x4e0] ss:$16 sps:$4 sm:$0xff]   ;;  %v15211_v44 = vld [vmem:[%s17256_s9 + $0x504] ss:$16 sps:$4 sm:$0xff]   ;;  %v13276_v17 = vcombine.high %v6478_v12, %v6482_v27 }
 0x7cf   :  { %9772 = vmatprep.subr.bf16.mxu1 %v13212_v20  ;;  %v15209_v16 = vld [vmem:[%s17256_s9 + $0x500] ss:$16 sps:$4 sm:$0xff]   ;;  %v13275_v20 = vcombine.low %v6478_v12, %v6482_v27  ;;  %v15214_v3 = vld [vmem:[%s17256_s9 + $0x524] ss:$16 sps:$4 sm:$0xff]   ;;  %v15263_v12 = vld [vmem:[%s17256_s9 + $0x148] ss:$16 sps:$4 sm:$0xff]  }
 0x7d0   :  { %11446 = vmatprep.mubr.bf16.mxu0 %v16628_v29  ;;  %v15350_v8 = vld [vmem:[%s17256_s9 + $0x600] ss:$16 sps:$4 sm:$0xff]   ;;  %v15352_v61 = vld [vmem:[%s17256_s9 + $0x604] ss:$16 sps:$4 sm:$0xff]  }
 0x7d1   :  { %11447 = vmatmul.mubr.bf16.vlgmr.msra.gmra.mrb[144].mxu0 %v16633_v43  ;;  %v15358_v36 = vld [vmem:[%s17256_s9 + $0x624] ss:$16 sps:$4 sm:$0xff]   ;;  %v15368_v27 = vld [vmem:[%s17256_s9 + $0x660] ss:$16 sps:$4 sm:$0xff]  }
 0x7d2   :  { %11456 = vmatpush1.bf16.msra.mxu0 %v15185_v59  ;;  %9773 = vmatpush1.bf16.msra.mxu1 %v13211_v51  ;;  %v15220_v59 = vld [vmem:[%s17256_s9 + $0x544] ss:$16 sps:$4 sm:$0xff]   ;;  %v15223_v51 = vld [vmem:[%s17256_s9 + $0x2c] ss:$16 sps:$4 sm:$0xff]  }
 0x7d3   :  { %11487 = vmatprep.mubr.bf16.mxu0 %v16639_v13  ;;  %11457 = vmatprep.subr.bf16.mxu0 %v15190_v53  ;;  %v15218_v53 = vld [vmem:[%s17256_s9 + $0x540] ss:$16 sps:$4 sm:$0xff]  }
 0x7d4   :  { %9774 = vmatprep.subr.bf16.mxu1 %v13220_v19  ;;  %v15221_v19 = vld [vmem:[%s17256_s9 + $0x28] ss:$16 sps:$4 sm:$0xff]  }
 0x7d6   :  { %11458 = vmatpush1.bf16.msra.mxu0 %v15188_v5  ;;  %9775 = vmatpush1.bf16.msra.mxu1 %v13219_v1  ;;  %v15232_v5 = vld [vmem:[%s17256_s9 + $0x584] ss:$16 sps:$4 sm:$0xff]   ;;  %v15235_v1 = vld [vmem:[%s17256_s9 + $0x6c] ss:$16 sps:$4 sm:$0xff]  }
 0x7d7   :  { %11459 = vmatprep.subr.bf16.mxu0 %v15193_v49  ;;  %9776 = vmatprep.subr.bf16.mxu1 %v13228_v41  ;;  %v15230_v49 = vld [vmem:[%s17256_s9 + $0x580] ss:$16 sps:$4 sm:$0xff]   ;;  %v15233_v41 = vld [vmem:[%s17256_s9 + $0x68] ss:$16 sps:$4 sm:$0xff]  }
 0x7da   :  { %11460 = vmatpush1.bf16.msra.mxu0 %v15191_v60  ;;  %9777 = vmatpush1.bf16.msra.mxu1 %v13227_v58  ;;  %v15241_v60 = vld [vmem:[%s17256_s9 + $0x8c] ss:$16 sps:$4 sm:$0xff]   ;;  %v15236_v58 = vld [vmem:[%s17256_s9 + $0x5a0] ss:$16 sps:$4 sm:$0xff]  }
 0x7db   :  { %11461 = vmatprep.subr.bf16.mxu0 %v15196_v2  ;;  %9778 = vmatprep.subr.bf16.mxu1 %v13236_v10  ;;  %v15239_v2 = vld [vmem:[%s17256_s9 + $0x88] ss:$16 sps:$4 sm:$0xff]  }
 0x7dc   :  { %v16751_v10 = vld [vmem:[#allocation19] sm:$0xff] }
 0x7dd   :  { %v6504_v52 = vrot.slane %v16751_v10, %v6503_v40  ;;  %v15281_v40 = vld [vmem:[%s17256_s9 + $0x208] ss:$16 sps:$4 sm:$0xff]  }
 0x7de   :  { %11462 = vmatpush1.bf16.msra.mxu0 %v15194_v37  ;;  %9779 = vmatpush1.bf16.msra.mxu1 %v13235_v7  ;;  %v15247_v37 = vld [vmem:[%s17256_s9 + $0xac] ss:$16 sps:$4 sm:$0xff]   ;;  %v15242_v7 = vld [vmem:[%s17256_s9 + $0x5c0] ss:$16 sps:$4 sm:$0xff]  }
 0x7df   :  { %11463 = vmatprep.subr.bf16.mxu0 %v15199_v42  ;;  %9780 = vmatprep.subr.bf16.mxu1 %v13244_v45  ;;  %v15245_v42 = vld [vmem:[%s17256_s9 + $0xa8] ss:$16 sps:$4 sm:$0xff]   ;;  %v14374_v45 = vadd.f32 %v16594_v35, %v6504_v52  ;;  %v15412_v52 = vld [vmem:[%s17256_s9 + $0x744] ss:$16 sps:$4 sm:$0xff]  }
 0x7e0   :  { %v15251_v35 = vld [vmem:[%s17256_s9 + $0xc8] ss:$16 sps:$4 sm:$0xff]  }
 0x7e2   :  { %11464 = vmatpush1.bf16.msra.mxu0 %v15197_v9  ;;  %9781 = vmatpush1.bf16.msra.mxu1 %v13243_v62  ;;  %v15248_v9 = vld [vmem:[%s17256_s9 + $0x5e0] ss:$16 sps:$4 sm:$0xff]   ;;  %v9803_v62 = vmax.f32 %v14374_v45, 0.0  ;;  %v15290_v45 = vld [vmem:[%s17256_s9 + $0x268] ss:$16 sps:$4 sm:$0xff]  }
 0x7e3   :  { %11465 = vmatprep.subr.bf16.mxu0 %v15202_v14  ;;  %9782 = vmatprep.subr.bf16.mxu1 %v13252_v21  ;;  %v15256_v14 = vld [vmem:[%s17256_s9 + $0xec] ss:$16 sps:$4 sm:$0xff]   ;;  %v15254_v21 = vld [vmem:[%s17256_s9 + $0xe8] ss:$16 sps:$4 sm:$0xff]  }
 0x7e6   :  { %11466 = vmatpush1.bf16.msra.mxu0 %v15200_v11  ;;  %9783 = vmatpush1.bf16.msra.mxu1 %v13251_v23  ;;  %v16791_v11 = vpack.c.bf16 %v9803_v62, %v9803_v62  ;;  %v15259_v23 = vld [vmem:[%s17256_s9 + $0x10c] ss:$16 sps:$4 sm:$0xff]   ;;  %v15430_v62 = vld [vmem:[%s17256_s9 + $0x7a4] ss:$16 sps:$4 sm:$0xff]  }
 0x7e7   :  { %11467 = vmatprep.subr.bf16.mxu0 %v15205_v54  ;;  %9784 = vmatprep.subr.bf16.mxu1 %v13260_v24  ;;  %v15257_v54 = vld [vmem:[%s17256_s9 + $0x108] ss:$16 sps:$4 sm:$0xff]   ;;  %v15356_v24 = vld [vmem:[%s17256_s9 + $0x620] ss:$16 sps:$4 sm:$0xff]  }
 0x7ea   :  { %11468 = vmatpush1.bf16.msra.mxu0 %v15203_v55  ;;  %9785 = vmatpush1.bf16.msra.mxu1 %v13259_v25  ;;  %v15260_v55 = vld [vmem:[%s17256_s9 + $0x128] ss:$16 sps:$4 sm:$0xff]   ;;  %v15362_v25 = vld [vmem:[%s17256_s9 + $0x640] ss:$16 sps:$4 sm:$0xff]  }
 0x7eb   :  { %11469 = vmatprep.subr.bf16.mxu0 %v15208_v32  ;;  %9786 = vmatprep.subr.bf16.mxu1 %v13268_v34  ;;  %v15364_v32 = vld [vmem:[%s17256_s9 + $0x644] ss:$16 sps:$4 sm:$0xff]   ;;  %v15265_v34 = vld [vmem:[%s17256_s9 + $0x14c] ss:$16 sps:$4 sm:$0xff]  }
 0x7ee   :  { %11470 = vmatpush1.bf16.msra.mxu0 %v15206_v30  ;;  %9787 = vmatpush1.bf16.msra.mxu1 %v13267_v47  ;;  %v15370_v30 = vld [vmem:[%s17256_s9 + $0x664] ss:$16 sps:$4 sm:$0xff]   ;;  %v15268_v47 = vld [vmem:[%s17256_s9 + $0x16c] ss:$16 sps:$4 sm:$0xff]  }
 0x7ef   :  { %11471 = vmatprep.subr.bf16.mxu0 %v15211_v44  ;;  %9788 = vmatprep.subr.bf16.mxu1 %v13276_v17  ;;  %v15266_v44 = vld [vmem:[%s17256_s9 + $0x168] ss:$16 sps:$4 sm:$0xff]   ;;  %v15374_v17 = vld [vmem:[%s17256_s9 + $0x680] ss:$16 sps:$4 sm:$0xff]  }
 0x7f2   :  { %11472 = vmatpush1.bf16.msra.mxu0 %v15209_v16  ;;  %9789 = vmatpush1.bf16.msra.mxu1 %v13275_v20  ;;  %v15376_v16 = vld [vmem:[%s17256_s9 + $0x684] ss:$16 sps:$4 sm:$0xff]   ;;  %v15271_v20 = vld [vmem:[%s17256_s9 + $0x18c] ss:$16 sps:$4 sm:$0xff]  }
 0x7f3   :  { %11473 = vmatprep.subr.bf16.mxu0 %v15214_v3  ;;  %11537 = vmatprep.subr.bf16.mxu1 %v15217_v56  ;;  %v15269_v3 = vld [vmem:[%s17256_s9 + $0x188] ss:$16 sps:$4 sm:$0xff]   ;;  %v15380_v56 = vld [vmem:[%s17256_s9 + $0x6a0] ss:$16 sps:$4 sm:$0xff]  }
 0x7f5   :  { %9791 = vmatmul.mubr.bf16.vlgmr.msra.gmra.mrb[96].mxu1 %v16378_v0  ;;  %v15229_v0 = vld [vmem:[%s17256_s9 + $0x4c] ss:$16 sps:$4 sm:$0xff]  }
 0x7f6   :  { %11474 = vmatpush1.bf16.msra.mxu0 %v15212_v57  ;;  %11538 = vmatpush1.bf16.msra.mxu1 %v15215_v33  ;;  %v15382_v57 = vld [vmem:[%s17256_s9 + $0x6a4] ss:$16 sps:$4 sm:$0xff]   ;;  %v15274_v33 = vld [vmem:[%s17256_s9 + $0x1ac] ss:$16 sps:$4 sm:$0xff]  }
 0x7f7   :  { %11569 = vmatprep.mubr.bf16.mxu1 %v16500_v22  ;;  %11475 = vmatprep.subr.bf16.mxu0 %v15220_v59  ;;  %v15227_v22 = vld [vmem:[%s17256_s9 + $0x48] ss:$16 sps:$4 sm:$0xff]  }
 0x7f8   :  { %11539 = vmatprep.subr.bf16.mxu1 %v15223_v51  ;;  %v15272_v59 = vld [vmem:[%s17256_s9 + $0x1a8] ss:$16 sps:$4 sm:$0xff]   ;;  %v15386_v51 = vld [vmem:[%s17256_s9 + $0x6c0] ss:$16 sps:$4 sm:$0xff]  }
 0x7fa   :  { %11476 = vmatpush1.bf16.msra.mxu0 %v15218_v53  ;;  %11540 = vmatpush1.bf16.msra.mxu1 %v15221_v19  ;;  %v15388_v53 = vld [vmem:[%s17256_s9 + $0x6c4] ss:$16 sps:$4 sm:$0xff]   ;;  %v15277_v19 = vld [vmem:[%s17256_s9 + $0x1cc] ss:$16 sps:$4 sm:$0xff]  }
 0x7fb   :  { %11477 = vmatprep.subr.bf16.mxu0 %v15226_v28  ;;  %11541 = vmatprep.subr.bf16.mxu1 %v15229_v0  ;;  %v15275_v28 = vld [vmem:[%s17256_s9 + $0x1c8] ss:$16 sps:$4 sm:$0xff]   ;;  %v15392_v0 = vld [vmem:[%s17256_s9 + $0x6e0] ss:$16 sps:$4 sm:$0xff]  }
 0x7fe   :  { %11478 = vmatpush1.bf16.msra.mxu0 %v15224_v63  ;;  %11542 = vmatpush1.bf16.msra.mxu1 %v15227_v22  ;;  %v15394_v63 = vld [vmem:[%s17256_s9 + $0x6e4] ss:$16 sps:$4 sm:$0xff]   ;;  %v15280_v22 = vld [vmem:[%s17256_s9 + $0x1ec] ss:$16 sps:$4 sm:$0xff]  }
 0x7ff   :  { %11479 = vmatprep.subr.bf16.mxu0 %v15232_v5  ;;  %11543 = vmatprep.subr.bf16.mxu1 %v15235_v1  ;;  %v15278_v5 = vld [vmem:[%s17256_s9 + $0x1e8] ss:$16 sps:$4 sm:$0xff]   ;;  %v15398_v1 = vld [vmem:[%s17256_s9 + $0x700] ss:$16 sps:$4 sm:$0xff]  }
 0x802   :  { %11480 = vmatpush1.bf16.msra.mxu0 %v15230_v49  ;;  %11544 = vmatpush1.bf16.msra.mxu1 %v15233_v41  ;;  %v15400_v49 = vld [vmem:[%s17256_s9 + $0x704] ss:$16 sps:$4 sm:$0xff]   ;;  %v15283_v41 = vld [vmem:[%s17256_s9 + $0x20c] ss:$16 sps:$4 sm:$0xff]  }
 0x803   :  { %11481 = vmatprep.subr.bf16.mxu0 %v15238_v4  ;;  %11545 = vmatprep.subr.bf16.mxu1 %v15241_v60  ;;  %v15406_v4 = vld [vmem:[%s17256_s9 + $0x724] ss:$16 sps:$4 sm:$0xff]   ;;  %v15286_v60 = vld [vmem:[%s17256_s9 + $0x22c] ss:$16 sps:$4 sm:$0xff]  }
 0x806   :  { %11482 = vmatpush1.bf16.msra.mxu0 %v15236_v58  ;;  %11546 = vmatpush1.bf16.msra.mxu1 %v15239_v2  ;;  %v15404_v58 = vld [vmem:[%s17256_s9 + $0x720] ss:$16 sps:$4 sm:$0xff]   ;;  %v15284_v2 = vld [vmem:[%s17256_s9 + $0x228] ss:$16 sps:$4 sm:$0xff]  }
 0x807   :  { %11483 = vmatprep.subr.bf16.mxu0 %v15244_v6  ;;  %11547 = vmatprep.subr.bf16.mxu1 %v15247_v37  ;;  %v15289_v6 = vld [vmem:[%s17256_s9 + $0x24c] ss:$16 sps:$4 sm:$0xff]   ;;  %v15418_v37 = vld [vmem:[%s17256_s9 + $0x764] ss:$16 sps:$4 sm:$0xff]  }
 0x80a   :  { %11484 = vmatpush1.bf16.msra.mxu0 %v15242_v7  ;;  %11548 = vmatpush1.bf16.msra.mxu1 %v15245_v42  ;;  %v15292_v7 = vld [vmem:[%s17256_s9 + $0x26c] ss:$16 sps:$4 sm:$0xff]   ;;  %v15416_v42 = vld [vmem:[%s17256_s9 + $0x760] ss:$16 sps:$4 sm:$0xff]  }
 0x80b   :  { %11485 = vmatprep.subr.bf16.mxu0 %v15250_v46  ;;  %11549 = vmatprep.subr.bf16.mxu1 %v15253_v15  ;;  %v15424_v46 = vld [vmem:[%s17256_s9 + $0x784] ss:$16 sps:$4 sm:$0xff]   ;;  %v15295_v15 = vld [vmem:[%s17256_s9 + $0x28c] ss:$16 sps:$4 sm:$0xff]  }
 0x80e   :  { %11486 = vmatpush1.bf16.msra.mxu0 %v15248_v9  ;;  %11550 = vmatpush1.bf16.msra.mxu1 %v15251_v35  ;;  %v15422_v9 = vld [vmem:[%s17256_s9 + $0x780] ss:$16 sps:$4 sm:$0xff]   ;;  %v15293_v35 = vld [vmem:[%s17256_s9 + $0x288] ss:$16 sps:$4 sm:$0xff]  }
 0x80f   :  { %11551 = vmatprep.subr.bf16.mxu1 %v15256_v14  ;;  %11496 = vmatprep.subr.bf16.mxu0 %v15352_v61  ;;  %v15298_v14 = vld [vmem:[%s17256_s9 + $0x2ac] ss:$16 sps:$4 sm:$0xff]  }
 0x810   :  { %v15301_v61 = vld [vmem:[%s17256_s9 + $0x2cc] ss:$16 sps:$4 sm:$0xff]  }
 0x811   :  { %11488 = vmatmul.mubr.bf16.vlgmr.msra.gmra.mrb[144].mxu0 %v16791_v11 }
 0x812   :  { %11552 = vmatpush1.bf16.msra.mxu1 %v15254_v21  ;;  %11497 = vmatpush1.bf16.msra.mxu0 %v15350_v8  ;;  %v15428_v21 = vld [vmem:[%s17256_s9 + $0x7a0] ss:$16 sps:$4 sm:$0xff]   ;;  %v15296_v8 = vld [vmem:[%s17256_s9 + $0x2a8] ss:$16 sps:$4 sm:$0xff]  }
 0x813   :  { %11553 = vmatprep.subr.bf16.mxu1 %v15259_v23  ;;  %11498 = vmatprep.subr.bf16.mxu0 %v15358_v36  ;;  %v15299_v23 = vld [vmem:[%s17256_s9 + $0x2c8] ss:$16 sps:$4 sm:$0xff]   ;;  %v15434_v36 = vld [vmem:[%s17256_s9 + $0x7c0] ss:$16 sps:$4 sm:$0xff]  }
 0x816   :  { %11554 = vmatpush1.bf16.msra.mxu1 %v15257_v54  ;;  %11499 = vmatpush1.bf16.msra.mxu0 %v15356_v24  ;;  %v15304_v54 = vld [vmem:[%s17256_s9 + $0x2ec] ss:$16 sps:$4 sm:$0xff]   ;;  %v15302_v24 = vld [vmem:[%s17256_s9 + $0x2e8] ss:$16 sps:$4 sm:$0xff]  }
 0x817   :  { %11555 = vmatprep.subr.bf16.mxu1 %v15262_v39  ;;  %11500 = vmatprep.subr.bf16.mxu0 %v15364_v32  ;;  %v15436_v39 = vld [vmem:[%s17256_s9 + $0x7c4] ss:$16 sps:$4 sm:$0xff]   ;;  %v15440_v32 = vld [vmem:[%s17256_s9 + $0x7e0] ss:$16 sps:$4 sm:$0xff]  }
 0x81a   :  { %11556 = vmatpush1.bf16.msra.mxu1 %v15260_v55  ;;  %11501 = vmatpush1.bf16.msra.mxu0 %v15362_v25  ;;  %v15307_v55 = vld [vmem:[%s17256_s9 + $0x30c] ss:$16 sps:$4 sm:$0xff]   ;;  %v15442_v25 = vld [vmem:[%s17256_s9 + $0x7e4] ss:$16 sps:$4 sm:$0xff]  }
 0x81b   :  { %11557 = vmatprep.subr.bf16.mxu1 %v15265_v34  ;;  %11502 = vmatprep.subr.bf16.mxu0 %v15370_v30  ;;  %v15305_v34 = vld [vmem:[%s17256_s9 + $0x308] ss:$16 sps:$4 sm:$0xff]   ;;  %v15313_v30 = vld [vmem:[%s17256_s9 + $0x34c] ss:$16 sps:$4 sm:$0xff]  }
 0x81e   :  { %11558 = vmatpush1.bf16.msra.mxu1 %v15263_v12  ;;  %11503 = vmatpush1.bf16.msra.mxu0 %v15368_v27  ;;  %v15310_v12 = vld [vmem:[%s17256_s9 + $0x32c] ss:$16 sps:$4 sm:$0xff]   ;;  %v15308_v27 = vld [vmem:[%s17256_s9 + $0x328] ss:$16 sps:$4 sm:$0xff]  }
 0x81f   :  { %11559 = vmatprep.subr.bf16.mxu1 %v15268_v47  ;;  %11504 = vmatprep.subr.bf16.mxu0 %v15376_v16  ;;  %v15311_v47 = vld [vmem:[%s17256_s9 + $0x348] ss:$16 sps:$4 sm:$0xff]   ;;  %v15319_v16 = vld [vmem:[%s17256_s9 + $0x38c] ss:$16 sps:$4 sm:$0xff]  }
 0x822   :  { %11560 = vmatpush1.bf16.msra.mxu1 %v15266_v44  ;;  %11505 = vmatpush1.bf16.msra.mxu0 %v15374_v17  ;;  %v15316_v44 = vld [vmem:[%s17256_s9 + $0x36c] ss:$16 sps:$4 sm:$0xff]   ;;  %v15314_v17 = vld [vmem:[%s17256_s9 + $0x368] ss:$16 sps:$4 sm:$0xff]  }
 0x823   :  { %11561 = vmatprep.subr.bf16.mxu1 %v15271_v20  ;;  %11506 = vmatprep.subr.bf16.mxu0 %v15382_v57  ;;  %v15317_v20 = vld [vmem:[%s17256_s9 + $0x388] ss:$16 sps:$4 sm:$0xff]   ;;  %v15325_v57 = vld [vmem:[%s17256_s9 + $0x3cc] ss:$16 sps:$4 sm:$0xff]  }
 0x826   :  { %11562 = vmatpush1.bf16.msra.mxu1 %v15269_v3  ;;  %11507 = vmatpush1.bf16.msra.mxu0 %v15380_v56  ;;  %v15322_v3 = vld [vmem:[%s17256_s9 + $0x3ac] ss:$16 sps:$4 sm:$0xff]   ;;  %v15320_v56 = vld [vmem:[%s17256_s9 + $0x3a8] ss:$16 sps:$4 sm:$0xff]  }
 0x827   :  { %11563 = vmatprep.subr.bf16.mxu1 %v15274_v33  ;;  %11508 = vmatprep.subr.bf16.mxu0 %v15388_v53  ;;  %v15323_v33 = vld [vmem:[%s17256_s9 + $0x3c8] ss:$16 sps:$4 sm:$0xff]   ;;  %v15331_v53 = vld [vmem:[%s17256_s9 + $0x40c] ss:$16 sps:$4 sm:$0xff]  }
 0x82a   :  { %11564 = vmatpush1.bf16.msra.mxu1 %v15272_v59  ;;  %11509 = vmatpush1.bf16.msra.mxu0 %v15386_v51  ;;  %v15328_v59 = vld [vmem:[%s17256_s9 + $0x3ec] ss:$16 sps:$4 sm:$0xff]   ;;  %v15326_v51 = vld [vmem:[%s17256_s9 + $0x3e8] ss:$16 sps:$4 sm:$0xff]  }
 0x82b   :  { %11565 = vmatprep.subr.bf16.mxu1 %v15277_v19  ;;  %11510 = vmatprep.subr.bf16.mxu0 %v15394_v63  ;;  %v15329_v19 = vld [vmem:[%s17256_s9 + $0x408] ss:$16 sps:$4 sm:$0xff]  }
 0x82c   :  { %v15332_v63 = vld [vmem:[%s17256_s9 + $0x428] ss:$16 sps:$4 sm:$0xff]  }
 0x82e   :  { %11566 = vmatpush1.bf16.msra.mxu1 %v15275_v28  ;;  %11511 = vmatpush1.bf16.msra.mxu0 %v15392_v0  ;;  %v15334_v28 = vld [vmem:[%s17256_s9 + $0x42c] ss:$16 sps:$4 sm:$0xff]  }
 0x82f   :  { %11567 = vmatprep.subr.bf16.mxu1 %v15280_v22  ;;  %11512 = vmatprep.subr.bf16.mxu0 %v15400_v49  ;;  %v15473_v0 = vld [vmem:[#allocation22 + $0x40] sm:$0xff]  }
 0x830   :  { %v15337_v22 = vld [vmem:[%s17256_s9 + $0x44c] ss:$16 sps:$4 sm:$0xff]   ;;  %v15341_v49 = vld [vmem:[%s17256_s9 + $0x488] ss:$16 sps:$4 sm:$0xff]  }
 0x832   :  { %11568 = vmatpush1.bf16.msra.mxu1 %v15278_v5  ;;  %11513 = vmatpush1.bf16.msra.mxu0 %v15398_v1  ;;  %v15335_v5 = vld [vmem:[%s17256_s9 + $0x448] ss:$16 sps:$4 sm:$0xff]   ;;  %v15343_v1 = vld [vmem:[%s17256_s9 + $0x48c] ss:$16 sps:$4 sm:$0xff]  }
 0x833   :  { %11578 = vmatprep.subr.bf16.mxu1 %v15283_v41  ;;  %11514 = vmatprep.subr.bf16.mxu0 %v15406_v4  ;;  %v15346_v41 = vld [vmem:[%s17256_s9 + $0x4ac] ss:$16 sps:$4 sm:$0xff]  }
 0x834   :  { %v15349_v4 = vld [vmem:[%s17256_s9 + $0x4cc] ss:$16 sps:$4 sm:$0xff]  }
 0x835   :  { %11570 = vmatmul.mubr.bf16.vlgmr.msra.gmra.mrb[100].mxu1 %v16502_v31  ;;  %v15410_v31 = vld [vmem:[%s17256_s9 + $0x740] ss:$16 sps:$4 sm:$0xff]  }
 0x836   :  { %11579 = vmatpush1.bf16.msra.mxu1 %v15281_v40  ;;  %11610 = vmatprep.mubr.bf16.mxu1 %v16628_v29  ;;  %v15287_v29 = vld [vmem:[%s17256_s9 + $0x248] ss:$16 sps:$4 sm:$0xff]  }
 0x837   :  { %11580 = vmatprep.subr.bf16.mxu1 %v15286_v60  ;;  %11515 = vmatpush1.bf16.msra.mxu0 %v15404_v58  ;;  %v15344_v40 = vld [vmem:[%s17256_s9 + $0x4a8] ss:$16 sps:$4 sm:$0xff]   ;;  %v15355_v58 = vld [vmem:[%s17256_s9 + $0x4ec] ss:$16 sps:$4 sm:$0xff]  }
 0x838   :  { %11516 = vmatprep.subr.bf16.mxu0 %v15412_v52  ;;  %v15347_v60 = vld [vmem:[%s17256_s9 + $0x4c8] ss:$16 sps:$4 sm:$0xff]   ;;  %v15361_v52 = vld [vmem:[%s17256_s9 + $0x50c] ss:$16 sps:$4 sm:$0xff]  }
 0x83a   :  { %11581 = vmatpush1.bf16.msra.mxu1 %v15284_v2  ;;  %v15353_v2 = vld [vmem:[%s17256_s9 + $0x4e8] ss:$16 sps:$4 sm:$0xff]  }
 0x83b   :  { %11582 = vmatprep.subr.bf16.mxu1 %v15289_v6  ;;  %11517 = vmatpush1.bf16.msra.mxu0 %v15410_v31  ;;  %v15359_v6 = vld [vmem:[%s17256_s9 + $0x508] ss:$16 sps:$4 sm:$0xff]   ;;  %v15367_v31 = vld [vmem:[%s17256_s9 + $0x52c] ss:$16 sps:$4 sm:$0xff]  }
 0x83c   :  { %11518 = vmatprep.subr.bf16.mxu0 %v15418_v37  ;;  %v15373_v37 = vld [vmem:[%s17256_s9 + $0x54c] ss:$16 sps:$4 sm:$0xff]  }
 0x83e   :  { %11583 = vmatpush1.bf16.msra.mxu1 %v15287_v29  ;;  %v15365_v29 = vld [vmem:[%s17256_s9 + $0x528] ss:$16 sps:$4 sm:$0xff]  }
 0x83f   :  { %11584 = vmatprep.subr.bf16.mxu1 %v15292_v7  ;;  %11519 = vmatpush1.bf16.msra.mxu0 %v15416_v42  ;;  %v15371_v7 = vld [vmem:[%s17256_s9 + $0x548] ss:$16 sps:$4 sm:$0xff]   ;;  %v15379_v42 = vld [vmem:[%s17256_s9 + $0x56c] ss:$16 sps:$4 sm:$0xff]  }
 0x840   :  { %11520 = vmatprep.subr.bf16.mxu0 %v15424_v46  ;;  %v15385_v46 = vld [vmem:[%s17256_s9 + $0x58c] ss:$16 sps:$4 sm:$0xff]  }
 0x842   :  { %11585 = vmatpush1.bf16.msra.mxu1 %v15290_v45  ;;  %v15377_v45 = vld [vmem:[%s17256_s9 + $0x568] ss:$16 sps:$4 sm:$0xff]  }
 0x843   :  { %11586 = vmatprep.subr.bf16.mxu1 %v15295_v15  ;;  %11521 = vmatpush1.bf16.msra.mxu0 %v15422_v9  ;;  %v15383_v15 = vld [vmem:[%s17256_s9 + $0x588] ss:$16 sps:$4 sm:$0xff]   ;;  %v15391_v9 = vld [vmem:[%s17256_s9 + $0x5ac] ss:$16 sps:$4 sm:$0xff]  }
 0x844   :  { %11522 = vmatprep.subr.bf16.mxu0 %v15430_v62  ;;  %v15397_v62 = vld [vmem:[%s17256_s9 + $0x5cc] ss:$16 sps:$4 sm:$0xff]  }
 0x846   :  { %11587 = vmatpush1.bf16.msra.mxu1 %v15293_v35  ;;  %v15389_v35 = vld [vmem:[%s17256_s9 + $0x5a8] ss:$16 sps:$4 sm:$0xff]  }
 0x847   :  { %11588 = vmatprep.subr.bf16.mxu1 %v15298_v14  ;;  %11523 = vmatpush1.bf16.msra.mxu0 %v15428_v21  ;;  %v15395_v14 = vld [vmem:[%s17256_s9 + $0x5c8] ss:$16 sps:$4 sm:$0xff]   ;;  %v15403_v21 = vld [vmem:[%s17256_s9 + $0x5ec] ss:$16 sps:$4 sm:$0xff]  }
 0x848   :  { %11524 = vmatprep.subr.bf16.mxu0 %v15436_v39  ;;  %v15419_v39 = vld [vmem:[%s17256_s9 + $0x648] ss:$16 sps:$4 sm:$0xff]  }
 0x84a   :  { %11589 = vmatpush1.bf16.msra.mxu1 %v15296_v8  ;;  %v15401_v8 = vld [vmem:[%s17256_s9 + $0x5e8] ss:$16 sps:$4 sm:$0xff]  }
 0x84b   :  { %11590 = vmatprep.subr.bf16.mxu1 %v15301_v61  ;;  %11525 = vmatpush1.bf16.msra.mxu0 %v15434_v36  ;;  %v15409_v61 = vld [vmem:[%s17256_s9 + $0x60c] ss:$16 sps:$4 sm:$0xff]  }
 0x84c   :  { %11526 = vmatprep.subr.bf16.mxu0 %v15442_v25  ;;  %v15421_v36 = vld [vmem:[%s17256_s9 + $0x64c] ss:$16 sps:$4 sm:$0xff]  }
 0x84d   :  { %v15433_v25 = vld [vmem:[%s17256_s9 + $0x68c] ss:$16 sps:$4 sm:$0xff]  }
 0x84e   :  { %11591 = vmatpush1.bf16.msra.mxu1 %v15299_v23  ;;  %v15407_v23 = vld [vmem:[%s17256_s9 + $0x608] ss:$16 sps:$4 sm:$0xff]  }
 0x84f   :  { %11592 = vmatprep.subr.bf16.mxu1 %v15304_v54  ;;  %11527 = vmatpush1.bf16.msra.mxu0 %v15440_v32  ;;  %v15415_v54 = vld [vmem:[%s17256_s9 + $0x62c] ss:$16 sps:$4 sm:$0xff]   ;;  %v6511_v32 = vsub.s32 6, %v16328_v38 }
 0x850   :  { %14272 = vmatprep.subr.bf16.mxu0 %v15473_v0  ;;  %v15474_v0 = vld [vmem:[#allocation22] sm:$0xff]  }
 0x852   :  { %11593 = vmatpush1.bf16.msra.mxu1 %v15302_v24  ;;  %v15413_v24 = vld [vmem:[%s17256_s9 + $0x628] ss:$16 sps:$4 sm:$0xff]  }
 0x853   :  { %11594 = vmatprep.subr.bf16.mxu1 %v15307_v55  ;;  %v15425_v55 = vld [vmem:[%s17256_s9 + $0x668] ss:$16 sps:$4 sm:$0xff]  }
 0x856   :  { %11595 = vmatpush1.bf16.msra.mxu1 %v15305_v34  ;;  %v15431_v34 = vld [vmem:[%s17256_s9 + $0x688] ss:$16 sps:$4 sm:$0xff]  }
 0x857   :  { %11596 = vmatprep.subr.bf16.mxu1 %v15310_v12  ;;  %v6515_v12 = vsub.s32 7, %v16328_v38 }
 0x85a   :  { %11597 = vmatpush1.bf16.msra.mxu1 %v15308_v27  ;;  %v15439_v27 = vld [vmem:[%s17256_s9 + $0x6ac] ss:$16 sps:$4 sm:$0xff]  }
 0x85b   :  { %11598 = vmatprep.subr.bf16.mxu1 %v15313_v30  ;;  %v6512_v30 = vrot.slane %v16751_v10, %v6511_v32 }
 0x85e   :  { %11599 = vmatpush1.bf16.msra.mxu1 %v15311_v47  ;;  %v6516_v47 = vrot.slane %v16751_v10, %v6515_v12 }
 0x85f   :  { %11600 = vmatprep.subr.bf16.mxu1 %v15316_v44  ;;  %v15437_v44 = vld [vmem:[%s17256_s9 + $0x6a8] ss:$16 sps:$4 sm:$0xff]  }
 0x862   :  { %11601 = vmatpush1.bf16.msra.mxu1 %v15314_v17  ;;  %v15445_v17 = vld [vmem:[%s17256_s9 + $0x6cc] ss:$16 sps:$4 sm:$0xff]  }
 0x863   :  { %11602 = vmatprep.subr.bf16.mxu1 %v15319_v16 }
 0x866   :  { %11603 = vmatpush1.bf16.msra.mxu1 %v15317_v20 }
 0x867   :  { %11604 = vmatprep.subr.bf16.mxu1 %v15322_v3 }
 0x86a   :  { %11605 = vmatpush1.bf16.msra.mxu1 %v15320_v56 }
 0x86b   :  { %11606 = vmatprep.subr.bf16.mxu1 %v15325_v57 }
 0x86e   :  { %11607 = vmatpush1.bf16.msra.mxu1 %v15323_v33  ;;  %v15443_v33 = vld [vmem:[%s17256_s9 + $0x6c8] ss:$16 sps:$4 sm:$0xff]  }
 0x86f   :  { %11608 = vmatprep.subr.bf16.mxu1 %v15328_v59 }
 0x872   :  { %11609 = vmatpush1.bf16.msra.mxu1 %v15326_v51  ;;  %v15448_v51 = vld [vmem:[%s17256_s9 + $0x6ec] ss:$16 sps:$4 sm:$0xff]  }
 0x873   :  { %11619 = vmatprep.subr.bf16.mxu1 %v15331_v53 }
 0x875   :  { %11611 = vmatmul.mubr.bf16.vlgmr.msra.gmra.mrb[100].mxu1 %v16633_v43  ;;  %v15340_v43 = vld [vmem:[%s17256_s9 + $0x46c] ss:$16 sps:$4 sm:$0xff]  }
 0x876   :  { %11620 = vmatpush1.bf16.msra.mxu1 %v15329_v19  ;;  %11651 = vmatprep.mubr.bf16.mxu1 %v16639_v13  ;;  %v15338_v13 = vld [vmem:[%s17256_s9 + $0x468] ss:$16 sps:$4 sm:$0xff]  }
 0x877   :  { %11621 = vmatprep.subr.bf16.mxu1 %v15334_v28  ;;  %v15446_v28 = vld [vmem:[%s17256_s9 + $0x6e8] ss:$16 sps:$4 sm:$0xff]  }
 0x87a   :  { %11622 = vmatpush1.bf16.msra.mxu1 %v15332_v63 }
 0x87b   :  { %11623 = vmatprep.subr.bf16.mxu1 %v15337_v22  ;;  %v15451_v22 = vld [vmem:[%s17256_s9 + $0x70c] ss:$16 sps:$4 sm:$0xff]  }
 0x87e   :  { %11624 = vmatpush1.bf16.msra.mxu1 %v15335_v5  ;;  %v15475_v5 = vld [vmem:[#allocation22 + $0x48] sm:$0xff]  }
 0x87f   :  { %11625 = vmatprep.subr.bf16.mxu1 %v15340_v43  ;;  %v15449_v43 = vld [vmem:[%s17256_s9 + $0x708] ss:$16 sps:$4 sm:$0xff]  }
 0x882   :  { %11626 = vmatpush1.bf16.msra.mxu1 %v15338_v13  ;;  %v15476_v13 = vld [vmem:[#allocation22 + $0x8] sm:$0xff]  }
 0x883   :  { %11627 = vmatprep.subr.bf16.mxu1 %v15343_v1  ;;  %v15454_v1 = vld [vmem:[%s17256_s9 + $0x72c] ss:$16 sps:$4 sm:$0xff]  }
 0x886   :  { %11628 = vmatpush1.bf16.msra.mxu1 %v15341_v49  ;;  %v15477_v49 = vld [vmem:[#allocation22 + $0x50] sm:$0xff]  }
 0x887   :  { %11629 = vmatprep.subr.bf16.mxu1 %v15346_v41  ;;  %v15452_v41 = vld [vmem:[%s17256_s9 + $0x728] ss:$16 sps:$4 sm:$0xff]  }
 0x88a   :  { %11630 = vmatpush1.bf16.msra.mxu1 %v15344_v40  ;;  %v15478_v40 = vld [vmem:[#allocation22 + $0x10] sm:$0xff]  }
 0x88b   :  { %11631 = vmatprep.subr.bf16.mxu1 %v15349_v4  ;;  %v15457_v4 = vld [vmem:[%s17256_s9 + $0x74c] ss:$16 sps:$4 sm:$0xff]  }
 0x88e   :  { %11632 = vmatpush1.bf16.msra.mxu1 %v15347_v60  ;;  %v15479_v60 = vld [vmem:[#allocation22 + $0x58] sm:$0xff]  }
 0x88f   :  { %11633 = vmatprep.subr.bf16.mxu1 %v15355_v58  ;;  %v15455_v58 = vld [vmem:[%s17256_s9 + $0x748] ss:$16 sps:$4 sm:$0xff]  }
 0x892   :  { %11634 = vmatpush1.bf16.msra.mxu1 %v15353_v2  ;;  %v15480_v2 = vld [vmem:[#allocation22 + $0x18] sm:$0xff]  }
 0x893   :  { %11635 = vmatprep.subr.bf16.mxu1 %v15361_v52  ;;  %v15460_v52 = vld [vmem:[%s17256_s9 + $0x76c] ss:$16 sps:$4 sm:$0xff]  }
 0x896   :  { %11636 = vmatpush1.bf16.msra.mxu1 %v15359_v6  ;;  %v15481_v6 = vld [vmem:[#allocation22 + $0x60] sm:$0xff]  }
 0x897   :  { %11637 = vmatprep.subr.bf16.mxu1 %v15367_v31  ;;  %v15458_v31 = vld [vmem:[%s17256_s9 + $0x768] ss:$16 sps:$4 sm:$0xff]  }
 0x89a   :  { %11638 = vmatpush1.bf16.msra.mxu1 %v15365_v29  ;;  %v15482_v29 = vld [vmem:[#allocation22 + $0x20] sm:$0xff]  }
 0x89b   :  { %11639 = vmatprep.subr.bf16.mxu1 %v15373_v37  ;;  %v15463_v37 = vld [vmem:[%s17256_s9 + $0x78c] ss:$16 sps:$4 sm:$0xff]  }
 0x89e   :  { %11640 = vmatpush1.bf16.msra.mxu1 %v15371_v7  ;;  %v15483_v7 = vld [vmem:[#allocation22 + $0x68] sm:$0xff]  }
 0x89f   :  { %11641 = vmatprep.subr.bf16.mxu1 %v15379_v42  ;;  %v15461_v42 = vld [vmem:[%s17256_s9 + $0x788] ss:$16 sps:$4 sm:$0xff]  }
 0x8a2   :  { %11642 = vmatpush1.bf16.msra.mxu1 %v15377_v45  ;;  %v15484_v45 = vld [vmem:[#allocation22 + $0x28] sm:$0xff]  }
 0x8a3   :  { %11643 = vmatprep.subr.bf16.mxu1 %v15385_v46  ;;  %v15466_v46 = vld [vmem:[%s17256_s9 + $0x7ac] ss:$16 sps:$4 sm:$0xff]  }
 0x8a6   :  { %11644 = vmatpush1.bf16.msra.mxu1 %v15383_v15  ;;  %v15464_v15 = vld [vmem:[%s17256_s9 + $0x7a8] ss:$16 sps:$4 sm:$0xff]  }
 0x8a7   :  { %11645 = vmatprep.subr.bf16.mxu1 %v15391_v9  ;;  %v15469_v9 = vld [vmem:[%s17256_s9 + $0x7cc] ss:$16 sps:$4 sm:$0xff]  }
 0x8aa   :  { %11646 = vmatpush1.bf16.msra.mxu1 %v15389_v35  ;;  %v15467_v35 = vld [vmem:[%s17256_s9 + $0x7c8] ss:$16 sps:$4 sm:$0xff]  }
 0x8ab   :  { %11647 = vmatprep.subr.bf16.mxu1 %v15397_v62  ;;  %v15472_v62 = vld [vmem:[%s17256_s9 + $0x7ec] ss:$16 sps:$4 sm:$0xff]  }
 0x8ae   :  { %11648 = vmatpush1.bf16.msra.mxu1 %v15395_v14  ;;  %v15470_v14 = vld [vmem:[%s17256_s9 + $0x7e8] ss:$16 sps:$4 sm:$0xff]  }
 0x8af   :  { %11649 = vmatprep.subr.bf16.mxu1 %v15403_v21  ;;  %v15485_v21 = vld [vmem:[#allocation22 + $0x70] sm:$0xff]  }
 0x8b2   :  { %11650 = vmatpush1.bf16.msra.mxu1 %v15401_v8  ;;  %v15486_v8 = vld [vmem:[#allocation22 + $0x30] sm:$0xff]  }
 0x8b3   :  { %11660 = vmatprep.subr.bf16.mxu1 %v15409_v61  ;;  %v15487_v61 = vld [vmem:[#allocation22 + $0x78] sm:$0xff]  }
 0x8b5   :  { %11652 = vmatmul.mubr.bf16.vlgmr.msra.gmra.mrb[100].mxu1 %v16791_v11  ;;  %v15427_v11 = vld [vmem:[%s17256_s9 + $0x66c] ss:$16 sps:$4 sm:$0xff]   ;;  %s15803_s9 = smov [#allocation25]  }
 0x8b6   :  { %11661 = vmatpush1.bf16.msra.mxu1 %v15407_v23  ;;  %v15488_v23 = vld [vmem:[#allocation22 + $0x38] sm:$0xff]   ;;  %s12059_s27 = sshll.u32 %s15803_s9, 4  ;;  %s12060_s27 = int_to_ptr.vmem [resolvable:$true] %s12059_s27 }
 0x8b7   :  { %11662 = vmatprep.subr.bf16.mxu1 %v15415_v54  ;;  %v15489_v54 = vld [vmem:[#allocation22 + $0xc0] sm:$0xff]   ;;  %s15748_s11 = scalar_lea.vmem %s12060_s27, 32  ;;  %p15753_p5 = scmp.lt.s32.totalorder %s12060_s27, %s12060_s27 }
 0x8b8   :  { %p15749_p4 = scmp.ne.s32.totalorder %s12060_s27, %s15748_s11  ;;  %p15754_p6 = scmp.lt.s32.totalorder %s15748_s11, %s15748_s11 }
 0x8ba   :  { %11663 = vmatpush1.bf16.msra.mxu1 %v15413_v24  ;;  %v10071_v24 = vld [vmem:[#allocation21] sm:$0xf]  ;;  %p15755_p7 = por %p15754_p6, %p15753_p5 }
 0x8bb   :  { %11664 = vmatprep.subr.bf16.mxu1 %v15421_v36  ;;  %v10076_v36 = vrot.slane %v10071_v24, %v16331_v48  ;;  %v15493_v48 = vld [vmem:[#allocation22 + $0xd0] sm:$0xff]  }
 0x8bc   :  { %p15756_p8 = pnand %p15755_p7, %p15749_p4 }
 0x8be   :  { %11665 = vmatpush1.bf16.msra.mxu1 %v15419_v39  ;;  %v10080_v39 = vrot.slane %v10071_v24, %v16334_v26  ;;  %v15494_v26 = vld [vmem:[#allocation22 + $0x90] sm:$0xff]  }
 0x8bf   :  { %11666 = vmatprep.subr.bf16.mxu1 %v15427_v11 }
 0x8c2   :  { %11667 = vmatpush1.bf16.msra.mxu1 %v15425_v55 }
 0x8c3   :  { %11668 = vmatprep.subr.bf16.mxu1 %v15433_v25 }
 0x8c6   :  { %11669 = vmatpush1.bf16.msra.mxu1 %v15431_v34 }
 0x8c7   :  { %11670 = vmatprep.subr.bf16.mxu1 %v15439_v27 }
 0x8c8   :  { %v9792_v16 = vpop.f32.mrb[96].mxu1 }
 0x8c9   :  { %v14376_v20 = vadd.f32 %v9792_v16, %v6512_v30  ;;  %v9794_v3 = vpop.f32.mrb[97].mxu1  ;;  %v15491_v16 = vld [vmem:[#allocation22 + $0xc8] sm:$0xff]  }
 0x8ca   :  { %v14377_v56 = vadd.f32 %v9794_v3, %v6516_v47  ;;  %v9796_v57 = vpop.f32.mrb[98].mxu1  ;;  %11671 = vmatpush1.bf16.msra.mxu1 %v15437_v44  ;;  %v15490_v44 = vld [vmem:[#allocation22 + $0x80] sm:$0xff]   ;;  %v15495_v3 = vld [vmem:[#allocation22 + $0xd8] sm:$0xff]  }
 0x8cb   :  { %v9805_v10 = vmax.f32 %v14376_v20, 0.0  ;;  %v9797_v59 = vpop.f32.mrb[99].mxu1  ;;  %11672 = vmatprep.subr.bf16.mxu1 %v15445_v17  ;;  %v15492_v20 = vld [vmem:[#allocation22 + $0x88] sm:$0xff]   ;;  %v15497_v57 = vld [vmem:[#allocation22 + $0xe0] sm:$0xff]  }
 0x8cc   :  { %v9806_v53 = vmax.f32 %v14377_v56, 0.0  ;;  %v15496_v56 = vld [vmem:[#allocation22 + $0x98] sm:$0xff]   ;;  %v15500_v59 = vld [vmem:[#allocation22 + $0xa8] sm:$0xff]  }
 0x8cd   :  { %v9813_v63 = vpack.c.bf16 %v9805_v10, %v9805_v10  ;;  %v15499_v10 = vld [vmem:[#allocation22 + $0xe8] sm:$0xff]  }
 0x8ce   :  { %v9814_v19 = vpack.c.bf16 %v9806_v53, %v9806_v53  ;;  %11673 = vmatpush1.bf16.msra.mxu1 %v15443_v33  ;;  %v15498_v33 = vld [vmem:[#allocation22 + $0xa0] sm:$0xff]   ;;  %v15502_v53 = vld [vmem:[#allocation22 + $0xb0] sm:$0xff]  }
 0x8cf   :  { %11674 = vmatprep.subr.bf16.mxu1 %v15448_v51  ;;  %v15501_v51 = vld [vmem:[#allocation22 + $0xf0] sm:$0xff]  }
 0x8d0   :  { %11528 = vmatprep.mubr.bf16.mxu0 %v9814_v19  ;;  %11692 = vmatprep.mubr.bf16.mxu1 %v9814_v19  ;;  %v15503_v19 = vld [vmem:[#allocation22 + $0xf8] sm:$0xff]  }
 0x8d1   :  { %11529 = vmatmul.mubr.bf16.vlgmr.msra.gmra.mrb[144].mxu0 %v9813_v63 }
 0x8d2   :  { %11675 = vmatpush1.bf16.msra.mxu1 %v15446_v28  ;;  %14273 = vmatpush3.bf16.msra.mxu0 %v15474_v0  ;;  %v10084_v28 = vrot.slane %v10071_v24, %v6495_v18  ;;  %v10088_v0 = vrot.slane %v10071_v24, %v6499_v50 }
 0x8d3   :  { %11676 = vmatprep.subr.bf16.mxu1 %v15451_v22  ;;  %14274 = vmatprep.subr.bf16.mxu0 %v15475_v5 }
 0x8d6   :  { %11677 = vmatpush1.bf16.msra.mxu1 %v15449_v43  ;;  %14275 = vmatpush3.bf16.msra.mxu0 %v15476_v13 }
 0x8d7   :  { %11678 = vmatprep.subr.bf16.mxu1 %v15454_v1  ;;  %14276 = vmatprep.subr.bf16.mxu0 %v15477_v49 }
 0x8da   :  { %11679 = vmatpush1.bf16.msra.mxu1 %v15452_v41  ;;  %14277 = vmatpush3.bf16.msra.mxu0 %v15478_v40 }
 0x8db   :  { %11680 = vmatprep.subr.bf16.mxu1 %v15457_v4  ;;  %14278 = vmatprep.subr.bf16.mxu0 %v15479_v60 }
 0x8de   :  { %11681 = vmatpush1.bf16.msra.mxu1 %v15455_v58  ;;  %14279 = vmatpush3.bf16.msra.mxu0 %v15480_v2 }
 0x8df   :  { %11682 = vmatprep.subr.bf16.mxu1 %v15460_v52  ;;  %14280 = vmatprep.subr.bf16.mxu0 %v15481_v6  ;;  %v13533_v52 = vld [vmem:[#allocation24] ss:$0 sm:$0xff] }
 0x8e2   :  { %11683 = vmatpush1.bf16.msra.mxu1 %v15458_v31  ;;  %14281 = vmatpush3.bf16.msra.mxu0 %v15482_v29 }
 0x8e3   :  { %11684 = vmatprep.subr.bf16.mxu1 %v15463_v37  ;;  %14282 = vmatprep.subr.bf16.mxu0 %v15483_v7 }
 0x8e6   :  { %11685 = vmatpush1.bf16.msra.mxu1 %v15461_v42  ;;  %14283 = vmatpush3.bf16.msra.mxu0 %v15484_v45 }
 0x8e7   :  { %11686 = vmatprep.subr.bf16.mxu1 %v15466_v46  ;;  %14284 = vmatprep.subr.bf16.mxu0 %v15485_v21 }
 0x8ea   :  { %11687 = vmatpush1.bf16.msra.mxu1 %v15464_v15  ;;  %14285 = vmatpush3.bf16.msra.mxu0 %v15486_v8 }
 0x8eb   :  { %11688 = vmatprep.subr.bf16.mxu1 %v15469_v9  ;;  %14286 = vmatprep.subr.bf16.mxu0 %v15487_v61 }
 0x8ee   :  { %11689 = vmatpush1.bf16.msra.mxu1 %v15467_v35  ;;  %14287 = vmatpush3.bf16.msra.mxu0 %v15488_v23 }
 0x8ef   :  { %11690 = vmatprep.subr.bf16.mxu1 %v15472_v62  ;;  %14294 = vmatprep.subr.bf16.mxu0 %v15489_v54 }
 0x8f2   :  { %11691 = vmatpush1.bf16.msra.mxu1 %v15470_v14 }
 0x8f5   :  { %11693 = vmatmul.mubr.bf16.vlgmr.msra.gmra.mrb[100].mxu1 %v9813_v63  ;;  %v15504_v63 = vld [vmem:[#allocation22 + $0xb8] sm:$0xff]  }
 0x9a4   :  { %v11530_v11 = vpop.f32.mrb[144].mxu0 }
 0x9a5   :  { %v14378_v55 = vadd.f32 %v11530_v11, %v10076_v36  ;;  %v11532_v25 = vpop.f32.mrb[145].mxu0 }
 0x9a6   :  { %v14379_v32 = vadd.f32 %v11532_v25, %v10080_v39  ;;  %v11534_v34 = vpop.f32.mrb[146].mxu0 }
 0x9a7   :  { %v11701_v12 = vmax.f32 %v14378_v55, 0.0  ;;  %v11535_v27 = vpop.f32.mrb[147].mxu0 }
 0x9a8   :  { %v11702_v30 = vmax.f32 %v14379_v32, 0.0 }
 0x9a9   :  { %v11705_v17 = vpack.c.bf16 %v11701_v12, %v11701_v12 }
 0x9aa   :  { %v11706_v47 = vpack.c.bf16 %v11702_v30, %v11702_v30 }
 0x9ac   :  { %12004 = vmatprep.mubr.bf16.mxu0 %v11706_v47 }
 0x9ad   :  { %12005 = vmatmul.mubr.bf16.vlgmr.msra.gmra.mrb[148].mxu0 %v11705_v17 }
 0x9ae   :  { %14295 = vmatpush3.bf16.msra.mxu0 %v15490_v44 }
 0x9af   :  { %14296 = vmatprep.subr.bf16.mxu0 %v15491_v16 }
 0x9b2   :  { %14297 = vmatpush3.bf16.msra.mxu0 %v15492_v20 }
 0x9b3   :  { %14298 = vmatprep.subr.bf16.mxu0 %v15493_v48 }
 0x9b6   :  { %14299 = vmatpush3.bf16.msra.mxu0 %v15494_v26 }
 0x9b7   :  { %14300 = vmatprep.subr.bf16.mxu0 %v15495_v3 }
 0x9ba   :  { %14301 = vmatpush3.bf16.msra.mxu0 %v15496_v56 }
 0x9bb   :  { %14302 = vmatprep.subr.bf16.mxu0 %v15497_v57 }
 0x9be   :  { %14303 = vmatpush3.bf16.msra.mxu0 %v15498_v33 }
 0x9bf   :  { %14304 = vmatprep.subr.bf16.mxu0 %v15499_v10 }
 0x9c2   :  { %14305 = vmatpush3.bf16.msra.mxu0 %v15500_v59 }
 0x9c3   :  { %14306 = vmatprep.subr.bf16.mxu0 %v15501_v51 }
 0x9c6   :  { %14307 = vmatpush3.bf16.msra.mxu0 %v15502_v53 }
 0x9c7   :  { %14308 = vmatprep.subr.bf16.mxu0 %v15503_v19 }
 0x9c8   :  { %v11694_v22 = vpop.f32.mrb[100].mxu1 }
 0x9c9   :  { %v14380_v5 = vadd.f32 %v11694_v22, %v10084_v28  ;;  %v11696_v43 = vpop.f32.mrb[101].mxu1 }
 0x9ca   :  { %v14381_v13 = vadd.f32 %v11696_v43, %v10088_v0  ;;  %v11698_v1 = vpop.f32.mrb[102].mxu1  ;;  %14309 = vmatpush3.bf16.msra.mxu0 %v15504_v63 }
 0x9cb   :  { %v11703_v49 = vmax.f32 %v14380_v5, 0.0  ;;  %v11699_v41 = vpop.f32.mrb[103].mxu1 }
 0x9cc   :  { %v11704_v40 = vmax.f32 %v14381_v13, 0.0 }
 0x9cd   :  { %v11707_v60 = vpack.c.bf16 %v11703_v49, %v11703_v49 }
 0x9ce   :  { %v11708_v4 = vpack.c.bf16 %v11704_v40, %v11704_v40 }
 0x9d0   :  { %12044 = vmatprep.mubr.bf16.mxu0 %v11708_v4 }
 0x9d1   :  { %12045 = vmatmul.mubr.bf16.vlgmr.msra.gmra.mrb[152].mxu0 %v11707_v60 }
 0xa80   :  { %v14288_v18 = vpop.f32.mrb[148].mxu0 }
 0xa81   :  { %v14289_v58 = vpop.f32.mrb[149].mxu0 }
 0xa82   :  { %v14290_v38 = vadd.f32 %v14289_v58, %v14288_v18  ;;  %v14291_v50 = vpop.f32.mrb[150].mxu0 }
 0xa83   :  { %v14292_v2 = vpop.f32.mrb[151].mxu0 }
 0xa84   :  { %v12007_v29 = vadd.f32 %v14290_v38, %v13533_v52 }
 0xaa4   :  { %v14310_v6 = vpop.f32.mrb[152].mxu0 }
 0xaa5   :  { %v14311_v31 = vpop.f32.mrb[153].mxu0 }
 0xaa6   :  { %v14312_v37 = vadd.f32 %v14311_v31, %v14310_v6  ;;  %v14313_v7 = vpop.f32.mrb[154].mxu0 }
 0xaa7   :  { %v14314_v42 = vpop.f32.mrb[155].mxu0 }
 0xaa8   :  { %v12047_v45 = vadd.f32 %v14312_v37, %v12007_v29 }
 0xaaa   :  { %12052 = vst [vmem:[#allocation25] sm:$0x3] %v12047_v45 }
 0xaab   :  { %15759 = shalt.err (!%p15756_p8)
}
 0xaac   :  { %s15760_s3 = scalar_lea.hbm %s17260_s13, 32 }
 0xaad   :  { %p15761_p9 = scmp.ne.s32.totalorder %s17260_s13, %s15760_s3  ;;  %p15764_p10 = scmp.lt.u32.totalorder %s15760_s3, %s17260_s13 }
 0xaaf   :  { %p15766_p11 = pnand %p15764_p10, %p15761_p9 }
 0xab1   :  { %15769 = shalt.err (!%p15766_p11)
}
 0xab2   :  { %12062 = dma.vmem_to_hbm [thread:$0]  %s12060_s27, 32, %s17260_s13, [#allocation9]  }
 0xab3   :  { %15782 = dma.done.wait [#allocation9], 32  }
 0xab4   :  { %15783 = vsyncadd [#allocation9], 4294967264 }
 0xab5   :  { %12066 = vsyncpa [#allocation8], 1 }
 0xab6   :  { %12067 = vsyncpa [#allocation11], 1 }
 0xab7   :  { %12068 = vsyncpa [#allocation14], 1 }
 0xab8   :  { %12069 = vsyncpa [#allocation17], 1 }
 0xab9   :  { %12070 = vsyncpa [#allocation20], 1 }
 0xaba   :  { %12071 = vsyncpa [#allocation23], 1 }
 0xabb   :  { %12072 = vsyncpa [#allocation9], 1 }

</bundles_post_ra>
